<compile_context>
chip_gen: v6e
topology: v6e:2x2x1
jax: 0.10.0
libtpu: 0.0.40
codegen_flags: <defaults>
</compile_context>

<pallas_src>
import functools

import jax
import jax.numpy as jnp
from jax.experimental import pallas as pl
from jax.experimental.pallas import tpu as pltpu

# ---------------------------------------------------------------------------
# Model hyper-parameters implied by the PyTorch module (5070 = 30*13*13).
# ---------------------------------------------------------------------------
H = W = 28
C_IN = 1
C_OUT = 30
KH = KW = 3
CONV_HW = 26                 # 28 - 3 + 1
POOL_HW = 13                 # maxpool 2x2 stride 2
P = POOL_HW * POOL_HW        # 169 pooled positions
FLAT = C_OUT * P             # 5070
HID = 150
OUT = 10
K_WINNERS = 400
BISECT_ITERS = 16            # range/2^16 resolution separates the 400th/401st value
TB_MAX = 128                 # head samples per grid step (v6e could use 256)
RB_MAX = 64                  # conv samples per grid step (lane-padding limits VMEM)


def _round_up(a, m):
    return (a + m - 1) // m * m


def _pick_batch_tiles(n):
    """Head tile tb in {8,16,...,128}; conv tile rbs = min(tb, RB_MAX).

    Picks the largest power-of-two tile that still leaves >= 2 grid steps so
    the 'parallel' batch axis can shard across v7x's two TensorCores; tiny
    batches fall back to a single 8-sample step.
    """
    half = max(8, _round_up(n, 16) // 2)
    tb = 8
    while tb * 2 <= min(TB_MAX, half):
        tb *= 2
    return tb, min(tb, RB_MAX)


# ---------------------------------------------------------------------------
# Kernel 1: fused Conv2d(1->30, 3x3) + bias + MaxPool2d(2,2), batched.
#   p_ref: (4, RB*169, 9) bf16 -- the 4 conv positions of each 2x2 pool window,
#          rows ordered (sample-local, pooled position).
#   wc:    (9, 30) bf16     bc: (1, 30) f32
#   o_ref: (RB*169, 30) bf16 -- pooled activations, row = b*169 + pos.
# ---------------------------------------------------------------------------
def conv_pool_kernel(p_ref, wc_ref, bc_ref, o_ref):
    w = wc_ref[...]                                           # (9, 30)
    m = jnp.dot(p_ref[0], w, preferred_element_type=jnp.float32)
    for t in range(1, 4):                                     # max over 2x2 window
        m = jnp.maximum(m, jnp.dot(p_ref[t], w,
                                   preferred_element_type=jnp.float32))
    # bias after max == bias before max (per-channel constant); store bf16.
    o_ref[...] = (m + bc_ref[...]).astype(jnp.bfloat16)


# ---------------------------------------------------------------------------
# Kernel 2: KWinner(k=400) + SparseLinear(5070,150) + ReLU + Linear(150,10),
# batched: each grid step handles TB samples.
#   f_ref: (TB, 5070) bf16 (lane-dense)   w1: (5070, 150) bf16 (rows permuted)
#   b1: (1,150) f32   w2: (150,10) f32   b2: (1,10) f32   o: (TB,10) f32
# KWinner: per-row top-k mask via bisection on the k-th largest value.
#   - compare stage in bf16 (2 elems/lane on v6e/v7x; legal on v5e),
#   - count via MXU dot against a ones column (f32 accumulation),
#   - lo/hi carried in f32, updated with the bf16-rounded threshold actually
#     used, so count(x >= lo) >= k always holds.
# ---------------------------------------------------------------------------
def head_kernel(f_ref, w1_ref, b1_ref, w2_ref, b2_ref, o_ref, *, k, iters):
    x = f_ref[...]                                            # (TB, 5070) bf16
    ones_col = jnp.ones((x.shape[1], 1), jnp.bfloat16)        # MXU count RHS
    k_f = jnp.float32(k)

    lo = jnp.min(x, axis=-1, keepdims=True).astype(jnp.float32) - 1.0
    hi = jnp.max(x, axis=-1, keepdims=True).astype(jnp.float32) + 1.0

    def body(_, carry):
        lo, hi = carry
        t_b = ((lo + hi) * 0.5).astype(jnp.bfloat16)          # threshold actually used
        mask = (x >= t_b).astype(jnp.bfloat16)                # bf16 VPU compare+select
        cnt = jnp.dot(mask, ones_col,                          # lane sum on the MXU
                      preferred_element_type=jnp.float32)      # (TB, 1) f32
        ge = cnt >= k_f
        t32 = t_b.astype(jnp.float32)
        return jnp.where(ge, t32, lo), jnp.where(ge, hi, t32)

    lo, hi = jax.lax.fori_loop(0, iters, body, (lo, hi))

    # TODO(synk): exact ties at the threshold may keep slightly more than k
    # winners (PyTorch topk breaks ties exactly); benign for inference.
    xk = jnp.where(x >= lo.astype(jnp.bfloat16), x, jnp.zeros_like(x))  # bf16

    h = jnp.dot(xk, w1_ref[...], preferred_element_type=jnp.float32) + b1_ref[...]
    h = jnp.maximum(h, 0.0)                                   # ReLU
    o_ref[...] = jnp.dot(h, w2_ref[...],
                         preferred_element_type=jnp.float32) + b2_ref[...]


# ---------------------------------------------------------------------------
# Wrapper
# ---------------------------------------------------------------------------
def hybrid_cnn_forward(x, params):
    """x: (N, 1, 28, 28) float32 (NCHW, like PyTorch). Returns (N, 10)."""
    wc, bc, w1, b1, w2, b2 = params
    n = x.shape[0]

    tb, rbs = _pick_batch_tiles(n)        # head / conv samples per grid step
    n_pad = _round_up(n, tb)              # rbs divides tb divides n_pad

    if n_pad != n:
        x = jnp.pad(x, ((0, n_pad - n), (0, 0), (0, 0), (0, 0)))

    # --- glue: im2col patches grouped per 2x2 pool-window position, bf16 -----
    # Built directly as strided bf16 slices (no (N,26,26,9) f32 intermediate).
    # TODO(synk): full in-kernel im2col from the raw (rbs,28,28) block would cut
    # HBM read amplification further but needs stride-2 lane slicing in Mosaic.
    x2 = x[:, 0].astype(jnp.bfloat16)                               # (Np, 28, 28)
    wins = []
    for wy in range(2):
        for wx in range(2):
            taps = [x2[:,
                       wy + ky: wy + ky + 2 * POOL_HW - 1: 2,
                       wx + kx: wx + kx + 2 * POOL_HW - 1: 2]
                    for ky in range(KH) for kx in range(KW)]
            wins.append(jnp.stack(taps, axis=-1))                   # (Np,13,13,9)
    patches = jnp.stack(wins, axis=0).reshape(4, n_pad * P, KH * KW)  # bf16

    wc_mat = wc.reshape(C_OUT, KH * KW).T.astype(jnp.bfloat16)      # (9, 30)
    bc_row = bc.reshape(1, C_OUT).astype(jnp.float32)

    cparams = pltpu.CompilerParams(
        dimension_semantics=("parallel",),
        vmem_limit_bytes=48 * 1024 * 1024,   # 64-sample conv tile needs ~27 MB; <= v7x budget
    )

    rb_rows = rbs * P
    pooled = pl.pallas_call(
        conv_pool_kernel,
        out_shape=jax.ShapeDtypeStruct((n_pad * P, C_OUT), jnp.bfloat16),
        grid=(n_pad // rbs,),
        in_specs=[
            pl.BlockSpec((4, rb_rows, KH * KW), lambda i: (0, i, 0)),
            pl.BlockSpec((KH * KW, C_OUT), lambda i: (0, 0)),
            pl.BlockSpec((1, C_OUT), lambda i: (0, 0)),
        ],
        out_specs=pl.BlockSpec((rb_rows, C_OUT), lambda i: (i, 0)),
        compiler_params=cparams,
    )(patches, wc_mat, bc_row)                                      # (Np*169, 30) bf16

    # --- flatten: free contiguous reshape; feature index = pos*30 + channel ---
    feat = pooled.reshape(n_pad, FLAT)                              # (Np, 5070) bf16

    # One-time weight-row permutation replaces the per-sample NCHW transpose:
    # PyTorch flatten index = ch*169 + pos  ->  our index = pos*30 + ch.
    w1p = (w1.T.reshape(C_OUT, P, HID)
           .transpose(1, 0, 2)
           .reshape(FLAT, HID)
           .astype(jnp.bfloat16))                                   # (5070, 150)
    b1_row = b1.reshape(1, HID).astype(jnp.float32)
    w2_mat = w2.T.astype(jnp.float32)                               # (150, 10)
    b2_row = b2.reshape(1, OUT).astype(jnp.float32)

    out = pl.pallas_call(
        functools.partial(head_kernel, k=K_WINNERS, iters=BISECT_ITERS),
        out_shape=jax.ShapeDtypeStruct((n_pad, OUT), jnp.float32),
        grid=(n_pad // tb,),
        in_specs=[
            pl.BlockSpec((tb, FLAT), lambda i: (i, 0)),
            pl.BlockSpec((FLAT, HID), lambda i: (0, 0)),
            pl.BlockSpec((1, HID), lambda i: (0, 0)),
            pl.BlockSpec((HID, OUT), lambda i: (0, 0)),
            pl.BlockSpec((1, OUT), lambda i: (0, 0)),
        ],
        out_specs=pl.BlockSpec((tb, OUT), lambda i: (i, 0)),
        compiler_params=cparams,
    )(feat, w1p, b1_row, w2_mat, b2_row)                            # (Np, 10)

    return out[:n]


def init_params(key):
    """Deterministic synthetic parameters (PyTorch shapes)."""
    ks = jax.random.split(key, 6)
    wc = 0.1 * jax.random.normal(ks[0], (C_OUT, C_IN, KH, KW), jnp.float32)  # Conv2d.weight
    bc = 0.1 * jax.random.normal(ks[1], (C_OUT,), jnp.float32)               # Conv2d.bias
    # TODO(synk): SparseLinear's sparsity mask / KWinner boosting are untrainable
    # runtime details not specified by the module; modeled as dense weights and
    # plain per-sample top-k here.
    w1 = 0.02 * jax.random.normal(ks[2], (HID, FLAT), jnp.float32)           # SparseLinear.weight
    b1 = 0.02 * jax.random.normal(ks[3], (HID,), jnp.float32)                # SparseLinear.bias
    w2 = 0.1 * jax.random.normal(ks[4], (OUT, HID), jnp.float32)             # Linear.weight
    b2 = 0.1 * jax.random.normal(ks[5], (OUT,), jnp.float32)                 # Linear.bias
    return wc, bc, w1, b1, w2, b2


if __name__ == "__main__":
    key = jax.random.PRNGKey(0)
    k_x, k_p = jax.random.split(key)
    # 28x28 single-channel input is forced by the 5070 = 30*13*13 fan-in.
    x = jax.random.normal(k_x, (2, C_IN, H, W), jnp.float32)
    params = init_params(k_p)

    y = jax.jit(hybrid_cnn_forward)(x, params)
    y = jax.block_until_ready(y)
    assert y.shape == (2, OUT) and bool(jnp.all(jnp.isfinite(y)))
    print("KERNEL_OK")
</pallas_src>

<mosaic_0001>
module attributes {stable_mosaic.version = 11 : i64} {
  func.func @conv_pool_kernel(%arg0: i32, %arg1: memref<4x1352x9xbf16, #tpu.memory_space<vmem>>, %arg2: memref<9x30xbf16, #tpu.memory_space<vmem>>, %arg3: memref<1x30xf32, #tpu.memory_space<vmem>>, %arg4: memref<1352x30xbf16, #tpu.memory_space<vmem>>) attributes {dimension_semantics = [#tpu.dimension_semantics<parallel>], iteration_bounds = array<i64: 1>, scalar_prefetch = 0 : i64, scratch_operands = 0 : i64, tpu.core_type = #tpu.core_type<tc>, window_params = [{transform_indices = @transform_0, window_bounds = array<i64: 4, 1352, 9>}, {pipeline_mode = #tpu.pipeline_mode<synchronous>, transform_indices = @transform_1, window_bounds = array<i64: 9, 30>}, {pipeline_mode = #tpu.pipeline_mode<synchronous>, transform_indices = @transform_2, window_bounds = array<i64: 1, 30>}, {transform_indices = @transform_3, window_bounds = array<i64: 1352, 30>}]} {
    %c0 = arith.constant 0 : index
    %c0_0 = arith.constant 0 : index
    %0 = vector.load %arg2[%c0, %c0_0] : memref<9x30xbf16, #tpu.memory_space<vmem>>, vector<9x30xbf16>
    %c0_1 = arith.constant 0 : index
    %c0_2 = arith.constant 0 : index
    %c0_3 = arith.constant 0 : index
    %1 = vector.load %arg1[%c0_1, %c0_2, %c0_3] : memref<4x1352x9xbf16, #tpu.memory_space<vmem>>, vector<1x1352x9xbf16>
    %2 = vector.shape_cast %1 : vector<1x1352x9xbf16> to vector<1352x9xbf16>
    %cst = arith.constant dense<0.000000e+00> : vector<1352x30xf32>
    %3 = tpu.matmul %2, %0, %cst {dimension_numbers = #tpu.dot_dimension_numbers<[1], [0], [0], [1], [0, 0, 1, 1], [], []>} : vector<1352x9xbf16>, vector<9x30xbf16>, vector<1352x30xf32> -> vector<1352x30xf32>
    %c1 = arith.constant 1 : index
    %c0_4 = arith.constant 0 : index
    %c0_5 = arith.constant 0 : index
    %4 = vector.load %arg1[%c1, %c0_4, %c0_5] : memref<4x1352x9xbf16, #tpu.memory_space<vmem>>, vector<1x1352x9xbf16>
    %5 = vector.shape_cast %4 : vector<1x1352x9xbf16> to vector<1352x9xbf16>
    %cst_6 = arith.constant dense<0.000000e+00> : vector<1352x30xf32>
    %6 = tpu.matmul %5, %0, %cst_6 {dimension_numbers = #tpu.dot_dimension_numbers<[1], [0], [0], [1], [0, 0, 1, 1], [], []>} : vector<1352x9xbf16>, vector<9x30xbf16>, vector<1352x30xf32> -> vector<1352x30xf32>
    %7 = arith.maximumf %3, %6 : vector<1352x30xf32>
    %c2 = arith.constant 2 : index
    %c0_7 = arith.constant 0 : index
    %c0_8 = arith.constant 0 : index
    %8 = vector.load %arg1[%c2, %c0_7, %c0_8] : memref<4x1352x9xbf16, #tpu.memory_space<vmem>>, vector<1x1352x9xbf16>
    %9 = vector.shape_cast %8 : vector<1x1352x9xbf16> to vector<1352x9xbf16>
    %cst_9 = arith.constant dense<0.000000e+00> : vector<1352x30xf32>
    %10 = tpu.matmul %9, %0, %cst_9 {dimension_numbers = #tpu.dot_dimension_numbers<[1], [0], [0], [1], [0, 0, 1, 1], [], []>} : vector<1352x9xbf16>, vector<9x30xbf16>, vector<1352x30xf32> -> vector<1352x30xf32>
    %11 = arith.maximumf %7, %10 : vector<1352x30xf32>
    %c3 = arith.constant 3 : index
    %c0_10 = arith.constant 0 : index
    %c0_11 = arith.constant 0 : index
    %12 = vector.load %arg1[%c3, %c0_10, %c0_11] : memref<4x1352x9xbf16, #tpu.memory_space<vmem>>, vector<1x1352x9xbf16>
    %13 = vector.shape_cast %12 : vector<1x1352x9xbf16> to vector<1352x9xbf16>
    %cst_12 = arith.constant dense<0.000000e+00> : vector<1352x30xf32>
    %14 = tpu.matmul %13, %0, %cst_12 {dimension_numbers = #tpu.dot_dimension_numbers<[1], [0], [0], [1], [0, 0, 1, 1], [], []>} : vector<1352x9xbf16>, vector<9x30xbf16>, vector<1352x30xf32> -> vector<1352x30xf32>
    %15 = arith.maximumf %11, %14 : vector<1352x30xf32>
    %c0_13 = arith.constant 0 : index
    %c0_14 = arith.constant 0 : index
    %16 = vector.load %arg3[%c0_13, %c0_14] : memref<1x30xf32, #tpu.memory_space<vmem>>, vector<1x30xf32>
    %17 = vector.broadcast %16 : vector<1x30xf32> to vector<1352x30xf32>
    %18 = arith.addf %15, %17 : vector<1352x30xf32>
    %19 = arith.truncf %18 : vector<1352x30xf32> to vector<1352x30xbf16>
    %c0_15 = arith.constant 0 : index
    %c0_16 = arith.constant 0 : index
    %20 = vector.load %arg4[%c0_15, %c0_16] : memref<1352x30xbf16, #tpu.memory_space<vmem>>, vector<1352x30xbf16>
    tpu.vector_store %arg4[%c0_15, %c0_16], %19 {strides = array<i32>} : memref<1352x30xbf16, #tpu.memory_space<vmem>>, vector<1352x30xbf16>,
    return
  }
  func.func @transform_0(%arg0: i32) -> (i32, i32, i32) {
    %c0_i32 = arith.constant 0 : i32
    %c0_i32_0 = arith.constant 0 : i32
    %c0_i32_1 = arith.constant 0 : i32
    return %c0_i32, %arg0, %c0_i32_0 : i32, i32, i32
  }
  func.func @transform_1(%arg0: i32) -> (i32, i32) {
    %c0_i32 = arith.constant 0 : i32
    %c0_i32_0 = arith.constant 0 : i32
    %c0_i32_1 = arith.constant 0 : i32
    return %c0_i32, %c0_i32_0 : i32, i32
  }
  func.func @transform_2(%arg0: i32) -> (i32, i32) {
    %c0_i32 = arith.constant 0 : i32
    %c0_i32_0 = arith.constant 0 : i32
    %c0_i32_1 = arith.constant 0 : i32
    return %c0_i32, %c0_i32_0 : i32, i32
  }
  func.func @transform_3(%arg0: i32) -> (i32, i32) {
    %c0_i32 = arith.constant 0 : i32
    %c0_i32_0 = arith.constant 0 : i32
    return %arg0, %c0_i32 : i32, i32
  }
}

module attributes {stable_mosaic.version = 11 : i64} {
  func.func @head_kernel(%arg0: i32, %arg1: memref<8x5070xbf16, #tpu.memory_space<vmem>>, %arg2: memref<5070x150xbf16, #tpu.memory_space<vmem>>, %arg3: memref<1x150xf32, #tpu.memory_space<vmem>>, %arg4: memref<150x10xf32, #tpu.memory_space<vmem>>, %arg5: memref<1x10xf32, #tpu.memory_space<vmem>>, %arg6: memref<8x10xf32, #tpu.memory_space<vmem>>) attributes {dimension_semantics = [#tpu.dimension_semantics<parallel>], iteration_bounds = array<i64: 1>, scalar_prefetch = 0 : i64, scratch_operands = 0 : i64, tpu.core_type = #tpu.core_type<tc>, window_params = [{transform_indices = @transform_0, window_bounds = array<i64: 8, 5070>}, {pipeline_mode = #tpu.pipeline_mode<synchronous>, transform_indices = @transform_1, window_bounds = array<i64: 5070, 150>}, {pipeline_mode = #tpu.pipeline_mode<synchronous>, transform_indices = @transform_2, window_bounds = array<i64: 1, 150>}, {pipeline_mode = #tpu.pipeline_mode<synchronous>, transform_indices = @transform_3, window_bounds = array<i64: 150, 10>}, {pipeline_mode = #tpu.pipeline_mode<synchronous>, transform_indices = @transform_4, window_bounds = array<i64: 1, 10>}, {transform_indices = @transform_5, window_bounds = array<i64: 8, 10>}]} {
    %c0 = arith.constant 0 : index
    %c0_0 = arith.constant 0 : index
    %0 = vector.load %arg1[%c0, %c0_0] : memref<8x5070xbf16, #tpu.memory_space<vmem>>, vector<8x5070xbf16>
    %cst = arith.constant 1.000000e+00 : bf16
    %1 = vector.broadcast %cst : bf16 to vector<5070x1xbf16>
    %cst_1 = arith.constant dense<0x7F80> : vector<8xbf16>
    %2 = vector.multi_reduction <minimumf>, %0, %cst_1 [1] : vector<8x5070xbf16> to vector<8xbf16>
    %3 = vector.shape_cast %2 : vector<8xbf16> to vector<8x1xbf16>
    %4 = arith.extf %3 : vector<8x1xbf16> to vector<8x1xf32>
    %cst_2 = arith.constant 1.000000e+00 : f32
    %5 = vector.broadcast %cst_2 : f32 to vector<8x1xf32>
    %6 = arith.subf %4, %5 : vector<8x1xf32>
    %cst_3 = arith.constant dense<0xFF80> : vector<8xbf16>
    %7 = vector.multi_reduction <maximumf>, %0, %cst_3 [1] : vector<8x5070xbf16> to vector<8xbf16>
    %8 = vector.shape_cast %7 : vector<8xbf16> to vector<8x1xbf16>
    %9 = arith.extf %8 : vector<8x1xbf16> to vector<8x1xf32>
    %cst_4 = arith.constant 1.000000e+00 : f32
    %10 = vector.broadcast %cst_4 : f32 to vector<8x1xf32>
    %11 = arith.addf %9, %10 : vector<8x1xf32>
    %cst_5 = arith.constant 4.000000e+02 : f32
    %c0_i32 = arith.constant 0 : i32
    %c16_i32 = arith.constant 16 : i32
    %12 = arith.addi %c0_i32, %c16_i32 : i32
    %c1_i32 = arith.constant 1 : i32
    %13:2 = scf.for %arg7 = %c0_i32 to %12 step %c1_i32 iter_args(%arg8 = %6, %arg9 = %11) -> (vector<8x1xf32>, vector<8x1xf32>)  : i32 {
      %32 = arith.addf %arg8, %arg9 : vector<8x1xf32>
      %cst_20 = arith.constant 5.000000e-01 : f32
      %33 = vector.broadcast %cst_20 : f32 to vector<8x1xf32>
      %34 = arith.mulf %32, %33 : vector<8x1xf32>
      %35 = arith.truncf %34 : vector<8x1xf32> to vector<8x1xbf16>
      %36 = vector.broadcast %35 : vector<8x1xbf16> to vector<8x5070xbf16>
      %37 = arith.cmpf oge, %0, %36 : vector<8x5070xbf16>
      %38 = arith.extui %37 : vector<8x5070xi1> to vector<8x5070xi32>
      %39 = arith.sitofp %38 : vector<8x5070xi32> to vector<8x5070xf32>
      %40 = arith.truncf %39 : vector<8x5070xf32> to vector<8x5070xbf16>
      %cst_21 = arith.constant dense<0.000000e+00> : vector<8x1xf32>
      %41 = tpu.matmul %40, %1, %cst_21 {dimension_numbers = #tpu.dot_dimension_numbers<[1], [0], [0], [1], [0, 0, 1, 1], [], []>} : vector<8x5070xbf16>, vector<5070x1xbf16>, vector<8x1xf32> -> vector<8x1xf32>
      %42 = vector.broadcast %cst_5 : f32 to vector<8x1xf32>
      %43 = arith.cmpf oge, %41, %42 : vector<8x1xf32>
      %44 = arith.extf %35 : vector<8x1xbf16> to vector<8x1xf32>
      %45 = arith.select %43, %44, %arg8 : vector<8x1xi1>, vector<8x1xf32>
      %46 = arith.select %43, %arg9, %44 : vector<8x1xi1>, vector<8x1xf32>
      scf.yield %45, %46 : vector<8x1xf32>, vector<8x1xf32>
    }
    %14 = arith.truncf %13#0 : vector<8x1xf32> to vector<8x1xbf16>
    %15 = vector.broadcast %14 : vector<8x1xbf16> to vector<8x5070xbf16>
    %16 = arith.cmpf oge, %0, %15 : vector<8x5070xbf16>
    %cst_6 = arith.constant 0.000000e+00 : bf16
    %17 = vector.broadcast %cst_6 : bf16 to vector<8x5070xbf16>
    %18 = arith.select %16, %0, %17 : vector<8x5070xi1>, vector<8x5070xbf16>
    %c0_7 = arith.constant 0 : index
    %c0_8 = arith.constant 0 : index
    %19 = vector.load %arg2[%c0_7, %c0_8] : memref<5070x150xbf16, #tpu.memory_space<vmem>>, vector<5070x150xbf16>
    %cst_9 = arith.constant dense<0.000000e+00> : vector<8x150xf32>
    %20 = tpu.matmul %18, %19, %cst_9 {dimension_numbers = #tpu.dot_dimension_numbers<[1], [0], [0], [1], [0, 0, 1, 1], [], []>} : vector<8x5070xbf16>, vector<5070x150xbf16>, vector<8x150xf32> -> vector<8x150xf32>
    %c0_10 = arith.constant 0 : index
    %c0_11 = arith.constant 0 : index
    %21 = vector.load %arg3[%c0_10, %c0_11] : memref<1x150xf32, #tpu.memory_space<vmem>>, vector<1x150xf32>
    %22 = vector.broadcast %21 : vector<1x150xf32> to vector<8x150xf32>
    %23 = arith.addf %20, %22 : vector<8x150xf32>
    %cst_12 = arith.constant 0.000000e+00 : f32
    %24 = vector.broadcast %cst_12 : f32 to vector<8x150xf32>
    %25 = arith.maximumf %23, %24 : vector<8x150xf32>
    %c0_13 = arith.constant 0 : index
    %c0_14 = arith.constant 0 : index
    %26 = vector.load %arg4[%c0_13, %c0_14] : memref<150x10xf32, #tpu.memory_space<vmem>>, vector<150x10xf32>
    %cst_15 = arith.constant dense<0.000000e+00> : vector<8x10xf32>
    %27 = tpu.matmul %25, %26, %cst_15 {dimension_numbers = #tpu.dot_dimension_numbers<[1], [0], [0], [1], [0, 0, 1, 1], [], []>} : vector<8x150xf32>, vector<150x10xf32>, vector<8x10xf32> -> vector<8x10xf32>
    %c0_16 = arith.constant 0 : index
    %c0_17 = arith.constant 0 : index
    %28 = vector.load %arg5[%c0_16, %c0_17] : memref<1x10xf32, #tpu.memory_space<vmem>>, vector<1x10xf32>
    %29 = vector.broadcast %28 : vector<1x10xf32> to vector<8x10xf32>
    %30 = arith.addf %27, %29 : vector<8x10xf32>
    %c0_18 = arith.constant 0 : index
    %c0_19 = arith.constant 0 : index
    %31 = vector.load %arg6[%c0_18, %c0_19] : memref<8x10xf32, #tpu.memory_space<vmem>>, vector<8x10xf32>
    tpu.vector_store %arg6[%c0_18, %c0_19], %30 {strides = array<i32>} : memref<8x10xf32, #tpu.memory_space<vmem>>, vector<8x10xf32>,
    return
  }
  func.func @transform_0(%arg0: i32) -> (i32, i32) {
    %c0_i32 = arith.constant 0 : i32
    %c0_i32_0 = arith.constant 0 : i32
    return %arg0, %c0_i32 : i32, i32
  }
  func.func @transform_1(%arg0: i32) -> (i32, i32) {
    %c0_i32 = arith.constant 0 : i32
    %c0_i32_0 = arith.constant 0 : i32
    %c0_i32_1 = arith.constant 0 : i32
    return %c0_i32, %c0_i32_0 : i32, i32
  }
  func.func @transform_2(%arg0: i32) -> (i32, i32) {
    %c0_i32 = arith.constant 0 : i32
    %c0_i32_0 = arith.constant 0 : i32
    %c0_i32_1 = arith.constant 0 : i32
    return %c0_i32, %c0_i32_0 : i32, i32
  }
  func.func @transform_3(%arg0: i32) -> (i32, i32) {
    %c0_i32 = arith.constant 0 : i32
    %c0_i32_0 = arith.constant 0 : i32
    %c0_i32_1 = arith.constant 0 : i32
    return %c0_i32, %c0_i32_0 : i32, i32
  }
  func.func @transform_4(%arg0: i32) -> (i32, i32) {
    %c0_i32 = arith.constant 0 : i32
    %c0_i32_0 = arith.constant 0 : i32
    %c0_i32_1 = arith.constant 0 : i32
    return %c0_i32, %c0_i32_0 : i32, i32
  }
  func.func @transform_5(%arg0: i32) -> (i32, i32) {
    %c0_i32 = arith.constant 0 : i32
    %c0_i32_0 = arith.constant 0 : i32
    return %arg0, %c0_i32 : i32, i32
  }
}

</mosaic_0001>

<bundles_post_ra>
// kernel: hybrid_cnn_forward.2
= control target key start
LH: loop header
LB: loop body
LE: loop exit
PB: predicated region body
PF: predicated region fallthrough
CT: control target
= control target key end

     0   :  { %vm870_vm0 = vcmask 1043456   ;;  %vm871_vm1 = vcmask 1044480   ;;  %v15849_v0 = vmov 0.0   ;;  %v11390_v2 = vmov 65535   ;;  %s15845_s1 = inlined_call_operand.vmem [shape: bf16[9,30], index: 1, kind: input, shape index: {}]   ;;  %s15846_s0 = inlined_call_operand.vmem [shape: bf16[4,1352,9], index: 0, kind: input, shape index: {}]   ;;  %s15847_s2 = inlined_call_operand.vmem [shape: f32[1,30], index: 2, kind: input, shape index: {}]   ;;  %s15848_s3 = inlined_call_operand.vmem [shape: bf16[1352,30], index: 3, kind: output, shape index: {}]  }
   0x1   :  { %9674 = vmatprep.subr.bf16.mxu0 %v15849_v0  ;;  %10016 = vmatprep.subr.bf16.mxu1 %v15849_v0  ;;  %v11045_v1 = vld [vmem:[%s15845_s1] sm:$0x1f]   ;;  %v872_v3 = vsel %vm870_vm0, 4294967295, %v11390_v2  ;;  %vm11391_vm2 = vmmov 0   ;;  %vm614_vm3 = vcmask 72704   ;;  %v11048_v8 = vld [vmem:[%s15846_s0 + $0x8] sm:$0xff]  }
   0x2   :  { %v873_v4 = vsel %vm871_vm1, %v872_v3, 0  ;;  %9676 = vmatprep.mubr.msk.bf16.mxu0 %vm11391_vm2, %v15849_v0  ;;  %10018 = vmatprep.mubr.msk.bf16.mxu1 %vm11391_vm2, %v15849_v0  ;;  %v11046_v5 = vld [vmem:[%s15846_s0] sm:$0xff]   ;;  %v11049_v9 = vld [vmem:[%s15846_s0 + $0x2ac] sm:$0xff]   ;;  %v11051_v11 = vld [vmem:[%s15846_s0 + $0x2b4] sm:$0xff]   ;;  %vm7629_vm4 = vcmask 240640  }
   0x3   :  { %v875_v6 = vand.u32 %v11045_v1, %v873_v4  ;;  %v11047_v7 = vld [vmem:[%s15846_s0 + $0x2a4] sm:$0xff]   ;;  %v11050_v10 = vld [vmem:[%s15846_s0 + $0x10] sm:$0xff]   ;;  %v11052_v12 = vld [vmem:[%s15846_s0 + $0x18] sm:$0xff]  }
   0x4   :  { %v11053_v13 = vld [vmem:[%s15846_s0 + $0x2bc] sm:$0xff]   ;;  %v11055_v15 = vld [vmem:[%s15846_s0 + $0x2c4] sm:$0xff]   ;;  %v11057_v17 = vld [vmem:[%s15846_s0 + $0x2cc] sm:$0xff]  }
   0x5   :  { %9675 = vmatpush3.bf16.msra.mxu0 %v875_v6  ;;  %10017 = vmatpush3.bf16.msra.mxu1 %v875_v6  ;;  %v11054_v14 = vld [vmem:[%s15846_s0 + $0x20] sm:$0xff]   ;;  %v11056_v16 = vld [vmem:[%s15846_s0 + $0x28] sm:$0xff]   ;;  %v11058_v18 = vld [vmem:[%s15846_s0 + $0x30] sm:$0xff]  }
   0x6   :  { %10358 = vmatprep.subr.bf16.mxu0 %v15849_v0  ;;  %10700 = vmatprep.subr.bf16.mxu1 %v15849_v0  ;;  %v11059_v19 = vld [vmem:[%s15846_s0 + $0x2d4] sm:$0xff]   ;;  %v11061_v21 = vld [vmem:[%s15846_s0 + $0x2dc] sm:$0xff]   ;;  %v11063_v23 = vld [vmem:[%s15846_s0 + $0x2e4] sm:$0xff]  }
   0x7   :  { %v11060_v20 = vld [vmem:[%s15846_s0 + $0x38] sm:$0xff]   ;;  %v11062_v22 = vld [vmem:[%s15846_s0 + $0x40] sm:$0xff]   ;;  %v11064_v24 = vld [vmem:[%s15846_s0 + $0x48] sm:$0xff]  }
   0x8   :  { %9677 = vmatmul.mubr.msk.bf16.vlgmr.msra.gmra.mxu0 %vm614_vm3, %v11046_v5  ;;  %10019 = vmatmul.mubr.msk.bf16.vlgmr.msra.gmra.mxu1 %vm614_vm3, %v11047_v7  ;;  %v11065_v25 = vld [vmem:[%s15846_s0 + $0x2ec] sm:$0xff]   ;;  %v11067_v27 = vld [vmem:[%s15846_s0 + $0x2f4] sm:$0xff]   ;;  %v11069_v29 = vld [vmem:[%s15846_s0 + $0x2fc] sm:$0xff]  }
   0x9   :  { %10359 = vmatpush3.bf16.msra.mxu0 %v875_v6  ;;  %10701 = vmatpush3.bf16.msra.mxu1 %v875_v6  ;;  %v11066_v26 = vld [vmem:[%s15846_s0 + $0x50] sm:$0xff]   ;;  %v11068_v28 = vld [vmem:[%s15846_s0 + $0x58] sm:$0xff]   ;;  %v11070_v30 = vld [vmem:[%s15846_s0 + $0x60] sm:$0xff]  }
   0xa   :  { %9680 = vmatprep.mubr.msk.bf16.mxu0 %vm11391_vm2, %v15849_v0  ;;  %10022 = vmatprep.mubr.msk.bf16.mxu1 %vm11391_vm2, %v15849_v0  ;;  %v11071_v31 = vld [vmem:[%s15846_s0 + $0x304] sm:$0xff]   ;;  %v11073_v33 = vld [vmem:[%s15846_s0 + $0x30c] sm:$0xff]   ;;  %v11075_v35 = vld [vmem:[%s15846_s0 + $0x314] sm:$0xff]  }
   0xb   :  { %v11072_v32 = vld [vmem:[%s15846_s0 + $0x68] sm:$0xff]   ;;  %v11074_v34 = vld [vmem:[%s15846_s0 + $0x70] sm:$0xff]   ;;  %v11076_v36 = vld [vmem:[%s15846_s0 + $0x78] sm:$0xff]  }
   0xc   :  { %v11077_v37 = vld [vmem:[%s15846_s0 + $0x31c] sm:$0xff]   ;;  %v11079_v39 = vld [vmem:[%s15846_s0 + $0x324] sm:$0xff]   ;;  %v11081_v41 = vld [vmem:[%s15846_s0 + $0x32c] sm:$0xff]  }
   0xd   :  { %v11078_v38 = vld [vmem:[%s15846_s0 + $0x80] sm:$0xff]   ;;  %v11080_v40 = vld [vmem:[%s15846_s0 + $0x88] sm:$0xff]   ;;  %v11082_v42 = vld [vmem:[%s15846_s0 + $0x90] sm:$0xff]  }
   0xe   :  { %v11083_v43 = vld [vmem:[%s15846_s0 + $0x334] sm:$0xff]   ;;  %v11085_v45 = vld [vmem:[%s15846_s0 + $0x33c] sm:$0xff]   ;;  %v11087_v47 = vld [vmem:[%s15846_s0 + $0x344] sm:$0xff]  }
   0xf   :  { %v11084_v44 = vld [vmem:[%s15846_s0 + $0x98] sm:$0xff]   ;;  %v11086_v46 = vld [vmem:[%s15846_s0 + $0xa0] sm:$0xff]   ;;  %v11088_v48 = vld [vmem:[%s15846_s0 + $0xa8] sm:$0xff]  }
  0x10   :  { %9681 = vmatmul.mubr.msk.bf16.gmra.mxu0 %vm614_vm3, %v11048_v8  ;;  %10023 = vmatmul.mubr.msk.bf16.gmra.mxu1 %vm614_vm3, %v11049_v9  ;;  %v11089_v49 = vld [vmem:[%s15846_s0 + $0x34c] sm:$0xff]   ;;  %v11091_v51 = vld [vmem:[%s15846_s0 + $0x354] sm:$0xff]   ;;  %v11093_v53 = vld [vmem:[%s15846_s0 + $0x35c] sm:$0xff]  }
  0x11   :  { %9684 = vmatprep.mubr.msk.bf16.mxu0 %vm11391_vm2, %v15849_v0  ;;  %10026 = vmatprep.mubr.msk.bf16.mxu1 %vm11391_vm2, %v15849_v0  ;;  %v11090_v50 = vld [vmem:[%s15846_s0 + $0xb0] sm:$0xff]   ;;  %v11092_v52 = vld [vmem:[%s15846_s0 + $0xb8] sm:$0xff]   ;;  %v11094_v54 = vld [vmem:[%s15846_s0 + $0xc0] sm:$0xff]  }
  0x12   :  { %v11095_v55 = vld [vmem:[%s15846_s0 + $0x364] sm:$0xff]   ;;  %v11097_v62 = vld [vmem:[%s15846_s0 + $0x36c] sm:$0xff]  }
  0x13   :  { %v11096_v61 = vld [vmem:[%s15846_s0 + $0xc8] sm:$0xff]  }
  0x18   :  { %9685 = vmatmul.mubr.msk.bf16.gmra.mxu0 %vm614_vm3, %v11050_v10  ;;  %10027 = vmatmul.mubr.msk.bf16.gmra.mxu1 %vm614_vm3, %v11051_v11  ;;  %v11098_v10 = vld [vmem:[%s15846_s0 + $0xd0] sm:$0xff]  }
  0x19   :  { %9688 = vmatprep.mubr.msk.bf16.mxu0 %vm11391_vm2, %v15849_v0  ;;  %10030 = vmatprep.mubr.msk.bf16.mxu1 %vm11391_vm2, %v15849_v0  ;;  %v11099_v11 = vld [vmem:[%s15846_s0 + $0x374] sm:$0xff]  }
  0x20   :  { %9689 = vmatmul.mubr.msk.bf16.gmra.mxu0 %vm614_vm3, %v11052_v12  ;;  %10031 = vmatmul.mubr.msk.bf16.gmra.mxu1 %vm614_vm3, %v11053_v13 }
  0x21   :  { %9692 = vmatprep.mubr.msk.bf16.mxu0 %vm11391_vm2, %v15849_v0  ;;  %10034 = vmatprep.mubr.msk.bf16.mxu1 %vm11391_vm2, %v15849_v0 }
  0x28   :  { %9693 = vmatmul.mubr.msk.bf16.gmra.mxu0 %vm614_vm3, %v11054_v14  ;;  %10035 = vmatmul.mubr.msk.bf16.gmra.mxu1 %vm614_vm3, %v11055_v15 }
  0x29   :  { %9696 = vmatprep.mubr.msk.bf16.mxu0 %vm11391_vm2, %v15849_v0  ;;  %10038 = vmatprep.mubr.msk.bf16.mxu1 %vm11391_vm2, %v15849_v0 }
  0x30   :  { %9697 = vmatmul.mubr.msk.bf16.gmra.mxu0 %vm614_vm3, %v11056_v16  ;;  %10039 = vmatmul.mubr.msk.bf16.gmra.mxu1 %vm614_vm3, %v11057_v17 }
  0x31   :  { %9700 = vmatprep.mubr.msk.bf16.mxu0 %vm11391_vm2, %v15849_v0  ;;  %10042 = vmatprep.mubr.msk.bf16.mxu1 %vm11391_vm2, %v15849_v0 }
  0x38   :  { %9701 = vmatmul.mubr.msk.bf16.gmra.mxu0 %vm614_vm3, %v11058_v18  ;;  %10043 = vmatmul.mubr.msk.bf16.gmra.mxu1 %vm614_vm3, %v11059_v19 }
  0x39   :  { %9704 = vmatprep.mubr.msk.bf16.mxu0 %vm11391_vm2, %v15849_v0  ;;  %10046 = vmatprep.mubr.msk.bf16.mxu1 %vm11391_vm2, %v15849_v0 }
  0x40   :  { %9705 = vmatmul.mubr.msk.bf16.gmra.mxu0 %vm614_vm3, %v11060_v20  ;;  %10047 = vmatmul.mubr.msk.bf16.gmra.mxu1 %vm614_vm3, %v11061_v21 }
  0x41   :  { %9708 = vmatprep.mubr.msk.bf16.mxu0 %vm11391_vm2, %v15849_v0  ;;  %10050 = vmatprep.mubr.msk.bf16.mxu1 %vm11391_vm2, %v15849_v0 }
  0x48   :  { %9709 = vmatmul.mubr.msk.bf16.gmra.mxu0 %vm614_vm3, %v11062_v22  ;;  %10051 = vmatmul.mubr.msk.bf16.gmra.mxu1 %vm614_vm3, %v11063_v23  ;;  %v11100_v22 = vld [vmem:[%s15846_s0 + $0xd8] sm:$0xff]  }
  0x49   :  { %9712 = vmatprep.mubr.msk.bf16.mxu0 %vm11391_vm2, %v15849_v0  ;;  %10054 = vmatprep.mubr.msk.bf16.mxu1 %vm11391_vm2, %v15849_v0  ;;  %v11101_v23 = vld [vmem:[%s15846_s0 + $0x37c] sm:$0xff]  }
  0x50   :  { %9713 = vmatmul.mubr.msk.bf16.gmra.mxu0 %vm614_vm3, %v11064_v24  ;;  %10055 = vmatmul.mubr.msk.bf16.gmra.mxu1 %vm614_vm3, %v11065_v25 }
  0x51   :  { %9716 = vmatprep.mubr.msk.bf16.mxu0 %vm11391_vm2, %v15849_v0  ;;  %10058 = vmatprep.mubr.msk.bf16.mxu1 %vm11391_vm2, %v15849_v0 }
  0x58   :  { %9717 = vmatmul.mubr.msk.bf16.gmra.mxu0 %vm614_vm3, %v11066_v26  ;;  %10059 = vmatmul.mubr.msk.bf16.gmra.mxu1 %vm614_vm3, %v11067_v27 }
  0x59   :  { %9720 = vmatprep.mubr.msk.bf16.mxu0 %vm11391_vm2, %v15849_v0  ;;  %10062 = vmatprep.mubr.msk.bf16.mxu1 %vm11391_vm2, %v15849_v0 }
  0x60   :  { %9721 = vmatmul.mubr.msk.bf16.gmra.mxu0 %vm614_vm3, %v11068_v28  ;;  %10063 = vmatmul.mubr.msk.bf16.gmra.mxu1 %vm614_vm3, %v11069_v29 }
  0x61   :  { %9724 = vmatprep.mubr.msk.bf16.mxu0 %vm11391_vm2, %v15849_v0  ;;  %10066 = vmatprep.mubr.msk.bf16.mxu1 %vm11391_vm2, %v15849_v0 }
  0x68   :  { %9725 = vmatmul.mubr.msk.bf16.gmra.mxu0 %vm614_vm3, %v11070_v30  ;;  %10067 = vmatmul.mubr.msk.bf16.gmra.mxu1 %vm614_vm3, %v11071_v31 }
  0x69   :  { %9728 = vmatprep.mubr.msk.bf16.mxu0 %vm11391_vm2, %v15849_v0  ;;  %10070 = vmatprep.mubr.msk.bf16.mxu1 %vm11391_vm2, %v15849_v0 }
  0x70   :  { %9729 = vmatmul.mubr.msk.bf16.gmra.mxu0 %vm614_vm3, %v11072_v32  ;;  %10071 = vmatmul.mubr.msk.bf16.gmra.mxu1 %vm614_vm3, %v11073_v33 }
  0x71   :  { %9732 = vmatprep.mubr.msk.bf16.mxu0 %vm11391_vm2, %v15849_v0  ;;  %10074 = vmatprep.mubr.msk.bf16.mxu1 %vm11391_vm2, %v15849_v0 }
  0x78   :  { %9733 = vmatmul.mubr.msk.bf16.gmra.mxu0 %vm614_vm3, %v11074_v34  ;;  %10075 = vmatmul.mubr.msk.bf16.gmra.mxu1 %vm614_vm3, %v11075_v35  ;;  %v11102_v34 = vld [vmem:[%s15846_s0 + $0xe0] sm:$0xff]  }
  0x79   :  { %9736 = vmatprep.mubr.msk.bf16.mxu0 %vm11391_vm2, %v15849_v0  ;;  %10078 = vmatprep.mubr.msk.bf16.mxu1 %vm11391_vm2, %v15849_v0  ;;  %v11103_v35 = vld [vmem:[%s15846_s0 + $0x384] sm:$0xff]  }
  0x80   :  { %9737 = vmatmul.mubr.msk.bf16.gmra.mxu0 %vm614_vm3, %v11076_v36  ;;  %10079 = vmatmul.mubr.msk.bf16.gmra.mxu1 %vm614_vm3, %v11077_v37 }
  0x81   :  { %9740 = vmatprep.mubr.msk.bf16.mxu0 %vm11391_vm2, %v15849_v0  ;;  %10082 = vmatprep.mubr.msk.bf16.mxu1 %vm11391_vm2, %v15849_v0 }
  0x88   :  { %9741 = vmatmul.mubr.msk.bf16.gmra.mxu0 %vm614_vm3, %v11078_v38  ;;  %10083 = vmatmul.mubr.msk.bf16.gmra.mxu1 %vm614_vm3, %v11079_v39 }
  0x89   :  { %9744 = vmatprep.mubr.msk.bf16.mxu0 %vm11391_vm2, %v15849_v0  ;;  %10086 = vmatprep.mubr.msk.bf16.mxu1 %vm11391_vm2, %v15849_v0 }
  0x90   :  { %9745 = vmatmul.mubr.msk.bf16.gmra.mxu0 %vm614_vm3, %v11080_v40  ;;  %10087 = vmatmul.mubr.msk.bf16.gmra.mxu1 %vm614_vm3, %v11081_v41 }
  0x91   :  { %9748 = vmatprep.mubr.msk.bf16.mxu0 %vm11391_vm2, %v15849_v0  ;;  %10090 = vmatprep.mubr.msk.bf16.mxu1 %vm11391_vm2, %v15849_v0 }
  0x98   :  { %9749 = vmatmul.mubr.msk.bf16.gmra.mxu0 %vm614_vm3, %v11082_v42  ;;  %10091 = vmatmul.mubr.msk.bf16.gmra.mxu1 %vm614_vm3, %v11083_v43 }
  0x99   :  { %9752 = vmatprep.mubr.msk.bf16.mxu0 %vm11391_vm2, %v15849_v0  ;;  %10094 = vmatprep.mubr.msk.bf16.mxu1 %vm11391_vm2, %v15849_v0 }
  0xa0   :  { %9753 = vmatmul.mubr.msk.bf16.gmra.mxu0 %vm614_vm3, %v11084_v44  ;;  %10095 = vmatmul.mubr.msk.bf16.gmra.mxu1 %vm614_vm3, %v11085_v45 }
  0xa1   :  { %9756 = vmatprep.mubr.msk.bf16.mxu0 %vm11391_vm2, %v15849_v0  ;;  %10098 = vmatprep.mubr.msk.bf16.mxu1 %vm11391_vm2, %v15849_v0 }
  0xa8   :  { %9757 = vmatmul.mubr.msk.bf16.gmra.mxu0 %vm614_vm3, %v11086_v46  ;;  %10099 = vmatmul.mubr.msk.bf16.gmra.mxu1 %vm614_vm3, %v11087_v47  ;;  %v11104_v46 = vld [vmem:[%s15846_s0 + $0xe8] sm:$0xff]  }
  0xa9   :  { %9760 = vmatprep.mubr.msk.bf16.mxu0 %vm11391_vm2, %v15849_v0  ;;  %10102 = vmatprep.mubr.msk.bf16.mxu1 %vm11391_vm2, %v15849_v0  ;;  %v11105_v47 = vld [vmem:[%s15846_s0 + $0x38c] sm:$0xff]  }
  0xb0   :  { %9761 = vmatmul.mubr.msk.bf16.gmra.mxu0 %vm614_vm3, %v11088_v48  ;;  %10103 = vmatmul.mubr.msk.bf16.gmra.mxu1 %vm614_vm3, %v11089_v49 }
  0xb1   :  { %9764 = vmatprep.mubr.msk.bf16.mxu0 %vm11391_vm2, %v15849_v0  ;;  %10106 = vmatprep.mubr.msk.bf16.mxu1 %vm11391_vm2, %v15849_v0 }
  0xb8   :  { %9765 = vmatmul.mubr.msk.bf16.gmra.mxu0 %vm614_vm3, %v11090_v50  ;;  %10107 = vmatmul.mubr.msk.bf16.gmra.mxu1 %vm614_vm3, %v11091_v51 }
  0xb9   :  { %9768 = vmatprep.mubr.msk.bf16.mxu0 %vm11391_vm2, %v15849_v0  ;;  %10110 = vmatprep.mubr.msk.bf16.mxu1 %vm11391_vm2, %v15849_v0 }
  0xc0   :  { %9769 = vmatmul.mubr.msk.bf16.gmra.mxu0 %vm614_vm3, %v11092_v52  ;;  %10111 = vmatmul.mubr.msk.bf16.gmra.mxu1 %vm614_vm3, %v11093_v53 }
  0xc1   :  { %9772 = vmatprep.mubr.msk.bf16.mxu0 %vm11391_vm2, %v15849_v0  ;;  %10114 = vmatprep.mubr.msk.bf16.mxu1 %vm11391_vm2, %v15849_v0 }
  0xc8   :  { %v11717_v56 = vpop.f32.mrf.mxu0  ;;  %9773 = vmatmul.mubr.msk.bf16.gmra.mxu0 %vm614_vm3, %v11094_v54  ;;  %v11720_v57 = vpop.f32.mrf.mxu1  ;;  %10115 = vmatmul.mubr.msk.bf16.gmra.mxu1 %vm614_vm3, %v11095_v55 }
  0xc9   :  { %9776 = vmatprep.mubr.msk.bf16.mxu0 %vm11391_vm2, %v15849_v0  ;;  %10118 = vmatprep.mubr.msk.bf16.mxu1 %vm11391_vm2, %v15849_v0 }
  0xca   :  { %v9678_v59 = vpop.f32.mrf.mxu0  ;;  %v10020_v60 = vpop.f32.mrf.mxu1 }
  0xcc   :  { %v11735_v63 = vpop.f32.mrf.mxu0  ;;  %v11737_v1 = vpop.f32.mrf.mxu1 }
  0xce   :  { %v9679_v3 = vpop.f32.mrf.mxu0  ;;  %v10021_v4 = vpop.f32.mrf.mxu1 }
  0xd0   :  { %v11741_v5 = vpop.f32.mrf.mxu0  ;;  %9777 = vmatmul.mubr.msk.bf16.gmra.mxu0 %vm614_vm3, %v11096_v61  ;;  %v11744_v6 = vpop.f32.mrf.mxu1  ;;  %10119 = vmatmul.mubr.msk.bf16.gmra.mxu1 %vm614_vm3, %v11097_v62  ;;  %v11106_v61 = vld [vmem:[%s15846_s0 + $0xf0] sm:$0xff]  }
  0xd1   :  { %9780 = vmatprep.mubr.msk.bf16.mxu0 %vm11391_vm2, %v15849_v0  ;;  %10122 = vmatprep.mubr.msk.bf16.mxu1 %vm11391_vm2, %v15849_v0  ;;  %v11107_v62 = vld [vmem:[%s15846_s0 + $0x394] sm:$0xff]  }
  0xd2   :  { %v9682_v8 = vpop.f32.mrf.mxu0  ;;  %v10024_v9 = vpop.f32.mrf.mxu1 }
  0xd4   :  { %v11759_v12 = vpop.f32.mrf.mxu0  ;;  %v11761_v13 = vpop.f32.mrf.mxu1 }
  0xd6   :  { %v9683_v15 = vpop.f32.mrf.mxu0  ;;  %v10025_v16 = vpop.f32.mrf.mxu1 }
  0xd8   :  { %v11765_v17 = vpop.f32.mrf.mxu0  ;;  %9781 = vmatmul.mubr.msk.bf16.gmra.mxu0 %vm614_vm3, %v11098_v10  ;;  %v11768_v18 = vpop.f32.mrf.mxu1  ;;  %10123 = vmatmul.mubr.msk.bf16.gmra.mxu1 %vm614_vm3, %v11099_v11 }
  0xd9   :  { %9784 = vmatprep.mubr.msk.bf16.mxu0 %vm11391_vm2, %v15849_v0  ;;  %10126 = vmatprep.mubr.msk.bf16.mxu1 %vm11391_vm2, %v15849_v0 }
  0xda   :  { %v9686_v20 = vpop.f32.mrf.mxu0  ;;  %v10028_v21 = vpop.f32.mrf.mxu1 }
  0xdc   :  { %v11783_v24 = vpop.f32.mrf.mxu0  ;;  %v11785_v25 = vpop.f32.mrf.mxu1 }
  0xde   :  { %v9687_v27 = vpop.f32.mrf.mxu0  ;;  %v10029_v28 = vpop.f32.mrf.mxu1 }
  0xe0   :  { %v11789_v29 = vpop.f32.mrf.mxu0  ;;  %9785 = vmatmul.mubr.msk.bf16.gmra.mxu0 %vm614_vm3, %v11100_v22  ;;  %v11792_v30 = vpop.f32.mrf.mxu1  ;;  %10127 = vmatmul.mubr.msk.bf16.gmra.mxu1 %vm614_vm3, %v11101_v23  ;;  %v11108_v22 = vld [vmem:[%s15846_s0 + $0xf8] sm:$0xff]  }
  0xe1   :  { %9788 = vmatprep.mubr.msk.bf16.mxu0 %vm11391_vm2, %v15849_v0  ;;  %10130 = vmatprep.mubr.msk.bf16.mxu1 %vm11391_vm2, %v15849_v0  ;;  %v11109_v23 = vld [vmem:[%s15846_s0 + $0x39c] sm:$0xff]  }
  0xe2   :  { %v9690_v32 = vpop.f32.mrf.mxu0  ;;  %v10032_v33 = vpop.f32.mrf.mxu1 }
  0xe4   :  { %v11807_v36 = vpop.f32.mrf.mxu0  ;;  %v11809_v37 = vpop.f32.mrf.mxu1 }
  0xe6   :  { %v9691_v39 = vpop.f32.mrf.mxu0  ;;  %v10033_v40 = vpop.f32.mrf.mxu1 }
  0xe8   :  { %v11813_v41 = vpop.f32.mrf.mxu0  ;;  %9789 = vmatmul.mubr.msk.bf16.gmra.mxu0 %vm614_vm3, %v11102_v34  ;;  %v11816_v42 = vpop.f32.mrf.mxu1  ;;  %10131 = vmatmul.mubr.msk.bf16.gmra.mxu1 %vm614_vm3, %v11103_v35 }
  0xe9   :  { %9792 = vmatprep.mubr.msk.bf16.mxu0 %vm11391_vm2, %v15849_v0  ;;  %10134 = vmatprep.mubr.msk.bf16.mxu1 %vm11391_vm2, %v15849_v0 }
  0xea   :  { %v9694_v44 = vpop.f32.mrf.mxu0  ;;  %v10036_v45 = vpop.f32.mrf.mxu1 }
  0xec   :  { %v11831_v48 = vpop.f32.mrf.mxu0  ;;  %v11833_v49 = vpop.f32.mrf.mxu1 }
  0xee   :  { %v9695_v51 = vpop.f32.mrf.mxu0  ;;  %v10037_v52 = vpop.f32.mrf.mxu1 }
  0xef   :  { %v11110_v51 = vld [vmem:[%s15846_s0 + $0x100] sm:$0xff]  }
  0xf0   :  { %v11837_v53 = vpop.f32.mrf.mxu0  ;;  %9793 = vmatmul.mubr.msk.bf16.gmra.mxu0 %vm614_vm3, %v11104_v46  ;;  %v11840_v54 = vpop.f32.mrf.mxu1  ;;  %10135 = vmatmul.mubr.msk.bf16.gmra.mxu1 %vm614_vm3, %v11105_v47  ;;  %v11111_v52 = vld [vmem:[%s15846_s0 + $0x3a4] sm:$0xff]  }
  0xf1   :  { %9796 = vmatprep.mubr.msk.bf16.mxu0 %vm11391_vm2, %v15849_v0  ;;  %10138 = vmatprep.mubr.msk.bf16.mxu1 %vm11391_vm2, %v15849_v0 }
  0xf2   :  { %v9698_v59 = vpop.f32.mrf.mxu0  ;;  %v10040_v60 = vpop.f32.mrf.mxu1 }
  0xf4   :  { %v11855_v3 = vpop.f32.mrf.mxu0  ;;  %v11857_v4 = vpop.f32.mrf.mxu1 }
  0xf6   :  { %v9699_v9 = vpop.f32.mrf.mxu0  ;;  %v10041_v10 = vpop.f32.mrf.mxu1 }
  0xf8   :  { %v11861_v11 = vpop.f32.mrf.mxu0  ;;  %9797 = vmatmul.mubr.msk.bf16.gmra.mxu0 %vm614_vm3, %v11106_v61  ;;  %v11864_v15 = vpop.f32.mrf.mxu1  ;;  %10139 = vmatmul.mubr.msk.bf16.gmra.mxu1 %vm614_vm3, %v11107_v62 }
  0xf9   :  { %9800 = vmatprep.mubr.msk.bf16.mxu0 %vm11391_vm2, %v15849_v0  ;;  %10142 = vmatprep.mubr.msk.bf16.mxu1 %vm11391_vm2, %v15849_v0 }
  0xfa   :  { %v9702_v20 = vpop.f32.mrf.mxu0  ;;  %v10044_v21 = vpop.f32.mrf.mxu1 }
  0xfc   :  { %v11879_v27 = vpop.f32.mrf.mxu0  ;;  %v11881_v28 = vpop.f32.mrf.mxu1 }
  0xfe   :  { %v9703_v33 = vpop.f32.mrf.mxu0  ;;  %v10045_v34 = vpop.f32.mrf.mxu1 }
  0xff   :  { %v11112_v33 = vld [vmem:[%s15846_s0 + $0x108] sm:$0xff]  }
 0x100   :  { %v11885_v35 = vpop.f32.mrf.mxu0  ;;  %9801 = vmatmul.mubr.msk.bf16.gmra.mxu0 %vm614_vm3, %v11108_v22  ;;  %v11888_v39 = vpop.f32.mrf.mxu1  ;;  %10143 = vmatmul.mubr.msk.bf16.gmra.mxu1 %vm614_vm3, %v11109_v23  ;;  %v11113_v34 = vld [vmem:[%s15846_s0 + $0x3ac] sm:$0xff]  }
 0x101   :  { %9804 = vmatprep.mubr.msk.bf16.mxu0 %vm11391_vm2, %v15849_v0  ;;  %10146 = vmatprep.mubr.msk.bf16.mxu1 %vm11391_vm2, %v15849_v0 }
 0x102   :  { %v9706_v44 = vpop.f32.mrf.mxu0  ;;  %v10048_v45 = vpop.f32.mrf.mxu1 }
 0x104   :  { %v11897_v46 = vpop.f32.mrf.mxu0  ;;  %v11899_v47 = vpop.f32.mrf.mxu1 }
 0x106   :  { %v9707_v60 = vpop.f32.mrf.mxu0  ;;  %v10049_v61 = vpop.f32.mrf.mxu1 }
 0x108   :  { %v11909_v62 = vpop.f32.mrf.mxu0  ;;  %9805 = vmatmul.mubr.msk.bf16.gmra.mxu0 %vm614_vm3, %v11110_v51  ;;  %v11912_v9 = vpop.f32.mrf.mxu1  ;;  %10147 = vmatmul.mubr.msk.bf16.gmra.mxu1 %vm614_vm3, %v11111_v52 }
 0x109   :  { %9808 = vmatprep.mubr.msk.bf16.mxu0 %vm11391_vm2, %v15849_v0  ;;  %10150 = vmatprep.mubr.msk.bf16.mxu1 %vm11391_vm2, %v15849_v0 }
 0x10a   :  { %v9710_v20 = vpop.f32.mrf.mxu0  ;;  %v10052_v21 = vpop.f32.mrf.mxu1 }
 0x10c   :  { %v11921_v22 = vpop.f32.mrf.mxu0  ;;  %v11923_v23 = vpop.f32.mrf.mxu1 }
 0x10e   :  { %v9711_v45 = vpop.f32.mrf.mxu0  ;;  %v10053_v51 = vpop.f32.mrf.mxu1 }
 0x110   :  { %v11933_v52 = vpop.f32.mrf.mxu0  ;;  %9809 = vmatmul.mubr.msk.bf16.gmra.mxu0 %vm614_vm3, %v11112_v33  ;;  %v11936_v60 = vpop.f32.mrf.mxu1  ;;  %10151 = vmatmul.mubr.msk.bf16.gmra.mxu1 %vm614_vm3, %v11113_v34  ;;  %v11114_v33 = vld [vmem:[%s15846_s0 + $0x110] sm:$0xff]  }
 0x111   :  { %9812 = vmatprep.mubr.msk.bf16.mxu0 %vm11391_vm2, %v15849_v0  ;;  %10154 = vmatprep.mubr.msk.bf16.mxu1 %vm11391_vm2, %v15849_v0  ;;  %v11115_v34 = vld [vmem:[%s15846_s0 + $0x3b4] sm:$0xff]  }
 0x112   :  { %v9714_v20 = vpop.f32.mrf.mxu0  ;;  %v10056_v21 = vpop.f32.mrf.mxu1 }
 0x114   :  { %v11945_v45 = vpop.f32.mrf.mxu0  ;;  %v11947_v51 = vpop.f32.mrf.mxu1 }
 0x116   :  { %v9715_v44 = vpop.f32.mrf.mxu0  ;;  %v10057_v10 = vpop.f32.mrf.mxu1 }
 0x118   :  { %v11957_v59 = vpop.f32.mrf.mxu0  ;;  %9813 = vmatmul.mubr.msk.bf16.gmra.mxu0 %vm614_vm3, %v11114_v33  ;;  %v11960_v20 = vpop.f32.mrf.mxu1  ;;  %10155 = vmatmul.mubr.msk.bf16.gmra.mxu1 %vm614_vm3, %v11115_v34  ;;  %v11116_v33 = vld [vmem:[%s15846_s0 + $0x118] sm:$0xff]  }
 0x119   :  { %9816 = vmatprep.mubr.msk.bf16.mxu0 %vm11391_vm2, %v15849_v0  ;;  %10158 = vmatprep.mubr.msk.bf16.mxu1 %vm11391_vm2, %v15849_v0  ;;  %v11117_v34 = vld [vmem:[%s15846_s0 + $0x3bc] sm:$0xff]  }
 0x11a   :  { %v9718_v61 = vpop.f32.mrf.mxu0  ;;  %v10060_v44 = vpop.f32.mrf.mxu1 }
 0x11c   :  { %v11969_v10 = vpop.f32.mrf.mxu0  ;;  %v11971_v40 = vpop.f32.mrf.mxu1 }
 0x11e   :  { %v9719_v32 = vpop.f32.mrf.mxu0  ;;  %v10061_v16 = vpop.f32.mrf.mxu1 }
 0x120   :  { %v11981_v8 = vpop.f32.mrf.mxu0  ;;  %9817 = vmatmul.mubr.msk.bf16.gmra.mxu0 %vm614_vm3, %v11116_v33  ;;  %v11984_v61 = vpop.f32.mrf.mxu1  ;;  %10159 = vmatmul.mubr.msk.bf16.gmra.mxu1 %vm614_vm3, %v11117_v34  ;;  %v11118_v33 = vld [vmem:[%s15846_s0 + $0x120] sm:$0xff]  }
 0x121   :  { %9820 = vmatprep.mubr.msk.bf16.mxu0 %vm11391_vm2, %v15849_v0  ;;  %10162 = vmatprep.mubr.msk.bf16.mxu1 %vm11391_vm2, %v15849_v0  ;;  %v11119_v34 = vld [vmem:[%s15846_s0 + $0x3c4] sm:$0xff]  }
 0x122   :  { %v9722_v21 = vpop.f32.mrf.mxu0  ;;  %v10064_v32 = vpop.f32.mrf.mxu1 }
 0x124   :  { %v11993_v16 = vpop.f32.mrf.mxu0  ;;  %v11995_v55 = vpop.f32.mrf.mxu1 }
 0x126   :  { %v9723_v50 = vpop.f32.mrf.mxu0  ;;  %v10065_v43 = vpop.f32.mrf.mxu1 }
 0x128   :  { %v12005_v38 = vpop.f32.mrf.mxu0  ;;  %9821 = vmatmul.mubr.msk.bf16.gmra.mxu0 %vm614_vm3, %v11118_v33  ;;  %v12008_v21 = vpop.f32.mrf.mxu1  ;;  %10163 = vmatmul.mubr.msk.bf16.gmra.mxu1 %vm614_vm3, %v11119_v34  ;;  %v11120_v33 = vld [vmem:[%s15846_s0 + $0x128] sm:$0xff]  }
 0x129   :  { %9824 = vmatprep.mubr.msk.bf16.mxu0 %vm11391_vm2, %v15849_v0  ;;  %10166 = vmatprep.mubr.msk.bf16.mxu1 %vm11391_vm2, %v15849_v0  ;;  %v11121_v34 = vld [vmem:[%s15846_s0 + $0x3cc] sm:$0xff]  }
 0x12a   :  { %v9726_v44 = vpop.f32.mrf.mxu0  ;;  %v10068_v50 = vpop.f32.mrf.mxu1 }
 0x12c   :  { %v12017_v43 = vpop.f32.mrf.mxu0  ;;  %v12019_v31 = vpop.f32.mrf.mxu1 }
 0x12d   :  { %16139 = vst [vmem:[#allocation2_spill] sm:$0xff] %v12017_v43  ;;  %16140 = vst [vmem:[#allocation3_spill] sm:$0xff] %v12019_v31 }
 0x12e   :  { %v9727_v26 = vpop.f32.mrf.mxu0  ;;  %v10069_v19 = vpop.f32.mrf.mxu1 }
 0x130   :  { %v12029_v14 = vpop.f32.mrf.mxu0  ;;  %9825 = vmatmul.mubr.msk.bf16.gmra.mxu0 %vm614_vm3, %v11120_v33  ;;  %v12032_v44 = vpop.f32.mrf.mxu1  ;;  %10167 = vmatmul.mubr.msk.bf16.gmra.mxu1 %vm614_vm3, %v11121_v34  ;;  %v11122_v33 = vld [vmem:[%s15846_s0 + $0x130] sm:$0xff]  }
 0x131   :  { %16141 = vst [vmem:[#allocation4_spill] sm:$0xff] %v12029_v14  ;;  %16142 = vst [vmem:[#allocation5_spill] sm:$0xff] %v12032_v44  ;;  %9828 = vmatprep.mubr.msk.bf16.mxu0 %vm11391_vm2, %v15849_v0  ;;  %10170 = vmatprep.mubr.msk.bf16.mxu1 %vm11391_vm2, %v15849_v0  ;;  %v11123_v34 = vld [vmem:[%s15846_s0 + $0x3d4] sm:$0xff]   ;;  %v16147_v44 = vmov 0.0  }
 0x132   :  { %v9730_v32 = vpop.f32.mrf.mxu0  ;;  %v10072_v26 = vpop.f32.mrf.mxu1 }
 0x134   :  { %v12041_v19 = vpop.f32.mrf.mxu0  ;;  %v12043_v7 = vpop.f32.mrf.mxu1 }
 0x135   :  { %16143 = vst [vmem:[#allocation6_spill] sm:$0xff] %v12041_v19  ;;  %16144 = vst [vmem:[#allocation7_spill] sm:$0xff] %v12043_v7 }
 0x136   :  { %v9731_v2 = vpop.f32.mrf.mxu0  ;;  %v10073_v58 = vpop.f32.mrf.mxu1 }
 0x138   :  { %v12053_v0 = vpop.f32.mrf.mxu0  ;;  %9829 = vmatmul.mubr.msk.bf16.gmra.mxu0 %vm614_vm3, %v11122_v33  ;;  %v12056_v32 = vpop.f32.mrf.mxu1  ;;  %10171 = vmatmul.mubr.msk.bf16.gmra.mxu1 %vm614_vm3, %v11123_v34  ;;  %v11124_v33 = vld [vmem:[%s15846_s0 + $0x138] sm:$0xff]  }
 0x139   :  { %16145 = vst [vmem:[#allocation8_spill] sm:$0xff] %v12053_v0  ;;  %16146 = vst [vmem:[#allocation9_spill] sm:$0xff] %v12056_v32  ;;  %9832 = vmatprep.mubr.msk.bf16.mxu0 %vm11391_vm2, %v16147_v44  ;;  %10174 = vmatprep.mubr.msk.bf16.mxu1 %vm11391_vm2, %v16147_v44  ;;  %v11125_v34 = vld [vmem:[%s15846_s0 + $0x3dc] sm:$0xff]  }
 0x13a   :  { %v9734_v50 = vpop.f32.mrf.mxu0  ;;  %v10076_v2 = vpop.f32.mrf.mxu1 }
 0x13c   :  { %v12065_v58 = vpop.f32.mrf.mxu0  ;;  %v12067_v7 = vpop.f32.mrf.mxu1 }
 0x13d   :  { %16148 = vst [vmem:[#allocation10_spill] sm:$0xff] %v12065_v58  ;;  %16149 = vst [vmem:[#allocation11_spill] sm:$0xff] %v12067_v7 }
 0x13e   :  { %v9735_v32 = vpop.f32.mrf.mxu0  ;;  %v10077_v0 = vpop.f32.mrf.mxu1 }
 0x140   :  { %v12077_v19 = vpop.f32.mrf.mxu0  ;;  %9833 = vmatmul.mubr.msk.bf16.gmra.mxu0 %vm614_vm3, %v11124_v33  ;;  %v12080_v50 = vpop.f32.mrf.mxu1  ;;  %10175 = vmatmul.mubr.msk.bf16.gmra.mxu1 %vm614_vm3, %v11125_v34  ;;  %v11126_v33 = vld [vmem:[%s15846_s0 + $0x140] sm:$0xff]  }
 0x141   :  { %16150 = vst [vmem:[#allocation12_spill] sm:$0xff] %v12077_v19  ;;  %16151 = vst [vmem:[#allocation13_spill] sm:$0xff] %v12080_v50  ;;  %9836 = vmatprep.mubr.msk.bf16.mxu0 %vm11391_vm2, %v16147_v44  ;;  %10178 = vmatprep.mubr.msk.bf16.mxu1 %vm11391_vm2, %v16147_v44  ;;  %v11127_v34 = vld [vmem:[%s15846_s0 + $0x3e4] sm:$0xff]  }
 0x142   :  { %v9738_v26 = vpop.f32.mrf.mxu0  ;;  %v10080_v32 = vpop.f32.mrf.mxu1 }
 0x144   :  { %v12089_v0 = vpop.f32.mrf.mxu0  ;;  %v12091_v7 = vpop.f32.mrf.mxu1 }
 0x145   :  { %16152 = vst [vmem:[#allocation14_spill] sm:$0xff] %v12089_v0  ;;  %16153 = vst [vmem:[#allocation15_spill] sm:$0xff] %v12091_v7 }
 0x146   :  { %v9739_v50 = vpop.f32.mrf.mxu0  ;;  %v10081_v19 = vpop.f32.mrf.mxu1 }
 0x148   :  { %v12101_v58 = vpop.f32.mrf.mxu0  ;;  %9837 = vmatmul.mubr.msk.bf16.gmra.mxu0 %vm614_vm3, %v11126_v33  ;;  %v12104_v26 = vpop.f32.mrf.mxu1  ;;  %10179 = vmatmul.mubr.msk.bf16.gmra.mxu1 %vm614_vm3, %v11127_v34  ;;  %v11128_v33 = vld [vmem:[%s15846_s0 + $0x148] sm:$0xff]  }
 0x149   :  { %16154 = vst [vmem:[#allocation16_spill] sm:$0xff] %v12101_v58  ;;  %16155 = vst [vmem:[#allocation17_spill] sm:$0xff] %v12104_v26  ;;  %9840 = vmatprep.mubr.msk.bf16.mxu0 %vm11391_vm2, %v16147_v44  ;;  %10182 = vmatprep.mubr.msk.bf16.mxu1 %vm11391_vm2, %v16147_v44  ;;  %v11129_v34 = vld [vmem:[%s15846_s0 + $0x3ec] sm:$0xff]  }
 0x14a   :  { %v9742_v2 = vpop.f32.mrf.mxu0  ;;  %v10084_v50 = vpop.f32.mrf.mxu1 }
 0x14c   :  { %v12113_v19 = vpop.f32.mrf.mxu0  ;;  %v12115_v7 = vpop.f32.mrf.mxu1 }
 0x14d   :  { %16156 = vst [vmem:[#allocation18_spill] sm:$0xff] %v12113_v19  ;;  %16157 = vst [vmem:[#allocation19_spill] sm:$0xff] %v12115_v7 }
 0x14e   :  { %v9743_v26 = vpop.f32.mrf.mxu0  ;;  %v10085_v58 = vpop.f32.mrf.mxu1 }
 0x150   :  { %v12125_v0 = vpop.f32.mrf.mxu0  ;;  %9841 = vmatmul.mubr.msk.bf16.gmra.mxu0 %vm614_vm3, %v11128_v33  ;;  %v12128_v2 = vpop.f32.mrf.mxu1  ;;  %10183 = vmatmul.mubr.msk.bf16.gmra.mxu1 %vm614_vm3, %v11129_v34  ;;  %v11130_v33 = vld [vmem:[%s15846_s0 + $0x150] sm:$0xff]  }
 0x151   :  { %16158 = vst [vmem:[#allocation20_spill] sm:$0xff] %v12125_v0  ;;  %16159 = vst [vmem:[#allocation21_spill] sm:$0xff] %v12128_v2  ;;  %9844 = vmatprep.mubr.msk.bf16.mxu0 %vm11391_vm2, %v16147_v44  ;;  %10186 = vmatprep.mubr.msk.bf16.mxu1 %vm11391_vm2, %v16147_v44  ;;  %v11131_v34 = vld [vmem:[%s15846_s0 + $0x3f4] sm:$0xff]  }
 0x152   :  { %v9746_v32 = vpop.f32.mrf.mxu0  ;;  %v10088_v26 = vpop.f32.mrf.mxu1 }
 0x154   :  { %v12137_v58 = vpop.f32.mrf.mxu0  ;;  %v12139_v7 = vpop.f32.mrf.mxu1 }
 0x155   :  { %16160 = vst [vmem:[#allocation22_spill] sm:$0xff] %v12137_v58  ;;  %16161 = vst [vmem:[#allocation23_spill] sm:$0xff] %v12139_v7 }
 0x156   :  { %v9747_v2 = vpop.f32.mrf.mxu0  ;;  %v10089_v0 = vpop.f32.mrf.mxu1 }
 0x158   :  { %v12149_v19 = vpop.f32.mrf.mxu0  ;;  %9845 = vmatmul.mubr.msk.bf16.gmra.mxu0 %vm614_vm3, %v11130_v33  ;;  %v12152_v32 = vpop.f32.mrf.mxu1  ;;  %10187 = vmatmul.mubr.msk.bf16.gmra.mxu1 %vm614_vm3, %v11131_v34  ;;  %v11132_v33 = vld [vmem:[%s15846_s0 + $0x158] sm:$0xff]  }
 0x159   :  { %16162 = vst [vmem:[#allocation24_spill] sm:$0xff] %v12149_v19  ;;  %16163 = vst [vmem:[#allocation25_spill] sm:$0xff] %v12152_v32  ;;  %9848 = vmatprep.mubr.msk.bf16.mxu0 %vm11391_vm2, %v16147_v44  ;;  %10190 = vmatprep.mubr.msk.bf16.mxu1 %vm11391_vm2, %v16147_v44  ;;  %v11133_v34 = vld [vmem:[%s15846_s0 + $0x3fc] sm:$0xff]  }
 0x15a   :  { %v9750_v50 = vpop.f32.mrf.mxu0  ;;  %v10092_v2 = vpop.f32.mrf.mxu1 }
 0x15c   :  { %v12161_v0 = vpop.f32.mrf.mxu0  ;;  %v12163_v7 = vpop.f32.mrf.mxu1 }
 0x15d   :  { %16164 = vst [vmem:[#allocation26_spill] sm:$0xff] %v12161_v0  ;;  %16165 = vst [vmem:[#allocation27_spill] sm:$0xff] %v12163_v7 }
 0x15e   :  { %v9751_v32 = vpop.f32.mrf.mxu0  ;;  %v10093_v19 = vpop.f32.mrf.mxu1 }
 0x160   :  { %v12173_v58 = vpop.f32.mrf.mxu0  ;;  %9849 = vmatmul.mubr.msk.bf16.gmra.mxu0 %vm614_vm3, %v11132_v33  ;;  %v12176_v50 = vpop.f32.mrf.mxu1  ;;  %10191 = vmatmul.mubr.msk.bf16.gmra.mxu1 %vm614_vm3, %v11133_v34  ;;  %v11134_v33 = vld [vmem:[%s15846_s0 + $0x160] sm:$0xff]  }
 0x161   :  { %16166 = vst [vmem:[#allocation28_spill] sm:$0xff] %v12173_v58  ;;  %16167 = vst [vmem:[#allocation29_spill] sm:$0xff] %v12176_v50  ;;  %9852 = vmatprep.mubr.msk.bf16.mxu0 %vm11391_vm2, %v16147_v44  ;;  %10194 = vmatprep.mubr.msk.bf16.mxu1 %vm11391_vm2, %v16147_v44  ;;  %v11135_v34 = vld [vmem:[%s15846_s0 + $0x404] sm:$0xff]  }
 0x162   :  { %v9754_v26 = vpop.f32.mrf.mxu0  ;;  %v10096_v32 = vpop.f32.mrf.mxu1 }
 0x164   :  { %v12185_v19 = vpop.f32.mrf.mxu0  ;;  %v12187_v7 = vpop.f32.mrf.mxu1 }
 0x165   :  { %16168 = vst [vmem:[#allocation30_spill] sm:$0xff] %v12185_v19  ;;  %16169 = vst [vmem:[#allocation31_spill] sm:$0xff] %v12187_v7 }
 0x166   :  { %v9755_v50 = vpop.f32.mrf.mxu0  ;;  %v10097_v58 = vpop.f32.mrf.mxu1 }
 0x168   :  { %v12197_v0 = vpop.f32.mrf.mxu0  ;;  %9853 = vmatmul.mubr.msk.bf16.gmra.mxu0 %vm614_vm3, %v11134_v33  ;;  %v12200_v26 = vpop.f32.mrf.mxu1  ;;  %10195 = vmatmul.mubr.msk.bf16.gmra.mxu1 %vm614_vm3, %v11135_v34  ;;  %v11136_v33 = vld [vmem:[%s15846_s0 + $0x168] sm:$0xff]  }
 0x169   :  { %16170 = vst [vmem:[#allocation32_spill] sm:$0xff] %v12197_v0  ;;  %16171 = vst [vmem:[#allocation33_spill] sm:$0xff] %v12200_v26  ;;  %9856 = vmatprep.mubr.msk.bf16.mxu0 %vm11391_vm2, %v16147_v44  ;;  %10198 = vmatprep.mubr.msk.bf16.mxu1 %vm11391_vm2, %v16147_v44  ;;  %v11137_v34 = vld [vmem:[%s15846_s0 + $0x40c] sm:$0xff]  }
 0x16a   :  { %v9758_v2 = vpop.f32.mrf.mxu0  ;;  %v10100_v50 = vpop.f32.mrf.mxu1 }
 0x16c   :  { %v12209_v58 = vpop.f32.mrf.mxu0  ;;  %v12211_v7 = vpop.f32.mrf.mxu1 }
 0x16d   :  { %16172 = vst [vmem:[#allocation34_spill] sm:$0xff] %v12209_v58  ;;  %16173 = vst [vmem:[#allocation35_spill] sm:$0xff] %v12211_v7 }
 0x16e   :  { %v9759_v26 = vpop.f32.mrf.mxu0  ;;  %v10101_v0 = vpop.f32.mrf.mxu1 }
 0x170   :  { %v12221_v19 = vpop.f32.mrf.mxu0  ;;  %9857 = vmatmul.mubr.msk.bf16.gmra.mxu0 %vm614_vm3, %v11136_v33  ;;  %v12224_v2 = vpop.f32.mrf.mxu1  ;;  %10199 = vmatmul.mubr.msk.bf16.gmra.mxu1 %vm614_vm3, %v11137_v34  ;;  %v11138_v33 = vld [vmem:[%s15846_s0 + $0x170] sm:$0xff]  }
 0x171   :  { %16174 = vst [vmem:[#allocation36_spill] sm:$0xff] %v12221_v19  ;;  %16175 = vst [vmem:[#allocation37_spill] sm:$0xff] %v12224_v2  ;;  %9860 = vmatprep.mubr.msk.bf16.mxu0 %vm11391_vm2, %v16147_v44  ;;  %10202 = vmatprep.mubr.msk.bf16.mxu1 %vm11391_vm2, %v16147_v44  ;;  %v11139_v34 = vld [vmem:[%s15846_s0 + $0x414] sm:$0xff]  }
 0x172   :  { %v9762_v32 = vpop.f32.mrf.mxu0  ;;  %v10104_v26 = vpop.f32.mrf.mxu1 }
 0x174   :  { %v12233_v0 = vpop.f32.mrf.mxu0  ;;  %v12235_v7 = vpop.f32.mrf.mxu1 }
 0x175   :  { %16176 = vst [vmem:[#allocation38_spill] sm:$0xff] %v12233_v0  ;;  %16177 = vst [vmem:[#allocation39_spill] sm:$0xff] %v12235_v7 }
 0x176   :  { %v9763_v2 = vpop.f32.mrf.mxu0  ;;  %v10105_v19 = vpop.f32.mrf.mxu1 }
 0x178   :  { %v12245_v58 = vpop.f32.mrf.mxu0  ;;  %9861 = vmatmul.mubr.msk.bf16.gmra.mxu0 %vm614_vm3, %v11138_v33  ;;  %v12248_v32 = vpop.f32.mrf.mxu1  ;;  %10203 = vmatmul.mubr.msk.bf16.gmra.mxu1 %vm614_vm3, %v11139_v34  ;;  %v11140_v33 = vld [vmem:[%s15846_s0 + $0x178] sm:$0xff]  }
 0x179   :  { %16178 = vst [vmem:[#allocation40_spill] sm:$0xff] %v12245_v58  ;;  %16179 = vst [vmem:[#allocation41_spill] sm:$0xff] %v12248_v32  ;;  %9864 = vmatprep.mubr.msk.bf16.mxu0 %vm11391_vm2, %v16147_v44  ;;  %10206 = vmatprep.mubr.msk.bf16.mxu1 %vm11391_vm2, %v16147_v44  ;;  %v11141_v34 = vld [vmem:[%s15846_s0 + $0x41c] sm:$0xff]  }
 0x17a   :  { %v9766_v50 = vpop.f32.mrf.mxu0  ;;  %v10108_v2 = vpop.f32.mrf.mxu1 }
 0x17c   :  { %v12257_v19 = vpop.f32.mrf.mxu0  ;;  %v12259_v7 = vpop.f32.mrf.mxu1 }
 0x17d   :  { %16180 = vst [vmem:[#allocation42_spill] sm:$0xff] %v12257_v19  ;;  %16181 = vst [vmem:[#allocation43_spill] sm:$0xff] %v12259_v7 }
 0x17e   :  { %v9767_v32 = vpop.f32.mrf.mxu0  ;;  %v10109_v58 = vpop.f32.mrf.mxu1 }
 0x180   :  { %v12269_v0 = vpop.f32.mrf.mxu0  ;;  %9865 = vmatmul.mubr.msk.bf16.gmra.mxu0 %vm614_vm3, %v11140_v33  ;;  %v12272_v50 = vpop.f32.mrf.mxu1  ;;  %10207 = vmatmul.mubr.msk.bf16.gmra.mxu1 %vm614_vm3, %v11141_v34  ;;  %v11142_v33 = vld [vmem:[%s15846_s0 + $0x180] sm:$0xff]  }
 0x181   :  { %16182 = vst [vmem:[#allocation44_spill] sm:$0xff] %v12269_v0  ;;  %16183 = vst [vmem:[#allocation45_spill] sm:$0xff] %v12272_v50  ;;  %9868 = vmatprep.mubr.msk.bf16.mxu0 %vm11391_vm2, %v16147_v44  ;;  %10210 = vmatprep.mubr.msk.bf16.mxu1 %vm11391_vm2, %v16147_v44  ;;  %v11143_v34 = vld [vmem:[%s15846_s0 + $0x424] sm:$0xff]  }
 0x182   :  { %v9770_v26 = vpop.f32.mrf.mxu0  ;;  %v10112_v32 = vpop.f32.mrf.mxu1 }
 0x184   :  { %v12281_v58 = vpop.f32.mrf.mxu0  ;;  %v12283_v7 = vpop.f32.mrf.mxu1 }
 0x185   :  { %16184 = vst [vmem:[#allocation46_spill] sm:$0xff] %v12281_v58  ;;  %16185 = vst [vmem:[#allocation47_spill] sm:$0xff] %v12283_v7 }
 0x186   :  { %v9771_v50 = vpop.f32.mrf.mxu0  ;;  %v10113_v0 = vpop.f32.mrf.mxu1 }
 0x188   :  { %v12293_v19 = vpop.f32.mrf.mxu0  ;;  %9869 = vmatmul.mubr.msk.bf16.gmra.mxu0 %vm614_vm3, %v11142_v33  ;;  %v12296_v26 = vpop.f32.mrf.mxu1  ;;  %10211 = vmatmul.mubr.msk.bf16.gmra.mxu1 %vm614_vm3, %v11143_v34  ;;  %v11144_v33 = vld [vmem:[%s15846_s0 + $0x188] sm:$0xff]  }
 0x189   :  { %16186 = vst [vmem:[#allocation48_spill] sm:$0xff] %v12293_v19  ;;  %16187 = vst [vmem:[#allocation49_spill] sm:$0xff] %v12296_v26  ;;  %9872 = vmatprep.mubr.msk.bf16.mxu0 %vm11391_vm2, %v16147_v44  ;;  %10214 = vmatprep.mubr.msk.bf16.mxu1 %vm11391_vm2, %v16147_v44  ;;  %v11145_v34 = vld [vmem:[%s15846_s0 + $0x42c] sm:$0xff]  }
 0x18a   :  { %v9774_v2 = vpop.f32.mrf.mxu0  ;;  %v10116_v50 = vpop.f32.mrf.mxu1 }
 0x18c   :  { %v12305_v0 = vpop.f32.mrf.mxu0  ;;  %v12307_v7 = vpop.f32.mrf.mxu1 }
 0x18d   :  { %16188 = vst [vmem:[#allocation50_spill] sm:$0xff] %v12305_v0  ;;  %16189 = vst [vmem:[#allocation51_spill] sm:$0xff] %v12307_v7 }
 0x18e   :  { %v9775_v26 = vpop.f32.mrf.mxu0  ;;  %v10117_v19 = vpop.f32.mrf.mxu1 }
 0x190   :  { %v12317_v58 = vpop.f32.mrf.mxu0  ;;  %9873 = vmatmul.mubr.msk.bf16.gmra.mxu0 %vm614_vm3, %v11144_v33  ;;  %v12320_v2 = vpop.f32.mrf.mxu1  ;;  %10215 = vmatmul.mubr.msk.bf16.gmra.mxu1 %vm614_vm3, %v11145_v34  ;;  %v11146_v33 = vld [vmem:[%s15846_s0 + $0x190] sm:$0xff]  }
 0x191   :  { %16190 = vst [vmem:[#allocation52_spill] sm:$0xff] %v12317_v58  ;;  %16191 = vst [vmem:[#allocation53_spill] sm:$0xff] %v12320_v2  ;;  %9876 = vmatprep.mubr.msk.bf16.mxu0 %vm11391_vm2, %v16147_v44  ;;  %10218 = vmatprep.mubr.msk.bf16.mxu1 %vm11391_vm2, %v16147_v44  ;;  %v11147_v34 = vld [vmem:[%s15846_s0 + $0x434] sm:$0xff]  }
 0x192   :  { %v9778_v32 = vpop.f32.mrf.mxu0  ;;  %v10120_v26 = vpop.f32.mrf.mxu1 }
 0x194   :  { %v12329_v19 = vpop.f32.mrf.mxu0  ;;  %v12331_v7 = vpop.f32.mrf.mxu1 }
 0x195   :  { %16192 = vst [vmem:[#allocation54_spill] sm:$0xff] %v12329_v19  ;;  %16193 = vst [vmem:[#allocation55_spill] sm:$0xff] %v12331_v7 }
 0x196   :  { %v9779_v2 = vpop.f32.mrf.mxu0  ;;  %v10121_v58 = vpop.f32.mrf.mxu1 }
 0x198   :  { %v12341_v0 = vpop.f32.mrf.mxu0  ;;  %9877 = vmatmul.mubr.msk.bf16.gmra.mxu0 %vm614_vm3, %v11146_v33  ;;  %v12344_v32 = vpop.f32.mrf.mxu1  ;;  %10219 = vmatmul.mubr.msk.bf16.gmra.mxu1 %vm614_vm3, %v11147_v34  ;;  %v11148_v33 = vld [vmem:[%s15846_s0 + $0x198] sm:$0xff]  }
 0x199   :  { %16194 = vst [vmem:[#allocation56_spill] sm:$0xff] %v12341_v0  ;;  %16195 = vst [vmem:[#allocation57_spill] sm:$0xff] %v12344_v32  ;;  %9880 = vmatprep.mubr.msk.bf16.mxu0 %vm11391_vm2, %v16147_v44  ;;  %10222 = vmatprep.mubr.msk.bf16.mxu1 %vm11391_vm2, %v16147_v44  ;;  %v11149_v34 = vld [vmem:[%s15846_s0 + $0x43c] sm:$0xff]  }
 0x19a   :  { %v9782_v50 = vpop.f32.mrf.mxu0  ;;  %v10124_v2 = vpop.f32.mrf.mxu1 }
 0x19c   :  { %v12353_v58 = vpop.f32.mrf.mxu0  ;;  %v12355_v7 = vpop.f32.mrf.mxu1 }
 0x19d   :  { %16196 = vst [vmem:[#allocation58_spill] sm:$0xff] %v12353_v58  ;;  %16197 = vst [vmem:[#allocation59_spill] sm:$0xff] %v12355_v7 }
 0x19e   :  { %v9783_v32 = vpop.f32.mrf.mxu0  ;;  %v10125_v0 = vpop.f32.mrf.mxu1 }
 0x1a0   :  { %v12365_v19 = vpop.f32.mrf.mxu0  ;;  %9881 = vmatmul.mubr.msk.bf16.gmra.mxu0 %vm614_vm3, %v11148_v33  ;;  %v12368_v50 = vpop.f32.mrf.mxu1  ;;  %10223 = vmatmul.mubr.msk.bf16.gmra.mxu1 %vm614_vm3, %v11149_v34  ;;  %v11150_v33 = vld [vmem:[%s15846_s0 + $0x1a0] sm:$0xff]  }
 0x1a1   :  { %16198 = vst [vmem:[#allocation60_spill] sm:$0xff] %v12365_v19  ;;  %16199 = vst [vmem:[#allocation61_spill] sm:$0xff] %v12368_v50  ;;  %9884 = vmatprep.mubr.msk.bf16.mxu0 %vm11391_vm2, %v16147_v44  ;;  %10226 = vmatprep.mubr.msk.bf16.mxu1 %vm11391_vm2, %v16147_v44  ;;  %v11151_v34 = vld [vmem:[%s15846_s0 + $0x444] sm:$0xff]  }
 0x1a2   :  { %v9786_v26 = vpop.f32.mrf.mxu0  ;;  %v10128_v32 = vpop.f32.mrf.mxu1 }
 0x1a4   :  { %v12377_v0 = vpop.f32.mrf.mxu0  ;;  %v12379_v7 = vpop.f32.mrf.mxu1 }
 0x1a5   :  { %16200 = vst [vmem:[#allocation62_spill] sm:$0xff] %v12377_v0  ;;  %16201 = vst [vmem:[#allocation63_spill] sm:$0xff] %v12379_v7 }
 0x1a6   :  { %v9787_v50 = vpop.f32.mrf.mxu0  ;;  %v10129_v19 = vpop.f32.mrf.mxu1 }
 0x1a8   :  { %v12389_v58 = vpop.f32.mrf.mxu0  ;;  %9885 = vmatmul.mubr.msk.bf16.gmra.mxu0 %vm614_vm3, %v11150_v33  ;;  %v12392_v26 = vpop.f32.mrf.mxu1  ;;  %10227 = vmatmul.mubr.msk.bf16.gmra.mxu1 %vm614_vm3, %v11151_v34  ;;  %v11152_v33 = vld [vmem:[%s15846_s0 + $0x1a8] sm:$0xff]  }
 0x1a9   :  { %16202 = vst [vmem:[#allocation64_spill] sm:$0xff] %v12389_v58  ;;  %16203 = vst [vmem:[#allocation65_spill] sm:$0xff] %v12392_v26  ;;  %9888 = vmatprep.mubr.msk.bf16.mxu0 %vm11391_vm2, %v16147_v44  ;;  %10230 = vmatprep.mubr.msk.bf16.mxu1 %vm11391_vm2, %v16147_v44  ;;  %v11153_v34 = vld [vmem:[%s15846_s0 + $0x44c] sm:$0xff]  }
 0x1aa   :  { %v9790_v2 = vpop.f32.mrf.mxu0  ;;  %v10132_v50 = vpop.f32.mrf.mxu1 }
 0x1ac   :  { %v12401_v19 = vpop.f32.mrf.mxu0  ;;  %v12403_v7 = vpop.f32.mrf.mxu1 }
 0x1ad   :  { %16204 = vst [vmem:[#allocation66_spill] sm:$0xff] %v12401_v19  ;;  %16205 = vst [vmem:[#allocation67_spill] sm:$0xff] %v12403_v7 }
 0x1ae   :  { %v9791_v26 = vpop.f32.mrf.mxu0  ;;  %v10133_v58 = vpop.f32.mrf.mxu1 }
 0x1b0   :  { %v12413_v0 = vpop.f32.mrf.mxu0  ;;  %9889 = vmatmul.mubr.msk.bf16.gmra.mxu0 %vm614_vm3, %v11152_v33  ;;  %v12416_v2 = vpop.f32.mrf.mxu1  ;;  %10231 = vmatmul.mubr.msk.bf16.gmra.mxu1 %vm614_vm3, %v11153_v34  ;;  %v11154_v33 = vld [vmem:[%s15846_s0 + $0x1b0] sm:$0xff]  }
 0x1b1   :  { %16206 = vst [vmem:[#allocation68_spill] sm:$0xff] %v12413_v0  ;;  %16207 = vst [vmem:[#allocation69_spill] sm:$0xff] %v12416_v2  ;;  %9892 = vmatprep.mubr.msk.bf16.mxu0 %vm11391_vm2, %v16147_v44  ;;  %10234 = vmatprep.mubr.msk.bf16.mxu1 %vm11391_vm2, %v16147_v44  ;;  %v11155_v34 = vld [vmem:[%s15846_s0 + $0x454] sm:$0xff]  }
 0x1b2   :  { %v9794_v32 = vpop.f32.mrf.mxu0  ;;  %v10136_v26 = vpop.f32.mrf.mxu1 }
 0x1b4   :  { %v12425_v58 = vpop.f32.mrf.mxu0  ;;  %v12427_v7 = vpop.f32.mrf.mxu1 }
 0x1b5   :  { %16208 = vst [vmem:[#allocation70_spill] sm:$0xff] %v12425_v58  ;;  %16209 = vst [vmem:[#allocation71_spill] sm:$0xff] %v12427_v7 }
 0x1b6   :  { %v9795_v2 = vpop.f32.mrf.mxu0  ;;  %v10137_v0 = vpop.f32.mrf.mxu1 }
 0x1b8   :  { %v12437_v19 = vpop.f32.mrf.mxu0  ;;  %9893 = vmatmul.mubr.msk.bf16.gmra.mxu0 %vm614_vm3, %v11154_v33  ;;  %v12440_v32 = vpop.f32.mrf.mxu1  ;;  %10235 = vmatmul.mubr.msk.bf16.gmra.mxu1 %vm614_vm3, %v11155_v34  ;;  %v11156_v33 = vld [vmem:[%s15846_s0 + $0x1b8] sm:$0xff]  }
 0x1b9   :  { %16210 = vst [vmem:[#allocation72_spill] sm:$0xff] %v12437_v19  ;;  %16211 = vst [vmem:[#allocation73_spill] sm:$0xff] %v12440_v32  ;;  %9896 = vmatprep.mubr.msk.bf16.mxu0 %vm11391_vm2, %v16147_v44  ;;  %10238 = vmatprep.mubr.msk.bf16.mxu1 %vm11391_vm2, %v16147_v44  ;;  %v11157_v34 = vld [vmem:[%s15846_s0 + $0x45c] sm:$0xff]  }
 0x1ba   :  { %v9798_v50 = vpop.f32.mrf.mxu0  ;;  %v10140_v2 = vpop.f32.mrf.mxu1 }
 0x1bc   :  { %v12449_v0 = vpop.f32.mrf.mxu0  ;;  %v12451_v7 = vpop.f32.mrf.mxu1 }
 0x1bd   :  { %16212 = vst [vmem:[#allocation74_spill] sm:$0xff] %v12449_v0  ;;  %16213 = vst [vmem:[#allocation75_spill] sm:$0xff] %v12451_v7 }
 0x1be   :  { %v9799_v32 = vpop.f32.mrf.mxu0  ;;  %v10141_v19 = vpop.f32.mrf.mxu1 }
 0x1c0   :  { %v12461_v58 = vpop.f32.mrf.mxu0  ;;  %9897 = vmatmul.mubr.msk.bf16.gmra.mxu0 %vm614_vm3, %v11156_v33  ;;  %v12464_v50 = vpop.f32.mrf.mxu1  ;;  %10239 = vmatmul.mubr.msk.bf16.gmra.mxu1 %vm614_vm3, %v11157_v34  ;;  %v11158_v33 = vld [vmem:[%s15846_s0 + $0x1c0] sm:$0xff]  }
 0x1c1   :  { %16214 = vst [vmem:[#allocation76_spill] sm:$0xff] %v12461_v58  ;;  %16215 = vst [vmem:[#allocation77_spill] sm:$0xff] %v12464_v50  ;;  %9900 = vmatprep.mubr.msk.bf16.mxu0 %vm11391_vm2, %v16147_v44  ;;  %10242 = vmatprep.mubr.msk.bf16.mxu1 %vm11391_vm2, %v16147_v44  ;;  %v11159_v34 = vld [vmem:[%s15846_s0 + $0x464] sm:$0xff]  }
 0x1c2   :  { %v9802_v26 = vpop.f32.mrf.mxu0  ;;  %v10144_v32 = vpop.f32.mrf.mxu1 }
 0x1c4   :  { %v12473_v19 = vpop.f32.mrf.mxu0  ;;  %v12475_v7 = vpop.f32.mrf.mxu1 }
 0x1c5   :  { %16216 = vst [vmem:[#allocation78_spill] sm:$0xff] %v12473_v19  ;;  %16217 = vst [vmem:[#allocation79_spill] sm:$0xff] %v12475_v7 }
 0x1c6   :  { %v9803_v50 = vpop.f32.mrf.mxu0  ;;  %v10145_v58 = vpop.f32.mrf.mxu1 }
 0x1c8   :  { %v12485_v0 = vpop.f32.mrf.mxu0  ;;  %9901 = vmatmul.mubr.msk.bf16.gmra.mxu0 %vm614_vm3, %v11158_v33  ;;  %v12488_v26 = vpop.f32.mrf.mxu1  ;;  %10243 = vmatmul.mubr.msk.bf16.gmra.mxu1 %vm614_vm3, %v11159_v34  ;;  %v11160_v33 = vld [vmem:[%s15846_s0 + $0x1c8] sm:$0xff]  }
 0x1c9   :  { %16218 = vst [vmem:[#allocation80_spill] sm:$0xff] %v12485_v0  ;;  %16219 = vst [vmem:[#allocation81_spill] sm:$0xff] %v12488_v26  ;;  %9904 = vmatprep.mubr.msk.bf16.mxu0 %vm11391_vm2, %v16147_v44  ;;  %10246 = vmatprep.mubr.msk.bf16.mxu1 %vm11391_vm2, %v16147_v44  ;;  %v11161_v34 = vld [vmem:[%s15846_s0 + $0x46c] sm:$0xff]  }
 0x1ca   :  { %v9806_v2 = vpop.f32.mrf.mxu0  ;;  %v10148_v50 = vpop.f32.mrf.mxu1 }
 0x1cc   :  { %v12497_v58 = vpop.f32.mrf.mxu0  ;;  %v12499_v7 = vpop.f32.mrf.mxu1 }
 0x1cd   :  { %16220 = vst [vmem:[#allocation82_spill] sm:$0xff] %v12497_v58  ;;  %16221 = vst [vmem:[#allocation83_spill] sm:$0xff] %v12499_v7 }
 0x1ce   :  { %v9807_v26 = vpop.f32.mrf.mxu0  ;;  %v10149_v0 = vpop.f32.mrf.mxu1 }
 0x1d0   :  { %v12509_v19 = vpop.f32.mrf.mxu0  ;;  %9905 = vmatmul.mubr.msk.bf16.gmra.mxu0 %vm614_vm3, %v11160_v33  ;;  %v12512_v2 = vpop.f32.mrf.mxu1  ;;  %10247 = vmatmul.mubr.msk.bf16.gmra.mxu1 %vm614_vm3, %v11161_v34  ;;  %v11162_v33 = vld [vmem:[%s15846_s0 + $0x1d0] sm:$0xff]  }
 0x1d1   :  { %16222 = vst [vmem:[#allocation84_spill] sm:$0xff] %v12509_v19  ;;  %16223 = vst [vmem:[#allocation85_spill] sm:$0xff] %v12512_v2  ;;  %9908 = vmatprep.mubr.msk.bf16.mxu0 %vm11391_vm2, %v16147_v44  ;;  %10250 = vmatprep.mubr.msk.bf16.mxu1 %vm11391_vm2, %v16147_v44  ;;  %v11163_v34 = vld [vmem:[%s15846_s0 + $0x474] sm:$0xff]  }
 0x1d2   :  { %v9810_v32 = vpop.f32.mrf.mxu0  ;;  %v10152_v26 = vpop.f32.mrf.mxu1 }
 0x1d4   :  { %v12521_v0 = vpop.f32.mrf.mxu0  ;;  %v12523_v7 = vpop.f32.mrf.mxu1 }
 0x1d5   :  { %16224 = vst [vmem:[#allocation86_spill] sm:$0xff] %v12521_v0  ;;  %16225 = vst [vmem:[#allocation87_spill] sm:$0xff] %v12523_v7 }
 0x1d6   :  { %v9811_v2 = vpop.f32.mrf.mxu0  ;;  %v10153_v19 = vpop.f32.mrf.mxu1 }
 0x1d8   :  { %v12533_v58 = vpop.f32.mrf.mxu0  ;;  %9909 = vmatmul.mubr.msk.bf16.gmra.mxu0 %vm614_vm3, %v11162_v33  ;;  %v12536_v32 = vpop.f32.mrf.mxu1  ;;  %10251 = vmatmul.mubr.msk.bf16.gmra.mxu1 %vm614_vm3, %v11163_v34  ;;  %v11164_v33 = vld [vmem:[%s15846_s0 + $0x1d8] sm:$0xff]  }
 0x1d9   :  { %16226 = vst [vmem:[#allocation88_spill] sm:$0xff] %v12533_v58  ;;  %16227 = vst [vmem:[#allocation89_spill] sm:$0xff] %v12536_v32  ;;  %9912 = vmatprep.mubr.msk.bf16.mxu0 %vm11391_vm2, %v16147_v44  ;;  %10254 = vmatprep.mubr.msk.bf16.mxu1 %vm11391_vm2, %v16147_v44  ;;  %v11165_v34 = vld [vmem:[%s15846_s0 + $0x47c] sm:$0xff]  }
 0x1da   :  { %v9814_v50 = vpop.f32.mrf.mxu0  ;;  %v10156_v2 = vpop.f32.mrf.mxu1 }
 0x1dc   :  { %v12545_v19 = vpop.f32.mrf.mxu0  ;;  %v12547_v7 = vpop.f32.mrf.mxu1 }
 0x1dd   :  { %16228 = vst [vmem:[#allocation90_spill] sm:$0xff] %v12545_v19  ;;  %16229 = vst [vmem:[#allocation91_spill] sm:$0xff] %v12547_v7 }
 0x1de   :  { %v9815_v32 = vpop.f32.mrf.mxu0  ;;  %v10157_v58 = vpop.f32.mrf.mxu1 }
 0x1e0   :  { %v12557_v0 = vpop.f32.mrf.mxu0  ;;  %9913 = vmatmul.mubr.msk.bf16.gmra.mxu0 %vm614_vm3, %v11164_v33  ;;  %v12560_v50 = vpop.f32.mrf.mxu1  ;;  %10255 = vmatmul.mubr.msk.bf16.gmra.mxu1 %vm614_vm3, %v11165_v34  ;;  %v11166_v33 = vld [vmem:[%s15846_s0 + $0x1e0] sm:$0xff]  }
 0x1e1   :  { %16230 = vst [vmem:[#allocation92_spill] sm:$0xff] %v12557_v0  ;;  %16231 = vst [vmem:[#allocation93_spill] sm:$0xff] %v12560_v50  ;;  %9916 = vmatprep.mubr.msk.bf16.mxu0 %vm11391_vm2, %v16147_v44  ;;  %10258 = vmatprep.mubr.msk.bf16.mxu1 %vm11391_vm2, %v16147_v44  ;;  %v11167_v34 = vld [vmem:[%s15846_s0 + $0x484] sm:$0xff]  }
 0x1e2   :  { %v9818_v26 = vpop.f32.mrf.mxu0  ;;  %v10160_v32 = vpop.f32.mrf.mxu1 }
 0x1e4   :  { %v12569_v58 = vpop.f32.mrf.mxu0  ;;  %v12571_v7 = vpop.f32.mrf.mxu1 }
 0x1e5   :  { %16232 = vst [vmem:[#allocation94_spill] sm:$0xff] %v12569_v58  ;;  %16233 = vst [vmem:[#allocation95_spill] sm:$0xff] %v12571_v7 }
 0x1e6   :  { %v9819_v50 = vpop.f32.mrf.mxu0  ;;  %v10161_v0 = vpop.f32.mrf.mxu1 }
 0x1e8   :  { %v12581_v19 = vpop.f32.mrf.mxu0  ;;  %9917 = vmatmul.mubr.msk.bf16.gmra.mxu0 %vm614_vm3, %v11166_v33  ;;  %v12584_v26 = vpop.f32.mrf.mxu1  ;;  %10259 = vmatmul.mubr.msk.bf16.gmra.mxu1 %vm614_vm3, %v11167_v34  ;;  %v11168_v33 = vld [vmem:[%s15846_s0 + $0x1e8] sm:$0xff]  }
 0x1e9   :  { %16234 = vst [vmem:[#allocation96_spill] sm:$0xff] %v12581_v19  ;;  %16235 = vst [vmem:[#allocation97_spill] sm:$0xff] %v12584_v26  ;;  %9920 = vmatprep.mubr.msk.bf16.mxu0 %vm11391_vm2, %v16147_v44  ;;  %10262 = vmatprep.mubr.msk.bf16.mxu1 %vm11391_vm2, %v16147_v44  ;;  %v11169_v34 = vld [vmem:[%s15846_s0 + $0x48c] sm:$0xff]  }
 0x1ea   :  { %v9822_v2 = vpop.f32.mrf.mxu0  ;;  %v10164_v50 = vpop.f32.mrf.mxu1 }
 0x1ec   :  { %v12593_v0 = vpop.f32.mrf.mxu0  ;;  %v12595_v7 = vpop.f32.mrf.mxu1 }
 0x1ed   :  { %16236 = vst [vmem:[#allocation98_spill] sm:$0xff] %v12593_v0  ;;  %16237 = vst [vmem:[#allocation99_spill] sm:$0xff] %v12595_v7 }
 0x1ee   :  { %v9823_v26 = vpop.f32.mrf.mxu0  ;;  %v10165_v19 = vpop.f32.mrf.mxu1 }
 0x1f0   :  { %v12605_v58 = vpop.f32.mrf.mxu0  ;;  %9921 = vmatmul.mubr.msk.bf16.gmra.mxu0 %vm614_vm3, %v11168_v33  ;;  %v12608_v2 = vpop.f32.mrf.mxu1  ;;  %10263 = vmatmul.mubr.msk.bf16.gmra.mxu1 %vm614_vm3, %v11169_v34  ;;  %v11170_v33 = vld [vmem:[%s15846_s0 + $0x1f0] sm:$0xff]  }
 0x1f1   :  { %16238 = vst [vmem:[#allocation100_spill] sm:$0xff] %v12605_v58  ;;  %16239 = vst [vmem:[#allocation101_spill] sm:$0xff] %v12608_v2  ;;  %9924 = vmatprep.mubr.msk.bf16.mxu0 %vm11391_vm2, %v16147_v44  ;;  %10266 = vmatprep.mubr.msk.bf16.mxu1 %vm11391_vm2, %v16147_v44  ;;  %v11171_v34 = vld [vmem:[%s15846_s0 + $0x494] sm:$0xff]  }
 0x1f2   :  { %v9826_v32 = vpop.f32.mrf.mxu0  ;;  %v10168_v26 = vpop.f32.mrf.mxu1 }
 0x1f4   :  { %v12617_v19 = vpop.f32.mrf.mxu0  ;;  %v12619_v7 = vpop.f32.mrf.mxu1 }
 0x1f5   :  { %16240 = vst [vmem:[#allocation102_spill] sm:$0xff] %v12617_v19  ;;  %16241 = vst [vmem:[#allocation103_spill] sm:$0xff] %v12619_v7 }
 0x1f6   :  { %v9827_v2 = vpop.f32.mrf.mxu0  ;;  %v10169_v58 = vpop.f32.mrf.mxu1 }
 0x1f8   :  { %v12629_v0 = vpop.f32.mrf.mxu0  ;;  %9925 = vmatmul.mubr.msk.bf16.gmra.mxu0 %vm614_vm3, %v11170_v33  ;;  %v12632_v32 = vpop.f32.mrf.mxu1  ;;  %10267 = vmatmul.mubr.msk.bf16.gmra.mxu1 %vm614_vm3, %v11171_v34  ;;  %v11172_v33 = vld [vmem:[%s15846_s0 + $0x1f8] sm:$0xff]  }
 0x1f9   :  { %16242 = vst [vmem:[#allocation104_spill] sm:$0xff] %v12629_v0  ;;  %16243 = vst [vmem:[#allocation105_spill] sm:$0xff] %v12632_v32  ;;  %9928 = vmatprep.mubr.msk.bf16.mxu0 %vm11391_vm2, %v16147_v44  ;;  %10270 = vmatprep.mubr.msk.bf16.mxu1 %vm11391_vm2, %v16147_v44  ;;  %v11173_v34 = vld [vmem:[%s15846_s0 + $0x49c] sm:$0xff]  }
 0x1fa   :  { %v9830_v50 = vpop.f32.mrf.mxu0  ;;  %v10172_v2 = vpop.f32.mrf.mxu1 }
 0x1fc   :  { %v12641_v58 = vpop.f32.mrf.mxu0  ;;  %v12643_v7 = vpop.f32.mrf.mxu1 }
 0x1fd   :  { %16244 = vst [vmem:[#allocation106_spill] sm:$0xff] %v12641_v58  ;;  %16245 = vst [vmem:[#allocation107_spill] sm:$0xff] %v12643_v7 }
 0x1fe   :  { %v9831_v32 = vpop.f32.mrf.mxu0  ;;  %v10173_v0 = vpop.f32.mrf.mxu1 }
 0x200   :  { %v12653_v19 = vpop.f32.mrf.mxu0  ;;  %9929 = vmatmul.mubr.msk.bf16.gmra.mxu0 %vm614_vm3, %v11172_v33  ;;  %v12656_v50 = vpop.f32.mrf.mxu1  ;;  %10271 = vmatmul.mubr.msk.bf16.gmra.mxu1 %vm614_vm3, %v11173_v34  ;;  %v11174_v33 = vld [vmem:[%s15846_s0 + $0x200] sm:$0xff]  }
 0x201   :  { %16246 = vst [vmem:[#allocation108_spill] sm:$0xff] %v12653_v19  ;;  %16247 = vst [vmem:[#allocation109_spill] sm:$0xff] %v12656_v50  ;;  %9932 = vmatprep.mubr.msk.bf16.mxu0 %vm11391_vm2, %v16147_v44  ;;  %10274 = vmatprep.mubr.msk.bf16.mxu1 %vm11391_vm2, %v16147_v44  ;;  %v11175_v34 = vld [vmem:[%s15846_s0 + $0x4a4] sm:$0xff]  }
 0x202   :  { %v9834_v26 = vpop.f32.mrf.mxu0  ;;  %v10176_v32 = vpop.f32.mrf.mxu1 }
 0x204   :  { %v12665_v0 = vpop.f32.mrf.mxu0  ;;  %v12667_v7 = vpop.f32.mrf.mxu1 }
 0x205   :  { %16248 = vst [vmem:[#allocation110_spill] sm:$0xff] %v12665_v0  ;;  %16249 = vst [vmem:[#allocation111_spill] sm:$0xff] %v12667_v7 }
 0x206   :  { %v9835_v50 = vpop.f32.mrf.mxu0  ;;  %v10177_v19 = vpop.f32.mrf.mxu1 }
 0x208   :  { %v12677_v58 = vpop.f32.mrf.mxu0  ;;  %9933 = vmatmul.mubr.msk.bf16.gmra.mxu0 %vm614_vm3, %v11174_v33  ;;  %v12680_v26 = vpop.f32.mrf.mxu1  ;;  %10275 = vmatmul.mubr.msk.bf16.gmra.mxu1 %vm614_vm3, %v11175_v34  ;;  %v11176_v33 = vld [vmem:[%s15846_s0 + $0x208] sm:$0xff]  }
 0x209   :  { %16250 = vst [vmem:[#allocation112_spill] sm:$0xff] %v12677_v58  ;;  %16251 = vst [vmem:[#allocation113_spill] sm:$0xff] %v12680_v26  ;;  %9936 = vmatprep.mubr.msk.bf16.mxu0 %vm11391_vm2, %v16147_v44  ;;  %10278 = vmatprep.mubr.msk.bf16.mxu1 %vm11391_vm2, %v16147_v44  ;;  %v11177_v34 = vld [vmem:[%s15846_s0 + $0x4ac] sm:$0xff]  }
 0x20a   :  { %v9838_v2 = vpop.f32.mrf.mxu0  ;;  %v10180_v50 = vpop.f32.mrf.mxu1 }
 0x20c   :  { %v12689_v19 = vpop.f32.mrf.mxu0  ;;  %v12691_v7 = vpop.f32.mrf.mxu1 }
 0x20d   :  { %16252 = vst [vmem:[#allocation114_spill] sm:$0xff] %v12689_v19  ;;  %16253 = vst [vmem:[#allocation115_spill] sm:$0xff] %v12691_v7 }
 0x20e   :  { %v9839_v26 = vpop.f32.mrf.mxu0  ;;  %v10181_v58 = vpop.f32.mrf.mxu1 }
 0x210   :  { %v12701_v0 = vpop.f32.mrf.mxu0  ;;  %9937 = vmatmul.mubr.msk.bf16.gmra.mxu0 %vm614_vm3, %v11176_v33  ;;  %v12704_v2 = vpop.f32.mrf.mxu1  ;;  %10279 = vmatmul.mubr.msk.bf16.gmra.mxu1 %vm614_vm3, %v11177_v34  ;;  %v11178_v33 = vld [vmem:[%s15846_s0 + $0x210] sm:$0xff]  }
 0x211   :  { %16254 = vst [vmem:[#allocation116_spill] sm:$0xff] %v12701_v0  ;;  %16255 = vst [vmem:[#allocation117_spill] sm:$0xff] %v12704_v2  ;;  %9940 = vmatprep.mubr.msk.bf16.mxu0 %vm11391_vm2, %v16147_v44  ;;  %10282 = vmatprep.mubr.msk.bf16.mxu1 %vm11391_vm2, %v16147_v44  ;;  %v11179_v34 = vld [vmem:[%s15846_s0 + $0x4b4] sm:$0xff]  }
 0x212   :  { %v9842_v32 = vpop.f32.mrf.mxu0  ;;  %v10184_v26 = vpop.f32.mrf.mxu1 }
 0x214   :  { %v12713_v58 = vpop.f32.mrf.mxu0  ;;  %v12715_v7 = vpop.f32.mrf.mxu1 }
 0x215   :  { %16256 = vst [vmem:[#allocation118_spill] sm:$0xff] %v12713_v58  ;;  %16257 = vst [vmem:[#allocation119_spill] sm:$0xff] %v12715_v7 }
 0x216   :  { %v9843_v2 = vpop.f32.mrf.mxu0  ;;  %v10185_v0 = vpop.f32.mrf.mxu1 }
 0x218   :  { %v12725_v19 = vpop.f32.mrf.mxu0  ;;  %9941 = vmatmul.mubr.msk.bf16.gmra.mxu0 %vm614_vm3, %v11178_v33  ;;  %v12728_v32 = vpop.f32.mrf.mxu1  ;;  %10283 = vmatmul.mubr.msk.bf16.gmra.mxu1 %vm614_vm3, %v11179_v34  ;;  %v11180_v33 = vld [vmem:[%s15846_s0 + $0x218] sm:$0xff]  }
 0x219   :  { %16258 = vst [vmem:[#allocation120_spill] sm:$0xff] %v12725_v19  ;;  %16259 = vst [vmem:[#allocation121_spill] sm:$0xff] %v12728_v32  ;;  %9944 = vmatprep.mubr.msk.bf16.mxu0 %vm11391_vm2, %v16147_v44  ;;  %10286 = vmatprep.mubr.msk.bf16.mxu1 %vm11391_vm2, %v16147_v44  ;;  %v11181_v34 = vld [vmem:[%s15846_s0 + $0x4bc] sm:$0xff]  }
 0x21a   :  { %v9846_v50 = vpop.f32.mrf.mxu0  ;;  %v10188_v2 = vpop.f32.mrf.mxu1 }
 0x21c   :  { %v12737_v0 = vpop.f32.mrf.mxu0  ;;  %v12739_v7 = vpop.f32.mrf.mxu1 }
 0x21d   :  { %16260 = vst [vmem:[#allocation122_spill] sm:$0xff] %v12737_v0  ;;  %16261 = vst [vmem:[#allocation123_spill] sm:$0xff] %v12739_v7 }
 0x21e   :  { %v9847_v32 = vpop.f32.mrf.mxu0  ;;  %v10189_v19 = vpop.f32.mrf.mxu1 }
 0x220   :  { %v12749_v58 = vpop.f32.mrf.mxu0  ;;  %9945 = vmatmul.mubr.msk.bf16.gmra.mxu0 %vm614_vm3, %v11180_v33  ;;  %v12752_v50 = vpop.f32.mrf.mxu1  ;;  %10287 = vmatmul.mubr.msk.bf16.gmra.mxu1 %vm614_vm3, %v11181_v34  ;;  %v11182_v33 = vld [vmem:[%s15846_s0 + $0x220] sm:$0xff]  }
 0x221   :  { %16262 = vst [vmem:[#allocation124_spill] sm:$0xff] %v12749_v58  ;;  %16263 = vst [vmem:[#allocation125_spill] sm:$0xff] %v12752_v50  ;;  %9948 = vmatprep.mubr.msk.bf16.mxu0 %vm11391_vm2, %v16147_v44  ;;  %10290 = vmatprep.mubr.msk.bf16.mxu1 %vm11391_vm2, %v16147_v44  ;;  %v11183_v34 = vld [vmem:[%s15846_s0 + $0x4c4] sm:$0xff]  }
 0x222   :  { %v9850_v26 = vpop.f32.mrf.mxu0  ;;  %v10192_v32 = vpop.f32.mrf.mxu1 }
 0x224   :  { %v12761_v19 = vpop.f32.mrf.mxu0  ;;  %v12763_v7 = vpop.f32.mrf.mxu1 }
 0x225   :  { %16264 = vst [vmem:[#allocation126_spill] sm:$0xff] %v12761_v19  ;;  %16265 = vst [vmem:[#allocation127_spill] sm:$0xff] %v12763_v7 }
 0x226   :  { %v9851_v50 = vpop.f32.mrf.mxu0  ;;  %v10193_v58 = vpop.f32.mrf.mxu1 }
 0x228   :  { %v12773_v0 = vpop.f32.mrf.mxu0  ;;  %9949 = vmatmul.mubr.msk.bf16.gmra.mxu0 %vm614_vm3, %v11182_v33  ;;  %v12776_v26 = vpop.f32.mrf.mxu1  ;;  %10291 = vmatmul.mubr.msk.bf16.gmra.mxu1 %vm614_vm3, %v11183_v34  ;;  %v11184_v33 = vld [vmem:[%s15846_s0 + $0x228] sm:$0xff]  }
 0x229   :  { %16266 = vst [vmem:[#allocation128_spill] sm:$0xff] %v12773_v0  ;;  %16267 = vst [vmem:[#allocation129_spill] sm:$0xff] %v12776_v26  ;;  %9952 = vmatprep.mubr.msk.bf16.mxu0 %vm11391_vm2, %v16147_v44  ;;  %10294 = vmatprep.mubr.msk.bf16.mxu1 %vm11391_vm2, %v16147_v44  ;;  %v11185_v34 = vld [vmem:[%s15846_s0 + $0x4cc] sm:$0xff]  }
 0x22a   :  { %v9854_v2 = vpop.f32.mrf.mxu0  ;;  %v10196_v50 = vpop.f32.mrf.mxu1 }
 0x22c   :  { %v12785_v58 = vpop.f32.mrf.mxu0  ;;  %v12787_v7 = vpop.f32.mrf.mxu1 }
 0x22d   :  { %16268 = vst [vmem:[#allocation130_spill] sm:$0xff] %v12785_v58  ;;  %16269 = vst [vmem:[#allocation131_spill] sm:$0xff] %v12787_v7 }
 0x22e   :  { %v9855_v26 = vpop.f32.mrf.mxu0  ;;  %v10197_v0 = vpop.f32.mrf.mxu1 }
 0x230   :  { %v12797_v19 = vpop.f32.mrf.mxu0  ;;  %9953 = vmatmul.mubr.msk.bf16.gmra.mxu0 %vm614_vm3, %v11184_v33  ;;  %v12800_v2 = vpop.f32.mrf.mxu1  ;;  %10295 = vmatmul.mubr.msk.bf16.gmra.mxu1 %vm614_vm3, %v11185_v34  ;;  %v11186_v33 = vld [vmem:[%s15846_s0 + $0x230] sm:$0xff]  }
 0x231   :  { %16270 = vst [vmem:[#allocation132_spill] sm:$0xff] %v12797_v19  ;;  %16271 = vst [vmem:[#allocation133_spill] sm:$0xff] %v12800_v2  ;;  %9956 = vmatprep.mubr.msk.bf16.mxu0 %vm11391_vm2, %v16147_v44  ;;  %10298 = vmatprep.mubr.msk.bf16.mxu1 %vm11391_vm2, %v16147_v44  ;;  %v11187_v34 = vld [vmem:[%s15846_s0 + $0x4d4] sm:$0xff]  }
 0x232   :  { %v9858_v32 = vpop.f32.mrf.mxu0  ;;  %v10200_v26 = vpop.f32.mrf.mxu1 }
 0x234   :  { %v12809_v0 = vpop.f32.mrf.mxu0  ;;  %v12811_v7 = vpop.f32.mrf.mxu1 }
 0x235   :  { %16272 = vst [vmem:[#allocation134_spill] sm:$0xff] %v12809_v0  ;;  %16273 = vst [vmem:[#allocation135_spill] sm:$0xff] %v12811_v7 }
 0x236   :  { %v9859_v2 = vpop.f32.mrf.mxu0  ;;  %v10201_v19 = vpop.f32.mrf.mxu1 }
 0x238   :  { %v12821_v58 = vpop.f32.mrf.mxu0  ;;  %9957 = vmatmul.mubr.msk.bf16.gmra.mxu0 %vm614_vm3, %v11186_v33  ;;  %v12824_v32 = vpop.f32.mrf.mxu1  ;;  %10299 = vmatmul.mubr.msk.bf16.gmra.mxu1 %vm614_vm3, %v11187_v34  ;;  %v11188_v33 = vld [vmem:[%s15846_s0 + $0x238] sm:$0xff]  }
 0x239   :  { %16274 = vst [vmem:[#allocation136_spill] sm:$0xff] %v12821_v58  ;;  %16275 = vst [vmem:[#allocation137_spill] sm:$0xff] %v12824_v32  ;;  %9960 = vmatprep.mubr.msk.bf16.mxu0 %vm11391_vm2, %v16147_v44  ;;  %10302 = vmatprep.mubr.msk.bf16.mxu1 %vm11391_vm2, %v16147_v44  ;;  %v11189_v34 = vld [vmem:[%s15846_s0 + $0x4dc] sm:$0xff]  }
 0x23a   :  { %v9862_v50 = vpop.f32.mrf.mxu0  ;;  %v10204_v2 = vpop.f32.mrf.mxu1 }
 0x23c   :  { %v12833_v19 = vpop.f32.mrf.mxu0  ;;  %v12835_v7 = vpop.f32.mrf.mxu1 }
 0x23d   :  { %16276 = vst [vmem:[#allocation138_spill] sm:$0xff] %v12833_v19  ;;  %16277 = vst [vmem:[#allocation139_spill] sm:$0xff] %v12835_v7 }
 0x23e   :  { %v9863_v32 = vpop.f32.mrf.mxu0  ;;  %v10205_v58 = vpop.f32.mrf.mxu1 }
 0x240   :  { %v12845_v0 = vpop.f32.mrf.mxu0  ;;  %9961 = vmatmul.mubr.msk.bf16.gmra.mxu0 %vm614_vm3, %v11188_v33  ;;  %v12848_v50 = vpop.f32.mrf.mxu1  ;;  %10303 = vmatmul.mubr.msk.bf16.gmra.mxu1 %vm614_vm3, %v11189_v34  ;;  %v11190_v33 = vld [vmem:[%s15846_s0 + $0x240] sm:$0xff]  }
 0x241   :  { %16278 = vst [vmem:[#allocation140_spill] sm:$0xff] %v12845_v0  ;;  %16279 = vst [vmem:[#allocation141_spill] sm:$0xff] %v12848_v50  ;;  %9964 = vmatprep.mubr.msk.bf16.mxu0 %vm11391_vm2, %v16147_v44  ;;  %10306 = vmatprep.mubr.msk.bf16.mxu1 %vm11391_vm2, %v16147_v44  ;;  %v11191_v34 = vld [vmem:[%s15846_s0 + $0x4e4] sm:$0xff]  }
 0x242   :  { %v9866_v26 = vpop.f32.mrf.mxu0  ;;  %v10208_v32 = vpop.f32.mrf.mxu1 }
 0x244   :  { %v12857_v58 = vpop.f32.mrf.mxu0  ;;  %v12859_v7 = vpop.f32.mrf.mxu1 }
 0x245   :  { %16280 = vst [vmem:[#allocation142_spill] sm:$0xff] %v12857_v58  ;;  %16281 = vst [vmem:[#allocation143_spill] sm:$0xff] %v12859_v7 }
 0x246   :  { %v9867_v50 = vpop.f32.mrf.mxu0  ;;  %v10209_v0 = vpop.f32.mrf.mxu1 }
 0x248   :  { %v12869_v19 = vpop.f32.mrf.mxu0  ;;  %9965 = vmatmul.mubr.msk.bf16.gmra.mxu0 %vm614_vm3, %v11190_v33  ;;  %v12872_v26 = vpop.f32.mrf.mxu1  ;;  %10307 = vmatmul.mubr.msk.bf16.gmra.mxu1 %vm614_vm3, %v11191_v34  ;;  %v11192_v33 = vld [vmem:[%s15846_s0 + $0x248] sm:$0xff]  }
 0x249   :  { %16282 = vst [vmem:[#allocation144_spill] sm:$0xff] %v12869_v19  ;;  %16283 = vst [vmem:[#allocation145_spill] sm:$0xff] %v12872_v26  ;;  %9968 = vmatprep.mubr.msk.bf16.mxu0 %vm11391_vm2, %v16147_v44  ;;  %10310 = vmatprep.mubr.msk.bf16.mxu1 %vm11391_vm2, %v16147_v44  ;;  %v11193_v34 = vld [vmem:[%s15846_s0 + $0x4ec] sm:$0xff]  }
 0x24a   :  { %v9870_v2 = vpop.f32.mrf.mxu0  ;;  %v10212_v50 = vpop.f32.mrf.mxu1 }
 0x24c   :  { %v12881_v0 = vpop.f32.mrf.mxu0  ;;  %v12883_v7 = vpop.f32.mrf.mxu1 }
 0x24d   :  { %16284 = vst [vmem:[#allocation146_spill] sm:$0xff] %v12881_v0  ;;  %16285 = vst [vmem:[#allocation147_spill] sm:$0xff] %v12883_v7 }
 0x24e   :  { %v9871_v26 = vpop.f32.mrf.mxu0  ;;  %v10213_v19 = vpop.f32.mrf.mxu1 }
 0x250   :  { %v12893_v58 = vpop.f32.mrf.mxu0  ;;  %9969 = vmatmul.mubr.msk.bf16.gmra.mxu0 %vm614_vm3, %v11192_v33  ;;  %v12896_v2 = vpop.f32.mrf.mxu1  ;;  %10311 = vmatmul.mubr.msk.bf16.gmra.mxu1 %vm614_vm3, %v11193_v34  ;;  %v11194_v33 = vld [vmem:[%s15846_s0 + $0x250] sm:$0xff]  }
 0x251   :  { %16286 = vst [vmem:[#allocation148_spill] sm:$0xff] %v12893_v58  ;;  %16287 = vst [vmem:[#allocation149_spill] sm:$0xff] %v12896_v2  ;;  %9972 = vmatprep.mubr.msk.bf16.mxu0 %vm11391_vm2, %v16147_v44  ;;  %10314 = vmatprep.mubr.msk.bf16.mxu1 %vm11391_vm2, %v16147_v44  ;;  %v11195_v34 = vld [vmem:[%s15846_s0 + $0x4f4] sm:$0xff]  }
 0x252   :  { %v9874_v32 = vpop.f32.mrf.mxu0  ;;  %v10216_v26 = vpop.f32.mrf.mxu1 }
 0x254   :  { %v12905_v19 = vpop.f32.mrf.mxu0  ;;  %v12907_v7 = vpop.f32.mrf.mxu1 }
 0x255   :  { %16288 = vst [vmem:[#allocation150_spill] sm:$0xff] %v12905_v19  ;;  %16289 = vst [vmem:[#allocation151_spill] sm:$0xff] %v12907_v7 }
 0x256   :  { %v9875_v2 = vpop.f32.mrf.mxu0  ;;  %v10217_v58 = vpop.f32.mrf.mxu1 }
 0x258   :  { %v12917_v0 = vpop.f32.mrf.mxu0  ;;  %9973 = vmatmul.mubr.msk.bf16.gmra.mxu0 %vm614_vm3, %v11194_v33  ;;  %v12920_v32 = vpop.f32.mrf.mxu1  ;;  %10315 = vmatmul.mubr.msk.bf16.gmra.mxu1 %vm614_vm3, %v11195_v34  ;;  %v11196_v33 = vld [vmem:[%s15846_s0 + $0x258] sm:$0xff]  }
 0x259   :  { %16290 = vst [vmem:[#allocation152_spill] sm:$0xff] %v12917_v0  ;;  %16291 = vst [vmem:[#allocation153_spill] sm:$0xff] %v12920_v32  ;;  %9976 = vmatprep.mubr.msk.bf16.mxu0 %vm11391_vm2, %v16147_v44  ;;  %10318 = vmatprep.mubr.msk.bf16.mxu1 %vm11391_vm2, %v16147_v44  ;;  %v11197_v34 = vld [vmem:[%s15846_s0 + $0x4fc] sm:$0xff]  }
 0x25a   :  { %v9878_v50 = vpop.f32.mrf.mxu0  ;;  %v10220_v2 = vpop.f32.mrf.mxu1 }
 0x25c   :  { %v12929_v58 = vpop.f32.mrf.mxu0  ;;  %v12931_v7 = vpop.f32.mrf.mxu1 }
 0x25d   :  { %16292 = vst [vmem:[#allocation154_spill] sm:$0xff] %v12929_v58  ;;  %16293 = vst [vmem:[#allocation155_spill] sm:$0xff] %v12931_v7 }
 0x25e   :  { %v9879_v32 = vpop.f32.mrf.mxu0  ;;  %v10221_v0 = vpop.f32.mrf.mxu1 }
 0x260   :  { %v12941_v19 = vpop.f32.mrf.mxu0  ;;  %9977 = vmatmul.mubr.msk.bf16.gmra.mxu0 %vm614_vm3, %v11196_v33  ;;  %v12944_v50 = vpop.f32.mrf.mxu1  ;;  %10319 = vmatmul.mubr.msk.bf16.gmra.mxu1 %vm614_vm3, %v11197_v34  ;;  %v11198_v33 = vld [vmem:[%s15846_s0 + $0x260] sm:$0xff]  }
 0x261   :  { %16294 = vst [vmem:[#allocation156_spill] sm:$0xff] %v12941_v19  ;;  %16295 = vst [vmem:[#allocation157_spill] sm:$0xff] %v12944_v50  ;;  %9980 = vmatprep.mubr.msk.bf16.mxu0 %vm11391_vm2, %v16147_v44  ;;  %10322 = vmatprep.mubr.msk.bf16.mxu1 %vm11391_vm2, %v16147_v44  ;;  %v11199_v34 = vld [vmem:[%s15846_s0 + $0x504] sm:$0xff]  }
 0x262   :  { %v9882_v26 = vpop.f32.mrf.mxu0  ;;  %v10224_v32 = vpop.f32.mrf.mxu1 }
 0x264   :  { %v12953_v0 = vpop.f32.mrf.mxu0  ;;  %v12955_v7 = vpop.f32.mrf.mxu1 }
 0x265   :  { %16296 = vst [vmem:[#allocation158_spill] sm:$0xff] %v12953_v0  ;;  %16297 = vst [vmem:[#allocation159_spill] sm:$0xff] %v12955_v7 }
 0x266   :  { %v9883_v50 = vpop.f32.mrf.mxu0  ;;  %v10225_v19 = vpop.f32.mrf.mxu1 }
 0x268   :  { %v12965_v58 = vpop.f32.mrf.mxu0  ;;  %9981 = vmatmul.mubr.msk.bf16.gmra.mxu0 %vm614_vm3, %v11198_v33  ;;  %v12968_v26 = vpop.f32.mrf.mxu1  ;;  %10323 = vmatmul.mubr.msk.bf16.gmra.mxu1 %vm614_vm3, %v11199_v34  ;;  %v11200_v33 = vld [vmem:[%s15846_s0 + $0x268] sm:$0xff]  }
 0x269   :  { %16298 = vst [vmem:[#allocation160_spill] sm:$0xff] %v12965_v58  ;;  %16299 = vst [vmem:[#allocation161_spill] sm:$0xff] %v12968_v26  ;;  %9984 = vmatprep.mubr.msk.bf16.mxu0 %vm11391_vm2, %v16147_v44  ;;  %10326 = vmatprep.mubr.msk.bf16.mxu1 %vm11391_vm2, %v16147_v44  ;;  %v11201_v34 = vld [vmem:[%s15846_s0 + $0x50c] sm:$0xff]  }
 0x26a   :  { %v9886_v2 = vpop.f32.mrf.mxu0  ;;  %v10228_v50 = vpop.f32.mrf.mxu1 }
 0x26c   :  { %v12977_v19 = vpop.f32.mrf.mxu0  ;;  %v12979_v7 = vpop.f32.mrf.mxu1 }
 0x26d   :  { %16300 = vst [vmem:[#allocation162_spill] sm:$0xff] %v12977_v19  ;;  %16301 = vst [vmem:[#allocation163_spill] sm:$0xff] %v12979_v7 }
 0x26e   :  { %v9887_v26 = vpop.f32.mrf.mxu0  ;;  %v10229_v58 = vpop.f32.mrf.mxu1 }
 0x270   :  { %v12989_v0 = vpop.f32.mrf.mxu0  ;;  %9985 = vmatmul.mubr.msk.bf16.gmra.mxu0 %vm614_vm3, %v11200_v33  ;;  %v12992_v2 = vpop.f32.mrf.mxu1  ;;  %10327 = vmatmul.mubr.msk.bf16.gmra.mxu1 %vm614_vm3, %v11201_v34  ;;  %v11202_v33 = vld [vmem:[%s15846_s0 + $0x270] sm:$0xff]  }
 0x271   :  { %16302 = vst [vmem:[#allocation164_spill] sm:$0xff] %v12989_v0  ;;  %16303 = vst [vmem:[#allocation165_spill] sm:$0xff] %v12992_v2  ;;  %9988 = vmatprep.mubr.msk.bf16.mxu0 %vm11391_vm2, %v16147_v44  ;;  %10330 = vmatprep.mubr.msk.bf16.mxu1 %vm11391_vm2, %v16147_v44  ;;  %v11203_v34 = vld [vmem:[%s15846_s0 + $0x514] sm:$0xff]  }
 0x272   :  { %v9890_v32 = vpop.f32.mrf.mxu0  ;;  %v10232_v26 = vpop.f32.mrf.mxu1 }
 0x274   :  { %v13001_v58 = vpop.f32.mrf.mxu0  ;;  %v13003_v7 = vpop.f32.mrf.mxu1 }
 0x275   :  { %16304 = vst [vmem:[#allocation166_spill] sm:$0xff] %v13001_v58  ;;  %16305 = vst [vmem:[#allocation167_spill] sm:$0xff] %v13003_v7 }
 0x276   :  { %v9891_v2 = vpop.f32.mrf.mxu0  ;;  %v10233_v0 = vpop.f32.mrf.mxu1 }
 0x278   :  { %v13013_v19 = vpop.f32.mrf.mxu0  ;;  %9989 = vmatmul.mubr.msk.bf16.gmra.mxu0 %vm614_vm3, %v11202_v33  ;;  %v13016_v32 = vpop.f32.mrf.mxu1  ;;  %10331 = vmatmul.mubr.msk.bf16.gmra.mxu1 %vm614_vm3, %v11203_v34  ;;  %v11204_v33 = vld [vmem:[%s15846_s0 + $0x278] sm:$0xff]  }
 0x279   :  { %16306 = vst [vmem:[#allocation168_spill] sm:$0xff] %v13013_v19  ;;  %16307 = vst [vmem:[#allocation169_spill] sm:$0xff] %v13016_v32  ;;  %9992 = vmatprep.mubr.msk.bf16.mxu0 %vm11391_vm2, %v16147_v44  ;;  %10334 = vmatprep.mubr.msk.bf16.mxu1 %vm11391_vm2, %v16147_v44  ;;  %v11205_v34 = vld [vmem:[%s15846_s0 + $0x51c] sm:$0xff]  }
 0x27a   :  { %v9894_v50 = vpop.f32.mrf.mxu0  ;;  %v10236_v2 = vpop.f32.mrf.mxu1 }
 0x27c   :  { %v13025_v0 = vpop.f32.mrf.mxu0  ;;  %v13027_v7 = vpop.f32.mrf.mxu1 }
 0x27d   :  { %16308 = vst [vmem:[#allocation170_spill] sm:$0xff] %v13025_v0  ;;  %16309 = vst [vmem:[#allocation171_spill] sm:$0xff] %v13027_v7 }
 0x27e   :  { %v9895_v32 = vpop.f32.mrf.mxu0  ;;  %v10237_v19 = vpop.f32.mrf.mxu1 }
 0x280   :  { %v13037_v58 = vpop.f32.mrf.mxu0  ;;  %9993 = vmatmul.mubr.msk.bf16.gmra.mxu0 %vm614_vm3, %v11204_v33  ;;  %v13040_v50 = vpop.f32.mrf.mxu1  ;;  %10335 = vmatmul.mubr.msk.bf16.gmra.mxu1 %vm614_vm3, %v11205_v34  ;;  %v11206_v33 = vld [vmem:[%s15846_s0 + $0x280] sm:$0xff]  }
 0x281   :  { %16310 = vst [vmem:[#allocation172_spill] sm:$0xff] %v13037_v58  ;;  %16311 = vst [vmem:[#allocation173_spill] sm:$0xff] %v13040_v50  ;;  %9996 = vmatprep.mubr.msk.bf16.mxu0 %vm11391_vm2, %v16147_v44  ;;  %10338 = vmatprep.mubr.msk.bf16.mxu1 %vm11391_vm2, %v16147_v44  ;;  %v11207_v34 = vld [vmem:[%s15846_s0 + $0x524] sm:$0xff]  }
 0x282   :  { %v9898_v26 = vpop.f32.mrf.mxu0  ;;  %v10240_v32 = vpop.f32.mrf.mxu1 }
 0x284   :  { %v13049_v19 = vpop.f32.mrf.mxu0  ;;  %v13051_v7 = vpop.f32.mrf.mxu1 }
 0x285   :  { %16312 = vst [vmem:[#allocation174_spill] sm:$0xff] %v13049_v19  ;;  %16313 = vst [vmem:[#allocation175_spill] sm:$0xff] %v13051_v7 }
 0x286   :  { %v9899_v50 = vpop.f32.mrf.mxu0  ;;  %v10241_v58 = vpop.f32.mrf.mxu1 }
 0x288   :  { %v13061_v0 = vpop.f32.mrf.mxu0  ;;  %9997 = vmatmul.mubr.msk.bf16.gmra.mxu0 %vm614_vm3, %v11206_v33  ;;  %v13064_v26 = vpop.f32.mrf.mxu1  ;;  %10339 = vmatmul.mubr.msk.bf16.gmra.mxu1 %vm614_vm3, %v11207_v34  ;;  %v11208_v33 = vld [vmem:[%s15846_s0 + $0x288] sm:$0xff]  }
 0x289   :  { %16314 = vst [vmem:[#allocation176_spill] sm:$0xff] %v13061_v0  ;;  %16315 = vst [vmem:[#allocation177_spill] sm:$0xff] %v13064_v26  ;;  %10000 = vmatprep.mubr.msk.bf16.mxu0 %vm11391_vm2, %v16147_v44  ;;  %10342 = vmatprep.mubr.msk.bf16.mxu1 %vm11391_vm2, %v16147_v44  ;;  %v11209_v34 = vld [vmem:[%s15846_s0 + $0x52c] sm:$0xff]  }
 0x28a   :  { %v9902_v2 = vpop.f32.mrf.mxu0  ;;  %v10244_v50 = vpop.f32.mrf.mxu1 }
 0x28c   :  { %v13073_v58 = vpop.f32.mrf.mxu0  ;;  %v13075_v7 = vpop.f32.mrf.mxu1 }
 0x28d   :  { %16316 = vst [vmem:[#allocation178_spill] sm:$0xff] %v13073_v58  ;;  %16317 = vst [vmem:[#allocation179_spill] sm:$0xff] %v13075_v7 }
 0x28e   :  { %v9903_v26 = vpop.f32.mrf.mxu0  ;;  %v10245_v0 = vpop.f32.mrf.mxu1 }
 0x290   :  { %v13085_v19 = vpop.f32.mrf.mxu0  ;;  %10001 = vmatmul.mubr.msk.bf16.gmra.mxu0 %vm614_vm3, %v11208_v33  ;;  %v13088_v2 = vpop.f32.mrf.mxu1  ;;  %10343 = vmatmul.mubr.msk.bf16.gmra.mxu1 %vm614_vm3, %v11209_v34  ;;  %v11210_v33 = vld [vmem:[%s15846_s0 + $0x290] sm:$0xff]  }
 0x291   :  { %16318 = vst [vmem:[#allocation180_spill] sm:$0xff] %v13085_v19  ;;  %16319 = vst [vmem:[#allocation181_spill] sm:$0xff] %v13088_v2  ;;  %10004 = vmatprep.mubr.msk.bf16.mxu0 %vm11391_vm2, %v16147_v44  ;;  %10346 = vmatprep.mubr.msk.bf16.mxu1 %vm11391_vm2, %v16147_v44  ;;  %v11211_v34 = vld [vmem:[%s15846_s0 + $0x534] sm:$0xff]  }
 0x292   :  { %v9906_v32 = vpop.f32.mrf.mxu0  ;;  %v10248_v26 = vpop.f32.mrf.mxu1 }
 0x294   :  { %v13097_v0 = vpop.f32.mrf.mxu0  ;;  %v13099_v7 = vpop.f32.mrf.mxu1 }
 0x295   :  { %16320 = vst [vmem:[#allocation182_spill] sm:$0xff] %v13097_v0  ;;  %16321 = vst [vmem:[#allocation183_spill] sm:$0xff] %v13099_v7 }
 0x296   :  { %v9907_v2 = vpop.f32.mrf.mxu0  ;;  %v10249_v19 = vpop.f32.mrf.mxu1 }
 0x298   :  { %v13109_v58 = vpop.f32.mrf.mxu0  ;;  %10005 = vmatmul.mubr.msk.bf16.gmra.mxu0 %vm614_vm3, %v11210_v33  ;;  %v13112_v32 = vpop.f32.mrf.mxu1  ;;  %10347 = vmatmul.mubr.msk.bf16.gmra.mxu1 %vm614_vm3, %v11211_v34  ;;  %v11212_v33 = vld [vmem:[%s15846_s0 + $0x298] sm:$0xff]  }
 0x299   :  { %16322 = vst [vmem:[#allocation184_spill] sm:$0xff] %v13109_v58  ;;  %16323 = vst [vmem:[#allocation185_spill] sm:$0xff] %v13112_v32  ;;  %10008 = vmatprep.mubr.msk.bf16.mxu0 %vm11391_vm2, %v16147_v44  ;;  %10350 = vmatprep.mubr.msk.bf16.mxu1 %vm11391_vm2, %v16147_v44  ;;  %v11213_v34 = vld [vmem:[%s15846_s0 + $0x53c] sm:$0xff]  }
 0x29a   :  { %v9910_v50 = vpop.f32.mrf.mxu0  ;;  %v10252_v2 = vpop.f32.mrf.mxu1 }
 0x29c   :  { %v13121_v19 = vpop.f32.mrf.mxu0  ;;  %v13123_v7 = vpop.f32.mrf.mxu1 }
 0x29d   :  { %16324 = vst [vmem:[#allocation186_spill] sm:$0xff] %v13121_v19  ;;  %16325 = vst [vmem:[#allocation187_spill] sm:$0xff] %v13123_v7 }
 0x29e   :  { %v9911_v32 = vpop.f32.mrf.mxu0  ;;  %v10253_v58 = vpop.f32.mrf.mxu1 }
 0x2a0   :  { %v13133_v0 = vpop.f32.mrf.mxu0  ;;  %10009 = vmatmul.mubr.msk.bf16.gmra.mxu0 %vm614_vm3, %v11212_v33  ;;  %v13136_v50 = vpop.f32.mrf.mxu1  ;;  %10351 = vmatmul.mubr.msk.bf16.gmra.mxu1 %vm614_vm3, %v11213_v34  ;;  %v11214_v33 = vld [vmem:[%s15846_s0 + $0x2a0] ss:$0 sps:$4 sm:$0xff]   ;;  %v11215_v34 = vld [vmem:[%s15846_s0 + $0x544] ss:$0 sps:$4 sm:$0xff]  }
 0x2a1   :  { %16326 = vst [vmem:[#allocation188_spill] sm:$0xff] %v13133_v0  ;;  %16327 = vst [vmem:[#allocation189_spill] sm:$0xff] %v13136_v50  ;;  %10012 = vmatprep.mubr.msk.bf16.mxu0 %vm11391_vm2, %v16147_v44  ;;  %10354 = vmatprep.mubr.msk.bf16.mxu1 %vm11391_vm2, %v16147_v44 }
 0x2a2   :  { %v9914_v26 = vpop.f32.mrf.mxu0  ;;  %v10256_v32 = vpop.f32.mrf.mxu1 }
 0x2a4   :  { %v13145_v58 = vpop.f32.mrf.mxu0  ;;  %v13147_v7 = vpop.f32.mrf.mxu1 }
 0x2a5   :  { %16328 = vst [vmem:[#allocation190_spill] sm:$0xff] %v13145_v58  ;;  %16329 = vst [vmem:[#allocation191_spill] sm:$0xff] %v13147_v7 }
 0x2a6   :  { %v9915_v50 = vpop.f32.mrf.mxu0  ;;  %v10257_v0 = vpop.f32.mrf.mxu1 }
 0x2a8   :  { %v13157_v19 = vpop.f32.mrf.mxu0  ;;  %10013 = vmatmul.mubr.msk.bf16.gmra.mxu0 %vm614_vm3, %v11214_v33  ;;  %v13160_v26 = vpop.f32.mrf.mxu1  ;;  %10355 = vmatmul.mubr.msk.bf16.gmra.mxu1 %vm614_vm3, %v11215_v34  ;;  %v11216_v33 = vld [vmem:[%s15846_s0 + $0x548] sm:$0xff]  }
 0x2a9   :  { %16330 = vst [vmem:[#allocation192_spill] sm:$0xff] %v13157_v19  ;;  %16331 = vst [vmem:[#allocation193_spill] sm:$0xff] %v13160_v26  ;;  %10360 = vmatprep.mubr.msk.bf16.mxu0 %vm11391_vm2, %v16147_v44  ;;  %10702 = vmatprep.mubr.msk.bf16.mxu1 %vm11391_vm2, %v16147_v44  ;;  %v11217_v34 = vld [vmem:[%s15846_s0 + $0x7ec] sm:$0xff]  }
 0x2aa   :  { %v9918_v2 = vpop.f32.mrf.mxu0  ;;  %v10260_v50 = vpop.f32.mrf.mxu1 }
 0x2ac   :  { %v13169_v0 = vpop.f32.mrf.mxu0  ;;  %v13171_v7 = vpop.f32.mrf.mxu1 }
 0x2ad   :  { %16332 = vst [vmem:[#allocation194_spill] sm:$0xff] %v13169_v0  ;;  %16333 = vst [vmem:[#allocation195_spill] sm:$0xff] %v13171_v7 }
 0x2ae   :  { %v9919_v26 = vpop.f32.mrf.mxu0  ;;  %v10261_v19 = vpop.f32.mrf.mxu1 }
 0x2b0   :  { %v13181_v58 = vpop.f32.mrf.mxu0  ;;  %v13183_v2 = vpop.f32.mrf.mxu1  ;;  %10361 = vmatmul.mubr.msk.bf16.vlgmr.msra.gmra.mxu0 %vm614_vm3, %v11216_v33  ;;  %10703 = vmatmul.mubr.msk.bf16.vlgmr.msra.gmra.mxu1 %vm614_vm3, %v11217_v34  ;;  %v11218_v33 = vld [vmem:[%s15846_s0 + $0x550] sm:$0xff]  }
 0x2b1   :  { %16334 = vst [vmem:[#allocation196_spill] sm:$0xff] %v13181_v58  ;;  %16335 = vst [vmem:[#allocation197_spill] sm:$0xff] %v13183_v2  ;;  %10364 = vmatprep.mubr.msk.bf16.mxu0 %vm11391_vm2, %v16147_v44  ;;  %10706 = vmatprep.mubr.msk.bf16.mxu1 %vm11391_vm2, %v16147_v44  ;;  %v11219_v34 = vld [vmem:[%s15846_s0 + $0x7f4] sm:$0xff]  }
 0x2b2   :  { %v9922_v32 = vpop.f32.mrf.mxu0  ;;  %v10264_v26 = vpop.f32.mrf.mxu1 }
 0x2b4   :  { %v13193_v19 = vpop.f32.mrf.mxu0  ;;  %v13195_v7 = vpop.f32.mrf.mxu1 }
 0x2b5   :  { %16336 = vst [vmem:[#allocation198_spill] sm:$0xff] %v13193_v19  ;;  %16337 = vst [vmem:[#allocation199_spill] sm:$0xff] %v13195_v7 }
 0x2b6   :  { %v9923_v2 = vpop.f32.mrf.mxu0  ;;  %v10265_v58 = vpop.f32.mrf.mxu1 }
 0x2b8   :  { %v13205_v0 = vpop.f32.mrf.mxu0  ;;  %v13207_v32 = vpop.f32.mrf.mxu1  ;;  %10365 = vmatmul.mubr.msk.bf16.gmra.mxu0 %vm614_vm3, %v11218_v33  ;;  %10707 = vmatmul.mubr.msk.bf16.gmra.mxu1 %vm614_vm3, %v11219_v34  ;;  %v11220_v33 = vld [vmem:[%s15846_s0 + $0x558] sm:$0xff]  }
 0x2b9   :  { %16338 = vst [vmem:[#allocation200_spill] sm:$0xff] %v13205_v0  ;;  %16339 = vst [vmem:[#allocation201_spill] sm:$0xff] %v13207_v32  ;;  %10368 = vmatprep.mubr.msk.bf16.mxu0 %vm11391_vm2, %v16147_v44  ;;  %10710 = vmatprep.mubr.msk.bf16.mxu1 %vm11391_vm2, %v16147_v44  ;;  %v11221_v34 = vld [vmem:[%s15846_s0 + $0x7fc] sm:$0xff]  }
 0x2ba   :  { %v9926_v50 = vpop.f32.mrf.mxu0  ;;  %v10268_v2 = vpop.f32.mrf.mxu1 }
 0x2bc   :  { %v13217_v58 = vpop.f32.mrf.mxu0  ;;  %v13219_v7 = vpop.f32.mrf.mxu1 }
 0x2bd   :  { %16340 = vst [vmem:[#allocation202_spill] sm:$0xff] %v13217_v58  ;;  %16341 = vst [vmem:[#allocation203_spill] sm:$0xff] %v13219_v7 }
 0x2be   :  { %v9927_v32 = vpop.f32.mrf.mxu0  ;;  %v10269_v0 = vpop.f32.mrf.mxu1 }
 0x2c0   :  { %v13229_v19 = vpop.f32.mrf.mxu0  ;;  %v13231_v50 = vpop.f32.mrf.mxu1  ;;  %10369 = vmatmul.mubr.msk.bf16.gmra.mxu0 %vm614_vm3, %v11220_v33  ;;  %10711 = vmatmul.mubr.msk.bf16.gmra.mxu1 %vm614_vm3, %v11221_v34  ;;  %v11222_v33 = vld [vmem:[%s15846_s0 + $0x560] sm:$0xff]  }
 0x2c1   :  { %16342 = vst [vmem:[#allocation204_spill] sm:$0xff] %v13229_v19  ;;  %16343 = vst [vmem:[#allocation205_spill] sm:$0xff] %v13231_v50  ;;  %10372 = vmatprep.mubr.msk.bf16.mxu0 %vm11391_vm2, %v16147_v44  ;;  %10714 = vmatprep.mubr.msk.bf16.mxu1 %vm11391_vm2, %v16147_v44  ;;  %v11223_v34 = vld [vmem:[%s15846_s0 + $0x804] sm:$0xff]  }
 0x2c2   :  { %v9930_v26 = vpop.f32.mrf.mxu0  ;;  %v10272_v32 = vpop.f32.mrf.mxu1 }
 0x2c4   :  { %v13241_v0 = vpop.f32.mrf.mxu0  ;;  %v13243_v7 = vpop.f32.mrf.mxu1 }
 0x2c5   :  { %16344 = vst [vmem:[#allocation206_spill] sm:$0xff] %v13241_v0  ;;  %16345 = vst [vmem:[#allocation207_spill] sm:$0xff] %v13243_v7 }
 0x2c6   :  { %v9931_v50 = vpop.f32.mrf.mxu0  ;;  %v10273_v19 = vpop.f32.mrf.mxu1 }
 0x2c8   :  { %v13253_v58 = vpop.f32.mrf.mxu0  ;;  %v13255_v26 = vpop.f32.mrf.mxu1  ;;  %10373 = vmatmul.mubr.msk.bf16.gmra.mxu0 %vm614_vm3, %v11222_v33  ;;  %10715 = vmatmul.mubr.msk.bf16.gmra.mxu1 %vm614_vm3, %v11223_v34  ;;  %v11224_v33 = vld [vmem:[%s15846_s0 + $0x568] sm:$0xff]  }
 0x2c9   :  { %16346 = vst [vmem:[#allocation208_spill] sm:$0xff] %v13253_v58  ;;  %16347 = vst [vmem:[#allocation209_spill] sm:$0xff] %v13255_v26  ;;  %10376 = vmatprep.mubr.msk.bf16.mxu0 %vm11391_vm2, %v16147_v44  ;;  %10718 = vmatprep.mubr.msk.bf16.mxu1 %vm11391_vm2, %v16147_v44  ;;  %v11225_v34 = vld [vmem:[%s15846_s0 + $0x80c] sm:$0xff]  }
 0x2ca   :  { %v9934_v2 = vpop.f32.mrf.mxu0  ;;  %v10276_v50 = vpop.f32.mrf.mxu1 }
 0x2cc   :  { %v13265_v19 = vpop.f32.mrf.mxu0  ;;  %v13267_v7 = vpop.f32.mrf.mxu1 }
 0x2cd   :  { %16348 = vst [vmem:[#allocation210_spill] sm:$0xff] %v13265_v19  ;;  %16349 = vst [vmem:[#allocation211_spill] sm:$0xff] %v13267_v7 }
 0x2ce   :  { %v9935_v26 = vpop.f32.mrf.mxu0  ;;  %v10277_v58 = vpop.f32.mrf.mxu1 }
 0x2d0   :  { %v13277_v0 = vpop.f32.mrf.mxu0  ;;  %v13279_v2 = vpop.f32.mrf.mxu1  ;;  %10377 = vmatmul.mubr.msk.bf16.gmra.mxu0 %vm614_vm3, %v11224_v33  ;;  %10719 = vmatmul.mubr.msk.bf16.gmra.mxu1 %vm614_vm3, %v11225_v34  ;;  %v11226_v33 = vld [vmem:[%s15846_s0 + $0x570] sm:$0xff]  }
 0x2d1   :  { %16350 = vst [vmem:[#allocation212_spill] sm:$0xff] %v13277_v0  ;;  %16351 = vst [vmem:[#allocation213_spill] sm:$0xff] %v13279_v2  ;;  %10380 = vmatprep.mubr.msk.bf16.mxu0 %vm11391_vm2, %v16147_v44  ;;  %10722 = vmatprep.mubr.msk.bf16.mxu1 %vm11391_vm2, %v16147_v44  ;;  %v11227_v34 = vld [vmem:[%s15846_s0 + $0x814] sm:$0xff]  }
 0x2d2   :  { %v9938_v32 = vpop.f32.mrf.mxu0  ;;  %v10280_v26 = vpop.f32.mrf.mxu1 }
 0x2d4   :  { %v13289_v58 = vpop.f32.mrf.mxu0  ;;  %v13291_v7 = vpop.f32.mrf.mxu1 }
 0x2d5   :  { %16352 = vst [vmem:[#allocation214_spill] sm:$0xff] %v13289_v58  ;;  %16353 = vst [vmem:[#allocation215_spill] sm:$0xff] %v13291_v7 }
 0x2d6   :  { %v9939_v2 = vpop.f32.mrf.mxu0  ;;  %v10281_v0 = vpop.f32.mrf.mxu1 }
 0x2d8   :  { %v13301_v19 = vpop.f32.mrf.mxu0  ;;  %v13303_v32 = vpop.f32.mrf.mxu1  ;;  %10381 = vmatmul.mubr.msk.bf16.gmra.mxu0 %vm614_vm3, %v11226_v33  ;;  %10723 = vmatmul.mubr.msk.bf16.gmra.mxu1 %vm614_vm3, %v11227_v34  ;;  %v11228_v33 = vld [vmem:[%s15846_s0 + $0x578] sm:$0xff]  }
 0x2d9   :  { %16354 = vst [vmem:[#allocation216_spill] sm:$0xff] %v13301_v19  ;;  %16355 = vst [vmem:[#allocation217_spill] sm:$0xff] %v13303_v32  ;;  %10384 = vmatprep.mubr.msk.bf16.mxu0 %vm11391_vm2, %v16147_v44  ;;  %10726 = vmatprep.mubr.msk.bf16.mxu1 %vm11391_vm2, %v16147_v44  ;;  %v11229_v34 = vld [vmem:[%s15846_s0 + $0x81c] sm:$0xff]  }
 0x2da   :  { %v9942_v50 = vpop.f32.mrf.mxu0  ;;  %v10284_v2 = vpop.f32.mrf.mxu1 }
 0x2dc   :  { %v13313_v0 = vpop.f32.mrf.mxu0  ;;  %v13315_v7 = vpop.f32.mrf.mxu1 }
 0x2dd   :  { %16356 = vst [vmem:[#allocation218_spill] sm:$0xff] %v13313_v0  ;;  %16357 = vst [vmem:[#allocation219_spill] sm:$0xff] %v13315_v7 }
 0x2de   :  { %v9943_v32 = vpop.f32.mrf.mxu0  ;;  %v10285_v19 = vpop.f32.mrf.mxu1 }
 0x2e0   :  { %v13325_v58 = vpop.f32.mrf.mxu0  ;;  %v13327_v50 = vpop.f32.mrf.mxu1  ;;  %10385 = vmatmul.mubr.msk.bf16.gmra.mxu0 %vm614_vm3, %v11228_v33  ;;  %10727 = vmatmul.mubr.msk.bf16.gmra.mxu1 %vm614_vm3, %v11229_v34  ;;  %v11230_v33 = vld [vmem:[%s15846_s0 + $0x580] sm:$0xff]  }
 0x2e1   :  { %16358 = vst [vmem:[#allocation220_spill] sm:$0xff] %v13325_v58  ;;  %16359 = vst [vmem:[#allocation221_spill] sm:$0xff] %v13327_v50  ;;  %10388 = vmatprep.mubr.msk.bf16.mxu0 %vm11391_vm2, %v16147_v44  ;;  %10730 = vmatprep.mubr.msk.bf16.mxu1 %vm11391_vm2, %v16147_v44  ;;  %v11231_v34 = vld [vmem:[%s15846_s0 + $0x824] sm:$0xff]  }
 0x2e2   :  { %v9946_v26 = vpop.f32.mrf.mxu0  ;;  %v10288_v32 = vpop.f32.mrf.mxu1 }
 0x2e4   :  { %v13337_v19 = vpop.f32.mrf.mxu0  ;;  %v13339_v7 = vpop.f32.mrf.mxu1 }
 0x2e5   :  { %16360 = vst [vmem:[#allocation222_spill] sm:$0xff] %v13337_v19  ;;  %16361 = vst [vmem:[#allocation223_spill] sm:$0xff] %v13339_v7 }
 0x2e6   :  { %v9947_v50 = vpop.f32.mrf.mxu0  ;;  %v10289_v58 = vpop.f32.mrf.mxu1 }
 0x2e8   :  { %v13349_v0 = vpop.f32.mrf.mxu0  ;;  %v13351_v26 = vpop.f32.mrf.mxu1  ;;  %10389 = vmatmul.mubr.msk.bf16.gmra.mxu0 %vm614_vm3, %v11230_v33  ;;  %10731 = vmatmul.mubr.msk.bf16.gmra.mxu1 %vm614_vm3, %v11231_v34  ;;  %v11232_v33 = vld [vmem:[%s15846_s0 + $0x588] sm:$0xff]  }
 0x2e9   :  { %16362 = vst [vmem:[#allocation224_spill] sm:$0xff] %v13349_v0  ;;  %16363 = vst [vmem:[#allocation225_spill] sm:$0xff] %v13351_v26  ;;  %10392 = vmatprep.mubr.msk.bf16.mxu0 %vm11391_vm2, %v16147_v44  ;;  %10734 = vmatprep.mubr.msk.bf16.mxu1 %vm11391_vm2, %v16147_v44  ;;  %v11233_v34 = vld [vmem:[%s15846_s0 + $0x82c] sm:$0xff]  }
 0x2ea   :  { %v9950_v2 = vpop.f32.mrf.mxu0  ;;  %v10292_v50 = vpop.f32.mrf.mxu1 }
 0x2ec   :  { %v13361_v58 = vpop.f32.mrf.mxu0  ;;  %v13363_v7 = vpop.f32.mrf.mxu1 }
 0x2ed   :  { %16364 = vst [vmem:[#allocation226_spill] sm:$0xff] %v13361_v58  ;;  %16365 = vst [vmem:[#allocation227_spill] sm:$0xff] %v13363_v7 }
 0x2ee   :  { %v9951_v26 = vpop.f32.mrf.mxu0  ;;  %v10293_v0 = vpop.f32.mrf.mxu1 }
 0x2f0   :  { %v13373_v19 = vpop.f32.mrf.mxu0  ;;  %v13375_v2 = vpop.f32.mrf.mxu1  ;;  %10393 = vmatmul.mubr.msk.bf16.gmra.mxu0 %vm614_vm3, %v11232_v33  ;;  %10735 = vmatmul.mubr.msk.bf16.gmra.mxu1 %vm614_vm3, %v11233_v34  ;;  %v11234_v33 = vld [vmem:[%s15846_s0 + $0x590] sm:$0xff]  }
 0x2f1   :  { %16366 = vst [vmem:[#allocation228_spill] sm:$0xff] %v13373_v19  ;;  %16367 = vst [vmem:[#allocation229_spill] sm:$0xff] %v13375_v2  ;;  %10396 = vmatprep.mubr.msk.bf16.mxu0 %vm11391_vm2, %v16147_v44  ;;  %10738 = vmatprep.mubr.msk.bf16.mxu1 %vm11391_vm2, %v16147_v44  ;;  %v11235_v34 = vld [vmem:[%s15846_s0 + $0x834] sm:$0xff]  }
 0x2f2   :  { %v9954_v32 = vpop.f32.mrf.mxu0  ;;  %v10296_v26 = vpop.f32.mrf.mxu1 }
 0x2f4   :  { %v13385_v0 = vpop.f32.mrf.mxu0  ;;  %v13387_v7 = vpop.f32.mrf.mxu1 }
 0x2f5   :  { %16368 = vst [vmem:[#allocation230_spill] sm:$0xff] %v13385_v0  ;;  %16369 = vst [vmem:[#allocation231_spill] sm:$0xff] %v13387_v7 }
 0x2f6   :  { %v9955_v2 = vpop.f32.mrf.mxu0  ;;  %v10297_v19 = vpop.f32.mrf.mxu1 }
 0x2f8   :  { %v13397_v58 = vpop.f32.mrf.mxu0  ;;  %v13399_v32 = vpop.f32.mrf.mxu1  ;;  %10397 = vmatmul.mubr.msk.bf16.gmra.mxu0 %vm614_vm3, %v11234_v33  ;;  %10739 = vmatmul.mubr.msk.bf16.gmra.mxu1 %vm614_vm3, %v11235_v34  ;;  %v11236_v33 = vld [vmem:[%s15846_s0 + $0x598] sm:$0xff]  }
 0x2f9   :  { %16370 = vst [vmem:[#allocation232_spill] sm:$0xff] %v13397_v58  ;;  %16371 = vst [vmem:[#allocation233_spill] sm:$0xff] %v13399_v32  ;;  %10400 = vmatprep.mubr.msk.bf16.mxu0 %vm11391_vm2, %v16147_v44  ;;  %10742 = vmatprep.mubr.msk.bf16.mxu1 %vm11391_vm2, %v16147_v44  ;;  %v11237_v34 = vld [vmem:[%s15846_s0 + $0x83c] sm:$0xff]  }
 0x2fa   :  { %v9958_v50 = vpop.f32.mrf.mxu0  ;;  %v10300_v2 = vpop.f32.mrf.mxu1 }
 0x2fc   :  { %v13409_v19 = vpop.f32.mrf.mxu0  ;;  %v13411_v7 = vpop.f32.mrf.mxu1 }
 0x2fd   :  { %16372 = vst [vmem:[#allocation234_spill] sm:$0xff] %v13409_v19  ;;  %16373 = vst [vmem:[#allocation235_spill] sm:$0xff] %v13411_v7 }
 0x2fe   :  { %v9959_v32 = vpop.f32.mrf.mxu0  ;;  %v10301_v58 = vpop.f32.mrf.mxu1 }
 0x300   :  { %v13421_v0 = vpop.f32.mrf.mxu0  ;;  %v13423_v50 = vpop.f32.mrf.mxu1  ;;  %10401 = vmatmul.mubr.msk.bf16.gmra.mxu0 %vm614_vm3, %v11236_v33  ;;  %10743 = vmatmul.mubr.msk.bf16.gmra.mxu1 %vm614_vm3, %v11237_v34  ;;  %v11238_v33 = vld [vmem:[%s15846_s0 + $0x5a0] sm:$0xff]  }
 0x301   :  { %16374 = vst [vmem:[#allocation236_spill] sm:$0xff] %v13421_v0  ;;  %16375 = vst [vmem:[#allocation237_spill] sm:$0xff] %v13423_v50  ;;  %10404 = vmatprep.mubr.msk.bf16.mxu0 %vm11391_vm2, %v16147_v44  ;;  %10746 = vmatprep.mubr.msk.bf16.mxu1 %vm11391_vm2, %v16147_v44  ;;  %v11239_v34 = vld [vmem:[%s15846_s0 + $0x844] sm:$0xff]  }
 0x302   :  { %v9962_v26 = vpop.f32.mrf.mxu0  ;;  %v10304_v32 = vpop.f32.mrf.mxu1 }
 0x304   :  { %v13433_v58 = vpop.f32.mrf.mxu0  ;;  %v13435_v7 = vpop.f32.mrf.mxu1 }
 0x305   :  { %16376 = vst [vmem:[#allocation238_spill] sm:$0xff] %v13433_v58  ;;  %16377 = vst [vmem:[#allocation239_spill] sm:$0xff] %v13435_v7 }
 0x306   :  { %v9963_v50 = vpop.f32.mrf.mxu0  ;;  %v10305_v0 = vpop.f32.mrf.mxu1 }
 0x308   :  { %v13445_v19 = vpop.f32.mrf.mxu0  ;;  %v13447_v26 = vpop.f32.mrf.mxu1  ;;  %10405 = vmatmul.mubr.msk.bf16.gmra.mxu0 %vm614_vm3, %v11238_v33  ;;  %10747 = vmatmul.mubr.msk.bf16.gmra.mxu1 %vm614_vm3, %v11239_v34  ;;  %v11240_v33 = vld [vmem:[%s15846_s0 + $0x5a8] sm:$0xff]  }
 0x309   :  { %16378 = vst [vmem:[#allocation240_spill] sm:$0xff] %v13445_v19  ;;  %16379 = vst [vmem:[#allocation241_spill] sm:$0xff] %v13447_v26  ;;  %10408 = vmatprep.mubr.msk.bf16.mxu0 %vm11391_vm2, %v16147_v44  ;;  %10750 = vmatprep.mubr.msk.bf16.mxu1 %vm11391_vm2, %v16147_v44  ;;  %v11241_v34 = vld [vmem:[%s15846_s0 + $0x84c] sm:$0xff]  }
 0x30a   :  { %v9966_v2 = vpop.f32.mrf.mxu0  ;;  %v10308_v50 = vpop.f32.mrf.mxu1 }
 0x30c   :  { %v13457_v0 = vpop.f32.mrf.mxu0  ;;  %v13459_v7 = vpop.f32.mrf.mxu1 }
 0x30d   :  { %16380 = vst [vmem:[#allocation242_spill] sm:$0xff] %v13457_v0  ;;  %16381 = vst [vmem:[#allocation243_spill] sm:$0xff] %v13459_v7 }
 0x30e   :  { %v9967_v26 = vpop.f32.mrf.mxu0  ;;  %v10309_v19 = vpop.f32.mrf.mxu1 }
 0x310   :  { %v13469_v58 = vpop.f32.mrf.mxu0  ;;  %v13471_v2 = vpop.f32.mrf.mxu1  ;;  %10409 = vmatmul.mubr.msk.bf16.gmra.mxu0 %vm614_vm3, %v11240_v33  ;;  %10751 = vmatmul.mubr.msk.bf16.gmra.mxu1 %vm614_vm3, %v11241_v34  ;;  %v11242_v33 = vld [vmem:[%s15846_s0 + $0x5b0] sm:$0xff]  }
 0x311   :  { %16382 = vst [vmem:[#allocation244_spill] sm:$0xff] %v13469_v58  ;;  %16383 = vst [vmem:[#allocation245_spill] sm:$0xff] %v13471_v2  ;;  %10412 = vmatprep.mubr.msk.bf16.mxu0 %vm11391_vm2, %v16147_v44  ;;  %10754 = vmatprep.mubr.msk.bf16.mxu1 %vm11391_vm2, %v16147_v44  ;;  %v11243_v34 = vld [vmem:[%s15846_s0 + $0x854] sm:$0xff]  }
 0x312   :  { %v9970_v32 = vpop.f32.mrf.mxu0  ;;  %v10312_v26 = vpop.f32.mrf.mxu1 }
 0x314   :  { %v13481_v19 = vpop.f32.mrf.mxu0  ;;  %v13483_v7 = vpop.f32.mrf.mxu1 }
 0x315   :  { %16384 = vst [vmem:[#allocation246_spill] sm:$0xff] %v13481_v19  ;;  %16385 = vst [vmem:[#allocation247_spill] sm:$0xff] %v13483_v7 }
 0x316   :  { %v9971_v2 = vpop.f32.mrf.mxu0  ;;  %v10313_v58 = vpop.f32.mrf.mxu1 }
 0x318   :  { %v13493_v0 = vpop.f32.mrf.mxu0  ;;  %v13495_v32 = vpop.f32.mrf.mxu1  ;;  %10413 = vmatmul.mubr.msk.bf16.gmra.mxu0 %vm614_vm3, %v11242_v33  ;;  %10755 = vmatmul.mubr.msk.bf16.gmra.mxu1 %vm614_vm3, %v11243_v34  ;;  %v11244_v33 = vld [vmem:[%s15846_s0 + $0x5b8] sm:$0xff]  }
 0x319   :  { %16386 = vst [vmem:[#allocation248_spill] sm:$0xff] %v13493_v0  ;;  %16387 = vst [vmem:[#allocation249_spill] sm:$0xff] %v13495_v32  ;;  %10416 = vmatprep.mubr.msk.bf16.mxu0 %vm11391_vm2, %v16147_v44  ;;  %10758 = vmatprep.mubr.msk.bf16.mxu1 %vm11391_vm2, %v16147_v44  ;;  %v11245_v34 = vld [vmem:[%s15846_s0 + $0x85c] sm:$0xff]  }
 0x31a   :  { %v9974_v50 = vpop.f32.mrf.mxu0  ;;  %v10316_v2 = vpop.f32.mrf.mxu1 }
 0x31c   :  { %v13505_v58 = vpop.f32.mrf.mxu0  ;;  %v13507_v7 = vpop.f32.mrf.mxu1 }
 0x31d   :  { %16388 = vst [vmem:[#allocation250_spill] sm:$0xff] %v13505_v58  ;;  %16389 = vst [vmem:[#allocation251_spill] sm:$0xff] %v13507_v7 }
 0x31e   :  { %v9975_v32 = vpop.f32.mrf.mxu0  ;;  %v10317_v0 = vpop.f32.mrf.mxu1 }
 0x320   :  { %v13517_v19 = vpop.f32.mrf.mxu0  ;;  %v13519_v50 = vpop.f32.mrf.mxu1  ;;  %10417 = vmatmul.mubr.msk.bf16.gmra.mxu0 %vm614_vm3, %v11244_v33  ;;  %10759 = vmatmul.mubr.msk.bf16.gmra.mxu1 %vm614_vm3, %v11245_v34  ;;  %v11246_v33 = vld [vmem:[%s15846_s0 + $0x5c0] sm:$0xff]  }
 0x321   :  { %16390 = vst [vmem:[#allocation252_spill] sm:$0xff] %v13517_v19  ;;  %16391 = vst [vmem:[#allocation253_spill] sm:$0xff] %v13519_v50  ;;  %10420 = vmatprep.mubr.msk.bf16.mxu0 %vm11391_vm2, %v16147_v44  ;;  %10762 = vmatprep.mubr.msk.bf16.mxu1 %vm11391_vm2, %v16147_v44  ;;  %v11247_v34 = vld [vmem:[%s15846_s0 + $0x864] sm:$0xff]  }
 0x322   :  { %v9978_v26 = vpop.f32.mrf.mxu0  ;;  %v10320_v32 = vpop.f32.mrf.mxu1 }
 0x324   :  { %v13529_v0 = vpop.f32.mrf.mxu0  ;;  %v13531_v7 = vpop.f32.mrf.mxu1 }
 0x325   :  { %16392 = vst [vmem:[#allocation254_spill] sm:$0xff] %v13529_v0  ;;  %16393 = vst [vmem:[#allocation255_spill] sm:$0xff] %v13531_v7 }
 0x326   :  { %v9979_v50 = vpop.f32.mrf.mxu0  ;;  %v10321_v19 = vpop.f32.mrf.mxu1 }
 0x328   :  { %v13541_v58 = vpop.f32.mrf.mxu0  ;;  %v13543_v26 = vpop.f32.mrf.mxu1  ;;  %10421 = vmatmul.mubr.msk.bf16.gmra.mxu0 %vm614_vm3, %v11246_v33  ;;  %10763 = vmatmul.mubr.msk.bf16.gmra.mxu1 %vm614_vm3, %v11247_v34  ;;  %v11248_v33 = vld [vmem:[%s15846_s0 + $0x5c8] sm:$0xff]  }
 0x329   :  { %16394 = vst [vmem:[#allocation256_spill] sm:$0xff] %v13541_v58  ;;  %16395 = vst [vmem:[#allocation257_spill] sm:$0xff] %v13543_v26  ;;  %10424 = vmatprep.mubr.msk.bf16.mxu0 %vm11391_vm2, %v16147_v44  ;;  %10766 = vmatprep.mubr.msk.bf16.mxu1 %vm11391_vm2, %v16147_v44  ;;  %v11249_v34 = vld [vmem:[%s15846_s0 + $0x86c] sm:$0xff]  }
 0x32a   :  { %v9982_v2 = vpop.f32.mrf.mxu0  ;;  %v10324_v50 = vpop.f32.mrf.mxu1 }
 0x32c   :  { %v13553_v19 = vpop.f32.mrf.mxu0  ;;  %v13555_v7 = vpop.f32.mrf.mxu1 }
 0x32d   :  { %16396 = vst [vmem:[#allocation258_spill] sm:$0xff] %v13553_v19  ;;  %16397 = vst [vmem:[#allocation259_spill] sm:$0xff] %v13555_v7 }
 0x32e   :  { %v9983_v26 = vpop.f32.mrf.mxu0  ;;  %v10325_v58 = vpop.f32.mrf.mxu1 }
 0x330   :  { %v13565_v0 = vpop.f32.mrf.mxu0  ;;  %v13567_v2 = vpop.f32.mrf.mxu1  ;;  %10425 = vmatmul.mubr.msk.bf16.gmra.mxu0 %vm614_vm3, %v11248_v33  ;;  %10767 = vmatmul.mubr.msk.bf16.gmra.mxu1 %vm614_vm3, %v11249_v34  ;;  %v11250_v33 = vld [vmem:[%s15846_s0 + $0x5d0] sm:$0xff]  }
 0x331   :  { %16398 = vst [vmem:[#allocation260_spill] sm:$0xff] %v13565_v0  ;;  %16399 = vst [vmem:[#allocation261_spill] sm:$0xff] %v13567_v2  ;;  %10428 = vmatprep.mubr.msk.bf16.mxu0 %vm11391_vm2, %v16147_v44  ;;  %10770 = vmatprep.mubr.msk.bf16.mxu1 %vm11391_vm2, %v16147_v44  ;;  %v11251_v34 = vld [vmem:[%s15846_s0 + $0x874] sm:$0xff]  }
 0x332   :  { %v9986_v32 = vpop.f32.mrf.mxu0  ;;  %v10328_v26 = vpop.f32.mrf.mxu1 }
 0x334   :  { %v13577_v58 = vpop.f32.mrf.mxu0  ;;  %v13579_v7 = vpop.f32.mrf.mxu1 }
 0x335   :  { %16400 = vst [vmem:[#allocation262_spill] sm:$0xff] %v13577_v58  ;;  %16401 = vst [vmem:[#allocation263_spill] sm:$0xff] %v13579_v7 }
 0x336   :  { %v9987_v2 = vpop.f32.mrf.mxu0  ;;  %v10329_v0 = vpop.f32.mrf.mxu1 }
 0x338   :  { %v13589_v19 = vpop.f32.mrf.mxu0  ;;  %v13591_v32 = vpop.f32.mrf.mxu1  ;;  %10429 = vmatmul.mubr.msk.bf16.gmra.mxu0 %vm614_vm3, %v11250_v33  ;;  %10771 = vmatmul.mubr.msk.bf16.gmra.mxu1 %vm614_vm3, %v11251_v34  ;;  %v11252_v33 = vld [vmem:[%s15846_s0 + $0x5d8] sm:$0xff]  }
 0x339   :  { %16402 = vst [vmem:[#allocation264_spill] sm:$0xff] %v13589_v19  ;;  %16403 = vst [vmem:[#allocation265_spill] sm:$0xff] %v13591_v32  ;;  %10432 = vmatprep.mubr.msk.bf16.mxu0 %vm11391_vm2, %v16147_v44  ;;  %10774 = vmatprep.mubr.msk.bf16.mxu1 %vm11391_vm2, %v16147_v44  ;;  %v11253_v34 = vld [vmem:[%s15846_s0 + $0x87c] sm:$0xff]  }
 0x33a   :  { %v9990_v50 = vpop.f32.mrf.mxu0  ;;  %v10332_v2 = vpop.f32.mrf.mxu1 }
 0x33c   :  { %v13601_v0 = vpop.f32.mrf.mxu0  ;;  %v13603_v7 = vpop.f32.mrf.mxu1 }
 0x33d   :  { %16404 = vst [vmem:[#allocation266_spill] sm:$0xff] %v13601_v0  ;;  %16405 = vst [vmem:[#allocation267_spill] sm:$0xff] %v13603_v7 }
 0x33e   :  { %v9991_v32 = vpop.f32.mrf.mxu0  ;;  %v10333_v19 = vpop.f32.mrf.mxu1 }
 0x340   :  { %v13613_v58 = vpop.f32.mrf.mxu0  ;;  %v13615_v50 = vpop.f32.mrf.mxu1  ;;  %10433 = vmatmul.mubr.msk.bf16.gmra.mxu0 %vm614_vm3, %v11252_v33  ;;  %10775 = vmatmul.mubr.msk.bf16.gmra.mxu1 %vm614_vm3, %v11253_v34  ;;  %v11254_v33 = vld [vmem:[%s15846_s0 + $0x5e0] sm:$0xff]  }
 0x341   :  { %16406 = vst [vmem:[#allocation268_spill] sm:$0xff] %v13613_v58  ;;  %16407 = vst [vmem:[#allocation269_spill] sm:$0xff] %v13615_v50  ;;  %10436 = vmatprep.mubr.msk.bf16.mxu0 %vm11391_vm2, %v16147_v44  ;;  %10778 = vmatprep.mubr.msk.bf16.mxu1 %vm11391_vm2, %v16147_v44  ;;  %v11255_v34 = vld [vmem:[%s15846_s0 + $0x884] sm:$0xff]  }
 0x342   :  { %v9994_v26 = vpop.f32.mrf.mxu0  ;;  %v10336_v32 = vpop.f32.mrf.mxu1 }
 0x344   :  { %v13625_v19 = vpop.f32.mrf.mxu0  ;;  %v13627_v7 = vpop.f32.mrf.mxu1 }
 0x345   :  { %16408 = vst [vmem:[#allocation270_spill] sm:$0xff] %v13625_v19  ;;  %16409 = vst [vmem:[#allocation271_spill] sm:$0xff] %v13627_v7 }
 0x346   :  { %v9995_v50 = vpop.f32.mrf.mxu0  ;;  %v10337_v58 = vpop.f32.mrf.mxu1 }
 0x348   :  { %v13637_v0 = vpop.f32.mrf.mxu0  ;;  %v13639_v26 = vpop.f32.mrf.mxu1  ;;  %10437 = vmatmul.mubr.msk.bf16.gmra.mxu0 %vm614_vm3, %v11254_v33  ;;  %10779 = vmatmul.mubr.msk.bf16.gmra.mxu1 %vm614_vm3, %v11255_v34  ;;  %v11256_v33 = vld [vmem:[%s15846_s0 + $0x5e8] sm:$0xff]  }
 0x349   :  { %16410 = vst [vmem:[#allocation272_spill] sm:$0xff] %v13637_v0  ;;  %16411 = vst [vmem:[#allocation273_spill] sm:$0xff] %v13639_v26  ;;  %10440 = vmatprep.mubr.msk.bf16.mxu0 %vm11391_vm2, %v16147_v44  ;;  %10782 = vmatprep.mubr.msk.bf16.mxu1 %vm11391_vm2, %v16147_v44  ;;  %v11257_v34 = vld [vmem:[%s15846_s0 + $0x88c] sm:$0xff]  }
 0x34a   :  { %v9998_v2 = vpop.f32.mrf.mxu0  ;;  %v10340_v50 = vpop.f32.mrf.mxu1 }
 0x34c   :  { %v13649_v58 = vpop.f32.mrf.mxu0  ;;  %v13651_v7 = vpop.f32.mrf.mxu1 }
 0x34d   :  { %16412 = vst [vmem:[#allocation274_spill] sm:$0xff] %v13649_v58  ;;  %16413 = vst [vmem:[#allocation275_spill] sm:$0xff] %v13651_v7 }
 0x34e   :  { %v9999_v26 = vpop.f32.mrf.mxu0  ;;  %v10341_v0 = vpop.f32.mrf.mxu1 }
 0x350   :  { %v13661_v19 = vpop.f32.mrf.mxu0  ;;  %v13663_v2 = vpop.f32.mrf.mxu1  ;;  %10441 = vmatmul.mubr.msk.bf16.gmra.mxu0 %vm614_vm3, %v11256_v33  ;;  %10783 = vmatmul.mubr.msk.bf16.gmra.mxu1 %vm614_vm3, %v11257_v34  ;;  %v11258_v33 = vld [vmem:[%s15846_s0 + $0x5f0] sm:$0xff]  }
 0x351   :  { %16414 = vst [vmem:[#allocation276_spill] sm:$0xff] %v13661_v19  ;;  %16415 = vst [vmem:[#allocation277_spill] sm:$0xff] %v13663_v2  ;;  %10444 = vmatprep.mubr.msk.bf16.mxu0 %vm11391_vm2, %v16147_v44  ;;  %10786 = vmatprep.mubr.msk.bf16.mxu1 %vm11391_vm2, %v16147_v44  ;;  %v11259_v34 = vld [vmem:[%s15846_s0 + $0x894] sm:$0xff]  }
 0x352   :  { %v10002_v32 = vpop.f32.mrf.mxu0  ;;  %v10344_v26 = vpop.f32.mrf.mxu1 }
 0x354   :  { %v13673_v0 = vpop.f32.mrf.mxu0  ;;  %v13675_v7 = vpop.f32.mrf.mxu1 }
 0x355   :  { %16416 = vst [vmem:[#allocation278_spill] sm:$0xff] %v13673_v0  ;;  %16417 = vst [vmem:[#allocation279_spill] sm:$0xff] %v13675_v7 }
 0x356   :  { %v10003_v2 = vpop.f32.mrf.mxu0  ;;  %v10345_v19 = vpop.f32.mrf.mxu1 }
 0x358   :  { %v13685_v58 = vpop.f32.mrf.mxu0  ;;  %v13687_v32 = vpop.f32.mrf.mxu1  ;;  %10445 = vmatmul.mubr.msk.bf16.gmra.mxu0 %vm614_vm3, %v11258_v33  ;;  %10787 = vmatmul.mubr.msk.bf16.gmra.mxu1 %vm614_vm3, %v11259_v34  ;;  %v11260_v33 = vld [vmem:[%s15846_s0 + $0x5f8] sm:$0xff]  }
 0x359   :  { %16418 = vst [vmem:[#allocation280_spill] sm:$0xff] %v13685_v58  ;;  %16419 = vst [vmem:[#allocation281_spill] sm:$0xff] %v13687_v32  ;;  %10448 = vmatprep.mubr.msk.bf16.mxu0 %vm11391_vm2, %v16147_v44  ;;  %10790 = vmatprep.mubr.msk.bf16.mxu1 %vm11391_vm2, %v16147_v44  ;;  %v11261_v34 = vld [vmem:[%s15846_s0 + $0x89c] sm:$0xff]  }
 0x35a   :  { %v10006_v50 = vpop.f32.mrf.mxu0  ;;  %v10348_v2 = vpop.f32.mrf.mxu1 }
 0x35c   :  { %v13697_v19 = vpop.f32.mrf.mxu0  ;;  %v13699_v7 = vpop.f32.mrf.mxu1 }
 0x35d   :  { %16420 = vst [vmem:[#allocation282_spill] sm:$0xff] %v13697_v19  ;;  %16421 = vst [vmem:[#allocation283_spill] sm:$0xff] %v13699_v7 }
 0x35e   :  { %v10007_v32 = vpop.f32.mrf.mxu0  ;;  %v10349_v58 = vpop.f32.mrf.mxu1 }
 0x360   :  { %v13709_v0 = vpop.f32.mrf.mxu0  ;;  %v13711_v50 = vpop.f32.mrf.mxu1  ;;  %10449 = vmatmul.mubr.msk.bf16.gmra.mxu0 %vm614_vm3, %v11260_v33  ;;  %10791 = vmatmul.mubr.msk.bf16.gmra.mxu1 %vm614_vm3, %v11261_v34  ;;  %v11262_v33 = vld [vmem:[%s15846_s0 + $0x600] sm:$0xff]  }
 0x361   :  { %16422 = vst [vmem:[#allocation284_spill] sm:$0xff] %v13709_v0  ;;  %16423 = vst [vmem:[#allocation285_spill] sm:$0xff] %v13711_v50  ;;  %10452 = vmatprep.mubr.msk.bf16.mxu0 %vm11391_vm2, %v16147_v44  ;;  %10794 = vmatprep.mubr.msk.bf16.mxu1 %vm11391_vm2, %v16147_v44  ;;  %v11263_v34 = vld [vmem:[%s15846_s0 + $0x8a4] sm:$0xff]  }
 0x362   :  { %v10010_v26 = vpop.f32.mrf.mxu0  ;;  %v10352_v32 = vpop.f32.mrf.mxu1 }
 0x364   :  { %v13721_v58 = vpop.f32.mrf.mxu0  ;;  %v13723_v7 = vpop.f32.mrf.mxu1 }
 0x365   :  { %16424 = vst [vmem:[#allocation286_spill] sm:$0xff] %v13721_v58  ;;  %16425 = vst [vmem:[#allocation287_spill] sm:$0xff] %v13723_v7  ;;  %v11264_v58 = vld [vmem:[%s15846_s0 + $0x608] sm:$0xff]  }
 0x366   :  { %v10011_v50 = vpop.f32.mrf.mxu0  ;;  %v10353_v0 = vpop.f32.mrf.mxu1 }
 0x368   :  { %v13733_v19 = vpop.f32.mrf.mxu0  ;;  %v13735_v26 = vpop.f32.mrf.mxu1  ;;  %10453 = vmatmul.mubr.msk.bf16.gmra.mxu0 %vm614_vm3, %v11262_v33  ;;  %10795 = vmatmul.mubr.msk.bf16.gmra.mxu1 %vm614_vm3, %v11263_v34  ;;  %v11265_v33 = vld [vmem:[%s15846_s0 + $0x8ac] sm:$0xff]  }
 0x369   :  { %16426 = vst [vmem:[#allocation288_spill] sm:$0xff] %v13733_v19  ;;  %16427 = vst [vmem:[#allocation289_spill] sm:$0xff] %v13735_v26  ;;  %10456 = vmatprep.mubr.msk.bf16.mxu0 %vm11391_vm2, %v16147_v44  ;;  %10798 = vmatprep.mubr.msk.bf16.mxu1 %vm11391_vm2, %v16147_v44 }
 0x36a   :  { %v10014_v2 = vpop.f32.mrf.mxu0  ;;  %v10356_v50 = vpop.f32.mrf.mxu1 }
 0x36b   :  { %v16428_v2 = vmax.f32 %v11717_v56, %v11720_v57  ;;  %v11266_v56 = vld [vmem:[%s15846_s0 + $0x610] sm:$0xff]  }
 0x36c   :  { %v1586_v0 = vpop.f32.mrf.mxu0  ;;  %v3146_v7 = vpop.f32.mrf.mxu1  ;;  %v11267_v57 = vld [vmem:[%s15846_s0 + $0x8b4] sm:$0xff]  }
 0x36e   :  { %v10015_v34 = vpop.f32.mrf.mxu0  ;;  %v10357_v32 = vpop.f32.mrf.mxu1 }
 0x36f   :  { %v13763_v32 = vld [vmem:[%s15847_s2] ss:$0 sm:$0xff] }
 0x370   :  { %v4200_v26 = vpop.f32.mrf.mxu0  ;;  %10457 = vmatmul.mubr.msk.bf16.gmra.mxu0 %vm614_vm3, %v11264_v58  ;;  %v5929_v19 = vpop.f32.mrf.mxu1  ;;  %10799 = vmatmul.mubr.msk.bf16.gmra.mxu1 %vm614_vm3, %v11265_v33 }
 0x371   :  { %v4878_v7 = vmax.f32 %v16428_v2, %v4200_v26  ;;  %10460 = vmatprep.mubr.msk.bf16.mxu0 %vm11391_vm2, %v16147_v44  ;;  %10802 = vmatprep.mubr.msk.bf16.mxu1 %vm11391_vm2, %v16147_v44  ;;  %v16429_v2 = vmax.f32 %v11735_v63, %v11737_v1  ;;  %v16430_v63 = vmax.f32 %v11741_v5, %v11744_v6  ;;  %v11269_v5 = vld [vmem:[%s15846_s0 + $0x8bc] sm:$0xff]  }
 0x372   :  { %v10362_v50 = vpop.f32.mrf.mxu0  ;;  %v10704_v58 = vpop.f32.mrf.mxu1 }
 0x373   :  { %v6607_v0 = vmax.f32 %v4878_v7, %v5929_v19 }
 0x374   :  { %v4203_v34 = vpop.f32.mrf.mxu0  ;;  %v5932_v33 = vpop.f32.mrf.mxu1 }
 0x375   :  { %v6783_v26 = vadd.f32 %v13763_v32, %v6607_v0  ;;  %v4879_v14 = vmax.f32 %v16429_v2, %v4203_v34  ;;  %v11268_v2 = vld [vmem:[%s15846_s0 + $0x618] sm:$0xff]  }
 0x376   :  { %v10363_v50 = vpop.f32.mrf.mxu0  ;;  %v10705_v58 = vpop.f32.mrf.mxu1 }
 0x377   :  { %v9161_v19 = vpack.c.bf16 %v6783_v26, %v6783_v26  ;;  %v6608_v7 = vmax.f32 %v4879_v14, %v5932_v33 }
 0x378   :  { %v4208_v31 = vpop.f32.mrf.mxu0  ;;  %10461 = vmatmul.mubr.msk.bf16.gmra.mxu0 %vm614_vm3, %v11266_v56  ;;  %v5937_v43 = vpop.f32.mrf.mxu1  ;;  %10803 = vmatmul.mubr.msk.bf16.gmra.mxu1 %vm614_vm3, %v11267_v57 }
 0x379   :  { %7630 = vst.msk [vmem:[%s15848_s3] sm:$0xf] %vm7629_vm4, %v9161_v19  ;;  %v6784_v0 = vadd.f32 %v13763_v32, %v6608_v7  ;;  %v4880_v1 = vmax.f32 %v16430_v63, %v4208_v31  ;;  %10464 = vmatprep.mubr.msk.bf16.mxu0 %vm11391_vm2, %v16147_v44  ;;  %10806 = vmatprep.mubr.msk.bf16.mxu1 %vm11391_vm2, %v16147_v44 }
 0x37a   :  { %v10366_v14 = vpop.f32.mrf.mxu0  ;;  %v10708_v34 = vpop.f32.mrf.mxu1  ;;  %v16431_v31 = vmax.f32 %v11759_v12, %v11761_v13  ;;  %v16432_v12 = vmax.f32 %v11765_v17, %v11768_v18  ;;  %v11271_v17 = vld [vmem:[%s15846_s0 + $0x8c4] sm:$0xff]  }
 0x37b   :  { %v9162_v33 = vpack.c.bf16 %v6784_v0, %v6784_v0  ;;  %v6609_v56 = vmax.f32 %v4880_v1, %v5937_v43 }
 0x37c   :  { %v4211_v57 = vpop.f32.mrf.mxu0  ;;  %v5940_v26 = vpop.f32.mrf.mxu1 }
 0x37d   :  { %7631 = vst.msk [vmem:[%s15848_s3 + $0x4] sm:$0xf] %vm7629_vm4, %v9162_v33  ;;  %v6785_v6 = vadd.f32 %v13763_v32, %v6609_v56  ;;  %v4881_v43 = vmax.f32 %v16431_v31, %v4211_v57 }
 0x37e   :  { %v10367_v50 = vpop.f32.mrf.mxu0  ;;  %v10709_v58 = vpop.f32.mrf.mxu1 }
 0x37f   :  { %v9163_v19 = vpack.c.bf16 %v6785_v6, %v6785_v6  ;;  %v6610_v7 = vmax.f32 %v4881_v43, %v5940_v26 }
 0x380   :  { %v4216_v0 = vpop.f32.mrf.mxu0  ;;  %10465 = vmatmul.mubr.msk.bf16.gmra.mxu0 %vm614_vm3, %v11268_v2  ;;  %v5945_v63 = vpop.f32.mrf.mxu1  ;;  %10807 = vmatmul.mubr.msk.bf16.gmra.mxu1 %vm614_vm3, %v11269_v5  ;;  %v11270_v2 = vld [vmem:[%s15846_s0 + $0x620] sm:$0xff]   ;;  %v16433_v5 = vmax.f32 %v11783_v24, %v11785_v25  ;;  %v16434_v24 = vmax.f32 %v11789_v29, %v11792_v30  ;;  %v11273_v29 = vld [vmem:[%s15846_s0 + $0x8cc] sm:$0xff]  }
 0x381   :  { %7632 = vst.msk [vmem:[%s15848_s3 + $0x8] sm:$0xf] %vm7629_vm4, %v9163_v19  ;;  %v6786_v1 = vadd.f32 %v13763_v32, %v6610_v7  ;;  %v4882_v13 = vmax.f32 %v16432_v12, %v4216_v0  ;;  %10468 = vmatprep.mubr.msk.bf16.mxu0 %vm11391_vm2, %v16147_v44  ;;  %10810 = vmatprep.mubr.msk.bf16.mxu1 %vm11391_vm2, %v16147_v44 }
 0x382   :  { %v10370_v14 = vpop.f32.mrf.mxu0  ;;  %v10712_v34 = vpop.f32.mrf.mxu1 }
 0x383   :  { %v9164_v33 = vpack.c.bf16 %v6786_v1, %v6786_v1  ;;  %v6611_v56 = vmax.f32 %v4882_v13, %v5945_v63 }
 0x384   :  { %v4219_v57 = vpop.f32.mrf.mxu0  ;;  %v5948_v26 = vpop.f32.mrf.mxu1 }
 0x385   :  { %7633 = vst.msk [vmem:[%s15848_s3 + $0xc] sm:$0xf] %vm7629_vm4, %v9164_v33  ;;  %v6787_v18 = vadd.f32 %v13763_v32, %v6611_v56  ;;  %v4883_v6 = vmax.f32 %v16433_v5, %v4219_v57  ;;  %v11272_v33 = vld [vmem:[%s15846_s0 + $0x628] sm:$0xff]   ;;  %v16435_v56 = vmax.f32 %v11807_v36, %v11809_v37  ;;  %v16436_v36 = vmax.f32 %v11813_v41, %v11816_v42  ;;  %v11275_v41 = vld [vmem:[%s15846_s0 + $0x8d4] sm:$0xff]  }
 0x386   :  { %v10371_v31 = vpop.f32.mrf.mxu0  ;;  %v10713_v43 = vpop.f32.mrf.mxu1 }
 0x387   :  { %v9165_v50 = vpack.c.bf16 %v6787_v18, %v6787_v18  ;;  %v6612_v58 = vmax.f32 %v4883_v6, %v5948_v26 }
 0x388   :  { %v4224_v19 = vpop.f32.mrf.mxu0  ;;  %10469 = vmatmul.mubr.msk.bf16.gmra.mxu0 %vm614_vm3, %v11270_v2  ;;  %v5953_v7 = vpop.f32.mrf.mxu1  ;;  %10811 = vmatmul.mubr.msk.bf16.gmra.mxu1 %vm614_vm3, %v11271_v17 }
 0x389   :  { %7634 = vst.msk [vmem:[%s15848_s3 + $0x10] sm:$0xf] %vm7629_vm4, %v9165_v50  ;;  %v6788_v0 = vadd.f32 %v13763_v32, %v6612_v58  ;;  %v4884_v25 = vmax.f32 %v16434_v24, %v4224_v19  ;;  %10472 = vmatprep.mubr.msk.bf16.mxu0 %vm11391_vm2, %v16147_v44  ;;  %10814 = vmatprep.mubr.msk.bf16.mxu1 %vm11391_vm2, %v16147_v44  ;;  %v11274_v24 = vld [vmem:[%s15846_s0 + $0x630] sm:$0xff]  }
 0x38a   :  { %v10374_v63 = vpop.f32.mrf.mxu0  ;;  %v10716_v1 = vpop.f32.mrf.mxu1 }
 0x38b   :  { %v9166_v12 = vpack.c.bf16 %v6788_v0, %v6788_v0  ;;  %v6613_v13 = vmax.f32 %v4884_v25, %v5953_v7  ;;  %v16437_v25 = vmax.f32 %v11831_v48, %v11833_v49  ;;  %v16438_v48 = vmax.f32 %v11837_v53, %v11840_v54  ;;  %v11277_v53 = vld [vmem:[%s15846_s0 + $0x8dc] sm:$0xff]  }
 0x38c   :  { %v4227_v14 = vpop.f32.mrf.mxu0  ;;  %v5956_v34 = vpop.f32.mrf.mxu1 }
 0x38d   :  { %7635 = vst.msk [vmem:[%s15848_s3 + $0x14] sm:$0xf] %vm7629_vm4, %v9166_v12  ;;  %v6789_v30 = vadd.f32 %v13763_v32, %v6613_v13  ;;  %v4885_v57 = vmax.f32 %v16435_v56, %v4227_v14 }
 0x38e   :  { %v10375_v26 = vpop.f32.mrf.mxu0  ;;  %v10717_v2 = vpop.f32.mrf.mxu1 }
 0x38f   :  { %v9167_v17 = vpack.c.bf16 %v6789_v30, %v6789_v30  ;;  %v6614_v18 = vmax.f32 %v4885_v57, %v5956_v34 }
 0x390   :  { %v4232_v5 = vpop.f32.mrf.mxu0  ;;  %10473 = vmatmul.mubr.msk.bf16.gmra.mxu0 %vm614_vm3, %v11272_v33  ;;  %v5961_v6 = vpop.f32.mrf.mxu1  ;;  %10815 = vmatmul.mubr.msk.bf16.gmra.mxu1 %vm614_vm3, %v11273_v29 }
 0x391   :  { %7636 = vst.msk [vmem:[%s15848_s3 + $0x18] sm:$0xf] %vm7629_vm4, %v9167_v17  ;;  %v6790_v31 = vadd.f32 %v13763_v32, %v6614_v18  ;;  %v4886_v37 = vmax.f32 %v16436_v36, %v4232_v5  ;;  %10476 = vmatprep.mubr.msk.bf16.mxu0 %vm11391_vm2, %v16147_v44  ;;  %10818 = vmatprep.mubr.msk.bf16.mxu1 %vm11391_vm2, %v16147_v44  ;;  %v11276_v18 = vld [vmem:[%s15846_s0 + $0x638] sm:$0xff]  }
 0x392   :  { %v10378_v43 = vpop.f32.mrf.mxu0  ;;  %v10720_v50 = vpop.f32.mrf.mxu1  ;;  %v16439_v5 = vmax.f32 %v11855_v3, %v11857_v4  ;;  %v16440_v3 = vmax.f32 %v11861_v11, %v11864_v15  ;;  %v11279_v11 = vld [vmem:[%s15846_s0 + $0x8e4] sm:$0xff]  }
 0x393   :  { %v9168_v58 = vpack.c.bf16 %v6790_v31, %v6790_v31  ;;  %v6615_v19 = vmax.f32 %v4886_v37, %v5961_v6 }
 0x394   :  { %v4235_v7 = vpop.f32.mrf.mxu0  ;;  %v5964_v0 = vpop.f32.mrf.mxu1 }
 0x395   :  { %7637 = vst.msk [vmem:[%s15848_s3 + $0x1c] sm:$0xf] %vm7629_vm4, %v9168_v58  ;;  %v6791_v42 = vadd.f32 %v13763_v32, %v6615_v19  ;;  %v4887_v63 = vmax.f32 %v16437_v25, %v4235_v7 }
 0x396   :  { %v10379_v1 = vpop.f32.mrf.mxu0  ;;  %v10721_v12 = vpop.f32.mrf.mxu1 }
 0x397   :  { %v9169_v13 = vpack.c.bf16 %v6791_v42, %v6791_v42  ;;  %v6616_v14 = vmax.f32 %v4887_v63, %v5964_v0  ;;  %v11278_v63 = vld [vmem:[%s15846_s0 + $0x640] sm:$0xff]   ;;  %v16441_v1 = vmax.f32 %v11879_v27, %v11881_v28  ;;  %v16442_v27 = vmax.f32 %v11885_v35, %v11888_v39  ;;  %v11281_v35 = vld [vmem:[%s15846_s0 + $0x8ec] sm:$0xff]  }
 0x398   :  { %v4240_v34 = vpop.f32.mrf.mxu0  ;;  %10477 = vmatmul.mubr.msk.bf16.gmra.mxu0 %vm614_vm3, %v11274_v24  ;;  %v5969_v33 = vpop.f32.mrf.mxu1  ;;  %10819 = vmatmul.mubr.msk.bf16.gmra.mxu1 %vm614_vm3, %v11275_v41 }
 0x399   :  { %7638 = vst.msk [vmem:[%s15848_s3 + $0x20] sm:$0xf] %vm7629_vm4, %v9169_v13  ;;  %v6792_v29 = vadd.f32 %v13763_v32, %v6616_v14  ;;  %v4888_v49 = vmax.f32 %v16438_v48, %v4240_v34  ;;  %10480 = vmatprep.mubr.msk.bf16.mxu0 %vm11391_vm2, %v16147_v44  ;;  %10822 = vmatprep.mubr.msk.bf16.mxu1 %vm11391_vm2, %v16147_v44 }
 0x39a   :  { %v10382_v30 = vpop.f32.mrf.mxu0  ;;  %v10724_v56 = vpop.f32.mrf.mxu1 }
 0x39b   :  { %v9170_v57 = vpack.c.bf16 %v6792_v29, %v6792_v29  ;;  %v6617_v26 = vmax.f32 %v4888_v49, %v5969_v33 }
 0x39c   :  { %v4243_v2 = vpop.f32.mrf.mxu0  ;;  %v5972_v17 = vpop.f32.mrf.mxu1 }
 0x39d   :  { %7639 = vst.msk [vmem:[%s15848_s3 + $0x24] sm:$0xf] %vm7629_vm4, %v9170_v57  ;;  %v6793_v54 = vadd.f32 %v13763_v32, %v6617_v26  ;;  %v4889_v6 = vmax.f32 %v16439_v5, %v4243_v2 }
 0x39e   :  { %v10383_v31 = vpop.f32.mrf.mxu0  ;;  %v10725_v36 = vpop.f32.mrf.mxu1 }
 0x39f   :  { %v9171_v37 = vpack.c.bf16 %v6793_v54, %v6793_v54  ;;  %v6618_v43 = vmax.f32 %v4889_v6, %v5972_v17 }
 0x3a0   :  { %v4248_v50 = vpop.f32.mrf.mxu0  ;;  %10481 = vmatmul.mubr.msk.bf16.gmra.mxu0 %vm614_vm3, %v11276_v18  ;;  %v5977_v58 = vpop.f32.mrf.mxu1  ;;  %10823 = vmatmul.mubr.msk.bf16.gmra.mxu1 %vm614_vm3, %v11277_v53  ;;  %v11280_v18 = vld [vmem:[%s15846_s0 + $0x648] sm:$0xff]   ;;  %v16443_v53 = vmax.f32 %v11897_v46, %v11899_v47  ;;  %v16444_v46 = vmax.f32 %v11909_v62, %v11912_v9  ;;  %v11283_v62 = vld [vmem:[%s15846_s0 + $0x8f4] sm:$0xff]  }
 0x3a1   :  { %7640 = vst.msk [vmem:[%s15848_s3 + $0x28] sm:$0xf] %vm7629_vm4, %v9171_v37  ;;  %v6794_v19 = vadd.f32 %v13763_v32, %v6618_v43  ;;  %v4890_v4 = vmax.f32 %v16440_v3, %v4248_v50  ;;  %10484 = vmatprep.mubr.msk.bf16.mxu0 %vm11391_vm2, %v16147_v44  ;;  %10826 = vmatprep.mubr.msk.bf16.mxu1 %vm11391_vm2, %v16147_v44 }
 0x3a2   :  { %v10386_v7 = vpop.f32.mrf.mxu0  ;;  %v10728_v0 = vpop.f32.mrf.mxu1 }
 0x3a3   :  { %v9172_v24 = vpack.c.bf16 %v6794_v19, %v6794_v19  ;;  %v6619_v41 = vmax.f32 %v4890_v4, %v5977_v58 }
 0x3a4   :  { %v4251_v42 = vpop.f32.mrf.mxu0  ;;  %v5980_v25 = vpop.f32.mrf.mxu1 }
 0x3a5   :  { %7641 = vst.msk [vmem:[%s15848_s3 + $0x2c] sm:$0xf] %vm7629_vm4, %v9172_v24  ;;  %v6795_v15 = vadd.f32 %v13763_v32, %v6619_v41  ;;  %v4891_v12 = vmax.f32 %v16441_v1, %v4251_v42  ;;  %v11282_v24 = vld [vmem:[%s15846_s0 + $0x650] sm:$0xff]   ;;  %v16445_v41 = vmax.f32 %v11921_v22, %v11923_v23  ;;  %v16446_v22 = vmax.f32 %v11933_v52, %v11936_v60  ;;  %v11285_v52 = vld [vmem:[%s15846_s0 + $0x8fc] sm:$0xff]  }
 0x3a6   :  { %v10387_v13 = vpop.f32.mrf.mxu0  ;;  %v10729_v14 = vpop.f32.mrf.mxu1 }
 0x3a7   :  { %v9173_v34 = vpack.c.bf16 %v6795_v15, %v6795_v15  ;;  %v6620_v33 = vmax.f32 %v4891_v12, %v5980_v25 }
 0x3a8   :  { %v4256_v29 = vpop.f32.mrf.mxu0  ;;  %10485 = vmatmul.mubr.msk.bf16.gmra.mxu0 %vm614_vm3, %v11278_v63  ;;  %v5985_v48 = vpop.f32.mrf.mxu1  ;;  %10827 = vmatmul.mubr.msk.bf16.gmra.mxu1 %vm614_vm3, %v11279_v11 }
 0x3a9   :  { %7642 = vst.msk [vmem:[%s15848_s3 + $0x30] sm:$0xf] %vm7629_vm4, %v9173_v34  ;;  %v6796_v49 = vadd.f32 %v13763_v32, %v6620_v33  ;;  %v4892_v28 = vmax.f32 %v16442_v27, %v4256_v29  ;;  %10488 = vmatprep.mubr.msk.bf16.mxu0 %vm11391_vm2, %v16147_v44  ;;  %10830 = vmatprep.mubr.msk.bf16.mxu1 %vm11391_vm2, %v16147_v44  ;;  %v11284_v27 = vld [vmem:[%s15846_s0 + $0x658] sm:$0xff]  }
 0x3aa   :  { %v10390_v30 = vpop.f32.mrf.mxu0  ;;  %v10732_v56 = vpop.f32.mrf.mxu1 }
 0x3ab   :  { %v9174_v57 = vpack.c.bf16 %v6796_v49, %v6796_v49  ;;  %v6621_v26 = vmax.f32 %v4892_v28, %v5985_v48  ;;  %v16447_v28 = vmax.f32 %v11945_v45, %v11947_v51  ;;  %v16448_v45 = vmax.f32 %v11957_v59, %v11960_v20  ;;  %v11287_v59 = vld [vmem:[%s15846_s0 + $0x904] sm:$0xff]  }
 0x3ac   :  { %v4259_v2 = vpop.f32.mrf.mxu0  ;;  %v5988_v17 = vpop.f32.mrf.mxu1 }
 0x3ad   :  { %7643 = vst.msk [vmem:[%s15848_s3 + $0x34] sm:$0xf] %vm7629_vm4, %v9174_v57  ;;  %v6797_v39 = vadd.f32 %v13763_v32, %v6621_v26  ;;  %v4893_v54 = vmax.f32 %v16443_v53, %v4259_v2 }
 0x3ae   :  { %v10391_v5 = vpop.f32.mrf.mxu0  ;;  %v10733_v6 = vpop.f32.mrf.mxu1 }
 0x3af   :  { %v9175_v31 = vpack.c.bf16 %v6797_v39, %v6797_v39  ;;  %v6622_v36 = vmax.f32 %v4893_v54, %v5988_v17 }
 0x3b0   :  { %v4264_v37 = vpop.f32.mrf.mxu0  ;;  %10489 = vmatmul.mubr.msk.bf16.gmra.mxu0 %vm614_vm3, %v11280_v18  ;;  %v5993_v43 = vpop.f32.mrf.mxu1  ;;  %10831 = vmatmul.mubr.msk.bf16.gmra.mxu1 %vm614_vm3, %v11281_v35 }
 0x3b1   :  { %7644 = vst.msk [vmem:[%s15848_s3 + $0x38] sm:$0xf] %vm7629_vm4, %v9175_v31  ;;  %v6798_v50 = vadd.f32 %v13763_v32, %v6622_v36  ;;  %v4894_v47 = vmax.f32 %v16444_v46, %v4264_v37  ;;  %10492 = vmatprep.mubr.msk.bf16.mxu0 %vm11391_vm2, %v16147_v44  ;;  %10834 = vmatprep.mubr.msk.bf16.mxu1 %vm11391_vm2, %v16147_v44  ;;  %v11286_v36 = vld [vmem:[%s15846_s0 + $0x660] sm:$0xff]  }
 0x3b2   :  { %v10394_v58 = vpop.f32.mrf.mxu0  ;;  %v10736_v19 = vpop.f32.mrf.mxu1  ;;  %v16449_v37 = vmax.f32 %v11969_v10, %v11971_v40  ;;  %v16450_v40 = vmax.f32 %v11981_v8, %v11984_v61  ;;  %v11289_v8 = vld [vmem:[%s15846_s0 + $0x90c] sm:$0xff]  }
 0x3b3   :  { %v9176_v3 = vpack.c.bf16 %v6798_v50, %v6798_v50  ;;  %v6623_v4 = vmax.f32 %v4894_v47, %v5993_v43 }
 0x3b4   :  { %v4267_v7 = vpop.f32.mrf.mxu0  ;;  %v5996_v0 = vpop.f32.mrf.mxu1 }
 0x3b5   :  { %7645 = vst.msk [vmem:[%s15848_s3 + $0x3c] sm:$0xf] %vm7629_vm4, %v9176_v3  ;;  %v6799_v9 = vadd.f32 %v13763_v32, %v6623_v4  ;;  %v4895_v42 = vmax.f32 %v16445_v41, %v4267_v7 }
 0x3b6   :  { %v10395_v25 = vpop.f32.mrf.mxu0  ;;  %v10737_v63 = vpop.f32.mrf.mxu1 }
 0x3b7   :  { %v9177_v11 = vpack.c.bf16 %v6799_v9, %v6799_v9  ;;  %v6624_v15 = vmax.f32 %v4895_v42, %v5996_v0  ;;  %v11288_v42 = vld [vmem:[%s15846_s0 + $0x668] sm:$0xff]   ;;  %v16451_v25 = vmax.f32 %v11993_v16, %v11995_v55  ;;  %v16452_v55 = vmax.f32 %v12005_v38, %v12008_v21  ;;  %v11291_v38 = vld [vmem:[%s15846_s0 + $0x914] sm:$0xff]  }
 0x3b8   :  { %v4272_v1 = vpop.f32.mrf.mxu0  ;;  %10493 = vmatmul.mubr.msk.bf16.gmra.mxu0 %vm614_vm3, %v11282_v24  ;;  %v6001_v12 = vpop.f32.mrf.mxu1  ;;  %10835 = vmatmul.mubr.msk.bf16.gmra.mxu1 %vm614_vm3, %v11283_v62 }
 0x3b9   :  { %7646 = vst.msk [vmem:[%s15848_s3 + $0x40] sm:$0xf] %vm7629_vm4, %v9177_v11  ;;  %v6800_v13 = vadd.f32 %v13763_v32, %v6624_v15  ;;  %v4896_v23 = vmax.f32 %v16446_v22, %v4272_v1  ;;  %10496 = vmatprep.mubr.msk.bf16.mxu0 %vm11391_vm2, %v16147_v44  ;;  %10838 = vmatprep.mubr.msk.bf16.mxu1 %vm11391_vm2, %v16147_v44 }
 0x3ba   :  { %v10398_v14 = vpop.f32.mrf.mxu0  ;;  %v10740_v34 = vpop.f32.mrf.mxu1 }
 0x3bb   :  { %v9178_v33 = vpack.c.bf16 %v6800_v13, %v6800_v13  ;;  %v6625_v29 = vmax.f32 %v4896_v23, %v6001_v12 }
 0x3bc   :  { %v4275_v48 = vpop.f32.mrf.mxu0  ;;  %v6004_v49 = vpop.f32.mrf.mxu1 }
 0x3bd   :  { %7647 = vst.msk [vmem:[%s15848_s3 + $0x44] sm:$0xf] %vm7629_vm4, %v9178_v33  ;;  %v6801_v60 = vadd.f32 %v13763_v32, %v6625_v29  ;;  %v4897_v30 = vmax.f32 %v16447_v28, %v4275_v48 }
 0x3be   :  { %v10399_v56 = vpop.f32.mrf.mxu0  ;;  %v10741_v57 = vpop.f32.mrf.mxu1 }
 0x3bf   :  { %v9179_v26 = vpack.c.bf16 %v6801_v60, %v6801_v60  ;;  %v6626_v2 = vmax.f32 %v4897_v30, %v6004_v49  ;;  %v16454_v60 = vld [vmem:[#allocation3_spill] sm:$0xff] }
 0x3c0   :  { %v4280_v17 = vpop.f32.mrf.mxu0  ;;  %10497 = vmatmul.mubr.msk.bf16.gmra.mxu0 %vm614_vm3, %v11284_v27  ;;  %v6009_v18 = vpop.f32.mrf.mxu1  ;;  %10839 = vmatmul.mubr.msk.bf16.gmra.mxu1 %vm614_vm3, %v11285_v52  ;;  %v11290_v27 = vld [vmem:[%s15846_s0 + $0x670] sm:$0xff]   ;;  %v16453_v52 = vld [vmem:[#allocation2_spill] sm:$0xff] }
 0x3c1   :  { %7648 = vst.msk [vmem:[%s15848_s3 + $0x48] sm:$0xf] %vm7629_vm4, %v9179_v26  ;;  %v6802_v35 = vadd.f32 %v13763_v32, %v6626_v2  ;;  %v4898_v51 = vmax.f32 %v16448_v45, %v4280_v17  ;;  %10500 = vmatprep.mubr.msk.bf16.mxu0 %vm11391_vm2, %v16147_v44  ;;  %10842 = vmatprep.mubr.msk.bf16.mxu1 %vm11391_vm2, %v16147_v44  ;;  %v16456_v45 = vld [vmem:[#allocation4_spill] sm:$0xff] }
 0x3c2   :  { %v10402_v39 = vpop.f32.mrf.mxu0  ;;  %v10744_v53 = vpop.f32.mrf.mxu1  ;;  %v16455_v28 = vmax.f32 %v16453_v52, %v16454_v60 }
 0x3c3   :  { %v9180_v54 = vpack.c.bf16 %v6802_v35, %v6802_v35  ;;  %v6627_v5 = vmax.f32 %v4898_v51, %v6009_v18  ;;  %v16457_v51 = vld [vmem:[#allocation5_spill] sm:$0xff] }
 0x3c4   :  { %v4283_v6 = vpop.f32.mrf.mxu0  ;;  %v6012_v31 = vpop.f32.mrf.mxu1  ;;  %v16458_v39 = vmax.f32 %v16456_v45, %v16457_v51  ;;  %v16472_v45 = vld [vmem:[#allocation15_spill] sm:$0xff] }
 0x3c5   :  { %7649 = vst.msk [vmem:[%s15848_s3 + $0x4c] sm:$0xf] %vm7629_vm4, %v9180_v54  ;;  %v6803_v20 = vadd.f32 %v13763_v32, %v6627_v5  ;;  %v4899_v43 = vmax.f32 %v16449_v37, %v4283_v6  ;;  %v11293_v37 = vld [vmem:[%s15846_s0 + $0x91c] sm:$0xff]  }
 0x3c6   :  { %v10403_v50 = vpop.f32.mrf.mxu0  ;;  %v10745_v46 = vpop.f32.mrf.mxu1 }
 0x3c7   :  { %v9181_v47 = vpack.c.bf16 %v6803_v20, %v6803_v20  ;;  %v6628_v58 = vmax.f32 %v4899_v43, %v6012_v31  ;;  %v11292_v20 = vld [vmem:[%s15846_s0 + $0x678] sm:$0xff]   ;;  %v16459_v50 = vld [vmem:[#allocation6_spill] sm:$0xff]  ;;  %v16460_v46 = vld [vmem:[#allocation7_spill] sm:$0xff] }
 0x3c8   :  { %v4288_v19 = vpop.f32.mrf.mxu0  ;;  %10501 = vmatmul.mubr.msk.bf16.gmra.mxu0 %vm614_vm3, %v11286_v36  ;;  %v6017_v3 = vpop.f32.mrf.mxu1  ;;  %10843 = vmatmul.mubr.msk.bf16.gmra.mxu1 %vm614_vm3, %v11287_v59 }
 0x3c9   :  { %7650 = vst.msk [vmem:[%s15848_s3 + $0x50] sm:$0xf] %vm7629_vm4, %v9181_v47  ;;  %v6804_v4 = vadd.f32 %v13763_v32, %v6628_v58  ;;  %v4900_v10 = vmax.f32 %v16450_v40, %v4288_v19  ;;  %10504 = vmatprep.mubr.msk.bf16.mxu0 %vm11391_vm2, %v16147_v44  ;;  %10846 = vmatprep.mubr.msk.bf16.mxu1 %vm11391_vm2, %v16147_v44 }
 0x3ca   :  { %v10406_v7 = vpop.f32.mrf.mxu0  ;;  %v10748_v0 = vpop.f32.mrf.mxu1  ;;  %v16461_v47 = vmax.f32 %v16459_v50, %v16460_v46 }
 0x3cb   :  { %v9182_v24 = vpack.c.bf16 %v6804_v4, %v6804_v4  ;;  %v6629_v62 = vmax.f32 %v4900_v10, %v6017_v3 }
 0x3cc   :  { %v4291_v9 = vpop.f32.mrf.mxu0  ;;  %v6020_v41 = vpop.f32.mrf.mxu1 }
 0x3cd   :  { %7651 = vst.msk [vmem:[%s15848_s3 + $0x54] sm:$0xf] %vm7629_vm4, %v9182_v24  ;;  %v6805_v61 = vadd.f32 %v13763_v32, %v6629_v62  ;;  %v4901_v63 = vmax.f32 %v16451_v25, %v4291_v9  ;;  %v16462_v24 = vld [vmem:[#allocation8_spill] sm:$0xff]  ;;  %v16463_v62 = vld [vmem:[#allocation9_spill] sm:$0xff] }
 0x3ce   :  { %v10407_v11 = vpop.f32.mrf.mxu0  ;;  %v10749_v15 = vpop.f32.mrf.mxu1  ;;  %v16464_v9 = vmax.f32 %v16462_v24, %v16463_v62  ;;  %v16478_v24 = vld [vmem:[#allocation19_spill] sm:$0xff] }
 0x3cf   :  { %v9183_v1 = vpack.c.bf16 %v6805_v61, %v6805_v61  ;;  %v6630_v12 = vmax.f32 %v4901_v63, %v6020_v41  ;;  %v11294_v15 = vld [vmem:[%s15846_s0 + $0x680] sm:$0xff]  }
 0x3d0   :  { %v4296_v13 = vpop.f32.mrf.mxu0  ;;  %10505 = vmatmul.mubr.msk.bf16.gmra.mxu0 %vm614_vm3, %v11288_v42  ;;  %v6025_v22 = vpop.f32.mrf.mxu1  ;;  %10847 = vmatmul.mubr.msk.bf16.gmra.mxu1 %vm614_vm3, %v11289_v8 }
 0x3d1   :  { %7652 = vst.msk [vmem:[%s15848_s3 + $0x58] sm:$0xf] %vm7629_vm4, %v9183_v1  ;;  %v6806_v23 = vadd.f32 %v13763_v32, %v6630_v12  ;;  %v4902_v16 = vmax.f32 %v16452_v55, %v4296_v13  ;;  %10508 = vmatprep.mubr.msk.bf16.mxu0 %vm11391_vm2, %v16147_v44  ;;  %10850 = vmatprep.mubr.msk.bf16.mxu1 %vm11391_vm2, %v16147_v44  ;;  %v11295_v1 = vld [vmem:[%s15846_s0 + $0x924] sm:$0xff]  }
 0x3d2   :  { %v10410_v14 = vpop.f32.mrf.mxu0  ;;  %v10752_v34 = vpop.f32.mrf.mxu1  ;;  %v16465_v13 = vld [vmem:[#allocation10_spill] sm:$0xff] }
 0x3d3   :  { %v9184_v33 = vpack.c.bf16 %v6806_v23, %v6806_v23  ;;  %v6631_v29 = vmax.f32 %v4902_v16, %v6025_v22  ;;  %v16466_v22 = vld [vmem:[#allocation11_spill] sm:$0xff] }
 0x3d4   :  { %v4299_v48 = vpop.f32.mrf.mxu0  ;;  %v6028_v49 = vpop.f32.mrf.mxu1  ;;  %v16467_v23 = vmax.f32 %v16465_v13, %v16466_v22 }
 0x3d5   :  { %7653 = vst.msk [vmem:[%s15848_s3 + $0x5c] sm:$0xf] %vm7629_vm4, %v9184_v33  ;;  %v6807_v21 = vadd.f32 %v13763_v32, %v6631_v29  ;;  %v4903_v30 = vmax.f32 %v16455_v28, %v4299_v48 }
 0x3d6   :  { %v10411_v56 = vpop.f32.mrf.mxu0  ;;  %v10753_v57 = vpop.f32.mrf.mxu1 }
 0x3d7   :  { %v9185_v26 = vpack.c.bf16 %v6807_v21, %v6807_v21  ;;  %v6632_v2 = vmax.f32 %v4903_v30, %v6028_v49 }
 0x3d8   :  { %v4304_v17 = vpop.f32.mrf.mxu0  ;;  %10509 = vmatmul.mubr.msk.bf16.gmra.mxu0 %vm614_vm3, %v11290_v27  ;;  %v6033_v18 = vpop.f32.mrf.mxu1  ;;  %10851 = vmatmul.mubr.msk.bf16.gmra.mxu1 %vm614_vm3, %v11291_v38  ;;  %v16468_v27 = vld [vmem:[#allocation12_spill] sm:$0xff]  ;;  %v16469_v38 = vld [vmem:[#allocation13_spill] sm:$0xff] }
 0x3d9   :  { %7654 = vst.msk [vmem:[%s15848_s3 + $0x60] sm:$0xf] %vm7629_vm4, %v9185_v26  ;;  %v6808_v35 = vadd.f32 %v13763_v32, %v6632_v2  ;;  %v4904_v53 = vmax.f32 %v16458_v39, %v4304_v17  ;;  %10512 = vmatprep.mubr.msk.bf16.mxu0 %vm11391_vm2, %v16147_v44  ;;  %10854 = vmatprep.mubr.msk.bf16.mxu1 %vm11391_vm2, %v16147_v44  ;;  %v11296_v2 = vld [vmem:[%s15846_s0 + $0x688] sm:$0xff]  }
 0x3da   :  { %v10414_v54 = vpop.f32.mrf.mxu0  ;;  %v10756_v5 = vpop.f32.mrf.mxu1  ;;  %v16470_v21 = vmax.f32 %v16468_v27, %v16469_v38  ;;  %v11297_v17 = vld [vmem:[%s15846_s0 + $0x92c] sm:$0xff]  }
 0x3db   :  { %v9186_v6 = vpack.c.bf16 %v6808_v35, %v6808_v35  ;;  %v6633_v31 = vmax.f32 %v4904_v53, %v6033_v18  ;;  %v16471_v35 = vld [vmem:[#allocation14_spill] sm:$0xff]  ;;  %v16484_v27 = vld [vmem:[#allocation23_spill] sm:$0xff] }
 0x3dc   :  { %v4307_v36 = vpop.f32.mrf.mxu0  ;;  %v6036_v59 = vpop.f32.mrf.mxu1  ;;  %v16473_v51 = vmax.f32 %v16471_v35, %v16472_v45 }
 0x3dd   :  { %7655 = vst.msk [vmem:[%s15848_s3 + $0x64] sm:$0xf] %vm7629_vm4, %v9186_v6  ;;  %v6809_v43 = vadd.f32 %v13763_v32, %v6633_v31  ;;  %v4905_v58 = vmax.f32 %v16461_v47, %v4307_v36 }
 0x3de   :  { %v10415_v19 = vpop.f32.mrf.mxu0  ;;  %v10757_v3 = vpop.f32.mrf.mxu1 }
 0x3df   :  { %v9187_v4 = vpack.c.bf16 %v6809_v43, %v6809_v43  ;;  %v6634_v40 = vmax.f32 %v4905_v58, %v6036_v59 }
 0x3e0   :  { %v4312_v10 = vpop.f32.mrf.mxu0  ;;  %10513 = vmatmul.mubr.msk.bf16.gmra.mxu0 %vm614_vm3, %v11292_v20  ;;  %v6041_v7 = vpop.f32.mrf.mxu1  ;;  %10855 = vmatmul.mubr.msk.bf16.gmra.mxu1 %vm614_vm3, %v11293_v37  ;;  %v16474_v20 = vld [vmem:[#allocation16_spill] sm:$0xff]  ;;  %v16475_v37 = vld [vmem:[#allocation17_spill] sm:$0xff] }
 0x3e1   :  { %7656 = vst.msk [vmem:[%s15848_s3 + $0x68] sm:$0xf] %vm7629_vm4, %v9187_v4  ;;  %v6810_v0 = vadd.f32 %v13763_v32, %v6634_v40  ;;  %v4906_v41 = vmax.f32 %v16464_v9, %v4312_v10  ;;  %10516 = vmatprep.mubr.msk.bf16.mxu0 %vm11391_vm2, %v16147_v44  ;;  %10858 = vmatprep.mubr.msk.bf16.mxu1 %vm11391_vm2, %v16147_v44  ;;  %v11298_v40 = vld [vmem:[%s15846_s0 + $0x690] sm:$0xff]  }
 0x3e2   :  { %v10418_v42 = vpop.f32.mrf.mxu0  ;;  %v10760_v8 = vpop.f32.mrf.mxu1  ;;  %v16476_v43 = vmax.f32 %v16474_v20, %v16475_v37  ;;  %v11299_v10 = vld [vmem:[%s15846_s0 + $0x934] sm:$0xff]   ;;  %v16490_v20 = vld [vmem:[#allocation27_spill] sm:$0xff] }
 0x3e3   :  { %v9188_v61 = vpack.c.bf16 %v6810_v0, %v6810_v0  ;;  %v6635_v25 = vmax.f32 %v4906_v41, %v6041_v7  ;;  %v16477_v0 = vld [vmem:[#allocation18_spill] sm:$0xff] }
 0x3e4   :  { %v4315_v63 = vpop.f32.mrf.mxu0  ;;  %v6044_v11 = vpop.f32.mrf.mxu1  ;;  %v16479_v62 = vmax.f32 %v16477_v0, %v16478_v24 }
 0x3e5   :  { %7657 = vst.msk [vmem:[%s15848_s3 + $0x6c] sm:$0xf] %vm7629_vm4, %v9188_v61  ;;  %v6811_v12 = vadd.f32 %v13763_v32, %v6635_v25  ;;  %v4907_v55 = vmax.f32 %v16467_v23, %v4315_v63 }
 0x3e6   :  { %v10419_v16 = vpop.f32.mrf.mxu0  ;;  %v10761_v14 = vpop.f32.mrf.mxu1 }
 0x3e7   :  { %v9189_v34 = vpack.c.bf16 %v6811_v12, %v6811_v12  ;;  %v6636_v33 = vmax.f32 %v4907_v55, %v6044_v11 }
 0x3e8   :  { %v4320_v29 = vpop.f32.mrf.mxu0  ;;  %10517 = vmatmul.mubr.msk.bf16.gmra.mxu0 %vm614_vm3, %v11294_v15  ;;  %v6049_v48 = vpop.f32.mrf.mxu1  ;;  %10859 = vmatmul.mubr.msk.bf16.gmra.mxu1 %vm614_vm3, %v11295_v1  ;;  %v16480_v15 = vld [vmem:[#allocation20_spill] sm:$0xff]  ;;  %v16481_v1 = vld [vmem:[#allocation21_spill] sm:$0xff] }
 0x3e9   :  { %7658 = vst.msk [vmem:[%s15848_s3 + $0x70] sm:$0xf] %vm7629_vm4, %v9189_v34  ;;  %v6812_v49 = vadd.f32 %v13763_v32, %v6636_v33  ;;  %v4908_v52 = vmax.f32 %v16470_v21, %v4320_v29  ;;  %10520 = vmatprep.mubr.msk.bf16.mxu0 %vm11391_vm2, %v16147_v44  ;;  %10862 = vmatprep.mubr.msk.bf16.mxu1 %vm11391_vm2, %v16147_v44  ;;  %v11300_v33 = vld [vmem:[%s15846_s0 + $0x698] sm:$0xff]  }
 0x3ea   :  { %v10422_v60 = vpop.f32.mrf.mxu0  ;;  %v10764_v28 = vpop.f32.mrf.mxu1  ;;  %v16482_v12 = vmax.f32 %v16480_v15, %v16481_v1  ;;  %v11301_v29 = vld [vmem:[%s15846_s0 + $0x93c] sm:$0xff]   ;;  %v16496_v15 = vld [vmem:[#allocation31_spill] sm:$0xff] }
 0x3eb   :  { %v9190_v30 = vpack.c.bf16 %v6812_v49, %v6812_v49  ;;  %v6637_v56 = vmax.f32 %v4908_v52, %v6049_v48  ;;  %v16483_v49 = vld [vmem:[#allocation22_spill] sm:$0xff] }
 0x3ec   :  { %v4323_v57 = vpop.f32.mrf.mxu0  ;;  %v6052_v26 = vpop.f32.mrf.mxu1  ;;  %v16485_v38 = vmax.f32 %v16483_v49, %v16484_v27 }
 0x3ed   :  { %7659 = vst.msk [vmem:[%s15848_s3 + $0x74] sm:$0xf] %vm7629_vm4, %v9190_v30  ;;  %v6813_v18 = vadd.f32 %v13763_v32, %v6637_v56  ;;  %v4909_v39 = vmax.f32 %v16473_v51, %v4323_v57 }
 0x3ee   :  { %v10423_v53 = vpop.f32.mrf.mxu0  ;;  %v10765_v54 = vpop.f32.mrf.mxu1 }
 0x3ef   :  { %v9191_v5 = vpack.c.bf16 %v6813_v18, %v6813_v18  ;;  %v6638_v6 = vmax.f32 %v4909_v39, %v6052_v26 }
 0x3f0   :  { %v4328_v31 = vpop.f32.mrf.mxu0  ;;  %10521 = vmatmul.mubr.msk.bf16.gmra.mxu0 %vm614_vm3, %v11296_v2  ;;  %v6057_v36 = vpop.f32.mrf.mxu1  ;;  %10863 = vmatmul.mubr.msk.bf16.gmra.mxu1 %vm614_vm3, %v11297_v17  ;;  %v16486_v2 = vld [vmem:[#allocation24_spill] sm:$0xff]  ;;  %v16487_v17 = vld [vmem:[#allocation25_spill] sm:$0xff] }
 0x3f1   :  { %7660 = vst.msk [vmem:[%s15848_s3 + $0x78] sm:$0xf] %vm7629_vm4, %v9191_v5  ;;  %v6814_v59 = vadd.f32 %v13763_v32, %v6638_v6  ;;  %v4910_v50 = vmax.f32 %v16476_v43, %v4328_v31  ;;  %10524 = vmatprep.mubr.msk.bf16.mxu0 %vm11391_vm2, %v16147_v44  ;;  %10866 = vmatprep.mubr.msk.bf16.mxu1 %vm11391_vm2, %v16147_v44  ;;  %v11302_v6 = vld [vmem:[%s15846_s0 + $0x6a0] sm:$0xff]  }
 0x3f2   :  { %v10426_v46 = vpop.f32.mrf.mxu0  ;;  %v10768_v47 = vpop.f32.mrf.mxu1  ;;  %v16488_v18 = vmax.f32 %v16486_v2, %v16487_v17  ;;  %v11303_v31 = vld [vmem:[%s15846_s0 + $0x944] sm:$0xff]  }
 0x3f3   :  { %v9192_v58 = vpack.c.bf16 %v6814_v59, %v6814_v59  ;;  %v6639_v19 = vmax.f32 %v4910_v50, %v6057_v36  ;;  %v16489_v59 = vld [vmem:[#allocation26_spill] sm:$0xff]  ;;  %v16502_v2 = vld [vmem:[#allocation35_spill] sm:$0xff] }
 0x3f4   :  { %v4331_v3 = vpop.f32.mrf.mxu0  ;;  %v6060_v4 = vpop.f32.mrf.mxu1  ;;  %v16491_v37 = vmax.f32 %v16489_v59, %v16490_v20 }
 0x3f5   :  { %7661 = vst.msk [vmem:[%s15848_s3 + $0x7c] sm:$0xf] %vm7629_vm4, %v9192_v58  ;;  %v6815_v7 = vadd.f32 %v13763_v32, %v6639_v19  ;;  %v4911_v9 = vmax.f32 %v16479_v62, %v4331_v3 }
 0x3f6   :  { %v10427_v41 = vpop.f32.mrf.mxu0  ;;  %v10769_v42 = vpop.f32.mrf.mxu1 }
 0x3f7   :  { %v9193_v8 = vpack.c.bf16 %v6815_v7, %v6815_v7  ;;  %v6640_v61 = vmax.f32 %v4911_v9, %v6060_v4 }
 0x3f8   :  { %v4336_v25 = vpop.f32.mrf.mxu0  ;;  %10525 = vmatmul.mubr.msk.bf16.gmra.mxu0 %vm614_vm3, %v11298_v40  ;;  %v6065_v63 = vpop.f32.mrf.mxu1  ;;  %10867 = vmatmul.mubr.msk.bf16.gmra.mxu1 %vm614_vm3, %v11299_v10  ;;  %v16492_v40 = vld [vmem:[#allocation28_spill] sm:$0xff]  ;;  %v16493_v10 = vld [vmem:[#allocation29_spill] sm:$0xff] }
 0x3f9   :  { %7662 = vst.msk [vmem:[%s15848_s3 + $0x80] sm:$0xf] %vm7629_vm4, %v9193_v8  ;;  %v6816_v11 = vadd.f32 %v13763_v32, %v6640_v61  ;;  %v4912_v13 = vmax.f32 %v16482_v12, %v4336_v25  ;;  %10528 = vmatprep.mubr.msk.bf16.mxu0 %vm11391_vm2, %v16147_v44  ;;  %10870 = vmatprep.mubr.msk.bf16.mxu1 %vm11391_vm2, %v16147_v44  ;;  %v11304_v61 = vld [vmem:[%s15846_s0 + $0x6a8] sm:$0xff]  }
 0x3fa   :  { %v10430_v22 = vpop.f32.mrf.mxu0  ;;  %v10772_v23 = vpop.f32.mrf.mxu1  ;;  %v16494_v7 = vmax.f32 %v16492_v40, %v16493_v10  ;;  %v11305_v25 = vld [vmem:[%s15846_s0 + $0x94c] sm:$0xff]  }
 0x3fb   :  { %v9194_v55 = vpack.c.bf16 %v6816_v11, %v6816_v11  ;;  %v6641_v16 = vmax.f32 %v4912_v13, %v6065_v63  ;;  %v16495_v11 = vld [vmem:[#allocation30_spill] sm:$0xff]  ;;  %v16508_v40 = vld [vmem:[#allocation39_spill] sm:$0xff] }
 0x3fc   :  { %v4339_v14 = vpop.f32.mrf.mxu0  ;;  %v6068_v34 = vpop.f32.mrf.mxu1  ;;  %v16497_v1 = vmax.f32 %v16495_v11, %v16496_v15 }
 0x3fd   :  { %7663 = vst.msk [vmem:[%s15848_s3 + $0x84] sm:$0xf] %vm7629_vm4, %v9194_v55  ;;  %v6817_v48 = vadd.f32 %v13763_v32, %v6641_v16  ;;  %v4913_v21 = vmax.f32 %v16485_v38, %v4339_v14 }
 0x3fe   :  { %v10431_v52 = vpop.f32.mrf.mxu0  ;;  %v10773_v60 = vpop.f32.mrf.mxu1 }
 0x3ff   :  { %v9195_v28 = vpack.c.bf16 %v6817_v48, %v6817_v48  ;;  %v6642_v30 = vmax.f32 %v4913_v21, %v6068_v34 }
 0x400   :  { %v4344_v56 = vpop.f32.mrf.mxu0  ;;  %10529 = vmatmul.mubr.msk.bf16.gmra.mxu0 %vm614_vm3, %v11300_v33  ;;  %v6073_v57 = vpop.f32.mrf.mxu1  ;;  %10871 = vmatmul.mubr.msk.bf16.gmra.mxu1 %vm614_vm3, %v11301_v29  ;;  %v16498_v33 = vld [vmem:[#allocation32_spill] sm:$0xff]  ;;  %v16499_v29 = vld [vmem:[#allocation33_spill] sm:$0xff] }
 0x401   :  { %7664 = vst.msk [vmem:[%s15848_s3 + $0x88] sm:$0xf] %vm7629_vm4, %v9195_v28  ;;  %v6818_v26 = vadd.f32 %v13763_v32, %v6642_v30  ;;  %v4914_v35 = vmax.f32 %v16488_v18, %v4344_v56  ;;  %10532 = vmatprep.mubr.msk.bf16.mxu0 %vm11391_vm2, %v16147_v44  ;;  %10874 = vmatprep.mubr.msk.bf16.mxu1 %vm11391_vm2, %v16147_v44  ;;  %v11306_v30 = vld [vmem:[%s15846_s0 + $0x6b0] sm:$0xff]  }
 0x402   :  { %v10434_v45 = vpop.f32.mrf.mxu0  ;;  %v10776_v51 = vpop.f32.mrf.mxu1  ;;  %v16500_v48 = vmax.f32 %v16498_v33, %v16499_v29  ;;  %v11307_v56 = vld [vmem:[%s15846_s0 + $0x954] sm:$0xff]   ;;  %v16514_v33 = vld [vmem:[#allocation43_spill] sm:$0xff] }
 0x403   :  { %v9196_v39 = vpack.c.bf16 %v6818_v26, %v6818_v26  ;;  %v6643_v53 = vmax.f32 %v4914_v35, %v6073_v57  ;;  %v16501_v26 = vld [vmem:[#allocation34_spill] sm:$0xff] }
 0x404   :  { %v4347_v54 = vpop.f32.mrf.mxu0  ;;  %v6076_v5 = vpop.f32.mrf.mxu1  ;;  %v16503_v17 = vmax.f32 %v16501_v26, %v16502_v2 }
 0x405   :  { %7665 = vst.msk [vmem:[%s15848_s3 + $0x8c] sm:$0xf] %vm7629_vm4, %v9196_v39  ;;  %v6819_v36 = vadd.f32 %v13763_v32, %v6643_v53  ;;  %v4915_v43 = vmax.f32 %v16491_v37, %v4347_v54 }
 0x406   :  { %v10435_v50 = vpop.f32.mrf.mxu0  ;;  %v10777_v46 = vpop.f32.mrf.mxu1 }
 0x407   :  { %v9197_v47 = vpack.c.bf16 %v6819_v36, %v6819_v36  ;;  %v6644_v58 = vmax.f32 %v4915_v43, %v6076_v5 }
 0x408   :  { %v4352_v19 = vpop.f32.mrf.mxu0  ;;  %10533 = vmatmul.mubr.msk.bf16.gmra.mxu0 %vm614_vm3, %v11302_v6  ;;  %v6081_v3 = vpop.f32.mrf.mxu1  ;;  %10875 = vmatmul.mubr.msk.bf16.gmra.mxu1 %vm614_vm3, %v11303_v31  ;;  %v16504_v6 = vld [vmem:[#allocation36_spill] sm:$0xff]  ;;  %v16505_v31 = vld [vmem:[#allocation37_spill] sm:$0xff] }
 0x409   :  { %7666 = vst.msk [vmem:[%s15848_s3 + $0x90] sm:$0xf] %vm7629_vm4, %v9197_v47  ;;  %v6820_v4 = vadd.f32 %v13763_v32, %v6644_v58  ;;  %v4916_v0 = vmax.f32 %v16494_v7, %v4352_v19  ;;  %10536 = vmatprep.mubr.msk.bf16.mxu0 %vm11391_vm2, %v16147_v44  ;;  %10878 = vmatprep.mubr.msk.bf16.mxu1 %vm11391_vm2, %v16147_v44  ;;  %v11309_v58 = vld [vmem:[%s15846_s0 + $0x95c] sm:$0xff]  }
 0x40a   :  { %v10438_v24 = vpop.f32.mrf.mxu0  ;;  %v10780_v62 = vpop.f32.mrf.mxu1  ;;  %v16506_v36 = vmax.f32 %v16504_v6, %v16505_v31  ;;  %v14362_v19 = vld [vmem:[%s15847_s2] ss:$0 sm:$0xff]  ;;  %v16520_v6 = vld [vmem:[#allocation47_spill] sm:$0xff] }
 0x40b   :  { %v9198_v9 = vpack.c.bf16 %v6820_v4, %v6820_v4  ;;  %v6645_v41 = vmax.f32 %v4916_v0, %v6081_v3  ;;  %v16507_v4 = vld [vmem:[#allocation38_spill] sm:$0xff] }
 0x40c   :  { %v4355_v42 = vpop.f32.mrf.mxu0  ;;  %v6084_v8 = vpop.f32.mrf.mxu1  ;;  %v16509_v10 = vmax.f32 %v16507_v4, %v16508_v40 }
 0x40d   :  { %7667 = vst.msk [vmem:[%s15848_s3 + $0x94] sm:$0xf] %vm7629_vm4, %v9198_v9  ;;  %v6821_v63 = vadd.f32 %v13763_v32, %v6645_v41  ;;  %v4917_v12 = vmax.f32 %v16497_v1, %v4355_v42 }
 0x40e   :  { %v10439_v13 = vpop.f32.mrf.mxu0  ;;  %v10781_v22 = vpop.f32.mrf.mxu1 }
 0x40f   :  { %v9199_v23 = vpack.c.bf16 %v6821_v63, %v6821_v63  ;;  %v6646_v55 = vmax.f32 %v4917_v12, %v6084_v8 }
 0x410   :  { %v4360_v16 = vpop.f32.mrf.mxu0  ;;  %10537 = vmatmul.mubr.msk.bf16.gmra.mxu0 %vm614_vm3, %v11304_v61  ;;  %v6089_v14 = vpop.f32.mrf.mxu1  ;;  %10879 = vmatmul.mubr.msk.bf16.gmra.mxu1 %vm614_vm3, %v11305_v25  ;;  %v16510_v61 = vld [vmem:[#allocation40_spill] sm:$0xff]  ;;  %v16511_v25 = vld [vmem:[#allocation41_spill] sm:$0xff] }
 0x411   :  { %7668 = vst.msk [vmem:[%s15848_s3 + $0x98] sm:$0xf] %vm7629_vm4, %v9199_v23  ;;  %v6822_v34 = vadd.f32 %v13763_v32, %v6646_v55  ;;  %v4918_v49 = vmax.f32 %v16500_v48, %v4360_v16  ;;  %10540 = vmatprep.mubr.msk.bf16.mxu0 %vm11391_vm2, %v16147_v44  ;;  %10882 = vmatprep.mubr.msk.bf16.mxu1 %vm11391_vm2, %v16147_v44  ;;  %v11310_v55 = vld [vmem:[%s15846_s0 + $0x6c0] sm:$0xff]  }
 0x412   :  { %v10442_v27 = vpop.f32.mrf.mxu0  ;;  %v10784_v38 = vpop.f32.mrf.mxu1  ;;  %v16512_v63 = vmax.f32 %v16510_v61, %v16511_v25  ;;  %v11311_v16 = vld [vmem:[%s15846_s0 + $0x964] sm:$0xff]  }
 0x413   :  { %v9200_v21 = vpack.c.bf16 %v6822_v34, %v6822_v34  ;;  %v6647_v52 = vmax.f32 %v4918_v49, %v6089_v14  ;;  %v16513_v34 = vld [vmem:[#allocation42_spill] sm:$0xff]  ;;  %v16526_v61 = vld [vmem:[#allocation51_spill] sm:$0xff] }
 0x414   :  { %v4363_v60 = vpop.f32.mrf.mxu0  ;;  %v6092_v28 = vpop.f32.mrf.mxu1  ;;  %v16515_v29 = vmax.f32 %v16513_v34, %v16514_v33 }
 0x415   :  { %7669 = vst.msk [vmem:[%s15848_s3 + $0x9c] sm:$0xf] %vm7629_vm4, %v9200_v21  ;;  %v6823_v57 = vadd.f32 %v13763_v32, %v6647_v52  ;;  %v4919_v18 = vmax.f32 %v16503_v17, %v4363_v60 }
 0x416   :  { %v10443_v35 = vpop.f32.mrf.mxu0  ;;  %v10785_v45 = vpop.f32.mrf.mxu1 }
 0x417   :  { %v9201_v51 = vpack.c.bf16 %v6823_v57, %v6823_v57  ;;  %v6648_v39 = vmax.f32 %v4919_v18, %v6092_v28 }
 0x418   :  { %v4368_v53 = vpop.f32.mrf.mxu0  ;;  %10541 = vmatmul.mubr.msk.bf16.gmra.mxu0 %vm614_vm3, %v11306_v30  ;;  %v6097_v54 = vpop.f32.mrf.mxu1  ;;  %10883 = vmatmul.mubr.msk.bf16.gmra.mxu1 %vm614_vm3, %v11307_v56  ;;  %v16516_v30 = vld [vmem:[#allocation44_spill] sm:$0xff]  ;;  %v16517_v56 = vld [vmem:[#allocation45_spill] sm:$0xff] }
 0x419   :  { %7670 = vst.msk [vmem:[%s15848_s3 + $0xa0] sm:$0xf] %vm7629_vm4, %v9201_v51  ;;  %v6824_v5 = vadd.f32 %v13763_v32, %v6648_v39  ;;  %v4920_v59 = vmax.f32 %v16506_v36, %v4368_v53  ;;  %10544 = vmatprep.mubr.msk.bf16.mxu0 %vm11391_vm2, %v16147_v44  ;;  %10886 = vmatprep.mubr.msk.bf16.mxu1 %vm11391_vm2, %v16147_v44  ;;  %v11308_v32 = vld [vmem:[%s15846_s0 + $0x6b8] sm:$0xff]   ;;  %v11312_v39 = vld [vmem:[%s15846_s0 + $0x6c8] sm:$0xff]  }
 0x41a   :  { %v10446_v20 = vpop.f32.mrf.mxu0  ;;  %v10788_v37 = vpop.f32.mrf.mxu1  ;;  %v16518_v57 = vmax.f32 %v16516_v30, %v16517_v56  ;;  %v11313_v53 = vld [vmem:[%s15846_s0 + $0x96c] sm:$0xff]  }
 0x41b   :  { %v9202_v43 = vpack.c.bf16 %v6824_v5, %v6824_v5  ;;  %v6649_v50 = vmax.f32 %v4920_v59, %v6097_v54  ;;  %v16519_v5 = vld [vmem:[#allocation46_spill] sm:$0xff]  ;;  %v16532_v30 = vld [vmem:[#allocation55_spill] sm:$0xff] }
 0x41c   :  { %v4371_v46 = vpop.f32.mrf.mxu0  ;;  %v6100_v47 = vpop.f32.mrf.mxu1  ;;  %v16521_v31 = vmax.f32 %v16519_v5, %v16520_v6 }
 0x41d   :  { %7671 = vst.msk [vmem:[%s15848_s3 + $0xa4] sm:$0xf] %vm7629_vm4, %v9202_v43  ;;  %v6825_v3 = vadd.f32 %v14362_v19, %v6649_v50  ;;  %v4921_v7 = vmax.f32 %v16509_v10, %v4371_v46 }
 0x41e   :  { %v10447_v0 = vpop.f32.mrf.mxu0  ;;  %v10789_v24 = vpop.f32.mrf.mxu1 }
 0x41f   :  { %v9203_v62 = vpack.c.bf16 %v6825_v3, %v6825_v3  ;;  %v6650_v9 = vmax.f32 %v4921_v7, %v6100_v47 }
 0x420   :  { %v4376_v41 = vpop.f32.mrf.mxu0  ;;  %10545 = vmatmul.mubr.msk.bf16.gmra.mxu0 %vm614_vm3, %v11308_v32  ;;  %v6105_v42 = vpop.f32.mrf.mxu1  ;;  %10887 = vmatmul.mubr.msk.bf16.gmra.mxu1 %vm614_vm3, %v11309_v58  ;;  %v16522_v32 = vld [vmem:[#allocation48_spill] sm:$0xff]  ;;  %v16523_v58 = vld [vmem:[#allocation49_spill] sm:$0xff] }
 0x421   :  { %7672 = vst.msk [vmem:[%s15848_s3 + $0xa8] sm:$0xf] %vm7629_vm4, %v9203_v62  ;;  %v6826_v8 = vadd.f32 %v14362_v19, %v6650_v9  ;;  %v4922_v11 = vmax.f32 %v16512_v63, %v4376_v41  ;;  %10548 = vmatprep.mubr.msk.bf16.mxu0 %vm11391_vm2, %v16147_v44  ;;  %10890 = vmatprep.mubr.msk.bf16.mxu1 %vm11391_vm2, %v16147_v44  ;;  %v11314_v9 = vld [vmem:[%s15846_s0 + $0x6d0] sm:$0xff]  }
 0x422   :  { %v10450_v15 = vpop.f32.mrf.mxu0  ;;  %v10792_v1 = vpop.f32.mrf.mxu1  ;;  %v16524_v3 = vmax.f32 %v16522_v32, %v16523_v58  ;;  %v11315_v41 = vld [vmem:[%s15846_s0 + $0x974] sm:$0xff]   ;;  %v16538_v32 = vld [vmem:[#allocation59_spill] sm:$0xff] }
 0x423   :  { %v9204_v12 = vpack.c.bf16 %v6826_v8, %v6826_v8  ;;  %v6651_v13 = vmax.f32 %v4922_v11, %v6105_v42  ;;  %v16525_v8 = vld [vmem:[#allocation50_spill] sm:$0xff] }
 0x424   :  { %v4379_v22 = vpop.f32.mrf.mxu0  ;;  %v6108_v23 = vpop.f32.mrf.mxu1  ;;  %v16527_v25 = vmax.f32 %v16525_v8, %v16526_v61 }
 0x425   :  { %7673 = vst.msk [vmem:[%s15848_s3 + $0xac] sm:$0xf] %vm7629_vm4, %v9204_v12  ;;  %v6827_v14 = vadd.f32 %v14362_v19, %v6651_v13  ;;  %v4923_v48 = vmax.f32 %v16515_v29, %v4379_v22 }
 0x426   :  { %v10451_v49 = vpop.f32.mrf.mxu0  ;;  %v10793_v27 = vpop.f32.mrf.mxu1 }
 0x427   :  { %v9205_v38 = vpack.c.bf16 %v6827_v14, %v6827_v14  ;;  %v6652_v21 = vmax.f32 %v4923_v48, %v6108_v23 }
 0x428   :  { %v4384_v52 = vpop.f32.mrf.mxu0  ;;  %10549 = vmatmul.mubr.msk.bf16.gmra.mxu0 %vm614_vm3, %v11310_v55  ;;  %v6113_v60 = vpop.f32.mrf.mxu1  ;;  %10891 = vmatmul.mubr.msk.bf16.gmra.mxu1 %vm614_vm3, %v11311_v16  ;;  %v16528_v55 = vld [vmem:[#allocation52_spill] sm:$0xff]  ;;  %v16529_v16 = vld [vmem:[#allocation53_spill] sm:$0xff] }
 0x429   :  { %7674 = vst.msk [vmem:[%s15848_s3 + $0xb0] sm:$0xf] %vm7629_vm4, %v9205_v38  ;;  %v6828_v28 = vadd.f32 %v14362_v19, %v6652_v21  ;;  %v4924_v26 = vmax.f32 %v16518_v57, %v4384_v52  ;;  %10552 = vmatprep.mubr.msk.bf16.mxu0 %vm11391_vm2, %v16147_v44  ;;  %10894 = vmatprep.mubr.msk.bf16.mxu1 %vm11391_vm2, %v16147_v44  ;;  %v11316_v21 = vld [vmem:[%s15846_s0 + $0x6d8] sm:$0xff]  }
 0x42a   :  { %v10454_v2 = vpop.f32.mrf.mxu0  ;;  %v10796_v17 = vpop.f32.mrf.mxu1  ;;  %v16530_v14 = vmax.f32 %v16528_v55, %v16529_v16  ;;  %v11317_v52 = vld [vmem:[%s15846_s0 + $0x97c] sm:$0xff]   ;;  %v16544_v55 = vld [vmem:[#allocation63_spill] sm:$0xff] }
 0x42b   :  { %v9206_v18 = vpack.c.bf16 %v6828_v28, %v6828_v28  ;;  %v6653_v35 = vmax.f32 %v4924_v26, %v6113_v60  ;;  %v16531_v28 = vld [vmem:[#allocation54_spill] sm:$0xff] }
 0x42c   :  { %v4387_v45 = vpop.f32.mrf.mxu0  ;;  %v6116_v51 = vpop.f32.mrf.mxu1  ;;  %v16533_v56 = vmax.f32 %v16531_v28, %v16532_v30 }
 0x42d   :  { %7675 = vst.msk [vmem:[%s15848_s3 + $0xb4] sm:$0xf] %vm7629_vm4, %v9206_v18  ;;  %v6829_v54 = vadd.f32 %v14362_v19, %v6653_v35  ;;  %v4925_v36 = vmax.f32 %v16521_v31, %v4387_v45 }
 0x42e   :  { %v10455_v59 = vpop.f32.mrf.mxu0  ;;  %v10797_v20 = vpop.f32.mrf.mxu1 }
 0x42f   :  { %v9207_v37 = vpack.c.bf16 %v6829_v54, %v6829_v54  ;;  %v6654_v43 = vmax.f32 %v4925_v36, %v6116_v51 }
 0x430   :  { %v4392_v50 = vpop.f32.mrf.mxu0  ;;  %10553 = vmatmul.mubr.msk.bf16.gmra.mxu0 %vm614_vm3, %v11312_v39  ;;  %v6121_v46 = vpop.f32.mrf.mxu1  ;;  %10895 = vmatmul.mubr.msk.bf16.gmra.mxu1 %vm614_vm3, %v11313_v53  ;;  %v16534_v39 = vld [vmem:[#allocation56_spill] sm:$0xff]  ;;  %v16535_v53 = vld [vmem:[#allocation57_spill] sm:$0xff] }
 0x431   :  { %7676 = vst.msk [vmem:[%s15848_s3 + $0xb8] sm:$0xf] %vm7629_vm4, %v9207_v37  ;;  %v6830_v47 = vadd.f32 %v14362_v19, %v6654_v43  ;;  %v4926_v4 = vmax.f32 %v16524_v3, %v4392_v50  ;;  %10556 = vmatprep.mubr.msk.bf16.mxu0 %vm11391_vm2, %v16147_v44  ;;  %10898 = vmatprep.mubr.msk.bf16.mxu1 %vm11391_vm2, %v16147_v44  ;;  %v11318_v43 = vld [vmem:[%s15846_s0 + $0x6e0] sm:$0xff]  }
 0x432   :  { %v10458_v40 = vpop.f32.mrf.mxu0  ;;  %v10800_v10 = vpop.f32.mrf.mxu1  ;;  %v16536_v54 = vmax.f32 %v16534_v39, %v16535_v53  ;;  %v11319_v50 = vld [vmem:[%s15846_s0 + $0x984] sm:$0xff]  }
 0x433   :  { %v9208_v7 = vpack.c.bf16 %v6830_v47, %v6830_v47  ;;  %v6655_v0 = vmax.f32 %v4926_v4, %v6121_v46  ;;  %v16537_v47 = vld [vmem:[#allocation58_spill] sm:$0xff]  ;;  %v16550_v39 = vld [vmem:[#allocation67_spill] sm:$0xff] }
 0x434   :  { %v4395_v24 = vpop.f32.mrf.mxu0  ;;  %v6124_v62 = vpop.f32.mrf.mxu1  ;;  %v16539_v58 = vmax.f32 %v16537_v47, %v16538_v32 }
 0x435   :  { %7677 = vst.msk [vmem:[%s15848_s3 + $0xbc] sm:$0xf] %vm7629_vm4, %v9208_v7  ;;  %v6831_v42 = vadd.f32 %v14362_v19, %v6655_v0  ;;  %v4927_v63 = vmax.f32 %v16527_v25, %v4395_v24 }
 0x436   :  { %v10459_v11 = vpop.f32.mrf.mxu0  ;;  %v10801_v15 = vpop.f32.mrf.mxu1 }
 0x437   :  { %v9209_v1 = vpack.c.bf16 %v6831_v42, %v6831_v42  ;;  %v6656_v12 = vmax.f32 %v4927_v63, %v6124_v62 }
 0x438   :  { %v4400_v13 = vpop.f32.mrf.mxu0  ;;  %10557 = vmatmul.mubr.msk.bf16.gmra.mxu0 %vm614_vm3, %v11314_v9  ;;  %v6129_v22 = vpop.f32.mrf.mxu1  ;;  %10899 = vmatmul.mubr.msk.bf16.gmra.mxu1 %vm614_vm3, %v11315_v41  ;;  %v16540_v9 = vld [vmem:[#allocation60_spill] sm:$0xff]  ;;  %v16541_v41 = vld [vmem:[#allocation61_spill] sm:$0xff] }
 0x439   :  { %7678 = vst.msk [vmem:[%s15848_s3 + $0xc0] sm:$0xf] %vm7629_vm4, %v9209_v1  ;;  %v6832_v23 = vadd.f32 %v14362_v19, %v6656_v12  ;;  %v4928_v34 = vmax.f32 %v16530_v14, %v4400_v13  ;;  %10560 = vmatprep.mubr.msk.bf16.mxu0 %vm11391_vm2, %v16147_v44  ;;  %10902 = vmatprep.mubr.msk.bf16.mxu1 %vm11391_vm2, %v16147_v44  ;;  %v11320_v12 = vld [vmem:[%s15846_s0 + $0x6e8] sm:$0xff]  }
 0x43a   :  { %v10462_v33 = vpop.f32.mrf.mxu0  ;;  %v10804_v29 = vpop.f32.mrf.mxu1  ;;  %v16542_v42 = vmax.f32 %v16540_v9, %v16541_v41  ;;  %v11321_v13 = vld [vmem:[%s15846_s0 + $0x98c] sm:$0xff]  }
 0x43b   :  { %v9210_v48 = vpack.c.bf16 %v6832_v23, %v6832_v23  ;;  %v6657_v49 = vmax.f32 %v4928_v34, %v6129_v22  ;;  %v16543_v23 = vld [vmem:[#allocation62_spill] sm:$0xff]  ;;  %v16556_v9 = vld [vmem:[#allocation71_spill] sm:$0xff] }
 0x43c   :  { %v4403_v27 = vpop.f32.mrf.mxu0  ;;  %v6132_v38 = vpop.f32.mrf.mxu1  ;;  %v16545_v16 = vmax.f32 %v16543_v23, %v16544_v55 }
 0x43d   :  { %7679 = vst.msk [vmem:[%s15848_s3 + $0xc4] sm:$0xf] %vm7629_vm4, %v9210_v48  ;;  %v6833_v60 = vadd.f32 %v14362_v19, %v6657_v49  ;;  %v4929_v57 = vmax.f32 %v16533_v56, %v4403_v27 }
 0x43e   :  { %v10463_v26 = vpop.f32.mrf.mxu0  ;;  %v10805_v2 = vpop.f32.mrf.mxu1 }
 0x43f   :  { %v9211_v17 = vpack.c.bf16 %v6833_v60, %v6833_v60  ;;  %v6658_v18 = vmax.f32 %v4929_v57, %v6132_v38 }
 0x440   :  { %v4408_v35 = vpop.f32.mrf.mxu0  ;;  %10561 = vmatmul.mubr.msk.bf16.gmra.mxu0 %vm614_vm3, %v11316_v21  ;;  %v6137_v45 = vpop.f32.mrf.mxu1  ;;  %10903 = vmatmul.mubr.msk.bf16.gmra.mxu1 %vm614_vm3, %v11317_v52  ;;  %v16546_v21 = vld [vmem:[#allocation64_spill] sm:$0xff]  ;;  %v16547_v52 = vld [vmem:[#allocation65_spill] sm:$0xff] }
 0x441   :  { %7680 = vst.msk [vmem:[%s15848_s3 + $0xc8] sm:$0xf] %vm7629_vm4, %v9211_v17  ;;  %v6834_v51 = vadd.f32 %v14362_v19, %v6658_v18  ;;  %v4930_v5 = vmax.f32 %v16536_v54, %v4408_v35  ;;  %10564 = vmatprep.mubr.msk.bf16.mxu0 %vm11391_vm2, %v16147_v44  ;;  %10906 = vmatprep.mubr.msk.bf16.mxu1 %vm11391_vm2, %v16147_v44  ;;  %v11322_v18 = vld [vmem:[%s15846_s0 + $0x6f0] sm:$0xff]  }
 0x442   :  { %v10466_v6 = vpop.f32.mrf.mxu0  ;;  %v10808_v31 = vpop.f32.mrf.mxu1  ;;  %v16548_v60 = vmax.f32 %v16546_v21, %v16547_v52  ;;  %v11323_v35 = vld [vmem:[%s15846_s0 + $0x994] sm:$0xff]   ;;  %v16562_v21 = vld [vmem:[#allocation75_spill] sm:$0xff] }
 0x443   :  { %v9212_v36 = vpack.c.bf16 %v6834_v51, %v6834_v51  ;;  %v6659_v59 = vmax.f32 %v4930_v5, %v6137_v45  ;;  %v16549_v51 = vld [vmem:[#allocation66_spill] sm:$0xff] }
 0x444   :  { %v4411_v20 = vpop.f32.mrf.mxu0  ;;  %v6140_v37 = vpop.f32.mrf.mxu1  ;;  %v16551_v53 = vmax.f32 %v16549_v51, %v16550_v39 }
 0x445   :  { %7681 = vst.msk [vmem:[%s15848_s3 + $0xcc] sm:$0xf] %vm7629_vm4, %v9212_v36  ;;  %v6835_v46 = vadd.f32 %v14362_v19, %v6659_v59  ;;  %v4931_v3 = vmax.f32 %v16539_v58, %v4411_v20 }
 0x446   :  { %v10467_v4 = vpop.f32.mrf.mxu0  ;;  %v10809_v40 = vpop.f32.mrf.mxu1 }
 0x447   :  { %v9213_v10 = vpack.c.bf16 %v6835_v46, %v6835_v46  ;;  %v6660_v7 = vmax.f32 %v4931_v3, %v6140_v37 }
 0x448   :  { %v4416_v0 = vpop.f32.mrf.mxu0  ;;  %10565 = vmatmul.mubr.msk.bf16.gmra.mxu0 %vm614_vm3, %v11318_v43  ;;  %v6145_v24 = vpop.f32.mrf.mxu1  ;;  %10907 = vmatmul.mubr.msk.bf16.gmra.mxu1 %vm614_vm3, %v11319_v50  ;;  %v16552_v43 = vld [vmem:[#allocation68_spill] sm:$0xff]  ;;  %v16553_v50 = vld [vmem:[#allocation69_spill] sm:$0xff] }
 0x449   :  { %7682 = vst.msk [vmem:[%s15848_s3 + $0xd0] sm:$0xf] %vm7629_vm4, %v9213_v10  ;;  %v6836_v62 = vadd.f32 %v14362_v19, %v6660_v7  ;;  %v4932_v8 = vmax.f32 %v16542_v42, %v4416_v0  ;;  %10568 = vmatprep.mubr.msk.bf16.mxu0 %vm11391_vm2, %v16147_v44  ;;  %10910 = vmatprep.mubr.msk.bf16.mxu1 %vm11391_vm2, %v16147_v44  ;;  %v11324_v7 = vld [vmem:[%s15846_s0 + $0x6f8] sm:$0xff]  }
 0x44a   :  { %v10470_v61 = vpop.f32.mrf.mxu0  ;;  %v10812_v25 = vpop.f32.mrf.mxu1  ;;  %v16554_v46 = vmax.f32 %v16552_v43, %v16553_v50  ;;  %v11325_v0 = vld [vmem:[%s15846_s0 + $0x99c] sm:$0xff]   ;;  %v16568_v43 = vld [vmem:[#allocation79_spill] sm:$0xff] }
 0x44b   :  { %v9214_v63 = vpack.c.bf16 %v6836_v62, %v6836_v62  ;;  %v6661_v11 = vmax.f32 %v4932_v8, %v6145_v24  ;;  %v16555_v62 = vld [vmem:[#allocation70_spill] sm:$0xff] }
 0x44c   :  { %v4419_v15 = vpop.f32.mrf.mxu0  ;;  %v6148_v1 = vpop.f32.mrf.mxu1  ;;  %v16557_v41 = vmax.f32 %v16555_v62, %v16556_v9 }
 0x44d   :  { %7683 = vst.msk [vmem:[%s15848_s3 + $0xd4] sm:$0xf] %vm7629_vm4, %v9214_v63  ;;  %v6837_v22 = vadd.f32 %v14362_v19, %v6661_v11  ;;  %v4933_v14 = vmax.f32 %v16545_v16, %v4419_v15 }
 0x44e   :  { %v10471_v34 = vpop.f32.mrf.mxu0  ;;  %v10813_v33 = vpop.f32.mrf.mxu1 }
 0x44f   :  { %v9215_v29 = vpack.c.bf16 %v6837_v22, %v6837_v22  ;;  %v6662_v48 = vmax.f32 %v4933_v14, %v6148_v1 }
 0x450   :  { %v4424_v49 = vpop.f32.mrf.mxu0  ;;  %10569 = vmatmul.mubr.msk.bf16.gmra.mxu0 %vm614_vm3, %v11320_v12  ;;  %v6153_v27 = vpop.f32.mrf.mxu1  ;;  %10911 = vmatmul.mubr.msk.bf16.gmra.mxu1 %vm614_vm3, %v11321_v13  ;;  %v16558_v12 = vld [vmem:[#allocation72_spill] sm:$0xff]  ;;  %v16559_v13 = vld [vmem:[#allocation73_spill] sm:$0xff] }
 0x451   :  { %7684 = vst.msk [vmem:[%s15848_s3 + $0xd8] sm:$0xf] %vm7629_vm4, %v9215_v29  ;;  %v6838_v38 = vadd.f32 %v14362_v19, %v6662_v48  ;;  %v4934_v28 = vmax.f32 %v16548_v60, %v4424_v49  ;;  %10572 = vmatprep.mubr.msk.bf16.mxu0 %vm11391_vm2, %v16147_v44  ;;  %10914 = vmatprep.mubr.msk.bf16.mxu1 %vm11391_vm2, %v16147_v44  ;;  %v11326_v48 = vld [vmem:[%s15846_s0 + $0x700] sm:$0xff]  }
 0x452   :  { %v10474_v30 = vpop.f32.mrf.mxu0  ;;  %v10816_v56 = vpop.f32.mrf.mxu1  ;;  %v16560_v22 = vmax.f32 %v16558_v12, %v16559_v13  ;;  %v11327_v49 = vld [vmem:[%s15846_s0 + $0x9a4] sm:$0xff]  }
 0x453   :  { %v9216_v57 = vpack.c.bf16 %v6838_v38, %v6838_v38  ;;  %v6663_v26 = vmax.f32 %v4934_v28, %v6153_v27  ;;  %v16561_v38 = vld [vmem:[#allocation74_spill] sm:$0xff]  ;;  %v16574_v12 = vld [vmem:[#allocation83_spill] sm:$0xff] }
 0x454   :  { %v4427_v2 = vpop.f32.mrf.mxu0  ;;  %v6156_v17 = vpop.f32.mrf.mxu1  ;;  %v16563_v52 = vmax.f32 %v16561_v38, %v16562_v21 }
 0x455   :  { %7685 = vst.msk [vmem:[%s15848_s3 + $0xdc] sm:$0xf] %vm7629_vm4, %v9216_v57  ;;  %v6839_v45 = vadd.f32 %v14362_v19, %v6663_v26  ;;  %v4935_v54 = vmax.f32 %v16551_v53, %v4427_v2 }
 0x456   :  { %v10475_v5 = vpop.f32.mrf.mxu0  ;;  %v10817_v6 = vpop.f32.mrf.mxu1 }
 0x457   :  { %v9217_v31 = vpack.c.bf16 %v6839_v45, %v6839_v45  ;;  %v6664_v36 = vmax.f32 %v4935_v54, %v6156_v17 }
 0x458   :  { %v4432_v59 = vpop.f32.mrf.mxu0  ;;  %10573 = vmatmul.mubr.msk.bf16.gmra.mxu0 %vm614_vm3, %v11322_v18  ;;  %v6161_v20 = vpop.f32.mrf.mxu1  ;;  %10915 = vmatmul.mubr.msk.bf16.gmra.mxu1 %vm614_vm3, %v11323_v35  ;;  %v16564_v18 = vld [vmem:[#allocation76_spill] sm:$0xff]  ;;  %v16565_v35 = vld [vmem:[#allocation77_spill] sm:$0xff] }
 0x459   :  { %7686 = vst.msk [vmem:[%s15848_s3 + $0xe0] sm:$0xf] %vm7629_vm4, %v9217_v31  ;;  %v6840_v37 = vadd.f32 %v14362_v19, %v6664_v36  ;;  %v4936_v47 = vmax.f32 %v16554_v46, %v4432_v59  ;;  %10576 = vmatprep.mubr.msk.bf16.mxu0 %vm11391_vm2, %v16147_v44  ;;  %10918 = vmatprep.mubr.msk.bf16.mxu1 %vm11391_vm2, %v16147_v44  ;;  %v11328_v36 = vld [vmem:[%s15846_s0 + $0x708] sm:$0xff]  }
 0x45a   :  { %v10478_v32 = vpop.f32.mrf.mxu0  ;;  %v10820_v58 = vpop.f32.mrf.mxu1  ;;  %v16566_v45 = vmax.f32 %v16564_v18, %v16565_v35  ;;  %v11329_v59 = vld [vmem:[%s15846_s0 + $0x9ac] sm:$0xff]  }
 0x45b   :  { %v9218_v3 = vpack.c.bf16 %v6840_v37, %v6840_v37  ;;  %v6665_v4 = vmax.f32 %v4936_v47, %v6161_v20  ;;  %v16567_v37 = vld [vmem:[#allocation78_spill] sm:$0xff]  ;;  %v16580_v18 = vld [vmem:[#allocation87_spill] sm:$0xff] }
 0x45c   :  { %v4435_v40 = vpop.f32.mrf.mxu0  ;;  %v6164_v10 = vpop.f32.mrf.mxu1  ;;  %v16569_v50 = vmax.f32 %v16567_v37, %v16568_v43 }
 0x45d   :  { %7687 = vst.msk [vmem:[%s15848_s3 + $0xe4] sm:$0xf] %vm7629_vm4, %v9218_v3  ;;  %v6841_v24 = vadd.f32 %v14362_v19, %v6665_v4  ;;  %v4937_v42 = vmax.f32 %v16557_v41, %v4435_v40 }
 0x45e   :  { %v10479_v8 = vpop.f32.mrf.mxu0  ;;  %v10821_v61 = vpop.f32.mrf.mxu1 }
 0x45f   :  { %v9219_v25 = vpack.c.bf16 %v6841_v24, %v6841_v24  ;;  %v6666_v63 = vmax.f32 %v4937_v42, %v6164_v10 }
 0x460   :  { %v4440_v11 = vpop.f32.mrf.mxu0  ;;  %10577 = vmatmul.mubr.msk.bf16.gmra.mxu0 %vm614_vm3, %v11324_v7  ;;  %v6169_v15 = vpop.f32.mrf.mxu1  ;;  %10919 = vmatmul.mubr.msk.bf16.gmra.mxu1 %vm614_vm3, %v11325_v0  ;;  %v16570_v7 = vld [vmem:[#allocation80_spill] sm:$0xff]  ;;  %v16571_v0 = vld [vmem:[#allocation81_spill] sm:$0xff] }
 0x461   :  { %7688 = vst.msk [vmem:[%s15848_s3 + $0xe8] sm:$0xf] %vm7629_vm4, %v9219_v25  ;;  %v6842_v1 = vadd.f32 %v14362_v19, %v6666_v63  ;;  %v4938_v23 = vmax.f32 %v16560_v22, %v4440_v11  ;;  %10580 = vmatprep.mubr.msk.bf16.mxu0 %vm11391_vm2, %v16147_v44  ;;  %10922 = vmatprep.mubr.msk.bf16.mxu1 %vm11391_vm2, %v16147_v44  ;;  %v11330_v63 = vld [vmem:[%s15846_s0 + $0x710] sm:$0xff]  }
 0x462   :  { %v10482_v55 = vpop.f32.mrf.mxu0  ;;  %v10824_v16 = vpop.f32.mrf.mxu1  ;;  %v16572_v24 = vmax.f32 %v16570_v7, %v16571_v0  ;;  %v11331_v11 = vld [vmem:[%s15846_s0 + $0x9b4] sm:$0xff]   ;;  %v16586_v7 = vld [vmem:[#allocation91_spill] sm:$0xff] }
 0x463   :  { %v9220_v14 = vpack.c.bf16 %v6842_v1, %v6842_v1  ;;  %v6667_v34 = vmax.f32 %v4938_v23, %v6169_v15  ;;  %v16573_v1 = vld [vmem:[#allocation82_spill] sm:$0xff] }
 0x464   :  { %v4443_v33 = vpop.f32.mrf.mxu0  ;;  %v6172_v29 = vpop.f32.mrf.mxu1  ;;  %v16575_v13 = vmax.f32 %v16573_v1, %v16574_v12 }
 0x465   :  { %7689 = vst.msk [vmem:[%s15848_s3 + $0xec] sm:$0xf] %vm7629_vm4, %v9220_v14  ;;  %v6843_v27 = vadd.f32 %v14362_v19, %v6667_v34  ;;  %v4939_v60 = vmax.f32 %v16563_v52, %v4443_v33 }
 0x466   :  { %v10483_v28 = vpop.f32.mrf.mxu0  ;;  %v10825_v30 = vpop.f32.mrf.mxu1 }
 0x467   :  { %v9221_v56 = vpack.c.bf16 %v6843_v27, %v6843_v27  ;;  %v6668_v57 = vmax.f32 %v4939_v60, %v6172_v29 }
 0x468   :  { %v4448_v26 = vpop.f32.mrf.mxu0  ;;  %10581 = vmatmul.mubr.msk.bf16.gmra.mxu0 %vm614_vm3, %v11326_v48  ;;  %v6177_v2 = vpop.f32.mrf.mxu1  ;;  %10923 = vmatmul.mubr.msk.bf16.gmra.mxu1 %vm614_vm3, %v11327_v49  ;;  %v16576_v48 = vld [vmem:[#allocation84_spill] sm:$0xff]  ;;  %v16577_v49 = vld [vmem:[#allocation85_spill] sm:$0xff] }
 0x469   :  { %7690 = vst.msk [vmem:[%s15848_s3 + $0xf0] sm:$0xf] %vm7629_vm4, %v9221_v56  ;;  %v6844_v17 = vadd.f32 %v14362_v19, %v6668_v57  ;;  %v4940_v51 = vmax.f32 %v16566_v45, %v4448_v26  ;;  %10584 = vmatprep.mubr.msk.bf16.mxu0 %vm11391_vm2, %v16147_v44  ;;  %10926 = vmatprep.mubr.msk.bf16.mxu1 %vm11391_vm2, %v16147_v44  ;;  %v11332_v57 = vld [vmem:[%s15846_s0 + $0x718] sm:$0xff]  }
 0x46a   :  { %v10486_v39 = vpop.f32.mrf.mxu0  ;;  %v10828_v53 = vpop.f32.mrf.mxu1  ;;  %v16578_v27 = vmax.f32 %v16576_v48, %v16577_v49  ;;  %v11333_v26 = vld [vmem:[%s15846_s0 + $0x9bc] sm:$0xff]   ;;  %v16592_v48 = vld [vmem:[#allocation95_spill] sm:$0xff] }
 0x46b   :  { %v9222_v54 = vpack.c.bf16 %v6844_v17, %v6844_v17  ;;  %v6669_v5 = vmax.f32 %v4940_v51, %v6177_v2  ;;  %v16579_v17 = vld [vmem:[#allocation86_spill] sm:$0xff] }
 0x46c   :  { %v4451_v6 = vpop.f32.mrf.mxu0  ;;  %v6180_v31 = vpop.f32.mrf.mxu1  ;;  %v16581_v35 = vmax.f32 %v16579_v17, %v16580_v18 }
 0x46d   :  { %7691 = vst.msk [vmem:[%s15848_s3 + $0xf4] sm:$0xf] %vm7629_vm4, %v9222_v54  ;;  %v6845_v20 = vadd.f32 %v14362_v19, %v6669_v5  ;;  %v4941_v46 = vmax.f32 %v16569_v50, %v4451_v6 }
 0x46e   :  { %v10487_v47 = vpop.f32.mrf.mxu0  ;;  %v10829_v32 = vpop.f32.mrf.mxu1 }
 0x46f   :  { %v9223_v58 = vpack.c.bf16 %v6845_v20, %v6845_v20  ;;  %v6670_v3 = vmax.f32 %v4941_v46, %v6180_v31 }
 0x470   :  { %v4456_v4 = vpop.f32.mrf.mxu0  ;;  %10585 = vmatmul.mubr.msk.bf16.gmra.mxu0 %vm614_vm3, %v11328_v36  ;;  %v6185_v40 = vpop.f32.mrf.mxu1  ;;  %10927 = vmatmul.mubr.msk.bf16.gmra.mxu1 %vm614_vm3, %v11329_v59  ;;  %v16582_v36 = vld [vmem:[#allocation88_spill] sm:$0xff]  ;;  %v16583_v59 = vld [vmem:[#allocation89_spill] sm:$0xff] }
 0x471   :  { %7692 = vst.msk [vmem:[%s15848_s3 + $0xf8] sm:$0xf] %vm7629_vm4, %v9223_v58  ;;  %v6846_v10 = vadd.f32 %v14362_v19, %v6670_v3  ;;  %v4942_v62 = vmax.f32 %v16572_v24, %v4456_v4  ;;  %10588 = vmatprep.mubr.msk.bf16.mxu0 %vm11391_vm2, %v16147_v44  ;;  %10930 = vmatprep.mubr.msk.bf16.mxu1 %vm11391_vm2, %v16147_v44  ;;  %v11334_v3 = vld [vmem:[%s15846_s0 + $0x720] sm:$0xff]  }
 0x472   :  { %v10490_v9 = vpop.f32.mrf.mxu0  ;;  %v10832_v41 = vpop.f32.mrf.mxu1  ;;  %v16584_v20 = vmax.f32 %v16582_v36, %v16583_v59  ;;  %v11335_v4 = vld [vmem:[%s15846_s0 + $0x9c4] sm:$0xff]  }
 0x473   :  { %v9224_v42 = vpack.c.bf16 %v6846_v10, %v6846_v10  ;;  %v6671_v8 = vmax.f32 %v4942_v62, %v6185_v40  ;;  %v16585_v10 = vld [vmem:[#allocation90_spill] sm:$0xff]  ;;  %v16598_v36 = vld [vmem:[#allocation99_spill] sm:$0xff] }
 0x474   :  { %v4459_v61 = vpop.f32.mrf.mxu0  ;;  %v6188_v25 = vpop.f32.mrf.mxu1  ;;  %v16587_v0 = vmax.f32 %v16585_v10, %v16586_v7 }
 0x475   :  { %7693 = vst.msk [vmem:[%s15848_s3 + $0xfc] sm:$0xf] %vm7629_vm4, %v9224_v42  ;;  %v6847_v15 = vadd.f32 %v14362_v19, %v6671_v8  ;;  %v4943_v22 = vmax.f32 %v16575_v13, %v4459_v61 }
 0x476   :  { %v10491_v23 = vpop.f32.mrf.mxu0  ;;  %v10833_v55 = vpop.f32.mrf.mxu1 }
 0x477   :  { %v9225_v16 = vpack.c.bf16 %v6847_v15, %v6847_v15  ;;  %v6672_v14 = vmax.f32 %v4943_v22, %v6188_v25 }
 0x478   :  { %v4464_v34 = vpop.f32.mrf.mxu0  ;;  %10589 = vmatmul.mubr.msk.bf16.gmra.mxu0 %vm614_vm3, %v11330_v63  ;;  %v6193_v33 = vpop.f32.mrf.mxu1  ;;  %10931 = vmatmul.mubr.msk.bf16.gmra.mxu1 %vm614_vm3, %v11331_v11  ;;  %v16588_v63 = vld [vmem:[#allocation92_spill] sm:$0xff]  ;;  %v16589_v11 = vld [vmem:[#allocation93_spill] sm:$0xff] }
 0x479   :  { %7694 = vst.msk [vmem:[%s15848_s3 + $0x100] sm:$0xf] %vm7629_vm4, %v9225_v16  ;;  %v6848_v29 = vadd.f32 %v14362_v19, %v6672_v14  ;;  %v4944_v38 = vmax.f32 %v16578_v27, %v4464_v34  ;;  %10592 = vmatprep.mubr.msk.bf16.mxu0 %vm11391_vm2, %v16147_v44  ;;  %10934 = vmatprep.mubr.msk.bf16.mxu1 %vm11391_vm2, %v16147_v44  ;;  %v11336_v14 = vld [vmem:[%s15846_s0 + $0x728] sm:$0xff]  }
 0x47a   :  { %v10494_v21 = vpop.f32.mrf.mxu0  ;;  %v10836_v52 = vpop.f32.mrf.mxu1  ;;  %v16590_v15 = vmax.f32 %v16588_v63, %v16589_v11  ;;  %v11337_v34 = vld [vmem:[%s15846_s0 + $0x9cc] sm:$0xff]  }
 0x47b   :  { %v9226_v60 = vpack.c.bf16 %v6848_v29, %v6848_v29  ;;  %v6673_v28 = vmax.f32 %v4944_v38, %v6193_v33  ;;  %v16591_v29 = vld [vmem:[#allocation94_spill] sm:$0xff]  ;;  %v16604_v63 = vld [vmem:[#allocation103_spill] sm:$0xff] }
 0x47c   :  { %v4467_v30 = vpop.f32.mrf.mxu0  ;;  %v6196_v56 = vpop.f32.mrf.mxu1  ;;  %v16593_v49 = vmax.f32 %v16591_v29, %v16592_v48 }
 0x47d   :  { %7695 = vst.msk [vmem:[%s15848_s3 + $0x104] sm:$0xf] %vm7629_vm4, %v9226_v60  ;;  %v6849_v2 = vadd.f32 %v14362_v19, %v6673_v28  ;;  %v4945_v45 = vmax.f32 %v16581_v35, %v4467_v30 }
 0x47e   :  { %v10495_v51 = vpop.f32.mrf.mxu0  ;;  %v10837_v39 = vpop.f32.mrf.mxu1 }
 0x47f   :  { %v9227_v53 = vpack.c.bf16 %v6849_v2, %v6849_v2  ;;  %v6674_v54 = vmax.f32 %v4945_v45, %v6196_v56 }
 0x480   :  { %v4472_v5 = vpop.f32.mrf.mxu0  ;;  %10593 = vmatmul.mubr.msk.bf16.gmra.mxu0 %vm614_vm3, %v11332_v57  ;;  %v6201_v6 = vpop.f32.mrf.mxu1  ;;  %10935 = vmatmul.mubr.msk.bf16.gmra.mxu1 %vm614_vm3, %v11333_v26  ;;  %v16594_v57 = vld [vmem:[#allocation96_spill] sm:$0xff]  ;;  %v16595_v26 = vld [vmem:[#allocation97_spill] sm:$0xff] }
 0x481   :  { %7696 = vst.msk [vmem:[%s15848_s3 + $0x108] sm:$0xf] %vm7629_vm4, %v9227_v53  ;;  %v6850_v31 = vadd.f32 %v14362_v19, %v6674_v54  ;;  %v4946_v37 = vmax.f32 %v16584_v20, %v4472_v5  ;;  %10596 = vmatprep.mubr.msk.bf16.mxu0 %vm11391_vm2, %v16147_v44  ;;  %10938 = vmatprep.mubr.msk.bf16.mxu1 %vm11391_vm2, %v16147_v44  ;;  %v11338_v54 = vld [vmem:[%s15846_s0 + $0x730] sm:$0xff]  }
 0x482   :  { %v10498_v43 = vpop.f32.mrf.mxu0  ;;  %v10840_v50 = vpop.f32.mrf.mxu1  ;;  %v16596_v2 = vmax.f32 %v16594_v57, %v16595_v26  ;;  %v11339_v5 = vld [vmem:[%s15846_s0 + $0x9d4] sm:$0xff]   ;;  %v16610_v57 = vld [vmem:[#allocation107_spill] sm:$0xff] }
 0x483   :  { %v9228_v46 = vpack.c.bf16 %v6850_v31, %v6850_v31  ;;  %v6675_v47 = vmax.f32 %v4946_v37, %v6201_v6  ;;  %v16597_v31 = vld [vmem:[#allocation98_spill] sm:$0xff] }
 0x484   :  { %v4475_v32 = vpop.f32.mrf.mxu0  ;;  %v6204_v58 = vpop.f32.mrf.mxu1  ;;  %v16599_v59 = vmax.f32 %v16597_v31, %v16598_v36 }
 0x485   :  { %7697 = vst.msk [vmem:[%s15848_s3 + $0x10c] sm:$0xf] %vm7629_vm4, %v9228_v46  ;;  %v6851_v40 = vadd.f32 %v14362_v19, %v6675_v47  ;;  %v4947_v24 = vmax.f32 %v16587_v0, %v4475_v32 }
 0x486   :  { %v10499_v62 = vpop.f32.mrf.mxu0  ;;  %v10841_v9 = vpop.f32.mrf.mxu1 }
 0x487   :  { %v9229_v41 = vpack.c.bf16 %v6851_v40, %v6851_v40  ;;  %v6676_v42 = vmax.f32 %v4947_v24, %v6204_v58 }
 0x488   :  { %v4480_v8 = vpop.f32.mrf.mxu0  ;;  %10597 = vmatmul.mubr.msk.bf16.gmra.mxu0 %vm614_vm3, %v11334_v3  ;;  %v6209_v61 = vpop.f32.mrf.mxu1  ;;  %10939 = vmatmul.mubr.msk.bf16.gmra.mxu1 %vm614_vm3, %v11335_v4  ;;  %v16600_v3 = vld [vmem:[#allocation100_spill] sm:$0xff]  ;;  %v16601_v4 = vld [vmem:[#allocation101_spill] sm:$0xff] }
 0x489   :  { %7698 = vst.msk [vmem:[%s15848_s3 + $0x110] sm:$0xf] %vm7629_vm4, %v9229_v41  ;;  %v6852_v25 = vadd.f32 %v14362_v19, %v6676_v42  ;;  %v4948_v1 = vmax.f32 %v16590_v15, %v4480_v8  ;;  %10600 = vmatprep.mubr.msk.bf16.mxu0 %vm11391_vm2, %v16147_v44  ;;  %10942 = vmatprep.mubr.msk.bf16.mxu1 %vm11391_vm2, %v16147_v44  ;;  %v11340_v42 = vld [vmem:[%s15846_s0 + $0x738] sm:$0xff]  }
 0x48a   :  { %v10502_v12 = vpop.f32.mrf.mxu0  ;;  %v10844_v13 = vpop.f32.mrf.mxu1  ;;  %v16602_v40 = vmax.f32 %v16600_v3, %v16601_v4  ;;  %v11341_v8 = vld [vmem:[%s15846_s0 + $0x9dc] sm:$0xff]   ;;  %v16616_v3 = vld [vmem:[#allocation111_spill] sm:$0xff] }
 0x48b   :  { %v9230_v22 = vpack.c.bf16 %v6852_v25, %v6852_v25  ;;  %v6677_v23 = vmax.f32 %v4948_v1, %v6209_v61  ;;  %v16603_v25 = vld [vmem:[#allocation102_spill] sm:$0xff] }
 0x48c   :  { %v4483_v55 = vpop.f32.mrf.mxu0  ;;  %v6212_v16 = vpop.f32.mrf.mxu1  ;;  %v16605_v11 = vmax.f32 %v16603_v25, %v16604_v63 }
 0x48d   :  { %7699 = vst.msk [vmem:[%s15848_s3 + $0x114] sm:$0xf] %vm7629_vm4, %v9230_v22  ;;  %v6853_v33 = vadd.f32 %v14362_v19, %v6677_v23  ;;  %v4949_v27 = vmax.f32 %v16593_v49, %v4483_v55 }
 0x48e   :  { %v10503_v38 = vpop.f32.mrf.mxu0  ;;  %v10845_v21 = vpop.f32.mrf.mxu1 }
 0x48f   :  { %v9231_v52 = vpack.c.bf16 %v6853_v33, %v6853_v33  ;;  %v6678_v60 = vmax.f32 %v4949_v27, %v6212_v16 }
 0x490   :  { %v4488_v28 = vpop.f32.mrf.mxu0  ;;  %10601 = vmatmul.mubr.msk.bf16.gmra.mxu0 %vm614_vm3, %v11336_v14  ;;  %v6217_v30 = vpop.f32.mrf.mxu1  ;;  %10943 = vmatmul.mubr.msk.bf16.gmra.mxu1 %vm614_vm3, %v11337_v34  ;;  %v16606_v14 = vld [vmem:[#allocation104_spill] sm:$0xff]  ;;  %v16607_v34 = vld [vmem:[#allocation105_spill] sm:$0xff] }
 0x491   :  { %7700 = vst.msk [vmem:[%s15848_s3 + $0x118] sm:$0xf] %vm7629_vm4, %v9231_v52  ;;  %v6854_v56 = vadd.f32 %v14362_v19, %v6678_v60  ;;  %v4950_v17 = vmax.f32 %v16596_v2, %v4488_v28  ;;  %10604 = vmatprep.mubr.msk.bf16.mxu0 %vm11391_vm2, %v16147_v44  ;;  %10946 = vmatprep.mubr.msk.bf16.mxu1 %vm11391_vm2, %v16147_v44  ;;  %v11342_v60 = vld [vmem:[%s15846_s0 + $0x740] sm:$0xff]  }
 0x492   :  { %v10506_v18 = vpop.f32.mrf.mxu0  ;;  %v10848_v35 = vpop.f32.mrf.mxu1  ;;  %v16608_v33 = vmax.f32 %v16606_v14, %v16607_v34  ;;  %v11343_v28 = vld [vmem:[%s15846_s0 + $0x9e4] sm:$0xff]  }
 0x493   :  { %v9232_v45 = vpack.c.bf16 %v6854_v56, %v6854_v56  ;;  %v6679_v51 = vmax.f32 %v4950_v17, %v6217_v30  ;;  %v16609_v56 = vld [vmem:[#allocation106_spill] sm:$0xff]  ;;  %v16622_v14 = vld [vmem:[#allocation115_spill] sm:$0xff] }
 0x494   :  { %v4491_v39 = vpop.f32.mrf.mxu0  ;;  %v6220_v53 = vpop.f32.mrf.mxu1  ;;  %v16611_v26 = vmax.f32 %v16609_v56, %v16610_v57 }
 0x495   :  { %7701 = vst.msk [vmem:[%s15848_s3 + $0x11c] sm:$0xf] %vm7629_vm4, %v9232_v45  ;;  %v6855_v6 = vadd.f32 %v14362_v19, %v6679_v51  ;;  %v4951_v20 = vmax.f32 %v16599_v59, %v4491_v39 }
 0x496   :  { %v10507_v37 = vpop.f32.mrf.mxu0  ;;  %v10849_v43 = vpop.f32.mrf.mxu1 }
 0x497   :  { %v9233_v50 = vpack.c.bf16 %v6855_v6, %v6855_v6  ;;  %v6680_v46 = vmax.f32 %v4951_v20, %v6220_v53 }
 0x498   :  { %v4496_v47 = vpop.f32.mrf.mxu0  ;;  %10605 = vmatmul.mubr.msk.bf16.gmra.mxu0 %vm614_vm3, %v11338_v54  ;;  %v6225_v32 = vpop.f32.mrf.mxu1  ;;  %10947 = vmatmul.mubr.msk.bf16.gmra.mxu1 %vm614_vm3, %v11339_v5  ;;  %v16612_v54 = vld [vmem:[#allocation108_spill] sm:$0xff]  ;;  %v16613_v5 = vld [vmem:[#allocation109_spill] sm:$0xff] }
 0x499   :  { %7702 = vst.msk [vmem:[%s15848_s3 + $0x120] sm:$0xf] %vm7629_vm4, %v9233_v50  ;;  %v6856_v58 = vadd.f32 %v14362_v19, %v6680_v46  ;;  %v4952_v10 = vmax.f32 %v16602_v40, %v4496_v47  ;;  %10608 = vmatprep.mubr.msk.bf16.mxu0 %vm11391_vm2, %v16147_v44  ;;  %10950 = vmatprep.mubr.msk.bf16.mxu1 %vm11391_vm2, %v16147_v44  ;;  %v11344_v46 = vld [vmem:[%s15846_s0 + $0x748] sm:$0xff]  }
 0x49a   :  { %v10510_v7 = vpop.f32.mrf.mxu0  ;;  %v10852_v0 = vpop.f32.mrf.mxu1  ;;  %v16614_v6 = vmax.f32 %v16612_v54, %v16613_v5  ;;  %v11345_v47 = vld [vmem:[%s15846_s0 + $0x9ec] sm:$0xff]  }
 0x49b   :  { %v9234_v24 = vpack.c.bf16 %v6856_v58, %v6856_v58  ;;  %v6681_v62 = vmax.f32 %v4952_v10, %v6225_v32  ;;  %v16615_v58 = vld [vmem:[#allocation110_spill] sm:$0xff]  ;;  %v16628_v54 = vld [vmem:[#allocation119_spill] sm:$0xff] }
 0x49c   :  { %v4499_v9 = vpop.f32.mrf.mxu0  ;;  %v6228_v41 = vpop.f32.mrf.mxu1  ;;  %v16617_v4 = vmax.f32 %v16615_v58, %v16616_v3 }
 0x49d   :  { %7703 = vst.msk [vmem:[%s15848_s3 + $0x124] sm:$0xf] %vm7629_vm4, %v9234_v24  ;;  %v6857_v61 = vadd.f32 %v14362_v19, %v6681_v62  ;;  %v4953_v15 = vmax.f32 %v16605_v11, %v4499_v9 }
 0x49e   :  { %v10511_v1 = vpop.f32.mrf.mxu0  ;;  %v10853_v12 = vpop.f32.mrf.mxu1 }
 0x49f   :  { %v9235_v13 = vpack.c.bf16 %v6857_v61, %v6857_v61  ;;  %v6682_v22 = vmax.f32 %v4953_v15, %v6228_v41 }
 0x4a0   :  { %v4504_v23 = vpop.f32.mrf.mxu0  ;;  %10609 = vmatmul.mubr.msk.bf16.gmra.mxu0 %vm614_vm3, %v11340_v42  ;;  %v6233_v55 = vpop.f32.mrf.mxu1  ;;  %10951 = vmatmul.mubr.msk.bf16.gmra.mxu1 %vm614_vm3, %v11341_v8  ;;  %v16618_v42 = vld [vmem:[#allocation112_spill] sm:$0xff]  ;;  %v16619_v8 = vld [vmem:[#allocation113_spill] sm:$0xff] }
 0x4a1   :  { %7704 = vst.msk [vmem:[%s15848_s3 + $0x128] sm:$0xf] %vm7629_vm4, %v9235_v13  ;;  %v6858_v16 = vadd.f32 %v14362_v19, %v6682_v22  ;;  %v4954_v29 = vmax.f32 %v16608_v33, %v4504_v23  ;;  %10612 = vmatprep.mubr.msk.bf16.mxu0 %vm11391_vm2, %v16147_v44  ;;  %10954 = vmatprep.mubr.msk.bf16.mxu1 %vm11391_vm2, %v16147_v44  ;;  %v11346_v22 = vld [vmem:[%s15846_s0 + $0x750] sm:$0xff]  }
 0x4a2   :  { %v10514_v48 = vpop.f32.mrf.mxu0  ;;  %v10856_v49 = vpop.f32.mrf.mxu1  ;;  %v16620_v61 = vmax.f32 %v16618_v42, %v16619_v8  ;;  %v11347_v23 = vld [vmem:[%s15846_s0 + $0x9f4] sm:$0xff]   ;;  %v16634_v42 = vld [vmem:[#allocation123_spill] sm:$0xff] }
 0x4a3   :  { %v9236_v27 = vpack.c.bf16 %v6858_v16, %v6858_v16  ;;  %v6683_v38 = vmax.f32 %v4954_v29, %v6233_v55  ;;  %v16621_v16 = vld [vmem:[#allocation114_spill] sm:$0xff] }
 0x4a4   :  { %v4507_v21 = vpop.f32.mrf.mxu0  ;;  %v6236_v52 = vpop.f32.mrf.mxu1  ;;  %v16623_v34 = vmax.f32 %v16621_v16, %v16622_v14 }
 0x4a5   :  { %7705 = vst.msk [vmem:[%s15848_s3 + $0x12c] sm:$0xf] %vm7629_vm4, %v9236_v27  ;;  %v6859_v30 = vadd.f32 %v14362_v19, %v6683_v38  ;;  %v4955_v2 = vmax.f32 %v16611_v26, %v4507_v21 }
 0x4a6   :  { %v10515_v17 = vpop.f32.mrf.mxu0  ;;  %v10857_v18 = vpop.f32.mrf.mxu1 }
 0x4a7   :  { %v9237_v35 = vpack.c.bf16 %v6859_v30, %v6859_v30  ;;  %v6684_v45 = vmax.f32 %v4955_v2, %v6236_v52 }
 0x4a8   :  { %v4512_v51 = vpop.f32.mrf.mxu0  ;;  %10613 = vmatmul.mubr.msk.bf16.gmra.mxu0 %vm614_vm3, %v11342_v60  ;;  %v6241_v39 = vpop.f32.mrf.mxu1  ;;  %10955 = vmatmul.mubr.msk.bf16.gmra.mxu1 %vm614_vm3, %v11343_v28  ;;  %v16624_v60 = vld [vmem:[#allocation116_spill] sm:$0xff]  ;;  %v16625_v28 = vld [vmem:[#allocation117_spill] sm:$0xff] }
 0x4a9   :  { %7706 = vst.msk [vmem:[%s15848_s3 + $0x130] sm:$0xf] %vm7629_vm4, %v9237_v35  ;;  %v6860_v53 = vadd.f32 %v14362_v19, %v6684_v45  ;;  %v4956_v31 = vmax.f32 %v16614_v6, %v4512_v51  ;;  %10616 = vmatprep.mubr.msk.bf16.mxu0 %vm11391_vm2, %v16147_v44  ;;  %10958 = vmatprep.mubr.msk.bf16.mxu1 %vm11391_vm2, %v16147_v44  ;;  %v11348_v45 = vld [vmem:[%s15846_s0 + $0x758] sm:$0xff]  }
 0x4aa   :  { %v10518_v36 = vpop.f32.mrf.mxu0  ;;  %v10860_v59 = vpop.f32.mrf.mxu1  ;;  %v16626_v30 = vmax.f32 %v16624_v60, %v16625_v28  ;;  %v11349_v51 = vld [vmem:[%s15846_s0 + $0x9fc] sm:$0xff]   ;;  %v16640_v60 = vld [vmem:[#allocation127_spill] sm:$0xff] }
 0x4ab   :  { %v9238_v20 = vpack.c.bf16 %v6860_v53, %v6860_v53  ;;  %v6685_v37 = vmax.f32 %v4956_v31, %v6241_v39  ;;  %v16627_v53 = vld [vmem:[#allocation118_spill] sm:$0xff] }
 0x4ac   :  { %v4515_v43 = vpop.f32.mrf.mxu0  ;;  %v6244_v50 = vpop.f32.mrf.mxu1  ;;  %v16629_v5 = vmax.f32 %v16627_v53, %v16628_v54 }
 0x4ad   :  { %7707 = vst.msk [vmem:[%s15848_s3 + $0x134] sm:$0xf] %vm7629_vm4, %v9238_v20  ;;  %v6861_v32 = vadd.f32 %v14362_v19, %v6685_v37  ;;  %v4957_v40 = vmax.f32 %v16617_v4, %v4515_v43 }
 0x4ae   :  { %v10519_v10 = vpop.f32.mrf.mxu0  ;;  %v10861_v7 = vpop.f32.mrf.mxu1 }
 0x4af   :  { %v9239_v0 = vpack.c.bf16 %v6861_v32, %v6861_v32  ;;  %v6686_v24 = vmax.f32 %v4957_v40, %v6244_v50 }
 0x4b0   :  { %v4520_v62 = vpop.f32.mrf.mxu0  ;;  %10617 = vmatmul.mubr.msk.bf16.gmra.mxu0 %vm614_vm3, %v11344_v46  ;;  %v6249_v9 = vpop.f32.mrf.mxu1  ;;  %10959 = vmatmul.mubr.msk.bf16.gmra.mxu1 %vm614_vm3, %v11345_v47  ;;  %v16630_v46 = vld [vmem:[#allocation120_spill] sm:$0xff]  ;;  %v16631_v47 = vld [vmem:[#allocation121_spill] sm:$0xff] }
 0x4b1   :  { %7708 = vst.msk [vmem:[%s15848_s3 + $0x138] sm:$0xf] %vm7629_vm4, %v9239_v0  ;;  %v6862_v41 = vadd.f32 %v14362_v19, %v6686_v24  ;;  %v4958_v25 = vmax.f32 %v16620_v61, %v4520_v62  ;;  %10620 = vmatprep.mubr.msk.bf16.mxu0 %vm11391_vm2, %v16147_v44  ;;  %10962 = vmatprep.mubr.msk.bf16.mxu1 %vm11391_vm2, %v16147_v44  ;;  %v11350_v24 = vld [vmem:[%s15846_s0 + $0x760] sm:$0xff]  }
 0x4b2   :  { %v10522_v63 = vpop.f32.mrf.mxu0  ;;  %v10864_v11 = vpop.f32.mrf.mxu1  ;;  %v16632_v32 = vmax.f32 %v16630_v46, %v16631_v47  ;;  %v11351_v62 = vld [vmem:[%s15846_s0 + $0xa04] sm:$0xff]  }
 0x4b3   :  { %v9240_v15 = vpack.c.bf16 %v6862_v41, %v6862_v41  ;;  %v6687_v1 = vmax.f32 %v4958_v25, %v6249_v9  ;;  %v16633_v41 = vld [vmem:[#allocation122_spill] sm:$0xff]  ;;  %v16646_v46 = vld [vmem:[#allocation131_spill] sm:$0xff] }
 0x4b4   :  { %v4523_v12 = vpop.f32.mrf.mxu0  ;;  %v6252_v13 = vpop.f32.mrf.mxu1  ;;  %v16635_v8 = vmax.f32 %v16633_v41, %v16634_v42 }
 0x4b5   :  { %7709 = vst.msk [vmem:[%s15848_s3 + $0x13c] sm:$0xf] %vm7629_vm4, %v9240_v15  ;;  %v6863_v55 = vadd.f32 %v14362_v19, %v6687_v1  ;;  %v4959_v33 = vmax.f32 %v16623_v34, %v4523_v12 }
 0x4b6   :  { %v10523_v29 = vpop.f32.mrf.mxu0  ;;  %v10865_v48 = vpop.f32.mrf.mxu1 }
 0x4b7   :  { %v9241_v49 = vpack.c.bf16 %v6863_v55, %v6863_v55  ;;  %v6688_v27 = vmax.f32 %v4959_v33, %v6252_v13 }
 0x4b8   :  { %v4528_v38 = vpop.f32.mrf.mxu0  ;;  %10621 = vmatmul.mubr.msk.bf16.gmra.mxu0 %vm614_vm3, %v11346_v22  ;;  %v6257_v21 = vpop.f32.mrf.mxu1  ;;  %10963 = vmatmul.mubr.msk.bf16.gmra.mxu1 %vm614_vm3, %v11347_v23  ;;  %v16636_v22 = vld [vmem:[#allocation124_spill] sm:$0xff]  ;;  %v16637_v23 = vld [vmem:[#allocation125_spill] sm:$0xff] }
 0x4b9   :  { %7710 = vst.msk [vmem:[%s15848_s3 + $0x140] sm:$0xf] %vm7629_vm4, %v9241_v49  ;;  %v6864_v52 = vadd.f32 %v14362_v19, %v6688_v27  ;;  %v4960_v56 = vmax.f32 %v16626_v30, %v4528_v38  ;;  %10624 = vmatprep.mubr.msk.bf16.mxu0 %vm11391_vm2, %v16147_v44  ;;  %10966 = vmatprep.mubr.msk.bf16.mxu1 %vm11391_vm2, %v16147_v44  ;;  %v11352_v27 = vld [vmem:[%s15846_s0 + $0x768] sm:$0xff]  }
 0x4ba   :  { %v10526_v57 = vpop.f32.mrf.mxu0  ;;  %v10868_v26 = vpop.f32.mrf.mxu1  ;;  %v16638_v55 = vmax.f32 %v16636_v22, %v16637_v23  ;;  %v11353_v38 = vld [vmem:[%s15846_s0 + $0xa0c] sm:$0xff]  }
 0x4bb   :  { %v9242_v2 = vpack.c.bf16 %v6864_v52, %v6864_v52  ;;  %v6689_v17 = vmax.f32 %v4960_v56, %v6257_v21  ;;  %v16639_v52 = vld [vmem:[#allocation126_spill] sm:$0xff]  ;;  %v16652_v22 = vld [vmem:[#allocation135_spill] sm:$0xff] }
 0x4bc   :  { %v4531_v18 = vpop.f32.mrf.mxu0  ;;  %v6260_v35 = vpop.f32.mrf.mxu1  ;;  %v16641_v28 = vmax.f32 %v16639_v52, %v16640_v60 }
 0x4bd   :  { %7711 = vst.msk [vmem:[%s15848_s3 + $0x144] sm:$0xf] %vm7629_vm4, %v9242_v2  ;;  %v6865_v39 = vadd.f32 %v14362_v19, %v6689_v17  ;;  %v4961_v6 = vmax.f32 %v16629_v5, %v4531_v18 }
 0x4be   :  { %v10527_v31 = vpop.f32.mrf.mxu0  ;;  %v10869_v36 = vpop.f32.mrf.mxu1 }
 0x4bf   :  { %v9243_v59 = vpack.c.bf16 %v6865_v39, %v6865_v39  ;;  %v6690_v20 = vmax.f32 %v4961_v6, %v6260_v35 }
 0x4c0   :  { %v4536_v37 = vpop.f32.mrf.mxu0  ;;  %10625 = vmatmul.mubr.msk.bf16.gmra.mxu0 %vm614_vm3, %v11348_v45  ;;  %v6265_v43 = vpop.f32.mrf.mxu1  ;;  %10967 = vmatmul.mubr.msk.bf16.gmra.mxu1 %vm614_vm3, %v11349_v51  ;;  %v16642_v45 = vld [vmem:[#allocation128_spill] sm:$0xff]  ;;  %v16643_v51 = vld [vmem:[#allocation129_spill] sm:$0xff] }
 0x4c1   :  { %7712 = vst.msk [vmem:[%s15848_s3 + $0x148] sm:$0xf] %vm7629_vm4, %v9243_v59  ;;  %v6866_v50 = vadd.f32 %v14362_v19, %v6690_v20  ;;  %v4962_v58 = vmax.f32 %v16632_v32, %v4536_v37  ;;  %10628 = vmatprep.mubr.msk.bf16.mxu0 %vm11391_vm2, %v16147_v44  ;;  %10970 = vmatprep.mubr.msk.bf16.mxu1 %vm11391_vm2, %v16147_v44  ;;  %v11354_v20 = vld [vmem:[%s15846_s0 + $0x770] sm:$0xff]  }
 0x4c2   :  { %v10530_v3 = vpop.f32.mrf.mxu0  ;;  %v10872_v4 = vpop.f32.mrf.mxu1  ;;  %v16644_v39 = vmax.f32 %v16642_v45, %v16643_v51  ;;  %v11355_v37 = vld [vmem:[%s15846_s0 + $0xa14] sm:$0xff]   ;;  %v16658_v45 = vld [vmem:[#allocation139_spill] sm:$0xff] }
 0x4c3   :  { %v9244_v40 = vpack.c.bf16 %v6866_v50, %v6866_v50  ;;  %v6691_v10 = vmax.f32 %v4962_v58, %v6265_v43  ;;  %v16645_v50 = vld [vmem:[#allocation130_spill] sm:$0xff] }
 0x4c4   :  { %v4539_v7 = vpop.f32.mrf.mxu0  ;;  %v6268_v0 = vpop.f32.mrf.mxu1  ;;  %v16647_v47 = vmax.f32 %v16645_v50, %v16646_v46 }
 0x4c5   :  { %7713 = vst.msk [vmem:[%s15848_s3 + $0x14c] sm:$0xf] %vm7629_vm4, %v9244_v40  ;;  %v6867_v9 = vadd.f32 %v14362_v19, %v6691_v10  ;;  %v4963_v61 = vmax.f32 %v16635_v8, %v4539_v7  ;;  %v14965_v19 = vld [vmem:[%s15847_s2] ss:$0 sm:$0xff] }
 0x4c6   :  { %v10531_v25 = vpop.f32.mrf.mxu0  ;;  %v10873_v63 = vpop.f32.mrf.mxu1 }
 0x4c7   :  { %v9245_v11 = vpack.c.bf16 %v6867_v9, %v6867_v9  ;;  %v6692_v15 = vmax.f32 %v4963_v61, %v6268_v0 }
 0x4c8   :  { %v4544_v1 = vpop.f32.mrf.mxu0  ;;  %10629 = vmatmul.mubr.msk.bf16.gmra.mxu0 %vm614_vm3, %v11350_v24  ;;  %v6273_v12 = vpop.f32.mrf.mxu1  ;;  %10971 = vmatmul.mubr.msk.bf16.gmra.mxu1 %vm614_vm3, %v11351_v62  ;;  %v16648_v24 = vld [vmem:[#allocation132_spill] sm:$0xff]  ;;  %v16649_v62 = vld [vmem:[#allocation133_spill] sm:$0xff] }
 0x4c9   :  { %7714 = vst.msk [vmem:[%s15848_s3 + $0x150] sm:$0xf] %vm7629_vm4, %v9245_v11  ;;  %v6868_v13 = vadd.f32 %v14965_v19, %v6692_v15  ;;  %v4964_v16 = vmax.f32 %v16638_v55, %v4544_v1  ;;  %10632 = vmatprep.mubr.msk.bf16.mxu0 %vm11391_vm2, %v16147_v44  ;;  %10974 = vmatprep.mubr.msk.bf16.mxu1 %vm11391_vm2, %v16147_v44  ;;  %v11356_v15 = vld [vmem:[%s15846_s0 + $0x778] sm:$0xff]  }
 0x4ca   :  { %v10534_v14 = vpop.f32.mrf.mxu0  ;;  %v10876_v34 = vpop.f32.mrf.mxu1  ;;  %v16650_v9 = vmax.f32 %v16648_v24, %v16649_v62  ;;  %v11357_v1 = vld [vmem:[%s15846_s0 + $0xa1c] sm:$0xff]   ;;  %v16664_v24 = vld [vmem:[#allocation143_spill] sm:$0xff] }
 0x4cb   :  { %v9246_v33 = vpack.c.bf16 %v6868_v13, %v6868_v13  ;;  %v6693_v29 = vmax.f32 %v4964_v16, %v6273_v12  ;;  %v16651_v13 = vld [vmem:[#allocation134_spill] sm:$0xff] }
 0x4cc   :  { %v4547_v48 = vpop.f32.mrf.mxu0  ;;  %v6276_v49 = vpop.f32.mrf.mxu1  ;;  %v16653_v23 = vmax.f32 %v16651_v13, %v16652_v22 }
 0x4cd   :  { %7715 = vst.msk [vmem:[%s15848_s3 + $0x154] sm:$0xf] %vm7629_vm4, %v9246_v33  ;;  %v6869_v21 = vadd.f32 %v14965_v19, %v6693_v29  ;;  %v4965_v30 = vmax.f32 %v16641_v28, %v4547_v48 }
 0x4ce   :  { %v10535_v56 = vpop.f32.mrf.mxu0  ;;  %v10877_v57 = vpop.f32.mrf.mxu1 }
 0x4cf   :  { %v9247_v26 = vpack.c.bf16 %v6869_v21, %v6869_v21  ;;  %v6694_v2 = vmax.f32 %v4965_v30, %v6276_v49 }
 0x4d0   :  { %v4552_v17 = vpop.f32.mrf.mxu0  ;;  %10633 = vmatmul.mubr.msk.bf16.gmra.mxu0 %vm614_vm3, %v11352_v27  ;;  %v6281_v18 = vpop.f32.mrf.mxu1  ;;  %10975 = vmatmul.mubr.msk.bf16.gmra.mxu1 %vm614_vm3, %v11353_v38  ;;  %v16654_v27 = vld [vmem:[#allocation136_spill] sm:$0xff]  ;;  %v16655_v38 = vld [vmem:[#allocation137_spill] sm:$0xff] }
 0x4d1   :  { %7716 = vst.msk [vmem:[%s15848_s3 + $0x158] sm:$0xf] %vm7629_vm4, %v9247_v26  ;;  %v6870_v35 = vadd.f32 %v14965_v19, %v6694_v2  ;;  %v4966_v53 = vmax.f32 %v16644_v39, %v4552_v17  ;;  %10636 = vmatprep.mubr.msk.bf16.mxu0 %vm11391_vm2, %v16147_v44  ;;  %10978 = vmatprep.mubr.msk.bf16.mxu1 %vm11391_vm2, %v16147_v44  ;;  %v11358_v2 = vld [vmem:[%s15846_s0 + $0x780] sm:$0xff]  }
 0x4d2   :  { %v10538_v54 = vpop.f32.mrf.mxu0  ;;  %v10880_v5 = vpop.f32.mrf.mxu1  ;;  %v16656_v21 = vmax.f32 %v16654_v27, %v16655_v38  ;;  %v11359_v17 = vld [vmem:[%s15846_s0 + $0xa24] sm:$0xff]  }
 0x4d3   :  { %v9248_v6 = vpack.c.bf16 %v6870_v35, %v6870_v35  ;;  %v6695_v31 = vmax.f32 %v4966_v53, %v6281_v18  ;;  %v16657_v35 = vld [vmem:[#allocation138_spill] sm:$0xff]  ;;  %v16670_v27 = vld [vmem:[#allocation147_spill] sm:$0xff] }
 0x4d4   :  { %v4555_v36 = vpop.f32.mrf.mxu0  ;;  %v6284_v59 = vpop.f32.mrf.mxu1  ;;  %v16659_v51 = vmax.f32 %v16657_v35, %v16658_v45 }
 0x4d5   :  { %7717 = vst.msk [vmem:[%s15848_s3 + $0x15c] sm:$0xf] %vm7629_vm4, %v9248_v6  ;;  %v6871_v43 = vadd.f32 %v14965_v19, %v6695_v31  ;;  %v4967_v32 = vmax.f32 %v16647_v47, %v4555_v36 }
 0x4d6   :  { %v10539_v58 = vpop.f32.mrf.mxu0  ;;  %v10881_v3 = vpop.f32.mrf.mxu1 }
 0x4d7   :  { %v9249_v4 = vpack.c.bf16 %v6871_v43, %v6871_v43  ;;  %v6696_v40 = vmax.f32 %v4967_v32, %v6284_v59 }
 0x4d8   :  { %v4560_v10 = vpop.f32.mrf.mxu0  ;;  %10637 = vmatmul.mubr.msk.bf16.gmra.mxu0 %vm614_vm3, %v11354_v20  ;;  %v6289_v7 = vpop.f32.mrf.mxu1  ;;  %10979 = vmatmul.mubr.msk.bf16.gmra.mxu1 %vm614_vm3, %v11355_v37  ;;  %v16660_v20 = vld [vmem:[#allocation140_spill] sm:$0xff]  ;;  %v16661_v37 = vld [vmem:[#allocation141_spill] sm:$0xff] }
 0x4d9   :  { %7718 = vst.msk [vmem:[%s15848_s3 + $0x160] sm:$0xf] %vm7629_vm4, %v9249_v4  ;;  %v6872_v0 = vadd.f32 %v14965_v19, %v6696_v40  ;;  %v4968_v41 = vmax.f32 %v16650_v9, %v4560_v10  ;;  %10640 = vmatprep.mubr.msk.bf16.mxu0 %vm11391_vm2, %v16147_v44  ;;  %10982 = vmatprep.mubr.msk.bf16.mxu1 %vm11391_vm2, %v16147_v44  ;;  %v11360_v40 = vld [vmem:[%s15846_s0 + $0x788] sm:$0xff]  }
 0x4da   :  { %v10542_v42 = vpop.f32.mrf.mxu0  ;;  %v10884_v8 = vpop.f32.mrf.mxu1  ;;  %v16662_v43 = vmax.f32 %v16660_v20, %v16661_v37  ;;  %v11361_v10 = vld [vmem:[%s15846_s0 + $0xa2c] sm:$0xff]  }
 0x4db   :  { %v9250_v61 = vpack.c.bf16 %v6872_v0, %v6872_v0  ;;  %v6697_v25 = vmax.f32 %v4968_v41, %v6289_v7  ;;  %v16663_v0 = vld [vmem:[#allocation142_spill] sm:$0xff]  ;;  %v16676_v20 = vld [vmem:[#allocation151_spill] sm:$0xff] }
 0x4dc   :  { %v4563_v63 = vpop.f32.mrf.mxu0  ;;  %v6292_v11 = vpop.f32.mrf.mxu1  ;;  %v16665_v62 = vmax.f32 %v16663_v0, %v16664_v24 }
 0x4dd   :  { %7719 = vst.msk [vmem:[%s15848_s3 + $0x164] sm:$0xf] %vm7629_vm4, %v9250_v61  ;;  %v6873_v12 = vadd.f32 %v14965_v19, %v6697_v25  ;;  %v4969_v55 = vmax.f32 %v16653_v23, %v4563_v63 }
 0x4de   :  { %v10543_v16 = vpop.f32.mrf.mxu0  ;;  %v10885_v14 = vpop.f32.mrf.mxu1 }
 0x4df   :  { %v9251_v34 = vpack.c.bf16 %v6873_v12, %v6873_v12  ;;  %v6698_v33 = vmax.f32 %v4969_v55, %v6292_v11 }
 0x4e0   :  { %v4568_v29 = vpop.f32.mrf.mxu0  ;;  %10641 = vmatmul.mubr.msk.bf16.gmra.mxu0 %vm614_vm3, %v11356_v15  ;;  %v6297_v48 = vpop.f32.mrf.mxu1  ;;  %10983 = vmatmul.mubr.msk.bf16.gmra.mxu1 %vm614_vm3, %v11357_v1  ;;  %v16666_v15 = vld [vmem:[#allocation144_spill] sm:$0xff]  ;;  %v16667_v1 = vld [vmem:[#allocation145_spill] sm:$0xff] }
 0x4e1   :  { %7720 = vst.msk [vmem:[%s15848_s3 + $0x168] sm:$0xf] %vm7629_vm4, %v9251_v34  ;;  %v6874_v49 = vadd.f32 %v14965_v19, %v6698_v33  ;;  %v4970_v52 = vmax.f32 %v16656_v21, %v4568_v29  ;;  %10644 = vmatprep.mubr.msk.bf16.mxu0 %vm11391_vm2, %v16147_v44  ;;  %10986 = vmatprep.mubr.msk.bf16.mxu1 %vm11391_vm2, %v16147_v44  ;;  %v11362_v33 = vld [vmem:[%s15846_s0 + $0x790] sm:$0xff]  }
 0x4e2   :  { %v10546_v60 = vpop.f32.mrf.mxu0  ;;  %v10888_v28 = vpop.f32.mrf.mxu1  ;;  %v16668_v12 = vmax.f32 %v16666_v15, %v16667_v1  ;;  %v11363_v29 = vld [vmem:[%s15846_s0 + $0xa34] sm:$0xff]   ;;  %v16682_v15 = vld [vmem:[#allocation155_spill] sm:$0xff] }
 0x4e3   :  { %v9252_v30 = vpack.c.bf16 %v6874_v49, %v6874_v49  ;;  %v6699_v56 = vmax.f32 %v4970_v52, %v6297_v48  ;;  %v16669_v49 = vld [vmem:[#allocation146_spill] sm:$0xff] }
 0x4e4   :  { %v4571_v57 = vpop.f32.mrf.mxu0  ;;  %v6300_v26 = vpop.f32.mrf.mxu1  ;;  %v16671_v38 = vmax.f32 %v16669_v49, %v16670_v27 }
 0x4e5   :  { %7721 = vst.msk [vmem:[%s15848_s3 + $0x16c] sm:$0xf] %vm7629_vm4, %v9252_v30  ;;  %v6875_v18 = vadd.f32 %v14965_v19, %v6699_v56  ;;  %v4971_v39 = vmax.f32 %v16659_v51, %v4571_v57 }
 0x4e6   :  { %v10547_v53 = vpop.f32.mrf.mxu0  ;;  %v10889_v54 = vpop.f32.mrf.mxu1 }
 0x4e7   :  { %v9253_v5 = vpack.c.bf16 %v6875_v18, %v6875_v18  ;;  %v6700_v6 = vmax.f32 %v4971_v39, %v6300_v26 }
 0x4e8   :  { %v4576_v31 = vpop.f32.mrf.mxu0  ;;  %10645 = vmatmul.mubr.msk.bf16.gmra.mxu0 %vm614_vm3, %v11358_v2  ;;  %v6305_v36 = vpop.f32.mrf.mxu1  ;;  %10987 = vmatmul.mubr.msk.bf16.gmra.mxu1 %vm614_vm3, %v11359_v17  ;;  %v16672_v2 = vld [vmem:[#allocation148_spill] sm:$0xff]  ;;  %v16673_v17 = vld [vmem:[#allocation149_spill] sm:$0xff] }
 0x4e9   :  { %7722 = vst.msk [vmem:[%s15848_s3 + $0x170] sm:$0xf] %vm7629_vm4, %v9253_v5  ;;  %v6876_v59 = vadd.f32 %v14965_v19, %v6700_v6  ;;  %v4972_v50 = vmax.f32 %v16662_v43, %v4576_v31  ;;  %10648 = vmatprep.mubr.msk.bf16.mxu0 %vm11391_vm2, %v16147_v44  ;;  %10990 = vmatprep.mubr.msk.bf16.mxu1 %vm11391_vm2, %v16147_v44  ;;  %v11364_v6 = vld [vmem:[%s15846_s0 + $0x798] sm:$0xff]  }
 0x4ea   :  { %v10550_v46 = vpop.f32.mrf.mxu0  ;;  %v10892_v47 = vpop.f32.mrf.mxu1  ;;  %v16674_v18 = vmax.f32 %v16672_v2, %v16673_v17  ;;  %v11365_v31 = vld [vmem:[%s15846_s0 + $0xa3c] sm:$0xff]   ;;  %v16688_v2 = vld [vmem:[#allocation159_spill] sm:$0xff] }
 0x4eb   :  { %v9254_v32 = vpack.c.bf16 %v6876_v59, %v6876_v59  ;;  %v6701_v58 = vmax.f32 %v4972_v50, %v6305_v36  ;;  %v16675_v59 = vld [vmem:[#allocation150_spill] sm:$0xff] }
 0x4ec   :  { %v4579_v3 = vpop.f32.mrf.mxu0  ;;  %v6308_v4 = vpop.f32.mrf.mxu1  ;;  %v16677_v37 = vmax.f32 %v16675_v59, %v16676_v20 }
 0x4ed   :  { %7723 = vst.msk [vmem:[%s15848_s3 + $0x174] sm:$0xf] %vm7629_vm4, %v9254_v32  ;;  %v6877_v7 = vadd.f32 %v14965_v19, %v6701_v58  ;;  %v4973_v9 = vmax.f32 %v16665_v62, %v4579_v3 }
 0x4ee   :  { %v10551_v41 = vpop.f32.mrf.mxu0  ;;  %v10893_v42 = vpop.f32.mrf.mxu1 }
 0x4ef   :  { %v9255_v8 = vpack.c.bf16 %v6877_v7, %v6877_v7  ;;  %v6702_v61 = vmax.f32 %v4973_v9, %v6308_v4 }
 0x4f0   :  { %v4584_v25 = vpop.f32.mrf.mxu0  ;;  %10649 = vmatmul.mubr.msk.bf16.gmra.mxu0 %vm614_vm3, %v11360_v40  ;;  %v6313_v63 = vpop.f32.mrf.mxu1  ;;  %10991 = vmatmul.mubr.msk.bf16.gmra.mxu1 %vm614_vm3, %v11361_v10  ;;  %v16678_v40 = vld [vmem:[#allocation152_spill] sm:$0xff]  ;;  %v16679_v10 = vld [vmem:[#allocation153_spill] sm:$0xff] }
 0x4f1   :  { %7724 = vst.msk [vmem:[%s15848_s3 + $0x178] sm:$0xf] %vm7629_vm4, %v9255_v8  ;;  %v6878_v11 = vadd.f32 %v14965_v19, %v6702_v61  ;;  %v4974_v13 = vmax.f32 %v16668_v12, %v4584_v25  ;;  %10652 = vmatprep.mubr.msk.bf16.mxu0 %vm11391_vm2, %v16147_v44  ;;  %10994 = vmatprep.mubr.msk.bf16.mxu1 %vm11391_vm2, %v16147_v44  ;;  %v11366_v61 = vld [vmem:[%s15846_s0 + $0x7a0] sm:$0xff]  }
 0x4f2   :  { %v10554_v22 = vpop.f32.mrf.mxu0  ;;  %v10896_v23 = vpop.f32.mrf.mxu1  ;;  %v16680_v7 = vmax.f32 %v16678_v40, %v16679_v10  ;;  %v11367_v25 = vld [vmem:[%s15846_s0 + $0xa44] sm:$0xff]  }
 0x4f3   :  { %v9256_v55 = vpack.c.bf16 %v6878_v11, %v6878_v11  ;;  %v6703_v16 = vmax.f32 %v4974_v13, %v6313_v63  ;;  %v16681_v11 = vld [vmem:[#allocation154_spill] sm:$0xff]  ;;  %v16694_v40 = vld [vmem:[#allocation163_spill] sm:$0xff] }
 0x4f4   :  { %v4587_v14 = vpop.f32.mrf.mxu0  ;;  %v6316_v34 = vpop.f32.mrf.mxu1  ;;  %v16683_v1 = vmax.f32 %v16681_v11, %v16682_v15 }
 0x4f5   :  { %7725 = vst.msk [vmem:[%s15848_s3 + $0x17c] sm:$0xf] %vm7629_vm4, %v9256_v55  ;;  %v6879_v48 = vadd.f32 %v14965_v19, %v6703_v16  ;;  %v4975_v21 = vmax.f32 %v16671_v38, %v4587_v14 }
 0x4f6   :  { %v10555_v52 = vpop.f32.mrf.mxu0  ;;  %v10897_v60 = vpop.f32.mrf.mxu1 }
 0x4f7   :  { %v9257_v28 = vpack.c.bf16 %v6879_v48, %v6879_v48  ;;  %v6704_v30 = vmax.f32 %v4975_v21, %v6316_v34 }
 0x4f8   :  { %v4592_v56 = vpop.f32.mrf.mxu0  ;;  %10653 = vmatmul.mubr.msk.bf16.gmra.mxu0 %vm614_vm3, %v11362_v33  ;;  %v6321_v57 = vpop.f32.mrf.mxu1  ;;  %10995 = vmatmul.mubr.msk.bf16.gmra.mxu1 %vm614_vm3, %v11363_v29  ;;  %v16684_v33 = vld [vmem:[#allocation156_spill] sm:$0xff]  ;;  %v16685_v29 = vld [vmem:[#allocation157_spill] sm:$0xff] }
 0x4f9   :  { %7726 = vst.msk [vmem:[%s15848_s3 + $0x180] sm:$0xf] %vm7629_vm4, %v9257_v28  ;;  %v6880_v26 = vadd.f32 %v14965_v19, %v6704_v30  ;;  %v4976_v35 = vmax.f32 %v16674_v18, %v4592_v56  ;;  %10656 = vmatprep.mubr.msk.bf16.mxu0 %vm11391_vm2, %v16147_v44  ;;  %10998 = vmatprep.mubr.msk.bf16.mxu1 %vm11391_vm2, %v16147_v44  ;;  %v11368_v30 = vld [vmem:[%s15846_s0 + $0x7a8] sm:$0xff]  }
 0x4fa   :  { %v10558_v45 = vpop.f32.mrf.mxu0  ;;  %v10900_v51 = vpop.f32.mrf.mxu1  ;;  %v16686_v48 = vmax.f32 %v16684_v33, %v16685_v29  ;;  %v11369_v56 = vld [vmem:[%s15846_s0 + $0xa4c] sm:$0xff]  }
 0x4fb   :  { %v9258_v39 = vpack.c.bf16 %v6880_v26, %v6880_v26  ;;  %v6705_v53 = vmax.f32 %v4976_v35, %v6321_v57  ;;  %v16687_v26 = vld [vmem:[#allocation158_spill] sm:$0xff]  ;;  %v16700_v33 = vld [vmem:[#allocation167_spill] sm:$0xff] }
 0x4fc   :  { %v4595_v54 = vpop.f32.mrf.mxu0  ;;  %v6324_v5 = vpop.f32.mrf.mxu1  ;;  %v16689_v17 = vmax.f32 %v16687_v26, %v16688_v2 }
 0x4fd   :  { %7727 = vst.msk [vmem:[%s15848_s3 + $0x184] sm:$0xf] %vm7629_vm4, %v9258_v39  ;;  %v6881_v36 = vadd.f32 %v14965_v19, %v6705_v53  ;;  %v4977_v43 = vmax.f32 %v16677_v37, %v4595_v54 }
 0x4fe   :  { %v10559_v50 = vpop.f32.mrf.mxu0  ;;  %v10901_v46 = vpop.f32.mrf.mxu1 }
 0x4ff   :  { %v9259_v47 = vpack.c.bf16 %v6881_v36, %v6881_v36  ;;  %v6706_v32 = vmax.f32 %v4977_v43, %v6324_v5 }
 0x500   :  { %v4600_v58 = vpop.f32.mrf.mxu0  ;;  %10657 = vmatmul.mubr.msk.bf16.gmra.mxu0 %vm614_vm3, %v11364_v6  ;;  %v6329_v3 = vpop.f32.mrf.mxu1  ;;  %10999 = vmatmul.mubr.msk.bf16.gmra.mxu1 %vm614_vm3, %v11365_v31  ;;  %v16690_v6 = vld [vmem:[#allocation160_spill] sm:$0xff]  ;;  %v16691_v31 = vld [vmem:[#allocation161_spill] sm:$0xff] }
 0x501   :  { %7728 = vst.msk [vmem:[%s15848_s3 + $0x188] sm:$0xf] %vm7629_vm4, %v9259_v47  ;;  %v6882_v4 = vadd.f32 %v14965_v19, %v6706_v32  ;;  %v4978_v0 = vmax.f32 %v16680_v7, %v4600_v58  ;;  %10660 = vmatprep.mubr.msk.bf16.mxu0 %vm11391_vm2, %v16147_v44  ;;  %11002 = vmatprep.mubr.msk.bf16.mxu1 %vm11391_vm2, %v16147_v44  ;;  %v11370_v32 = vld [vmem:[%s15846_s0 + $0x7b0] sm:$0xff]  }
 0x502   :  { %v10562_v24 = vpop.f32.mrf.mxu0  ;;  %v10904_v62 = vpop.f32.mrf.mxu1  ;;  %v16692_v36 = vmax.f32 %v16690_v6, %v16691_v31  ;;  %v11371_v58 = vld [vmem:[%s15846_s0 + $0xa54] sm:$0xff]   ;;  %v16706_v6 = vld [vmem:[#allocation171_spill] sm:$0xff] }
 0x503   :  { %v9260_v9 = vpack.c.bf16 %v6882_v4, %v6882_v4  ;;  %v6707_v41 = vmax.f32 %v4978_v0, %v6329_v3  ;;  %v16693_v4 = vld [vmem:[#allocation162_spill] sm:$0xff] }
 0x504   :  { %v4603_v42 = vpop.f32.mrf.mxu0  ;;  %v6332_v8 = vpop.f32.mrf.mxu1  ;;  %v16695_v10 = vmax.f32 %v16693_v4, %v16694_v40 }
 0x505   :  { %7729 = vst.msk [vmem:[%s15848_s3 + $0x18c] sm:$0xf] %vm7629_vm4, %v9260_v9  ;;  %v6883_v63 = vadd.f32 %v14965_v19, %v6707_v41  ;;  %v4979_v12 = vmax.f32 %v16683_v1, %v4603_v42 }
 0x506   :  { %v10563_v13 = vpop.f32.mrf.mxu0  ;;  %v10905_v22 = vpop.f32.mrf.mxu1 }
 0x507   :  { %v9261_v23 = vpack.c.bf16 %v6883_v63, %v6883_v63  ;;  %v6708_v55 = vmax.f32 %v4979_v12, %v6332_v8 }
 0x508   :  { %v4608_v16 = vpop.f32.mrf.mxu0  ;;  %10661 = vmatmul.mubr.msk.bf16.gmra.mxu0 %vm614_vm3, %v11366_v61  ;;  %v6337_v14 = vpop.f32.mrf.mxu1  ;;  %11003 = vmatmul.mubr.msk.bf16.gmra.mxu1 %vm614_vm3, %v11367_v25  ;;  %v16696_v61 = vld [vmem:[#allocation164_spill] sm:$0xff]  ;;  %v16697_v25 = vld [vmem:[#allocation165_spill] sm:$0xff] }
 0x509   :  { %7730 = vst.msk [vmem:[%s15848_s3 + $0x190] sm:$0xf] %vm7629_vm4, %v9261_v23  ;;  %v6884_v34 = vadd.f32 %v14965_v19, %v6708_v55  ;;  %v4980_v49 = vmax.f32 %v16686_v48, %v4608_v16  ;;  %10664 = vmatprep.mubr.msk.bf16.mxu0 %vm11391_vm2, %v16147_v44  ;;  %11006 = vmatprep.mubr.msk.bf16.mxu1 %vm11391_vm2, %v16147_v44  ;;  %v11372_v55 = vld [vmem:[%s15846_s0 + $0x7b8] sm:$0xff]  }
 0x50a   :  { %v10566_v27 = vpop.f32.mrf.mxu0  ;;  %v10908_v38 = vpop.f32.mrf.mxu1  ;;  %v16698_v63 = vmax.f32 %v16696_v61, %v16697_v25  ;;  %v11373_v16 = vld [vmem:[%s15846_s0 + $0xa5c] sm:$0xff]   ;;  %v16712_v61 = vld [vmem:[#allocation175_spill] sm:$0xff] }
 0x50b   :  { %v9262_v21 = vpack.c.bf16 %v6884_v34, %v6884_v34  ;;  %v6709_v52 = vmax.f32 %v4980_v49, %v6337_v14  ;;  %v16699_v34 = vld [vmem:[#allocation166_spill] sm:$0xff] }
 0x50c   :  { %v4611_v60 = vpop.f32.mrf.mxu0  ;;  %v6340_v28 = vpop.f32.mrf.mxu1  ;;  %v16701_v29 = vmax.f32 %v16699_v34, %v16700_v33 }
 0x50d   :  { %7731 = vst.msk [vmem:[%s15848_s3 + $0x194] sm:$0xf] %vm7629_vm4, %v9262_v21  ;;  %v6885_v57 = vadd.f32 %v14965_v19, %v6709_v52  ;;  %v4981_v18 = vmax.f32 %v16689_v17, %v4611_v60 }
 0x50e   :  { %v10567_v35 = vpop.f32.mrf.mxu0  ;;  %v10909_v45 = vpop.f32.mrf.mxu1 }
 0x50f   :  { %v9263_v51 = vpack.c.bf16 %v6885_v57, %v6885_v57  ;;  %v6710_v39 = vmax.f32 %v4981_v18, %v6340_v28 }
 0x510   :  { %v4616_v53 = vpop.f32.mrf.mxu0  ;;  %10665 = vmatmul.mubr.msk.bf16.gmra.mxu0 %vm614_vm3, %v11368_v30  ;;  %v6345_v54 = vpop.f32.mrf.mxu1  ;;  %11007 = vmatmul.mubr.msk.bf16.gmra.mxu1 %vm614_vm3, %v11369_v56  ;;  %v16702_v30 = vld [vmem:[#allocation168_spill] sm:$0xff]  ;;  %v16703_v56 = vld [vmem:[#allocation169_spill] sm:$0xff] }
 0x511   :  { %7732 = vst.msk [vmem:[%s15848_s3 + $0x198] sm:$0xf] %vm7629_vm4, %v9263_v51  ;;  %v6886_v5 = vadd.f32 %v14965_v19, %v6710_v39  ;;  %v4982_v59 = vmax.f32 %v16692_v36, %v4616_v53  ;;  %10668 = vmatprep.mubr.msk.bf16.mxu0 %vm11391_vm2, %v16147_v44  ;;  %11010 = vmatprep.mubr.msk.bf16.mxu1 %vm11391_vm2, %v16147_v44  ;;  %v11374_v39 = vld [vmem:[%s15846_s0 + $0x7c0] sm:$0xff]  }
 0x512   :  { %v10570_v20 = vpop.f32.mrf.mxu0  ;;  %v10912_v37 = vpop.f32.mrf.mxu1  ;;  %v16704_v57 = vmax.f32 %v16702_v30, %v16703_v56  ;;  %v11375_v53 = vld [vmem:[%s15846_s0 + $0xa64] sm:$0xff]  }
 0x513   :  { %v9264_v43 = vpack.c.bf16 %v6886_v5, %v6886_v5  ;;  %v6711_v50 = vmax.f32 %v4982_v59, %v6345_v54  ;;  %v16705_v5 = vld [vmem:[#allocation170_spill] sm:$0xff]  ;;  %v16718_v30 = vld [vmem:[#allocation179_spill] sm:$0xff] }
 0x514   :  { %v4619_v46 = vpop.f32.mrf.mxu0  ;;  %v6348_v47 = vpop.f32.mrf.mxu1  ;;  %v16707_v31 = vmax.f32 %v16705_v5, %v16706_v6 }
 0x515   :  { %7733 = vst.msk [vmem:[%s15848_s3 + $0x19c] sm:$0xf] %vm7629_vm4, %v9264_v43  ;;  %v6887_v3 = vadd.f32 %v14965_v19, %v6711_v50  ;;  %v4983_v7 = vmax.f32 %v16695_v10, %v4619_v46 }
 0x516   :  { %v10571_v0 = vpop.f32.mrf.mxu0  ;;  %v10913_v24 = vpop.f32.mrf.mxu1 }
 0x517   :  { %v9265_v62 = vpack.c.bf16 %v6887_v3, %v6887_v3  ;;  %v6712_v9 = vmax.f32 %v4983_v7, %v6348_v47 }
 0x518   :  { %v4624_v41 = vpop.f32.mrf.mxu0  ;;  %10669 = vmatmul.mubr.msk.bf16.gmra.mxu0 %vm614_vm3, %v11370_v32  ;;  %v6353_v42 = vpop.f32.mrf.mxu1  ;;  %11011 = vmatmul.mubr.msk.bf16.gmra.mxu1 %vm614_vm3, %v11371_v58  ;;  %v16708_v32 = vld [vmem:[#allocation172_spill] sm:$0xff]  ;;  %v16709_v58 = vld [vmem:[#allocation173_spill] sm:$0xff] }
 0x519   :  { %7734 = vst.msk [vmem:[%s15848_s3 + $0x1a0] sm:$0xf] %vm7629_vm4, %v9265_v62  ;;  %v6888_v8 = vadd.f32 %v14965_v19, %v6712_v9  ;;  %v4984_v11 = vmax.f32 %v16698_v63, %v4624_v41  ;;  %10672 = vmatprep.mubr.msk.bf16.mxu0 %vm11391_vm2, %v16147_v44  ;;  %11014 = vmatprep.mubr.msk.bf16.mxu1 %vm11391_vm2, %v16147_v44  ;;  %v11376_v9 = vld [vmem:[%s15846_s0 + $0x7c8] sm:$0xff]  }
 0x51a   :  { %v10574_v15 = vpop.f32.mrf.mxu0  ;;  %v10916_v1 = vpop.f32.mrf.mxu1  ;;  %v16710_v3 = vmax.f32 %v16708_v32, %v16709_v58  ;;  %v11377_v41 = vld [vmem:[%s15846_s0 + $0xa6c] sm:$0xff]  }
 0x51b   :  { %v9266_v12 = vpack.c.bf16 %v6888_v8, %v6888_v8  ;;  %v6713_v13 = vmax.f32 %v4984_v11, %v6353_v42  ;;  %v16711_v8 = vld [vmem:[#allocation174_spill] sm:$0xff]  ;;  %v16724_v32 = vld [vmem:[#allocation183_spill] sm:$0xff] }
 0x51c   :  { %v4627_v22 = vpop.f32.mrf.mxu0  ;;  %v6356_v23 = vpop.f32.mrf.mxu1  ;;  %v16713_v25 = vmax.f32 %v16711_v8, %v16712_v61 }
 0x51d   :  { %7735 = vst.msk [vmem:[%s15848_s3 + $0x1a4] sm:$0xf] %vm7629_vm4, %v9266_v12  ;;  %v6889_v14 = vadd.f32 %v14965_v19, %v6713_v13  ;;  %v4985_v48 = vmax.f32 %v16701_v29, %v4627_v22 }
 0x51e   :  { %v10575_v49 = vpop.f32.mrf.mxu0  ;;  %v10917_v27 = vpop.f32.mrf.mxu1 }
 0x51f   :  { %v9267_v38 = vpack.c.bf16 %v6889_v14, %v6889_v14  ;;  %v6714_v21 = vmax.f32 %v4985_v48, %v6356_v23 }
 0x520   :  { %v4632_v52 = vpop.f32.mrf.mxu0  ;;  %10673 = vmatmul.mubr.msk.bf16.gmra.mxu0 %vm614_vm3, %v11372_v55  ;;  %v6361_v60 = vpop.f32.mrf.mxu1  ;;  %11015 = vmatmul.mubr.msk.bf16.gmra.mxu1 %vm614_vm3, %v11373_v16  ;;  %v16714_v55 = vld [vmem:[#allocation176_spill] sm:$0xff]  ;;  %v16715_v16 = vld [vmem:[#allocation177_spill] sm:$0xff] }
 0x521   :  { %7736 = vst.msk [vmem:[%s15848_s3 + $0x1a8] sm:$0xf] %vm7629_vm4, %v9267_v38  ;;  %v6890_v28 = vadd.f32 %v14965_v19, %v6714_v21  ;;  %v4986_v26 = vmax.f32 %v16704_v57, %v4632_v52  ;;  %10676 = vmatprep.mubr.msk.bf16.mxu0 %vm11391_vm2, %v16147_v44  ;;  %11018 = vmatprep.mubr.msk.bf16.mxu1 %vm11391_vm2, %v16147_v44  ;;  %v11378_v21 = vld [vmem:[%s15846_s0 + $0x7d0] sm:$0xff]  }
 0x522   :  { %v10578_v2 = vpop.f32.mrf.mxu0  ;;  %v10920_v17 = vpop.f32.mrf.mxu1  ;;  %v16716_v14 = vmax.f32 %v16714_v55, %v16715_v16  ;;  %v11379_v52 = vld [vmem:[%s15846_s0 + $0xa74] sm:$0xff]   ;;  %v16730_v55 = vld [vmem:[#allocation187_spill] sm:$0xff] }
 0x523   :  { %v9268_v18 = vpack.c.bf16 %v6890_v28, %v6890_v28  ;;  %v6715_v35 = vmax.f32 %v4986_v26, %v6361_v60  ;;  %v16717_v28 = vld [vmem:[#allocation178_spill] sm:$0xff] }
 0x524   :  { %v4635_v45 = vpop.f32.mrf.mxu0  ;;  %v6364_v51 = vpop.f32.mrf.mxu1  ;;  %v16719_v56 = vmax.f32 %v16717_v28, %v16718_v30 }
 0x525   :  { %7737 = vst.msk [vmem:[%s15848_s3 + $0x1ac] sm:$0xf] %vm7629_vm4, %v9268_v18  ;;  %v6891_v54 = vadd.f32 %v14965_v19, %v6715_v35  ;;  %v4987_v36 = vmax.f32 %v16707_v31, %v4635_v45 }
 0x526   :  { %v10579_v59 = vpop.f32.mrf.mxu0  ;;  %v10921_v20 = vpop.f32.mrf.mxu1 }
 0x527   :  { %v9269_v37 = vpack.c.bf16 %v6891_v54, %v6891_v54  ;;  %v6716_v43 = vmax.f32 %v4987_v36, %v6364_v51 }
 0x528   :  { %v4640_v50 = vpop.f32.mrf.mxu0  ;;  %10677 = vmatmul.mubr.msk.bf16.gmra.mxu0 %vm614_vm3, %v11374_v39  ;;  %v6369_v46 = vpop.f32.mrf.mxu1  ;;  %11019 = vmatmul.mubr.msk.bf16.gmra.mxu1 %vm614_vm3, %v11375_v53  ;;  %v16720_v39 = vld [vmem:[#allocation180_spill] sm:$0xff]  ;;  %v16721_v53 = vld [vmem:[#allocation181_spill] sm:$0xff] }
 0x529   :  { %7738 = vst.msk [vmem:[%s15848_s3 + $0x1b0] sm:$0xf] %vm7629_vm4, %v9269_v37  ;;  %v6892_v47 = vadd.f32 %v14965_v19, %v6716_v43  ;;  %v4988_v4 = vmax.f32 %v16710_v3, %v4640_v50  ;;  %10680 = vmatprep.mubr.msk.bf16.mxu0 %vm11391_vm2, %v16147_v44  ;;  %11022 = vmatprep.mubr.msk.bf16.mxu1 %vm11391_vm2, %v16147_v44  ;;  %v11380_v43 = vld [vmem:[%s15846_s0 + $0x7d8] sm:$0xff]  }
 0x52a   :  { %v10582_v40 = vpop.f32.mrf.mxu0  ;;  %v10924_v10 = vpop.f32.mrf.mxu1  ;;  %v16722_v54 = vmax.f32 %v16720_v39, %v16721_v53  ;;  %v11381_v50 = vld [vmem:[%s15846_s0 + $0xa7c] sm:$0xff]  }
 0x52b   :  { %v9270_v7 = vpack.c.bf16 %v6892_v47, %v6892_v47  ;;  %v6717_v0 = vmax.f32 %v4988_v4, %v6369_v46  ;;  %v16723_v47 = vld [vmem:[#allocation182_spill] sm:$0xff] }
 0x52c   :  { %v4643_v24 = vpop.f32.mrf.mxu0  ;;  %v6372_v62 = vpop.f32.mrf.mxu1  ;;  %v16725_v58 = vmax.f32 %v16723_v47, %v16724_v32 }
 0x52d   :  { %7739 = vst.msk [vmem:[%s15848_s3 + $0x1b4] sm:$0xf] %vm7629_vm4, %v9270_v7  ;;  %v6893_v42 = vadd.f32 %v14965_v19, %v6717_v0  ;;  %v4989_v63 = vmax.f32 %v16713_v25, %v4643_v24 }
 0x52e   :  { %v10583_v11 = vpop.f32.mrf.mxu0  ;;  %v10925_v15 = vpop.f32.mrf.mxu1 }
 0x52f   :  { %v9271_v1 = vpack.c.bf16 %v6893_v42, %v6893_v42  ;;  %v6718_v12 = vmax.f32 %v4989_v63, %v6372_v62 }
 0x530   :  { %v4648_v13 = vpop.f32.mrf.mxu0  ;;  %10681 = vmatmul.mubr.msk.bf16.gmra.mxu0 %vm614_vm3, %v11376_v9  ;;  %v6377_v22 = vpop.f32.mrf.mxu1  ;;  %11023 = vmatmul.mubr.msk.bf16.gmra.mxu1 %vm614_vm3, %v11377_v41  ;;  %v16726_v9 = vld [vmem:[#allocation184_spill] sm:$0xff]  ;;  %v16727_v41 = vld [vmem:[#allocation185_spill] sm:$0xff] }
 0x531   :  { %7740 = vst.msk [vmem:[%s15848_s3 + $0x1b8] sm:$0xf] %vm7629_vm4, %v9271_v1  ;;  %v6894_v23 = vadd.f32 %v14965_v19, %v6718_v12  ;;  %v4990_v34 = vmax.f32 %v16716_v14, %v4648_v13  ;;  %10684 = vmatprep.mubr.msk.bf16.mxu0 %vm11391_vm2, %v16147_v44  ;;  %11026 = vmatprep.mubr.msk.bf16.mxu1 %vm11391_vm2, %v16147_v44  ;;  %v11382_v12 = vld [vmem:[%s15846_s0 + $0x7e0] sm:$0xff]  }
 0x532   :  { %v10586_v33 = vpop.f32.mrf.mxu0  ;;  %v10928_v29 = vpop.f32.mrf.mxu1  ;;  %v16728_v42 = vmax.f32 %v16726_v9, %v16727_v41  ;;  %v11383_v13 = vld [vmem:[%s15846_s0 + $0xa84] sm:$0xff]  }
 0x533   :  { %v9272_v48 = vpack.c.bf16 %v6894_v23, %v6894_v23  ;;  %v6719_v49 = vmax.f32 %v4990_v34, %v6377_v22  ;;  %v16729_v23 = vld [vmem:[#allocation186_spill] sm:$0xff] }
 0x534   :  { %v4651_v27 = vpop.f32.mrf.mxu0  ;;  %v6380_v38 = vpop.f32.mrf.mxu1  ;;  %v16731_v16 = vmax.f32 %v16729_v23, %v16730_v55 }
 0x535   :  { %7741 = vst.msk [vmem:[%s15848_s3 + $0x1bc] sm:$0xf] %vm7629_vm4, %v9272_v48  ;;  %v6895_v60 = vadd.f32 %v14965_v19, %v6719_v49  ;;  %v4991_v57 = vmax.f32 %v16719_v56, %v4651_v27 }
 0x536   :  { %v10587_v26 = vpop.f32.mrf.mxu0  ;;  %v10929_v2 = vpop.f32.mrf.mxu1 }
 0x537   :  { %v9273_v17 = vpack.c.bf16 %v6895_v60, %v6895_v60  ;;  %v6720_v18 = vmax.f32 %v4991_v57, %v6380_v38 }
 0x538   :  { %v4656_v35 = vpop.f32.mrf.mxu0  ;;  %10685 = vmatmul.mubr.msk.bf16.gmra.mxu0 %vm614_vm3, %v11378_v21  ;;  %v6385_v45 = vpop.f32.mrf.mxu1  ;;  %11027 = vmatmul.mubr.msk.bf16.gmra.mxu1 %vm614_vm3, %v11379_v52  ;;  %v16732_v21 = vld [vmem:[#allocation188_spill] sm:$0xff]  ;;  %v16733_v52 = vld [vmem:[#allocation189_spill] sm:$0xff] }
 0x539   :  { %7742 = vst.msk [vmem:[%s15848_s3 + $0x1c0] sm:$0xf] %vm7629_vm4, %v9273_v17  ;;  %v6896_v51 = vadd.f32 %v14965_v19, %v6720_v18  ;;  %v4992_v5 = vmax.f32 %v16722_v54, %v4656_v35  ;;  %10688 = vmatprep.mubr.msk.bf16.mxu0 %vm11391_vm2, %v16147_v44  ;;  %11030 = vmatprep.mubr.msk.bf16.mxu1 %vm11391_vm2, %v16147_v44  ;;  %v11384_v18 = vld [vmem:[%s15846_s0 + $0x7e8] ss:$0 sps:$4 sm:$0xff]   ;;  %v11385_v35 = vld [vmem:[%s15846_s0 + $0xa8c] ss:$0 sps:$4 sm:$0xff]  }
 0x53a   :  { %v10590_v6 = vpop.f32.mrf.mxu0  ;;  %v10932_v31 = vpop.f32.mrf.mxu1  ;;  %v16734_v60 = vmax.f32 %v16732_v21, %v16733_v52 }
 0x53b   :  { %v9274_v36 = vpack.c.bf16 %v6896_v51, %v6896_v51  ;;  %v6721_v59 = vmax.f32 %v4992_v5, %v6385_v45  ;;  %v16735_v45 = vld [vmem:[#allocation190_spill] sm:$0xff]  ;;  %v16736_v51 = vld [vmem:[#allocation191_spill] sm:$0xff] }
 0x53c   :  { %v4659_v20 = vpop.f32.mrf.mxu0  ;;  %v6388_v37 = vpop.f32.mrf.mxu1  ;;  %v16737_v39 = vmax.f32 %v16735_v45, %v16736_v51 }
 0x53d   :  { %7743 = vst.msk [vmem:[%s15848_s3 + $0x1c4] sm:$0xf] %vm7629_vm4, %v9274_v36  ;;  %v6897_v46 = vadd.f32 %v14965_v19, %v6721_v59  ;;  %v4993_v3 = vmax.f32 %v16725_v58, %v4659_v20 }
 0x53e   :  { %v10591_v4 = vpop.f32.mrf.mxu0  ;;  %v10933_v40 = vpop.f32.mrf.mxu1 }
 0x53f   :  { %v9275_v10 = vpack.c.bf16 %v6897_v46, %v6897_v46  ;;  %v6722_v7 = vmax.f32 %v4993_v3, %v6388_v37  ;;  %v16738_v37 = vld [vmem:[#allocation192_spill] sm:$0xff] }
 0x540   :  { %v4664_v0 = vpop.f32.mrf.mxu0  ;;  %10689 = vmatmul.mubr.msk.bf16.gmra.mxu0 %vm614_vm3, %v11380_v43  ;;  %v6393_v24 = vpop.f32.mrf.mxu1  ;;  %11031 = vmatmul.mubr.msk.bf16.gmra.mxu1 %vm614_vm3, %v11381_v50  ;;  %v16739_v43 = vld [vmem:[#allocation193_spill] sm:$0xff] }
 0x541   :  { %7744 = vst.msk [vmem:[%s15848_s3 + $0x1c8] sm:$0xf] %vm7629_vm4, %v9275_v10  ;;  %v6898_v62 = vadd.f32 %v14965_v19, %v6722_v7  ;;  %v4994_v8 = vmax.f32 %v16728_v42, %v4664_v0  ;;  %10692 = vmatprep.mubr.msk.bf16.mxu0 %vm11391_vm2, %v16147_v44  ;;  %11034 = vmatprep.mubr.msk.bf16.mxu1 %vm11391_vm2, %v16147_v44  ;;  %v16741_v7 = vld [vmem:[#allocation194_spill] sm:$0xff]  ;;  %v16742_v0 = vld [vmem:[#allocation195_spill] sm:$0xff] }
 0x542   :  { %v10594_v61 = vpop.f32.mrf.mxu0  ;;  %v10936_v25 = vpop.f32.mrf.mxu1  ;;  %v16740_v50 = vmax.f32 %v16738_v37, %v16739_v43 }
 0x543   :  { %v9276_v63 = vpack.c.bf16 %v6898_v62, %v6898_v62  ;;  %v6723_v11 = vmax.f32 %v4994_v8, %v6393_v24  ;;  %v16743_v24 = vmax.f32 %v16741_v7, %v16742_v0 }
 0x544   :  { %v4667_v15 = vpop.f32.mrf.mxu0  ;;  %v6396_v1 = vpop.f32.mrf.mxu1 }
 0x545   :  { %7745 = vst.msk [vmem:[%s15848_s3 + $0x1cc] sm:$0xf] %vm7629_vm4, %v9276_v63  ;;  %v6899_v22 = vadd.f32 %v14965_v19, %v6723_v11  ;;  %v4995_v14 = vmax.f32 %v16731_v16, %v4667_v15  ;;  %v16744_v11 = vld [vmem:[#allocation196_spill] sm:$0xff]  ;;  %v16745_v15 = vld [vmem:[#allocation197_spill] sm:$0xff] }
 0x546   :  { %v10595_v34 = vpop.f32.mrf.mxu0  ;;  %v10937_v33 = vpop.f32.mrf.mxu1 }
 0x547   :  { %v9277_v29 = vpack.c.bf16 %v6899_v22, %v6899_v22  ;;  %v6724_v48 = vmax.f32 %v4995_v14, %v6396_v1  ;;  %v16746_v1 = vmax.f32 %v16744_v11, %v16745_v15  ;;  %v16747_v33 = vld [vmem:[#allocation198_spill] sm:$0xff] }
 0x548   :  { %v4672_v49 = vpop.f32.mrf.mxu0  ;;  %10693 = vmatmul.mubr.msk.bf16.gmra.mxu0 %vm614_vm3, %v11382_v12  ;;  %v6401_v27 = vpop.f32.mrf.mxu1  ;;  %11035 = vmatmul.mubr.msk.bf16.gmra.mxu1 %vm614_vm3, %v11383_v13 }
 0x549   :  { %7746 = vst.msk [vmem:[%s15848_s3 + $0x1d0] sm:$0xf] %vm7629_vm4, %v9277_v29  ;;  %v6900_v38 = vadd.f32 %v14965_v19, %v6724_v48  ;;  %v4996_v28 = vmax.f32 %v16734_v60, %v4672_v49  ;;  %10696 = vmatprep.mubr.msk.bf16.mxu0 %vm11391_vm2, %v16147_v44  ;;  %11038 = vmatprep.mubr.msk.bf16.mxu1 %vm11391_vm2, %v16147_v44  ;;  %v16748_v29 = vld [vmem:[#allocation199_spill] sm:$0xff] }
 0x54a   :  { %v10598_v30 = vpop.f32.mrf.mxu0  ;;  %v10940_v56 = vpop.f32.mrf.mxu1  ;;  %v16749_v48 = vmax.f32 %v16747_v33, %v16748_v29 }
 0x54b   :  { %v9278_v57 = vpack.c.bf16 %v6900_v38, %v6900_v38  ;;  %v6725_v26 = vmax.f32 %v4996_v28, %v6401_v27  ;;  %v16750_v56 = vld [vmem:[#allocation200_spill] sm:$0xff] }
 0x54c   :  { %v4675_v2 = vpop.f32.mrf.mxu0  ;;  %v6404_v17 = vpop.f32.mrf.mxu1 }
 0x54d   :  { %7747 = vst.msk [vmem:[%s15848_s3 + $0x1d4] sm:$0xf] %vm7629_vm4, %v9278_v57  ;;  %v6901_v44 = vadd.f32 %v14965_v19, %v6725_v26  ;;  %v4997_v53 = vmax.f32 %v16737_v39, %v4675_v2  ;;  %v16751_v57 = vld [vmem:[#allocation201_spill] sm:$0xff] }
 0x54e   :  { %v10599_v54 = vpop.f32.mrf.mxu0  ;;  %v10941_v5 = vpop.f32.mrf.mxu1  ;;  %v16752_v26 = vmax.f32 %v16750_v56, %v16751_v57 }
 0x54f   :  { %v9279_v6 = vpack.c.bf16 %v6901_v44, %v6901_v44  ;;  %v6726_v31 = vmax.f32 %v4997_v53, %v6404_v17  ;;  %v16753_v53 = vld [vmem:[#allocation202_spill] sm:$0xff]  ;;  %v16754_v54 = vld [vmem:[#allocation203_spill] sm:$0xff] }
 0x550   :  { %v4680_v36 = vpop.f32.mrf.mxu0  ;;  %10697 = vmatmul.mubr.msk.bf16.gmra.mxu0 %vm614_vm3, %v11384_v18  ;;  %v6409_v59 = vpop.f32.mrf.mxu1  ;;  %11039 = vmatmul.mubr.msk.bf16.gmra.mxu1 %vm614_vm3, %v11385_v35  ;;  %v16755_v5 = vmax.f32 %v16753_v53, %v16754_v54 }
 0x551   :  { %7748 = vst.msk [vmem:[%s15848_s3 + $0x1d8] sm:$0xf] %vm7629_vm4, %v9279_v6  ;;  %v6902_v20 = vadd.f32 %v14965_v19, %v6726_v31  ;;  %v4998_v46 = vmax.f32 %v16740_v50, %v4680_v36 }
 0x552   :  { %v10602_v47 = vpop.f32.mrf.mxu0  ;;  %v10944_v32 = vpop.f32.mrf.mxu1 }
 0x553   :  { %v9280_v58 = vpack.c.bf16 %v6902_v20, %v6902_v20  ;;  %v6727_v3 = vmax.f32 %v4998_v46, %v6409_v59  ;;  %v16756_v46 = vld [vmem:[#allocation204_spill] sm:$0xff]  ;;  %v16757_v47 = vld [vmem:[#allocation205_spill] sm:$0xff] }
 0x554   :  { %v4683_v4 = vpop.f32.mrf.mxu0  ;;  %v6412_v40 = vpop.f32.mrf.mxu1  ;;  %v16758_v32 = vmax.f32 %v16756_v46, %v16757_v47 }
 0x555   :  { %7749 = vst.msk [vmem:[%s15848_s3 + $0x1dc] sm:$0xf] %vm7629_vm4, %v9280_v58  ;;  %v6903_v10 = vadd.f32 %v14965_v19, %v6727_v3  ;;  %v4999_v62 = vmax.f32 %v16743_v24, %v4683_v4 }
 0x556   :  { %v10603_v9 = vpop.f32.mrf.mxu0  ;;  %v10945_v41 = vpop.f32.mrf.mxu1 }
 0x557   :  { %v9281_v42 = vpack.c.bf16 %v6903_v10, %v6903_v10  ;;  %v6728_v8 = vmax.f32 %v4999_v62, %v6412_v40  ;;  %v16759_v62 = vld [vmem:[#allocation206_spill] sm:$0xff]  ;;  %v16760_v9 = vld [vmem:[#allocation207_spill] sm:$0xff] }
 0x558   :  { %v4688_v61 = vpop.f32.mrf.mxu0  ;;  %v6417_v25 = vpop.f32.mrf.mxu1  ;;  %v16761_v41 = vmax.f32 %v16759_v62, %v16760_v9 }
 0x559   :  { %7750 = vst.msk [vmem:[%s15848_s3 + $0x1e0] sm:$0xf] %vm7629_vm4, %v9281_v42  ;;  %v6904_v63 = vadd.f32 %v14965_v19, %v6728_v8  ;;  %v5000_v12 = vmax.f32 %v16746_v1, %v4688_v61 }
 0x55a   :  { %v10606_v13 = vpop.f32.mrf.mxu0  ;;  %v10948_v22 = vpop.f32.mrf.mxu1 }
 0x55b   :  { %v9282_v23 = vpack.c.bf16 %v6904_v63, %v6904_v63  ;;  %v6729_v55 = vmax.f32 %v5000_v12, %v6417_v25  ;;  %v16762_v12 = vld [vmem:[#allocation208_spill] sm:$0xff]  ;;  %v16763_v13 = vld [vmem:[#allocation209_spill] sm:$0xff] }
 0x55c   :  { %v4691_v16 = vpop.f32.mrf.mxu0  ;;  %v6420_v14 = vpop.f32.mrf.mxu1  ;;  %v16764_v22 = vmax.f32 %v16762_v12, %v16763_v13 }
 0x55d   :  { %7751 = vst.msk [vmem:[%s15848_s3 + $0x1e4] sm:$0xf] %vm7629_vm4, %v9282_v23  ;;  %v6905_v34 = vadd.f32 %v14965_v19, %v6729_v55  ;;  %v5001_v49 = vmax.f32 %v16749_v48, %v4691_v16 }
 0x55e   :  { %v10607_v27 = vpop.f32.mrf.mxu0  ;;  %v10949_v38 = vpop.f32.mrf.mxu1 }
 0x55f   :  { %v9283_v21 = vpack.c.bf16 %v6905_v34, %v6905_v34  ;;  %v6730_v52 = vmax.f32 %v5001_v49, %v6420_v14  ;;  %v16765_v49 = vld [vmem:[#allocation210_spill] sm:$0xff]  ;;  %v16766_v27 = vld [vmem:[#allocation211_spill] sm:$0xff] }
 0x560   :  { %v4696_v60 = vpop.f32.mrf.mxu0  ;;  %v6425_v28 = vpop.f32.mrf.mxu1  ;;  %v16767_v38 = vmax.f32 %v16765_v49, %v16766_v27 }
 0x561   :  { %7752 = vst.msk [vmem:[%s15848_s3 + $0x1e8] sm:$0xf] %vm7629_vm4, %v9283_v21  ;;  %v6906_v30 = vadd.f32 %v14965_v19, %v6730_v52  ;;  %v5002_v2 = vmax.f32 %v16752_v26, %v4696_v60 }
 0x562   :  { %v10610_v17 = vpop.f32.mrf.mxu0  ;;  %v10952_v18 = vpop.f32.mrf.mxu1 }
 0x563   :  { %v9284_v35 = vpack.c.bf16 %v6906_v30, %v6906_v30  ;;  %v6731_v44 = vmax.f32 %v5002_v2, %v6425_v28  ;;  %v16768_v2 = vld [vmem:[#allocation212_spill] sm:$0xff]  ;;  %v16769_v17 = vld [vmem:[#allocation213_spill] sm:$0xff] }
 0x564   :  { %v4699_v45 = vpop.f32.mrf.mxu0  ;;  %v6428_v51 = vpop.f32.mrf.mxu1  ;;  %v16770_v18 = vmax.f32 %v16768_v2, %v16769_v17 }
 0x565   :  { %7753 = vst.msk [vmem:[%s15848_s3 + $0x1ec] sm:$0xf] %vm7629_vm4, %v9284_v35  ;;  %v6907_v39 = vadd.f32 %v14965_v19, %v6731_v44  ;;  %v5003_v6 = vmax.f32 %v16755_v5, %v4699_v45 }
 0x566   :  { %v10611_v31 = vpop.f32.mrf.mxu0  ;;  %v10953_v36 = vpop.f32.mrf.mxu1 }
 0x567   :  { %v9285_v59 = vpack.c.bf16 %v6907_v39, %v6907_v39  ;;  %v6732_v20 = vmax.f32 %v5003_v6, %v6428_v51  ;;  %v16771_v6 = vld [vmem:[#allocation214_spill] sm:$0xff]  ;;  %v16772_v31 = vld [vmem:[#allocation215_spill] sm:$0xff] }
 0x568   :  { %v4704_v37 = vpop.f32.mrf.mxu0  ;;  %v6433_v43 = vpop.f32.mrf.mxu1  ;;  %v16773_v36 = vmax.f32 %v16771_v6, %v16772_v31 }
 0x569   :  { %7754 = vst.msk [vmem:[%s15848_s3 + $0x1f0] sm:$0xf] %vm7629_vm4, %v9285_v59  ;;  %v6908_v50 = vadd.f32 %v14965_v19, %v6732_v20  ;;  %v5004_v58 = vmax.f32 %v16758_v32, %v4704_v37  ;;  %v15542_v32 = vld [vmem:[%s15847_s2] ss:$0 sm:$0xff] }
 0x56a   :  { %v10614_v3 = vpop.f32.mrf.mxu0  ;;  %v10956_v4 = vpop.f32.mrf.mxu1 }
 0x56b   :  { %v9286_v40 = vpack.c.bf16 %v6908_v50, %v6908_v50  ;;  %v6733_v10 = vmax.f32 %v5004_v58, %v6433_v43  ;;  %v16774_v58 = vld [vmem:[#allocation216_spill] sm:$0xff]  ;;  %v16775_v3 = vld [vmem:[#allocation217_spill] sm:$0xff] }
 0x56c   :  { %v4707_v7 = vpop.f32.mrf.mxu0  ;;  %v6436_v0 = vpop.f32.mrf.mxu1  ;;  %v16776_v4 = vmax.f32 %v16774_v58, %v16775_v3 }
 0x56d   :  { %7755 = vst.msk [vmem:[%s15848_s3 + $0x1f4] sm:$0xf] %vm7629_vm4, %v9286_v40  ;;  %v6909_v24 = vadd.f32 %v14965_v19, %v6733_v10  ;;  %v5005_v42 = vmax.f32 %v16761_v41, %v4707_v7 }
 0x56e   :  { %v10615_v8 = vpop.f32.mrf.mxu0  ;;  %v10957_v61 = vpop.f32.mrf.mxu1 }
 0x56f   :  { %v9287_v25 = vpack.c.bf16 %v6909_v24, %v6909_v24  ;;  %v6734_v63 = vmax.f32 %v5005_v42, %v6436_v0  ;;  %v16777_v42 = vld [vmem:[#allocation218_spill] sm:$0xff]  ;;  %v16778_v8 = vld [vmem:[#allocation219_spill] sm:$0xff] }
 0x570   :  { %v4712_v11 = vpop.f32.mrf.mxu0  ;;  %v6441_v15 = vpop.f32.mrf.mxu1  ;;  %v16779_v61 = vmax.f32 %v16777_v42, %v16778_v8 }
 0x571   :  { %7756 = vst.msk [vmem:[%s15848_s3 + $0x1f8] sm:$0xf] %vm7629_vm4, %v9287_v25  ;;  %v6910_v1 = vadd.f32 %v14965_v19, %v6734_v63  ;;  %v5006_v23 = vmax.f32 %v16764_v22, %v4712_v11 }
 0x572   :  { %v10618_v55 = vpop.f32.mrf.mxu0  ;;  %v10960_v16 = vpop.f32.mrf.mxu1 }
 0x573   :  { %v9288_v14 = vpack.c.bf16 %v6910_v1, %v6910_v1  ;;  %v6735_v34 = vmax.f32 %v5006_v23, %v6441_v15  ;;  %v16780_v23 = vld [vmem:[#allocation220_spill] sm:$0xff]  ;;  %v16781_v55 = vld [vmem:[#allocation221_spill] sm:$0xff] }
 0x574   :  { %v4715_v33 = vpop.f32.mrf.mxu0  ;;  %v6444_v29 = vpop.f32.mrf.mxu1  ;;  %v16782_v16 = vmax.f32 %v16780_v23, %v16781_v55 }
 0x575   :  { %7757 = vst.msk [vmem:[%s15848_s3 + $0x1fc] sm:$0xf] %vm7629_vm4, %v9288_v14  ;;  %v6911_v48 = vadd.f32 %v14965_v19, %v6735_v34  ;;  %v5007_v21 = vmax.f32 %v16767_v38, %v4715_v33 }
 0x576   :  { %v10619_v52 = vpop.f32.mrf.mxu0  ;;  %v10961_v60 = vpop.f32.mrf.mxu1 }
 0x577   :  { %v9289_v28 = vpack.c.bf16 %v6911_v48, %v6911_v48  ;;  %v6736_v30 = vmax.f32 %v5007_v21, %v6444_v29  ;;  %v16783_v21 = vld [vmem:[#allocation222_spill] sm:$0xff]  ;;  %v16784_v52 = vld [vmem:[#allocation223_spill] sm:$0xff] }
 0x578   :  { %v4720_v56 = vpop.f32.mrf.mxu0  ;;  %v6449_v57 = vpop.f32.mrf.mxu1  ;;  %v16785_v60 = vmax.f32 %v16783_v21, %v16784_v52 }
 0x579   :  { %7758 = vst.msk [vmem:[%s15848_s3 + $0x200] sm:$0xf] %vm7629_vm4, %v9289_v28  ;;  %v6912_v26 = vadd.f32 %v14965_v19, %v6736_v30  ;;  %v5008_v35 = vmax.f32 %v16770_v18, %v4720_v56 }
 0x57a   :  { %v10622_v44 = vpop.f32.mrf.mxu0  ;;  %v10964_v45 = vpop.f32.mrf.mxu1 }
 0x57b   :  { %v9290_v51 = vpack.c.bf16 %v6912_v26, %v6912_v26  ;;  %v6737_v39 = vmax.f32 %v5008_v35, %v6449_v57  ;;  %v16786_v35 = vld [vmem:[#allocation224_spill] sm:$0xff]  ;;  %v16787_v44 = vld [vmem:[#allocation225_spill] sm:$0xff] }
 0x57c   :  { %v4723_v53 = vpop.f32.mrf.mxu0  ;;  %v6452_v54 = vpop.f32.mrf.mxu1  ;;  %v16788_v45 = vmax.f32 %v16786_v35, %v16787_v44 }
 0x57d   :  { %7759 = vst.msk [vmem:[%s15848_s3 + $0x204] sm:$0xf] %vm7629_vm4, %v9290_v51  ;;  %v6913_v5 = vadd.f32 %v14965_v19, %v6737_v39  ;;  %v5009_v59 = vmax.f32 %v16773_v36, %v4723_v53 }
 0x57e   :  { %v10623_v20 = vpop.f32.mrf.mxu0  ;;  %v10965_v37 = vpop.f32.mrf.mxu1 }
 0x57f   :  { %v9291_v43 = vpack.c.bf16 %v6913_v5, %v6913_v5  ;;  %v6738_v50 = vmax.f32 %v5009_v59, %v6452_v54  ;;  %v16789_v59 = vld [vmem:[#allocation226_spill] sm:$0xff]  ;;  %v16790_v20 = vld [vmem:[#allocation227_spill] sm:$0xff] }
 0x580   :  { %v4728_v46 = vpop.f32.mrf.mxu0  ;;  %v6457_v47 = vpop.f32.mrf.mxu1  ;;  %v16791_v37 = vmax.f32 %v16789_v59, %v16790_v20 }
 0x581   :  { %7760 = vst.msk [vmem:[%s15848_s3 + $0x208] sm:$0xf] %vm7629_vm4, %v9291_v43  ;;  %v6914_v19 = vadd.f32 %v15542_v32, %v6738_v50  ;;  %v5010_v40 = vmax.f32 %v16776_v4, %v4728_v46 }
 0x582   :  { %v10626_v10 = vpop.f32.mrf.mxu0  ;;  %v10968_v7 = vpop.f32.mrf.mxu1 }
 0x583   :  { %v9292_v0 = vpack.c.bf16 %v6914_v19, %v6914_v19  ;;  %v6739_v24 = vmax.f32 %v5010_v40, %v6457_v47  ;;  %v16792_v40 = vld [vmem:[#allocation228_spill] sm:$0xff]  ;;  %v16793_v10 = vld [vmem:[#allocation229_spill] sm:$0xff] }
 0x584   :  { %v4731_v62 = vpop.f32.mrf.mxu0  ;;  %v6460_v9 = vpop.f32.mrf.mxu1  ;;  %v16794_v7 = vmax.f32 %v16792_v40, %v16793_v10 }
 0x585   :  { %7761 = vst.msk [vmem:[%s15848_s3 + $0x20c] sm:$0xf] %vm7629_vm4, %v9292_v0  ;;  %v6915_v41 = vadd.f32 %v15542_v32, %v6739_v24  ;;  %v5011_v25 = vmax.f32 %v16779_v61, %v4731_v62 }
 0x586   :  { %v10627_v63 = vpop.f32.mrf.mxu0  ;;  %v10969_v11 = vpop.f32.mrf.mxu1 }
 0x587   :  { %v9293_v15 = vpack.c.bf16 %v6915_v41, %v6915_v41  ;;  %v6740_v1 = vmax.f32 %v5011_v25, %v6460_v9  ;;  %v16795_v25 = vld [vmem:[#allocation230_spill] sm:$0xff]  ;;  %v16796_v63 = vld [vmem:[#allocation231_spill] sm:$0xff] }
 0x588   :  { %v4736_v12 = vpop.f32.mrf.mxu0  ;;  %v6465_v13 = vpop.f32.mrf.mxu1  ;;  %v16797_v11 = vmax.f32 %v16795_v25, %v16796_v63 }
 0x589   :  { %7762 = vst.msk [vmem:[%s15848_s3 + $0x210] sm:$0xf] %vm7629_vm4, %v9293_v15  ;;  %v6916_v22 = vadd.f32 %v15542_v32, %v6740_v1  ;;  %v5012_v14 = vmax.f32 %v16782_v16, %v4736_v12 }
 0x58a   :  { %v10630_v34 = vpop.f32.mrf.mxu0  ;;  %v10972_v33 = vpop.f32.mrf.mxu1 }
 0x58b   :  { %v9294_v29 = vpack.c.bf16 %v6916_v22, %v6916_v22  ;;  %v6741_v48 = vmax.f32 %v5012_v14, %v6465_v13  ;;  %v16798_v14 = vld [vmem:[#allocation232_spill] sm:$0xff]  ;;  %v16799_v34 = vld [vmem:[#allocation233_spill] sm:$0xff] }
 0x58c   :  { %v4739_v49 = vpop.f32.mrf.mxu0  ;;  %v6468_v27 = vpop.f32.mrf.mxu1  ;;  %v16800_v33 = vmax.f32 %v16798_v14, %v16799_v34 }
 0x58d   :  { %7763 = vst.msk [vmem:[%s15848_s3 + $0x214] sm:$0xf] %vm7629_vm4, %v9294_v29  ;;  %v6917_v38 = vadd.f32 %v15542_v32, %v6741_v48  ;;  %v5013_v28 = vmax.f32 %v16785_v60, %v4739_v49 }
 0x58e   :  { %v10631_v30 = vpop.f32.mrf.mxu0  ;;  %v10973_v56 = vpop.f32.mrf.mxu1 }
 0x58f   :  { %v9295_v57 = vpack.c.bf16 %v6917_v38, %v6917_v38  ;;  %v6742_v26 = vmax.f32 %v5013_v28, %v6468_v27  ;;  %v16801_v28 = vld [vmem:[#allocation234_spill] sm:$0xff]  ;;  %v16802_v30 = vld [vmem:[#allocation235_spill] sm:$0xff] }
 0x590   :  { %v4744_v2 = vpop.f32.mrf.mxu0  ;;  %v6473_v17 = vpop.f32.mrf.mxu1  ;;  %v16803_v56 = vmax.f32 %v16801_v28, %v16802_v30 }
 0x591   :  { %7764 = vst.msk [vmem:[%s15848_s3 + $0x218] sm:$0xf] %vm7629_vm4, %v9295_v57  ;;  %v6918_v18 = vadd.f32 %v15542_v32, %v6742_v26  ;;  %v5014_v51 = vmax.f32 %v16788_v45, %v4744_v2 }
 0x592   :  { %v10634_v39 = vpop.f32.mrf.mxu0  ;;  %v10976_v53 = vpop.f32.mrf.mxu1 }
 0x593   :  { %v9296_v54 = vpack.c.bf16 %v6918_v18, %v6918_v18  ;;  %v6743_v5 = vmax.f32 %v5014_v51, %v6473_v17  ;;  %v16804_v51 = vld [vmem:[#allocation236_spill] sm:$0xff]  ;;  %v16805_v39 = vld [vmem:[#allocation237_spill] sm:$0xff] }
 0x594   :  { %v4747_v6 = vpop.f32.mrf.mxu0  ;;  %v6476_v31 = vpop.f32.mrf.mxu1  ;;  %v16806_v53 = vmax.f32 %v16804_v51, %v16805_v39 }
 0x595   :  { %7765 = vst.msk [vmem:[%s15848_s3 + $0x21c] sm:$0xf] %vm7629_vm4, %v9296_v54  ;;  %v6919_v36 = vadd.f32 %v15542_v32, %v6743_v5  ;;  %v5015_v43 = vmax.f32 %v16791_v37, %v4747_v6 }
 0x596   :  { %v10635_v50 = vpop.f32.mrf.mxu0  ;;  %v10977_v46 = vpop.f32.mrf.mxu1 }
 0x597   :  { %v9297_v47 = vpack.c.bf16 %v6919_v36, %v6919_v36  ;;  %v6744_v19 = vmax.f32 %v5015_v43, %v6476_v31  ;;  %v16807_v43 = vld [vmem:[#allocation238_spill] sm:$0xff]  ;;  %v16808_v50 = vld [vmem:[#allocation239_spill] sm:$0xff] }
 0x598   :  { %v4752_v58 = vpop.f32.mrf.mxu0  ;;  %v6481_v3 = vpop.f32.mrf.mxu1  ;;  %v16809_v46 = vmax.f32 %v16807_v43, %v16808_v50 }
 0x599   :  { %7766 = vst.msk [vmem:[%s15848_s3 + $0x220] sm:$0xf] %vm7629_vm4, %v9297_v47  ;;  %v6920_v4 = vadd.f32 %v15542_v32, %v6744_v19  ;;  %v5016_v0 = vmax.f32 %v16794_v7, %v4752_v58 }
 0x59a   :  { %v10638_v24 = vpop.f32.mrf.mxu0  ;;  %v10980_v62 = vpop.f32.mrf.mxu1 }
 0x59b   :  { %v9298_v9 = vpack.c.bf16 %v6920_v4, %v6920_v4  ;;  %v6745_v41 = vmax.f32 %v5016_v0, %v6481_v3  ;;  %v16810_v0 = vld [vmem:[#allocation240_spill] sm:$0xff]  ;;  %v16811_v24 = vld [vmem:[#allocation241_spill] sm:$0xff] }
 0x59c   :  { %v4755_v42 = vpop.f32.mrf.mxu0  ;;  %v6484_v8 = vpop.f32.mrf.mxu1  ;;  %v16812_v62 = vmax.f32 %v16810_v0, %v16811_v24 }
 0x59d   :  { %7767 = vst.msk [vmem:[%s15848_s3 + $0x224] sm:$0xf] %vm7629_vm4, %v9298_v9  ;;  %v6921_v61 = vadd.f32 %v15542_v32, %v6745_v41  ;;  %v5017_v15 = vmax.f32 %v16797_v11, %v4755_v42 }
 0x59e   :  { %v10639_v1 = vpop.f32.mrf.mxu0  ;;  %v10981_v12 = vpop.f32.mrf.mxu1 }
 0x59f   :  { %v9299_v13 = vpack.c.bf16 %v6921_v61, %v6921_v61  ;;  %v6746_v22 = vmax.f32 %v5017_v15, %v6484_v8  ;;  %v16813_v15 = vld [vmem:[#allocation242_spill] sm:$0xff]  ;;  %v16814_v1 = vld [vmem:[#allocation243_spill] sm:$0xff] }
 0x5a0   :  { %v4760_v23 = vpop.f32.mrf.mxu0  ;;  %v6489_v55 = vpop.f32.mrf.mxu1  ;;  %v16815_v12 = vmax.f32 %v16813_v15, %v16814_v1 }
 0x5a1   :  { %7768 = vst.msk [vmem:[%s15848_s3 + $0x228] sm:$0xf] %vm7629_vm4, %v9299_v13  ;;  %v6922_v16 = vadd.f32 %v15542_v32, %v6746_v22  ;;  %v5018_v29 = vmax.f32 %v16800_v33, %v4760_v23 }
 0x5a2   :  { %v10642_v48 = vpop.f32.mrf.mxu0  ;;  %v10984_v49 = vpop.f32.mrf.mxu1 }
 0x5a3   :  { %v9300_v27 = vpack.c.bf16 %v6922_v16, %v6922_v16  ;;  %v6747_v38 = vmax.f32 %v5018_v29, %v6489_v55  ;;  %v16816_v29 = vld [vmem:[#allocation244_spill] sm:$0xff]  ;;  %v16817_v48 = vld [vmem:[#allocation245_spill] sm:$0xff] }
 0x5a4   :  { %v4763_v21 = vpop.f32.mrf.mxu0  ;;  %v6492_v52 = vpop.f32.mrf.mxu1  ;;  %v16818_v49 = vmax.f32 %v16816_v29, %v16817_v48 }
 0x5a5   :  { %7769 = vst.msk [vmem:[%s15848_s3 + $0x22c] sm:$0xf] %vm7629_vm4, %v9300_v27  ;;  %v6923_v60 = vadd.f32 %v15542_v32, %v6747_v38  ;;  %v5019_v57 = vmax.f32 %v16803_v56, %v4763_v21 }
 0x5a6   :  { %v10643_v26 = vpop.f32.mrf.mxu0  ;;  %v10985_v2 = vpop.f32.mrf.mxu1 }
 0x5a7   :  { %v9301_v17 = vpack.c.bf16 %v6923_v60, %v6923_v60  ;;  %v6748_v18 = vmax.f32 %v5019_v57, %v6492_v52  ;;  %v16819_v57 = vld [vmem:[#allocation246_spill] sm:$0xff]  ;;  %v16820_v26 = vld [vmem:[#allocation247_spill] sm:$0xff] }
 0x5a8   :  { %v4768_v35 = vpop.f32.mrf.mxu0  ;;  %v6497_v44 = vpop.f32.mrf.mxu1  ;;  %v16821_v2 = vmax.f32 %v16819_v57, %v16820_v26 }
 0x5a9   :  { %7770 = vst.msk [vmem:[%s15848_s3 + $0x230] sm:$0xf] %vm7629_vm4, %v9301_v17  ;;  %v6924_v45 = vadd.f32 %v15542_v32, %v6748_v18  ;;  %v5020_v54 = vmax.f32 %v16806_v53, %v4768_v35 }
 0x5aa   :  { %v10646_v5 = vpop.f32.mrf.mxu0  ;;  %v10988_v6 = vpop.f32.mrf.mxu1 }
 0x5ab   :  { %v9302_v31 = vpack.c.bf16 %v6924_v45, %v6924_v45  ;;  %v6749_v36 = vmax.f32 %v5020_v54, %v6497_v44  ;;  %v16822_v54 = vld [vmem:[#allocation248_spill] sm:$0xff]  ;;  %v16823_v5 = vld [vmem:[#allocation249_spill] sm:$0xff] }
 0x5ac   :  { %v4771_v59 = vpop.f32.mrf.mxu0  ;;  %v6500_v20 = vpop.f32.mrf.mxu1  ;;  %v16824_v6 = vmax.f32 %v16822_v54, %v16823_v5 }
 0x5ad   :  { %7771 = vst.msk [vmem:[%s15848_s3 + $0x234] sm:$0xf] %vm7629_vm4, %v9302_v31  ;;  %v6925_v37 = vadd.f32 %v15542_v32, %v6749_v36  ;;  %v5021_v47 = vmax.f32 %v16809_v46, %v4771_v59 }
 0x5ae   :  { %v10647_v19 = vpop.f32.mrf.mxu0  ;;  %v10989_v58 = vpop.f32.mrf.mxu1 }
 0x5af   :  { %v9303_v3 = vpack.c.bf16 %v6925_v37, %v6925_v37  ;;  %v6750_v4 = vmax.f32 %v5021_v47, %v6500_v20  ;;  %v16825_v47 = vld [vmem:[#allocation250_spill] sm:$0xff]  ;;  %v16826_v19 = vld [vmem:[#allocation251_spill] sm:$0xff] }
 0x5b0   :  { %v4776_v40 = vpop.f32.mrf.mxu0  ;;  %v6505_v10 = vpop.f32.mrf.mxu1  ;;  %v16827_v58 = vmax.f32 %v16825_v47, %v16826_v19 }
 0x5b1   :  { %7772 = vst.msk [vmem:[%s15848_s3 + $0x238] sm:$0xf] %vm7629_vm4, %v9303_v3  ;;  %v6926_v7 = vadd.f32 %v15542_v32, %v6750_v4  ;;  %v5022_v9 = vmax.f32 %v16812_v62, %v4776_v40 }
 0x5b2   :  { %v10650_v41 = vpop.f32.mrf.mxu0  ;;  %v10992_v42 = vpop.f32.mrf.mxu1 }
 0x5b3   :  { %v9304_v8 = vpack.c.bf16 %v6926_v7, %v6926_v7  ;;  %v6751_v61 = vmax.f32 %v5022_v9, %v6505_v10  ;;  %v16828_v9 = vld [vmem:[#allocation252_spill] sm:$0xff]  ;;  %v16829_v41 = vld [vmem:[#allocation253_spill] sm:$0xff] }
 0x5b4   :  { %v4779_v25 = vpop.f32.mrf.mxu0  ;;  %v6508_v63 = vpop.f32.mrf.mxu1  ;;  %v16830_v42 = vmax.f32 %v16828_v9, %v16829_v41 }
 0x5b5   :  { %7773 = vst.msk [vmem:[%s15848_s3 + $0x23c] sm:$0xf] %vm7629_vm4, %v9304_v8  ;;  %v6927_v11 = vadd.f32 %v15542_v32, %v6751_v61  ;;  %v5023_v13 = vmax.f32 %v16815_v12, %v4779_v25 }
 0x5b6   :  { %v10651_v22 = vpop.f32.mrf.mxu0  ;;  %v10993_v23 = vpop.f32.mrf.mxu1 }
 0x5b7   :  { %v9305_v55 = vpack.c.bf16 %v6927_v11, %v6927_v11  ;;  %v6752_v16 = vmax.f32 %v5023_v13, %v6508_v63  ;;  %v16831_v13 = vld [vmem:[#allocation254_spill] sm:$0xff]  ;;  %v16832_v22 = vld [vmem:[#allocation255_spill] sm:$0xff] }
 0x5b8   :  { %v4784_v14 = vpop.f32.mrf.mxu0  ;;  %v6513_v34 = vpop.f32.mrf.mxu1  ;;  %v16833_v23 = vmax.f32 %v16831_v13, %v16832_v22 }
 0x5b9   :  { %7774 = vst.msk [vmem:[%s15848_s3 + $0x240] sm:$0xf] %vm7629_vm4, %v9305_v55  ;;  %v6928_v33 = vadd.f32 %v15542_v32, %v6752_v16  ;;  %v5024_v27 = vmax.f32 %v16818_v49, %v4784_v14 }
 0x5ba   :  { %v10654_v38 = vpop.f32.mrf.mxu0  ;;  %v10996_v21 = vpop.f32.mrf.mxu1 }
 0x5bb   :  { %v9306_v52 = vpack.c.bf16 %v6928_v33, %v6928_v33  ;;  %v6753_v60 = vmax.f32 %v5024_v27, %v6513_v34  ;;  %v16834_v27 = vld [vmem:[#allocation256_spill] sm:$0xff]  ;;  %v16835_v38 = vld [vmem:[#allocation257_spill] sm:$0xff] }
 0x5bc   :  { %v4787_v28 = vpop.f32.mrf.mxu0  ;;  %v6516_v30 = vpop.f32.mrf.mxu1  ;;  %v16836_v21 = vmax.f32 %v16834_v27, %v16835_v38 }
 0x5bd   :  { %7775 = vst.msk [vmem:[%s15848_s3 + $0x244] sm:$0xf] %vm7629_vm4, %v9306_v52  ;;  %v6929_v56 = vadd.f32 %v15542_v32, %v6753_v60  ;;  %v5025_v17 = vmax.f32 %v16821_v2, %v4787_v28 }
 0x5be   :  { %v10655_v18 = vpop.f32.mrf.mxu0  ;;  %v10997_v35 = vpop.f32.mrf.mxu1 }
 0x5bf   :  { %v9307_v44 = vpack.c.bf16 %v6929_v56, %v6929_v56  ;;  %v6754_v45 = vmax.f32 %v5025_v17, %v6516_v30  ;;  %v16837_v17 = vld [vmem:[#allocation258_spill] sm:$0xff]  ;;  %v16838_v18 = vld [vmem:[#allocation259_spill] sm:$0xff] }
 0x5c0   :  { %v4792_v51 = vpop.f32.mrf.mxu0  ;;  %v6521_v39 = vpop.f32.mrf.mxu1  ;;  %v16839_v35 = vmax.f32 %v16837_v17, %v16838_v18 }
 0x5c1   :  { %7776 = vst.msk [vmem:[%s15848_s3 + $0x248] sm:$0xf] %vm7629_vm4, %v9307_v44  ;;  %v6930_v53 = vadd.f32 %v15542_v32, %v6754_v45  ;;  %v5026_v31 = vmax.f32 %v16824_v6, %v4792_v51 }
 0x5c2   :  { %v10658_v36 = vpop.f32.mrf.mxu0  ;;  %v11000_v59 = vpop.f32.mrf.mxu1 }
 0x5c3   :  { %v9308_v20 = vpack.c.bf16 %v6930_v53, %v6930_v53  ;;  %v6755_v37 = vmax.f32 %v5026_v31, %v6521_v39  ;;  %v16840_v31 = vld [vmem:[#allocation260_spill] sm:$0xff]  ;;  %v16841_v36 = vld [vmem:[#allocation261_spill] sm:$0xff] }
 0x5c4   :  { %v4795_v43 = vpop.f32.mrf.mxu0  ;;  %v6524_v50 = vpop.f32.mrf.mxu1  ;;  %v16842_v59 = vmax.f32 %v16840_v31, %v16841_v36 }
 0x5c5   :  { %7777 = vst.msk [vmem:[%s15848_s3 + $0x24c] sm:$0xf] %vm7629_vm4, %v9308_v20  ;;  %v6931_v46 = vadd.f32 %v15542_v32, %v6755_v37  ;;  %v5027_v3 = vmax.f32 %v16827_v58, %v4795_v43 }
 0x5c6   :  { %v10659_v4 = vpop.f32.mrf.mxu0  ;;  %v11001_v40 = vpop.f32.mrf.mxu1 }
 0x5c7   :  { %v9309_v10 = vpack.c.bf16 %v6931_v46, %v6931_v46  ;;  %v6756_v7 = vmax.f32 %v5027_v3, %v6524_v50  ;;  %v16843_v3 = vld [vmem:[#allocation262_spill] sm:$0xff]  ;;  %v16844_v4 = vld [vmem:[#allocation263_spill] sm:$0xff] }
 0x5c8   :  { %v4800_v0 = vpop.f32.mrf.mxu0  ;;  %v6529_v24 = vpop.f32.mrf.mxu1  ;;  %v16845_v40 = vmax.f32 %v16843_v3, %v16844_v4 }
 0x5c9   :  { %7778 = vst.msk [vmem:[%s15848_s3 + $0x250] sm:$0xf] %vm7629_vm4, %v9309_v10  ;;  %v6932_v62 = vadd.f32 %v15542_v32, %v6756_v7  ;;  %v5028_v8 = vmax.f32 %v16830_v42, %v4800_v0 }
 0x5ca   :  { %v10662_v61 = vpop.f32.mrf.mxu0  ;;  %v11004_v25 = vpop.f32.mrf.mxu1 }
 0x5cb   :  { %v9310_v63 = vpack.c.bf16 %v6932_v62, %v6932_v62  ;;  %v6757_v11 = vmax.f32 %v5028_v8, %v6529_v24  ;;  %v16846_v8 = vld [vmem:[#allocation264_spill] sm:$0xff]  ;;  %v16847_v61 = vld [vmem:[#allocation265_spill] sm:$0xff] }
 0x5cc   :  { %v4803_v15 = vpop.f32.mrf.mxu0  ;;  %v6532_v1 = vpop.f32.mrf.mxu1  ;;  %v16848_v25 = vmax.f32 %v16846_v8, %v16847_v61 }
 0x5cd   :  { %7779 = vst.msk [vmem:[%s15848_s3 + $0x254] sm:$0xf] %vm7629_vm4, %v9310_v63  ;;  %v6933_v12 = vadd.f32 %v15542_v32, %v6757_v11  ;;  %v5029_v55 = vmax.f32 %v16833_v23, %v4803_v15 }
 0x5ce   :  { %v10663_v16 = vpop.f32.mrf.mxu0  ;;  %v11005_v14 = vpop.f32.mrf.mxu1 }
 0x5cf   :  { %v9311_v34 = vpack.c.bf16 %v6933_v12, %v6933_v12  ;;  %v6758_v33 = vmax.f32 %v5029_v55, %v6532_v1  ;;  %v16849_v55 = vld [vmem:[#allocation266_spill] sm:$0xff]  ;;  %v16850_v16 = vld [vmem:[#allocation267_spill] sm:$0xff] }
 0x5d0   :  { %v4808_v29 = vpop.f32.mrf.mxu0  ;;  %v6537_v48 = vpop.f32.mrf.mxu1  ;;  %v16851_v14 = vmax.f32 %v16849_v55, %v16850_v16 }
 0x5d1   :  { %7780 = vst.msk [vmem:[%s15848_s3 + $0x258] sm:$0xf] %vm7629_vm4, %v9311_v34  ;;  %v6934_v49 = vadd.f32 %v15542_v32, %v6758_v33  ;;  %v5030_v52 = vmax.f32 %v16836_v21, %v4808_v29 }
 0x5d2   :  { %v10666_v60 = vpop.f32.mrf.mxu0  ;;  %v11008_v28 = vpop.f32.mrf.mxu1 }
 0x5d3   :  { %v9312_v30 = vpack.c.bf16 %v6934_v49, %v6934_v49  ;;  %v6759_v56 = vmax.f32 %v5030_v52, %v6537_v48  ;;  %v16852_v52 = vld [vmem:[#allocation268_spill] sm:$0xff]  ;;  %v16853_v60 = vld [vmem:[#allocation269_spill] sm:$0xff] }
 0x5d4   :  { %v4811_v57 = vpop.f32.mrf.mxu0  ;;  %v6540_v26 = vpop.f32.mrf.mxu1  ;;  %v16854_v28 = vmax.f32 %v16852_v52, %v16853_v60 }
 0x5d5   :  { %7781 = vst.msk [vmem:[%s15848_s3 + $0x25c] sm:$0xf] %vm7629_vm4, %v9312_v30  ;;  %v6935_v2 = vadd.f32 %v15542_v32, %v6759_v56  ;;  %v5031_v44 = vmax.f32 %v16839_v35, %v4811_v57 }
 0x5d6   :  { %v10667_v45 = vpop.f32.mrf.mxu0  ;;  %v11009_v51 = vpop.f32.mrf.mxu1 }
 0x5d7   :  { %v9313_v39 = vpack.c.bf16 %v6935_v2, %v6935_v2  ;;  %v6760_v53 = vmax.f32 %v5031_v44, %v6540_v26  ;;  %v16855_v44 = vld [vmem:[#allocation270_spill] sm:$0xff]  ;;  %v16856_v45 = vld [vmem:[#allocation271_spill] sm:$0xff] }
 0x5d8   :  { %v4816_v54 = vpop.f32.mrf.mxu0  ;;  %v6545_v5 = vpop.f32.mrf.mxu1  ;;  %v16857_v51 = vmax.f32 %v16855_v44, %v16856_v45 }
 0x5d9   :  { %7782 = vst.msk [vmem:[%s15848_s3 + $0x260] sm:$0xf] %vm7629_vm4, %v9313_v39  ;;  %v6936_v6 = vadd.f32 %v15542_v32, %v6760_v53  ;;  %v5032_v20 = vmax.f32 %v16842_v59, %v4816_v54 }
 0x5da   :  { %v10670_v37 = vpop.f32.mrf.mxu0  ;;  %v11012_v43 = vpop.f32.mrf.mxu1 }
 0x5db   :  { %v9314_v50 = vpack.c.bf16 %v6936_v6, %v6936_v6  ;;  %v6761_v46 = vmax.f32 %v5032_v20, %v6545_v5  ;;  %v16858_v20 = vld [vmem:[#allocation272_spill] sm:$0xff]  ;;  %v16859_v37 = vld [vmem:[#allocation273_spill] sm:$0xff] }
 0x5dc   :  { %v4819_v47 = vpop.f32.mrf.mxu0  ;;  %v6548_v19 = vpop.f32.mrf.mxu1  ;;  %v16860_v43 = vmax.f32 %v16858_v20, %v16859_v37 }
 0x5dd   :  { %7783 = vst.msk [vmem:[%s15848_s3 + $0x264] sm:$0xf] %vm7629_vm4, %v9314_v50  ;;  %v6937_v58 = vadd.f32 %v15542_v32, %v6761_v46  ;;  %v5033_v10 = vmax.f32 %v16845_v40, %v4819_v47 }
 0x5de   :  { %v10671_v7 = vpop.f32.mrf.mxu0  ;;  %v11013_v0 = vpop.f32.mrf.mxu1 }
 0x5df   :  { %v9315_v24 = vpack.c.bf16 %v6937_v58, %v6937_v58  ;;  %v6762_v62 = vmax.f32 %v5033_v10, %v6548_v19  ;;  %v16861_v10 = vld [vmem:[#allocation274_spill] sm:$0xff]  ;;  %v16862_v7 = vld [vmem:[#allocation275_spill] sm:$0xff] }
 0x5e0   :  { %v4824_v9 = vpop.f32.mrf.mxu0  ;;  %v6553_v41 = vpop.f32.mrf.mxu1  ;;  %v16863_v0 = vmax.f32 %v16861_v10, %v16862_v7 }
 0x5e1   :  { %7784 = vst.msk [vmem:[%s15848_s3 + $0x268] sm:$0xf] %vm7629_vm4, %v9315_v24  ;;  %v6938_v42 = vadd.f32 %v15542_v32, %v6762_v62  ;;  %v5034_v63 = vmax.f32 %v16848_v25, %v4824_v9 }
 0x5e2   :  { %v10674_v11 = vpop.f32.mrf.mxu0  ;;  %v11016_v15 = vpop.f32.mrf.mxu1 }
 0x5e3   :  { %v9316_v1 = vpack.c.bf16 %v6938_v42, %v6938_v42  ;;  %v6763_v12 = vmax.f32 %v5034_v63, %v6553_v41  ;;  %v16864_v63 = vld [vmem:[#allocation276_spill] sm:$0xff]  ;;  %v16865_v11 = vld [vmem:[#allocation277_spill] sm:$0xff] }
 0x5e4   :  { %v4827_v13 = vpop.f32.mrf.mxu0  ;;  %v6556_v22 = vpop.f32.mrf.mxu1  ;;  %v16866_v15 = vmax.f32 %v16864_v63, %v16865_v11 }
 0x5e5   :  { %7785 = vst.msk [vmem:[%s15848_s3 + $0x26c] sm:$0xf] %vm7629_vm4, %v9316_v1  ;;  %v6939_v23 = vadd.f32 %v15542_v32, %v6763_v12  ;;  %v5035_v34 = vmax.f32 %v16851_v14, %v4827_v13 }
 0x5e6   :  { %v10675_v33 = vpop.f32.mrf.mxu0  ;;  %v11017_v29 = vpop.f32.mrf.mxu1 }
 0x5e7   :  { %v9317_v48 = vpack.c.bf16 %v6939_v23, %v6939_v23  ;;  %v6764_v49 = vmax.f32 %v5035_v34, %v6556_v22  ;;  %v16867_v34 = vld [vmem:[#allocation278_spill] sm:$0xff]  ;;  %v16868_v33 = vld [vmem:[#allocation279_spill] sm:$0xff] }
 0x5e8   :  { %v4832_v27 = vpop.f32.mrf.mxu0  ;;  %v6561_v38 = vpop.f32.mrf.mxu1  ;;  %v16869_v29 = vmax.f32 %v16867_v34, %v16868_v33 }
 0x5e9   :  { %7786 = vst.msk [vmem:[%s15848_s3 + $0x270] sm:$0xf] %vm7629_vm4, %v9317_v48  ;;  %v6940_v21 = vadd.f32 %v15542_v32, %v6764_v49  ;;  %v5036_v30 = vmax.f32 %v16854_v28, %v4832_v27 }
 0x5ea   :  { %v10678_v56 = vpop.f32.mrf.mxu0  ;;  %v11020_v57 = vpop.f32.mrf.mxu1 }
 0x5eb   :  { %v9318_v26 = vpack.c.bf16 %v6940_v21, %v6940_v21  ;;  %v6765_v2 = vmax.f32 %v5036_v30, %v6561_v38  ;;  %v16870_v30 = vld [vmem:[#allocation280_spill] sm:$0xff]  ;;  %v16871_v56 = vld [vmem:[#allocation281_spill] sm:$0xff] }
 0x5ec   :  { %v4835_v17 = vpop.f32.mrf.mxu0  ;;  %v6564_v18 = vpop.f32.mrf.mxu1  ;;  %v16872_v57 = vmax.f32 %v16870_v30, %v16871_v56 }
 0x5ed   :  { %7787 = vst.msk [vmem:[%s15848_s3 + $0x274] sm:$0xf] %vm7629_vm4, %v9318_v26  ;;  %v6941_v35 = vadd.f32 %v15542_v32, %v6765_v2  ;;  %v5037_v39 = vmax.f32 %v16857_v51, %v4835_v17 }
 0x5ee   :  { %v10679_v53 = vpop.f32.mrf.mxu0  ;;  %v11021_v54 = vpop.f32.mrf.mxu1 }
 0x5ef   :  { %v9319_v5 = vpack.c.bf16 %v6941_v35, %v6941_v35  ;;  %v6766_v6 = vmax.f32 %v5037_v39, %v6564_v18  ;;  %v16873_v39 = vld [vmem:[#allocation282_spill] sm:$0xff]  ;;  %v16874_v53 = vld [vmem:[#allocation283_spill] sm:$0xff] }
 0x5f0   :  { %v4840_v31 = vpop.f32.mrf.mxu0  ;;  %v6569_v36 = vpop.f32.mrf.mxu1  ;;  %v16875_v54 = vmax.f32 %v16873_v39, %v16874_v53 }
 0x5f1   :  { %7788 = vst.msk [vmem:[%s15848_s3 + $0x278] sm:$0xf] %vm7629_vm4, %v9319_v5  ;;  %v6942_v59 = vadd.f32 %v15542_v32, %v6766_v6  ;;  %v5038_v50 = vmax.f32 %v16860_v43, %v4840_v31 }
 0x5f2   :  { %v10682_v46 = vpop.f32.mrf.mxu0  ;;  %v11024_v47 = vpop.f32.mrf.mxu1 }
 0x5f3   :  { %v9320_v19 = vpack.c.bf16 %v6942_v59, %v6942_v59  ;;  %v6767_v58 = vmax.f32 %v5038_v50, %v6569_v36  ;;  %v16876_v50 = vld [vmem:[#allocation284_spill] sm:$0xff]  ;;  %v16877_v46 = vld [vmem:[#allocation285_spill] sm:$0xff] }
 0x5f4   :  { %v4843_v3 = vpop.f32.mrf.mxu0  ;;  %v6572_v4 = vpop.f32.mrf.mxu1  ;;  %v16878_v47 = vmax.f32 %v16876_v50, %v16877_v46 }
 0x5f5   :  { %7789 = vst.msk [vmem:[%s15848_s3 + $0x27c] sm:$0xf] %vm7629_vm4, %v9320_v19  ;;  %v6943_v40 = vadd.f32 %v15542_v32, %v6767_v58  ;;  %v5039_v24 = vmax.f32 %v16863_v0, %v4843_v3 }
 0x5f6   :  { %v10683_v62 = vpop.f32.mrf.mxu0  ;;  %v11025_v9 = vpop.f32.mrf.mxu1 }
 0x5f7   :  { %v9321_v41 = vpack.c.bf16 %v6943_v40, %v6943_v40  ;;  %v6768_v42 = vmax.f32 %v5039_v24, %v6572_v4  ;;  %v16879_v24 = vld [vmem:[#allocation286_spill] sm:$0xff]  ;;  %v16880_v62 = vld [vmem:[#allocation287_spill] sm:$0xff] }
 0x5f8   :  { %v4848_v8 = vpop.f32.mrf.mxu0  ;;  %v6577_v61 = vpop.f32.mrf.mxu1  ;;  %v16881_v9 = vmax.f32 %v16879_v24, %v16880_v62 }
 0x5f9   :  { %7790 = vst.msk [vmem:[%s15848_s3 + $0x280] sm:$0xf] %vm7629_vm4, %v9321_v41  ;;  %v6944_v25 = vadd.f32 %v15542_v32, %v6768_v42  ;;  %v5040_v1 = vmax.f32 %v16866_v15, %v4848_v8 }
 0x5fa   :  { %v10686_v12 = vpop.f32.mrf.mxu0  ;;  %v11028_v13 = vpop.f32.mrf.mxu1 }
 0x5fb   :  { %v9322_v22 = vpack.c.bf16 %v6944_v25, %v6944_v25  ;;  %v6769_v23 = vmax.f32 %v5040_v1, %v6577_v61  ;;  %v16882_v1 = vld [vmem:[#allocation288_spill] sm:$0xff]  ;;  %v16883_v12 = vld [vmem:[#allocation289_spill] sm:$0xff] }
 0x5fc   :  { %v4851_v55 = vpop.f32.mrf.mxu0  ;;  %v6580_v16 = vpop.f32.mrf.mxu1  ;;  %v16884_v13 = vmax.f32 %v16882_v1, %v16883_v12 }
 0x5fd   :  { %7791 = vst.msk [vmem:[%s15848_s3 + $0x284] sm:$0xf] %vm7629_vm4, %v9322_v22  ;;  %v6945_v14 = vadd.f32 %v15542_v32, %v6769_v23  ;;  %v5041_v48 = vmax.f32 %v16869_v29, %v4851_v55 }
 0x5fe   :  { %v10687_v49 = vpop.f32.mrf.mxu0  ;;  %v11029_v27 = vpop.f32.mrf.mxu1 }
 0x5ff   :  { %v9323_v38 = vpack.c.bf16 %v6945_v14, %v6945_v14  ;;  %v6770_v21 = vmax.f32 %v5041_v48, %v6580_v16 }
 0x600   :  { %v4856_v52 = vpop.f32.mrf.mxu0  ;;  %v6585_v60 = vpop.f32.mrf.mxu1 }
 0x601   :  { %7792 = vst.msk [vmem:[%s15848_s3 + $0x288] sm:$0xf] %vm7629_vm4, %v9323_v38  ;;  %v6946_v28 = vadd.f32 %v15542_v32, %v6770_v21  ;;  %v5042_v26 = vmax.f32 %v16872_v57, %v4856_v52 }
 0x602   :  { %v10690_v2 = vpop.f32.mrf.mxu0  ;;  %v11032_v17 = vpop.f32.mrf.mxu1 }
 0x603   :  { %v9324_v18 = vpack.c.bf16 %v6946_v28, %v6946_v28  ;;  %v6771_v35 = vmax.f32 %v5042_v26, %v6585_v60 }
 0x604   :  { %v4859_v44 = vpop.f32.mrf.mxu0  ;;  %v6588_v45 = vpop.f32.mrf.mxu1 }
 0x605   :  { %7793 = vst.msk [vmem:[%s15848_s3 + $0x28c] sm:$0xf] %vm7629_vm4, %v9324_v18  ;;  %v6947_v51 = vadd.f32 %v15542_v32, %v6771_v35  ;;  %v5043_v5 = vmax.f32 %v16875_v54, %v4859_v44 }
 0x606   :  { %v10691_v6 = vpop.f32.mrf.mxu0  ;;  %v11033_v31 = vpop.f32.mrf.mxu1 }
 0x607   :  { %v9325_v36 = vpack.c.bf16 %v6947_v51, %v6947_v51  ;;  %v6772_v59 = vmax.f32 %v5043_v5, %v6588_v45 }
 0x608   :  { %v4864_v20 = vpop.f32.mrf.mxu0  ;;  %v6593_v37 = vpop.f32.mrf.mxu1 }
 0x609   :  { %7794 = vst.msk [vmem:[%s15848_s3 + $0x290] sm:$0xf] %vm7629_vm4, %v9325_v36  ;;  %v6948_v43 = vadd.f32 %v15542_v32, %v6772_v59  ;;  %v5044_v19 = vmax.f32 %v16878_v47, %v4864_v20 }
 0x60a   :  { %v10694_v58 = vpop.f32.mrf.mxu0  ;;  %v11036_v3 = vpop.f32.mrf.mxu1 }
 0x60b   :  { %v9326_v4 = vpack.c.bf16 %v6948_v43, %v6948_v43  ;;  %v6773_v40 = vmax.f32 %v5044_v19, %v6593_v37 }
 0x60c   :  { %v4867_v10 = vpop.f32.mrf.mxu0  ;;  %v6596_v7 = vpop.f32.mrf.mxu1 }
 0x60d   :  { %7795 = vst.msk [vmem:[%s15848_s3 + $0x294] sm:$0xf] %vm7629_vm4, %v9326_v4  ;;  %v6949_v0 = vadd.f32 %v15542_v32, %v6773_v40  ;;  %v5045_v41 = vmax.f32 %v16881_v9, %v4867_v10 }
 0x60e   :  { %v10695_v42 = vpop.f32.mrf.mxu0  ;;  %v11037_v8 = vpop.f32.mrf.mxu1 }
 0x60f   :  { %v9327_v61 = vpack.c.bf16 %v6949_v0, %v6949_v0  ;;  %v6774_v25 = vmax.f32 %v5045_v41, %v6596_v7 }
 0x610   :  { %v4872_v63 = vpop.f32.mrf.mxu0  ;;  %v6601_v11 = vpop.f32.mrf.mxu1 }
 0x611   :  { %7796 = vst.msk [vmem:[%s15848_s3 + $0x298] sm:$0xf] %vm7629_vm4, %v9327_v61  ;;  %v6950_v15 = vadd.f32 %v15542_v32, %v6774_v25  ;;  %v5046_v22 = vmax.f32 %v16884_v13, %v4872_v63 }
 0x612   :  { %v10698_v23 = vpop.f32.mrf.mxu0  ;;  %v11040_v55 = vpop.f32.mrf.mxu1 }
 0x613   :  { %v9328_v16 = vpack.c.bf16 %v6950_v15, %v6950_v15  ;;  %v6775_v14 = vmax.f32 %v5046_v22, %v6601_v11 }
 0x614   :  { %v4875_v34 = vpop.f32.mrf.mxu0  ;;  %v6604_v33 = vpop.f32.mrf.mxu1 }
 0x615   :  { %7797 = vst.msk [vmem:[%s15848_s3 + $0x29c] sm:$0xf] %vm7629_vm4, %v9328_v16  ;;  %v6951_v29 = vadd.f32 %v15542_v32, %v6775_v14 }
 0x616   :  { %v10699_v48 = vpop.f32.mrf.mxu0  ;;  %v11041_v49 = vpop.f32.mrf.mxu1 }
 0x617   :  { %v9329_v27 = vpack.c.bf16 %v6951_v29, %v6951_v29 }
 0x619   :  { %7798 = vst.msk [vmem:[%s15848_s3 + $0x2a0] sm:$0xf] %vm7629_vm4, %v9329_v27 }

// kernel: hybrid_cnn_forward.3
= control target key start
LH: loop header
LB: loop body
LE: loop exit
PB: predicated region body
PF: predicated region fallthrough
CT: control target
= control target key end

     0   :  { %vm146_vm0 = vcmask 1043456   ;;  %vm300_vm1 = vcmask 633856   ;;  %s11936_s0 = inlined_call_operand.vmem [shape: bf16[8,5070], index: 0, kind: input, shape index: {}]   ;;  %s11937_s1 = inlined_call_operand.vmem [shape: bf16[5070,150], index: 1, kind: input, shape index: {}]   ;;  %s11938_s2 = inlined_call_operand.vmem [shape: f32[1,150], index: 2, kind: input, shape index: {}]   ;;  %s11939_s3 = inlined_call_operand.vmem [shape: f32[150,10], index: 3, kind: input, shape index: {}]   ;;  %s11940_s4 = inlined_call_operand.vmem [shape: f32[1,10], index: 4, kind: input, shape index: {}]   ;;  %s11941_s5 = inlined_call_operand.vmem [shape: f32[8,10], index: 5, kind: output, shape index: {}]  }
   0x1   :  { %v8818_v0 = vld [vmem:[%s11936_s0] sm:$0xff]  ;;  %v8823_v1 = vld [vmem:[%s11936_s0 + $0x8] sm:$0xff]  ;;  %v8828_v2 = vld [vmem:[%s11936_s0 + $0x10] sm:$0xff] }
   0x2   :  { %v8833_v3 = vld [vmem:[%s11936_s0 + $0x18] sm:$0xff]  ;;  %v8838_v4 = vld [vmem:[%s11936_s0 + $0x20] sm:$0xff]  ;;  %v8843_v5 = vld [vmem:[%s11936_s0 + $0x28] sm:$0xff]  ;;  %v8847_v6 = vcombine.low %v8818_v0, %v8818_v0  ;;  %v8851_v7 = vcombine.high %v8818_v0, %v8818_v0  ;;  %v8870_v11 = vcombine.low %v8823_v1, %v8823_v1  ;;  %v8874_v12 = vcombine.high %v8823_v1, %v8823_v1 }
   0x3   :  { %v8856_v8 = vld [vmem:[%s11936_s0 + $0x30] sm:$0xff]  ;;  %v8861_v9 = vld [vmem:[%s11936_s0 + $0x38] sm:$0xff]  ;;  %v8866_v10 = vld [vmem:[%s11936_s0 + $0x40] sm:$0xff]  ;;  %v8878_v13 = vcombine.low %v8828_v2, %v8828_v2  ;;  %v8882_v14 = vcombine.high %v8828_v2, %v8828_v2  ;;  %v8896_v17 = vcombine.low %v8833_v3, %v8833_v3  ;;  %v8900_v18 = vcombine.high %v8833_v3, %v8833_v3 }
   0x4   :  { %11966 = vst [vmem:[#allocation2_spill] sm:$0xff] %v8866_v10  ;;  %v8887_v15 = vld [vmem:[%s11936_s0 + $0x48] sm:$0xff]  ;;  %v8892_v16 = vld [vmem:[%s11936_s0 + $0x50] sm:$0xff]  ;;  %v8904_v19 = vcombine.low %v8838_v4, %v8838_v4  ;;  %v8908_v20 = vcombine.high %v8838_v4, %v8838_v4  ;;  %v8913_v21 = vld [vmem:[%s11936_s0 + $0x58] sm:$0xff]  ;;  %v8922_v23 = vcombine.low %v8843_v5, %v8843_v5  ;;  %v8926_v24 = vcombine.high %v8843_v5, %v8843_v5 }
   0x5   :  { %11967 = vst [vmem:[#allocation3_spill] sm:$0xff] %v8887_v15  ;;  %11968 = vst [vmem:[#allocation4_spill] sm:$0xff] %v8892_v16  ;;  %v8918_v22 = vld [vmem:[%s11936_s0 + $0x60] sm:$0xff]  ;;  %v8930_v25 = vcombine.low %v8856_v8, %v8856_v8  ;;  %v8934_v26 = vcombine.high %v8856_v8, %v8856_v8  ;;  %v8939_v27 = vld [vmem:[%s11936_s0 + $0x68] sm:$0xff]  ;;  %v8948_v29 = vcombine.low %v8861_v9, %v8861_v9  ;;  %v149_v59 = vsel %vm146_vm0, %v8847_v6, 2139127680 }
   0x6   :  { %11969 = vst [vmem:[#allocation5_spill] sm:$0xff] %v8913_v21  ;;  %11970 = vst [vmem:[#allocation6_spill] sm:$0xff] %v8918_v22  ;;  %v8944_v28 = vld [vmem:[%s11936_s0 + $0x70] sm:$0xff]  ;;  %v8952_v30 = vcombine.high %v8861_v9, %v8861_v9  ;;  %v8956_v31 = vcombine.low %v8866_v10, %v8866_v10  ;;  %v8960_v32 = vcombine.high %v8866_v10, %v8866_v10  ;;  %v8965_v33 = vld [vmem:[%s11936_s0 + $0x78] sm:$0xff]  ;;  %v152_v60 = vsel %vm146_vm0, %v8851_v7, 2139127680 }
   0x7   :  { %11971 = vst [vmem:[#allocation7_spill] sm:$0xff] %v8939_v27  ;;  %11972 = vst [vmem:[#allocation8_spill] sm:$0xff] %v8944_v28  ;;  %v8970_v34 = vld [vmem:[%s11936_s0 + $0x80] sm:$0xff]  ;;  %v8974_v35 = vcombine.low %v8887_v15, %v8887_v15  ;;  %v8978_v36 = vcombine.high %v8887_v15, %v8887_v15  ;;  %v8982_v37 = vcombine.low %v8892_v16, %v8892_v16  ;;  %v8991_v39 = vld [vmem:[%s11936_s0 + $0x88] sm:$0xff]  ;;  %v155_v61 = vsel %vm146_vm0, %v8870_v11, 2139127680 }
   0x8   :  { %11973 = vst [vmem:[#allocation9_spill] sm:$0xff] %v8965_v33  ;;  %11974 = vst [vmem:[#allocation10_spill] sm:$0xff] %v8970_v34  ;;  %v8986_v38 = vcombine.high %v8892_v16, %v8892_v16  ;;  %v8996_v40 = vld [vmem:[%s11936_s0 + $0x90] sm:$0xff]  ;;  %v9000_v41 = vcombine.low %v8913_v21, %v8913_v21  ;;  %v9004_v42 = vcombine.high %v8913_v21, %v8913_v21  ;;  %v9017_v45 = vld [vmem:[%s11936_s0 + $0x98] sm:$0xff]  ;;  %v158_v63 = vsel %vm146_vm0, %v8874_v12, 2139127680 }
   0x9   :  { %11975 = vst [vmem:[#allocation11_spill] sm:$0xff] %v8991_v39  ;;  %11976 = vst [vmem:[#allocation12_spill] sm:$0xff] %v8996_v40  ;;  %v9008_v43 = vcombine.low %v8918_v22, %v8918_v22  ;;  %v9012_v44 = vcombine.high %v8918_v22, %v8918_v22  ;;  %v9021_v46 = vcombine.low %v8939_v27, %v8939_v27  ;;  %v177_v21 = vsel %vm146_vm0, %v8904_v19, 2139127680  ;;  %s9239_s0 = smov 0  }
   0xa   :  { %11977 = vst [vmem:[#allocation13_spill] sm:$0xff] %v9017_v45  ;;  %v9025_v47 = vcombine.high %v8939_v27, %v8939_v27  ;;  %v9029_v48 = vcombine.low %v8944_v28, %v8944_v28  ;;  %v9033_v49 = vcombine.high %v8944_v28, %v8944_v28  ;;  %v9037_v50 = vcombine.low %v8965_v33, %v8965_v33 }
   0xb   :  { %v9041_v51 = vcombine.high %v8965_v33, %v8965_v33  ;;  %v9045_v52 = vcombine.low %v8970_v34, %v8970_v34  ;;  %v9049_v53 = vcombine.high %v8970_v34, %v8970_v34  ;;  %v9053_v54 = vcombine.low %v8991_v39, %v8991_v39 }
   0xc   :  { %v9057_v55 = vcombine.high %v8991_v39, %v8991_v39  ;;  %v9061_v56 = vcombine.low %v8996_v40, %v8996_v40  ;;  %v9065_v57 = vcombine.high %v8996_v40, %v8996_v40  ;;  %v9069_v58 = vcombine.low %v9017_v45, %v9017_v45 }
   0xd   :  { %v9079_v62 = vcombine.high %v9017_v45, %v9017_v45  ;;  %v161_v40 = vsel %vm146_vm0, %v8878_v13, 2139127680  ;;  %v165_v39 = vsel %vm146_vm0, %v8882_v14, 2139127680  ;;  %v169_v28 = vsel %vm146_vm0, %v8896_v17, 2139127680 }
   0xe   :  { %v163_v34 = vmin.bf16 %v161_v40, %v149_v59  ;;  %v167_v33 = vmin.bf16 %v165_v39, %v152_v60  ;;  %v173_v27 = vsel %vm146_vm0, %v8900_v18, 2139127680  ;;  %v171_v22 = vmin.bf16 %v169_v28, %v155_v61 }
   0xf   :  { %v175_v45 = vmin.bf16 %v173_v27, %v158_v63  ;;  %v181_v16 = vsel %vm146_vm0, %v8908_v20, 2139127680  ;;  %v185_v40 = vsel %vm146_vm0, %v8922_v23, 2139127680  ;;  %v189_v39 = vsel %vm146_vm0, %v8926_v24, 2139127680 }
  0x10   :  { %v179_v15 = vmin.bf16 %v177_v21, %v163_v34  ;;  %v183_v10 = vmin.bf16 %v181_v16, %v167_v33  ;;  %v187_v59 = vmin.bf16 %v185_v40, %v171_v22  ;;  %v193_v28 = vsel %vm146_vm0, %v8930_v25, 2139127680 }
  0x11   :  { %v191_v60 = vmin.bf16 %v189_v39, %v175_v45  ;;  %v197_v27 = vsel %vm146_vm0, %v8934_v26, 2139127680  ;;  %v201_v21 = vsel %vm146_vm0, %v8948_v29, 2139127680  ;;  %v205_v16 = vsel %vm146_vm0, %v8952_v30, 2139127680 }
  0x12   :  { %v195_v61 = vmin.bf16 %v193_v28, %v179_v15  ;;  %v199_v63 = vmin.bf16 %v197_v27, %v183_v10  ;;  %v203_v33 = vmin.bf16 %v201_v21, %v187_v59  ;;  %v209_v22 = vsel %vm146_vm0, %v8956_v31, 2139127680 }
  0x13   :  { %v207_v34 = vmin.bf16 %v205_v16, %v191_v60  ;;  %v213_v45 = vsel %vm146_vm0, %v8960_v32, 2139127680  ;;  %v217_v10 = vsel %vm146_vm0, %v8974_v35, 2139127680  ;;  %v221_v15 = vsel %vm146_vm0, %v8978_v36, 2139127680 }
  0x14   :  { %v211_v40 = vmin.bf16 %v209_v22, %v195_v61  ;;  %v215_v39 = vmin.bf16 %v213_v45, %v199_v63  ;;  %v219_v28 = vmin.bf16 %v217_v10, %v203_v33  ;;  %v225_v59 = vsel %vm146_vm0, %v8982_v37, 2139127680 }
  0x15   :  { %v223_v27 = vmin.bf16 %v221_v15, %v207_v34  ;;  %v229_v60 = vsel %vm146_vm0, %v8986_v38, 2139127680  ;;  %v233_v61 = vsel %vm146_vm0, %v9000_v41, 2139127680  ;;  %v237_v63 = vsel %vm146_vm0, %v9004_v42, 2139127680 }
  0x16   :  { %v227_v21 = vmin.bf16 %v225_v59, %v211_v40  ;;  %v231_v16 = vmin.bf16 %v229_v60, %v215_v39  ;;  %v235_v22 = vmin.bf16 %v233_v61, %v219_v28  ;;  %v241_v33 = vsel %vm146_vm0, %v9008_v43, 2139127680 }
  0x17   :  { %v239_v45 = vmin.bf16 %v237_v63, %v223_v27  ;;  %v245_v34 = vsel %vm146_vm0, %v9012_v44, 2139127680  ;;  %v249_v40 = vsel %vm146_vm0, %v9021_v46, 2139127680  ;;  %v253_v39 = vsel %vm146_vm0, %v9025_v47, 2139127680 }
  0x18   :  { %v243_v10 = vmin.bf16 %v241_v33, %v227_v21  ;;  %v247_v15 = vmin.bf16 %v245_v34, %v231_v16  ;;  %v251_v59 = vmin.bf16 %v249_v40, %v235_v22  ;;  %v257_v28 = vsel %vm146_vm0, %v9029_v48, 2139127680 }
  0x19   :  { %v255_v60 = vmin.bf16 %v253_v39, %v239_v45  ;;  %v261_v27 = vsel %vm146_vm0, %v9033_v49, 2139127680  ;;  %v265_v21 = vsel %vm146_vm0, %v9037_v50, 2139127680  ;;  %v269_v16 = vsel %vm146_vm0, %v9041_v51, 2139127680 }
  0x1a   :  { %v259_v61 = vmin.bf16 %v257_v28, %v243_v10  ;;  %v263_v63 = vmin.bf16 %v261_v27, %v247_v15  ;;  %v267_v33 = vmin.bf16 %v265_v21, %v251_v59  ;;  %v273_v22 = vsel %vm146_vm0, %v9045_v52, 2139127680 }
  0x1b   :  { %v271_v34 = vmin.bf16 %v269_v16, %v255_v60  ;;  %v277_v45 = vsel %vm146_vm0, %v9049_v53, 2139127680  ;;  %v281_v10 = vsel %vm146_vm0, %v9053_v54, 2139127680  ;;  %v285_v15 = vsel %vm146_vm0, %v9057_v55, 2139127680 }
  0x1c   :  { %v275_v40 = vmin.bf16 %v273_v22, %v259_v61  ;;  %v279_v39 = vmin.bf16 %v277_v45, %v263_v63  ;;  %v283_v28 = vmin.bf16 %v281_v10, %v267_v33  ;;  %v289_v59 = vsel %vm146_vm0, %v9061_v56, 2139127680 }
  0x1d   :  { %v287_v27 = vmin.bf16 %v285_v15, %v271_v34  ;;  %v293_v60 = vsel %vm146_vm0, %v9065_v57, 2139127680  ;;  %v297_v61 = vsel %vm146_vm0, %v9069_v58, 2139127680  ;;  %v302_v63 = vsel %vm300_vm1, %v9079_v62, 2139127680 }
  0x1e   :  { %v291_v21 = vmin.bf16 %v289_v59, %v275_v40  ;;  %v295_v16 = vmin.bf16 %v293_v60, %v279_v39  ;;  %v299_v22 = vmin.bf16 %v297_v61, %v283_v28  ;;  %v313_v33 = vsel %vm146_vm0, %v8847_v6, 4286644096 }
  0x1f   :  { %v304_v45 = vmin.bf16 %v302_v63, %v287_v27  ;;  %v315_v34 = vsel %vm146_vm0, %v8851_v7, 4286644096  ;;  %v317_v15 = vsel %vm146_vm0, %v8870_v11, 4286644096  ;;  %v319_v40 = vsel %vm146_vm0, %v8874_v12, 4286644096 }
  0x20   :  { %v305_v10 = vmin.bf16 %v295_v16, %v291_v21  ;;  %v321_v39 = vsel %vm146_vm0, %v8878_v13, 4286644096  ;;  %v324_v28 = vsel %vm146_vm0, %v8882_v14, 4286644096  ;;  %v327_v6 = vsel %vm146_vm0, %v8896_v17, 4286644096 }
  0x21   :  { %v306_v59 = vmin.bf16 %v304_v45, %v299_v22  ;;  %v323_v60 = vmax.bf16 %v321_v39, %v313_v33  ;;  %v326_v27 = vmax.bf16 %v324_v28, %v315_v34  ;;  %v329_v7 = vmax.bf16 %v327_v6, %v317_v15 }
  0x22   :  { %v330_v21 = vsel %vm146_vm0, %v8900_v18, 4286644096  ;;  %v333_v11 = vsel %vm146_vm0, %v8904_v19, 4286644096  ;;  %v336_v13 = vsel %vm146_vm0, %v8908_v20, 4286644096 }
  0x23   :  { %v307_v12 = vmin.bf16 %v306_v59, %v305_v10  ;;  %v332_v16 = vmax.bf16 %v330_v21, %v319_v40  ;;  %v335_v61 = vmax.bf16 %v333_v11, %v323_v60  ;;  %v338_v63 = vmax.bf16 %v336_v13, %v326_v27 }
  0x24   :  { %v339_v14 = vsel %vm146_vm0, %v8922_v23, 4286644096  ;;  %v342_v17 = vsel %vm146_vm0, %v8926_v24, 4286644096  ;;  %v345_v22 = vsel %vm146_vm0, %v8930_v25, 4286644096 }
  0x25   :  { %308 = vmin.xlane.bf16.xlu0 %v307_v12  ;;  %v341_v18 = vmax.bf16 %v339_v14, %v329_v7  ;;  %v344_v45 = vmax.bf16 %v342_v17, %v332_v16  ;;  %v347_v19 = vmax.bf16 %v345_v22, %v335_v61  ;;  %v348_v33 = vsel %vm146_vm0, %v8934_v26, 4286644096 }
  0x26   :  { %v350_v34 = vmax.bf16 %v348_v33, %v338_v63  ;;  %v351_v20 = vsel %vm146_vm0, %v8948_v29, 4286644096  ;;  %v354_v23 = vsel %vm146_vm0, %v8952_v30, 4286644096  ;;  %v357_v24 = vsel %vm146_vm0, %v8956_v31, 4286644096 }
  0x27   :  { %v353_v10 = vmax.bf16 %v351_v20, %v341_v18  ;;  %v356_v15 = vmax.bf16 %v354_v23, %v344_v45  ;;  %v359_v25 = vmax.bf16 %v357_v24, %v347_v19  ;;  %v360_v40 = vsel %vm146_vm0, %v8960_v32, 4286644096 }
  0x28   :  { %v362_v39 = vmax.bf16 %v360_v40, %v350_v34  ;;  %v363_v26 = vsel %vm146_vm0, %v8974_v35, 4286644096  ;;  %v366_v59 = vsel %vm146_vm0, %v8978_v36, 4286644096  ;;  %v369_v29 = vsel %vm146_vm0, %v8982_v37, 4286644096 }
  0x29   :  { %v365_v30 = vmax.bf16 %v363_v26, %v353_v10  ;;  %v368_v60 = vmax.bf16 %v366_v59, %v356_v15  ;;  %v371_v28 = vmax.bf16 %v369_v29, %v359_v25  ;;  %v372_v31 = vsel %vm146_vm0, %v8986_v38, 4286644096 }
  0x2a   :  { %v374_v6 = vmax.bf16 %v372_v31, %v362_v39  ;;  %v375_v32 = vsel %vm146_vm0, %v9000_v41, 4286644096  ;;  %v378_v27 = vsel %vm146_vm0, %v9004_v42, 4286644096  ;;  %v381_v35 = vsel %vm146_vm0, %v9008_v43, 4286644096 }
  0x2b   :  { %v377_v36 = vmax.bf16 %v375_v32, %v365_v30  ;;  %v380_v7 = vmax.bf16 %v378_v27, %v368_v60  ;;  %v383_v21 = vmax.bf16 %v381_v35, %v371_v28  ;;  %v384_v37 = vsel %vm146_vm0, %v9012_v44, 4286644096 }
  0x2c   :  { %v386_v11 = vmax.bf16 %v384_v37, %v374_v6  ;;  %v387_v38 = vsel %vm146_vm0, %v9021_v46, 4286644096  ;;  %v390_v12 = vsel %vm146_vm0, %v9025_v47, 4286644096  ;;  %v393_v41 = vsel %vm146_vm0, %v9029_v48, 4286644096 }
  0x2d   :  { %v389_v42 = vmax.bf16 %v387_v38, %v377_v36  ;;  %v392_v16 = vmax.bf16 %v390_v12, %v380_v7  ;;  %v395_v61 = vmax.bf16 %v393_v41, %v383_v21  ;;  %v396_v43 = vsel %vm146_vm0, %v9033_v49, 4286644096 }
  0x2e   :  { %v398_v13 = vmax.bf16 %v396_v43, %v386_v11  ;;  %v399_v44 = vsel %vm146_vm0, %v9037_v50, 4286644096  ;;  %v402_v63 = vsel %vm146_vm0, %v9041_v51, 4286644096  ;;  %v405_v46 = vsel %vm146_vm0, %v9045_v52, 4286644096 }
  0x2f   :  { %v401_v47 = vmax.bf16 %v399_v44, %v389_v42  ;;  %v404_v14 = vmax.bf16 %v402_v63, %v392_v16  ;;  %v407_v17 = vmax.bf16 %v405_v46, %v395_v61  ;;  %v408_v48 = vsel %vm146_vm0, %v9049_v53, 4286644096 }
  0x30   :  { %v410_v22 = vmax.bf16 %v408_v48, %v398_v13  ;;  %v411_v49 = vsel %vm146_vm0, %v9053_v54, 4286644096  ;;  %v414_v18 = vsel %vm146_vm0, %v9057_v55, 4286644096  ;;  %v417_v50 = vsel %vm146_vm0, %v9061_v56, 4286644096 }
  0x31   :  { %v413_v51 = vmax.bf16 %v411_v49, %v401_v47  ;;  %v416_v45 = vmax.bf16 %v414_v18, %v404_v14  ;;  %v419_v19 = vmax.bf16 %v417_v50, %v407_v17  ;;  %v420_v52 = vsel %vm146_vm0, %v9065_v57, 4286644096 }
  0x32   :  { %v422_v33 = vmax.bf16 %v420_v52, %v410_v22  ;;  %v423_v53 = vsel %vm146_vm0, %v9069_v58, 4286644096  ;;  %v426_v34 = vsel %vm300_vm1, %v9079_v62, 4286644096 }
  0x33   :  { %v425_v54 = vmax.bf16 %v423_v53, %v413_v51  ;;  %v428_v20 = vmax.bf16 %v426_v34, %v416_v45 }
  0x34   :  { %v429_v23 = vmax.bf16 %v422_v33, %v419_v19 }
  0x35   :  { %v430_v55 = vmax.bf16 %v428_v20, %v425_v54 }
  0x37   :  { %v431_v24 = vmax.bf16 %v430_v55, %v429_v23 }
  0x39   :  { %432 = vmax.xlane.bf16.xlu0 %v431_v24 }
  0xb2   :  { %v309_v56 = vpop.xlane.xlu0 %308 }
  0xb3   :  { %v310_v10 = vunpack.c.l.bf16 %v309_v56 }
  0xb5   :  { %v6513_v15 = vadd.f32 -1.0, %v310_v10  }
  0xc6   :  { %v433_v25 = vpop.xlane.xlu0 %432 }
  0xc7   :  { %v434_v40 = vunpack.c.l.bf16 %v433_v25 }
  0xc9   :  { %v435_v39 = vadd.f32 1.0, %v434_v40  }
  0xca LB: > { %v8778_v57 = vmov 0   ;;  %v8779_v58 = vmov 1065369472   ;;  %v444_v62 = vadd.f32 %v8768_v39, %v8772_v15  ;;  %v8780_v29 = vmov 839922192   ;;  %v11978_v18 = vld [vmem:[#allocation2_spill] sm:$0xff]  ;;  %s8776_s0 = sphi %s9239_s0, %s441_s0   ;;  %v8772_v15 = vphi %v6513_v15, %v11990_v15   ;;  %v8768_v39 = vphi %v435_v39, %v1511_v39  }
  0xcb   : > { %7801 = vset.pattern.permute.xlu0 %v8778_v57  ;;  %7312 = vmatprep.subr.bf16.mxu0 %v8779_v58  ;;  %v453_v30 = vunpack.c.l.s4 %v8780_v29  ;;  %v455_v60 = vlaneseq  ;;  %v8781_v16 = vmov 1.0|1.0   ;;  %v11979_v50 = vld [vmem:[#allocation3_spill] sm:$0xff]  ;;  %v11980_v34 = vld [vmem:[#allocation4_spill] sm:$0xff]  ;;  %v11981_v54 = vld [vmem:[#allocation5_spill] sm:$0xff]  ;;  %s441_s0 = sadd.s32 1, %s8776_s0  }
  0xcc   : > { %7334 = vmatprep.subr.bf16.mxu1 %v8779_v58  ;;  %7313 = vmatpush3.bf16.msra.mxu0 %v8779_v58  ;;  %v445_v26 = vmul.f32 0.5, %v444_v62  ;;  %v11982_v25 = vld [vmem:[#allocation6_spill] sm:$0xff]  ;;  %v11983_v40 = vld [vmem:[#allocation7_spill] sm:$0xff]  ;;  %p438_p0 = scmp.ge.s32.totalorder %s441_s0, 16  }
  0xcd   : > { %7335 = vmatpush3.bf16.msra.mxu1 %v8779_v58  ;;  %7314 = vmatprep.subr.bf16.mxu0 %v8779_v58  ;;  %v454_v28 = vunpack.c.0.s8 %v453_v30  ;;  %v9290_v31 = vshrl.u32 %v455_v60, 7 }
  0xce   : > { %7336 = vmatprep.subr.bf16.mxu1 %v8779_v58  ;;  %v9259_v59 = vpack.c.bf16 %v445_v26, %v445_v26 }
  0xcf   : > { %v9293_v6 = vsub.s32 %v454_v28, %v9290_v31 }
  0xd0   : > { %7315 = vmatpush3.bf16.msra.mxu0 %v8779_v58  ;;  %449 = vperm.xlu0 %7801, %v9259_v59  }
  0xd1   : > { %7337 = vmatpush3.bf16.msra.mxu1 %v8779_v58  ;;  %7316 = vmatprep.subr.bf16.mxu0 %v8779_v58 }
  0xd2   : > { %7338 = vmatprep.subr.bf16.mxu1 %v8779_v58 }
  0xd4   : > { %7317 = vmatpush3.bf16.msra.mxu0 %v8779_v58 }
  0xd5   : > { %7339 = vmatpush3.bf16.msra.mxu1 %v8779_v58  ;;  %7318 = vmatprep.subr.bf16.mxu0 %v8779_v58 }
  0xd6   : > { %7340 = vmatprep.subr.bf16.mxu1 %v8779_v58 }
  0xd8   : > { %7319 = vmatpush3.bf16.msra.mxu0 %v8779_v58 }
  0xd9   : > { %7341 = vmatpush3.bf16.msra.mxu1 %v8779_v58  ;;  %7320 = vmatprep.subr.bf16.mxu0 %v8779_v58 }
  0xda   : > { %7342 = vmatprep.subr.bf16.mxu1 %v8779_v58 }
  0xdc   : > { %7321 = vmatpush3.bf16.msra.mxu0 %v8779_v58 }
  0xdd   : > { %7343 = vmatpush3.bf16.msra.mxu1 %v8779_v58  ;;  %7322 = vmatprep.subr.bf16.mxu0 %v8779_v58 }
  0xde   : > { %7344 = vmatprep.subr.bf16.mxu1 %v8779_v58 }
  0xe0   : > { %7323 = vmatpush3.bf16.msra.mxu0 %v8779_v58 }
  0xe1   : > { %7345 = vmatpush3.bf16.msra.mxu1 %v8779_v58  ;;  %7324 = vmatprep.subr.bf16.mxu0 %v8779_v58 }
  0xe2   : > { %7346 = vmatprep.subr.bf16.mxu1 %v8779_v58 }
  0xe4   : > { %7325 = vmatpush3.bf16.msra.mxu0 %v8779_v58 }
  0xe5   : > { %7347 = vmatpush3.bf16.msra.mxu1 %v8779_v58  ;;  %7326 = vmatprep.subr.bf16.mxu0 %v8779_v58 }
  0xe6   : > { %7348 = vmatprep.subr.bf16.mxu1 %v8779_v58 }
  0xe8   : > { %7327 = vmatpush3.bf16.msra.mxu0 %v8779_v58 }
  0xe9   : > { %7349 = vmatpush3.bf16.msra.mxu1 %v8779_v58  ;;  %7356 = vmatprep.subr.bf16.mxu0 %v8779_v58 }
  0xea   : > { %7378 = vmatprep.subr.bf16.mxu1 %v8779_v58 }
 0x14b   : > { %v450_v32 = vpop.permute.xlu0 %449 }
 0x14c   : > { %v9296_v27 = vrot.slane %v450_v32, %v9293_v6  ;;  %v11984_v32 = vld [vmem:[#allocation8_spill] sm:$0xff] }
 0x14e   : > { %vm460_vm2 = vcmp.ge.bf16.partialorder %v8818_v0, %v9296_v27  ;;  %vm461_vm3 = vcmp.ge.bf16.partialorder %v8823_v1, %v9296_v27  ;;  %vm462_vm4 = vcmp.ge.bf16.partialorder %v8828_v2, %v9296_v27  ;;  %vm463_vm5 = vcmp.ge.bf16.partialorder %v8833_v3, %v9296_v27 }
 0x14f   : > { %v480_v35 = vsel %vm460_vm2, 65537, %v8778_v57  ;;  %v481_v36 = vsel %vm461_vm3, 65537, %v8778_v57  ;;  %v9309_v7 = vsel %vm462_vm4, 65537, %v8778_v57  ;;  %v9312_v21 = vsel %vm463_vm5, 65537, %v8778_v57 }
 0x150   : > { %v500_v37 = vunpack.c.l.b16 %v480_v35  ;;  %v501_v11 = vunpack.c.h.b16 %v480_v35  ;;  %v502_v38 = vunpack.c.l.b16 %v481_v36  ;;  %v503_v12 = vunpack.c.h.b16 %v481_v36  ;;  %v11985_v35 = vld [vmem:[#allocation9_spill] sm:$0xff] }
 0x151   : > { %v505_v41 = vunpack.c.h.b16 %v9309_v7  ;;  %v507_v42 = vunpack.c.h.b16 %v9312_v21  ;;  %vm464_vm2 = vcmp.ge.bf16.partialorder %v8838_v4, %v9296_v27  ;;  %vm465_vm3 = vcmp.ge.bf16.partialorder %v8843_v5, %v9296_v27 }
 0x152   : > { %vm541_vm6 = vcmp.ne.s32.totalorder %v501_v11, 0  ;;  %vm543_vm7 = vcmp.ne.s32.totalorder %v503_v12, 0  ;;  %vm540_vm8 = vcmp.ne.s32.totalorder %v500_v37, 0  ;;  %vm542_vm10 = vcmp.ne.s32.totalorder %v502_v38, 0 }
 0x153   : > { %vm6554_vm9 = vmpackc.low %vm541_vm6, %vm541_vm6  ;;  %vm545_vm12 = vcmp.ne.s32.totalorder %v505_v41, 0  ;;  %vm547_vm14 = vcmp.ne.s32.totalorder %v507_v42, 0  ;;  %v484_v61 = vsel %vm464_vm2, 65537, %v8778_v57  ;;  %v504_v43 = vunpack.c.l.b16 %v9309_v7 }
 0x154   : > { %6555 = vmatprep.mubr.msk.bf16.mxu0 %vm6554_vm9, %v8781_v16  ;;  %vm6558_vm11 = vmpackc.low %vm543_vm7, %vm543_vm7  ;;  %v485_v13 = vsel %vm465_vm3, 65537, %v8778_v57  ;;  %v506_v44 = vunpack.c.l.b16 %v9312_v21  ;;  %v509_v63 = vunpack.c.h.b16 %v484_v61  ;;  %v508_v14 = vunpack.c.l.b16 %v484_v61 }
 0x155   : > { %6559 = vmatprep.mubr.msk.bf16.mxu1 %vm6558_vm11, %v8781_v16  ;;  %vm6556_vm13 = vmpackc.low %vm540_vm8, %vm540_vm8  ;;  %v511_v46 = vunpack.c.h.b16 %v485_v13  ;;  %vm544_vm4 = vcmp.ne.s32.totalorder %v504_v43, 0  ;;  %v510_v48 = vunpack.c.l.b16 %v485_v13 }
 0x156   : > { %6557 = vmatmul.mubr.msk.bf16.vlgmr.msra.gmra.mxu0 %vm6556_vm13, %v8781_v16  ;;  %vm6560_vm15 = vmpackc.low %vm542_vm10, %vm542_vm10  ;;  %vm546_vm5 = vcmp.ne.s32.totalorder %v506_v44, 0  ;;  %vm549_vm6 = vcmp.ne.s32.totalorder %v509_v63, 0  ;;  %vm467_vm13 = vcmp.ge.bf16.partialorder %v8861_v9, %v9296_v27 }
 0x157   : > { %6561 = vmatmul.mubr.msk.bf16.vlgmr.msra.gmra.mxu1 %vm6560_vm15, %v8781_v16  ;;  %7357 = vmatpush3.bf16.msra.mxu0 %v8779_v58  ;;  %vm6562_vm0 = vmpackc.low %vm545_vm12, %vm545_vm12  ;;  %vm551_vm8 = vcmp.ne.s32.totalorder %v511_v46, 0  ;;  %vm466_vm12 = vcmp.ge.bf16.partialorder %v8856_v8, %v9296_v27  ;;  %v487_v17 = vsel %vm467_vm13, 65537, %v8778_v57  ;;  %vm550_vm15 = vcmp.ne.s32.totalorder %v510_v48, 0  ;;  %v11987_v48 = vld [vmem:[#allocation11_spill] sm:$0xff] }
 0x158   : > { %7379 = vmatpush3.bf16.msra.mxu1 %v8779_v58  ;;  %6563 = vmatprep.mubr.msk.bf16.mxu0 %vm6562_vm0, %v8781_v16  ;;  %vm6566_vm1 = vmpackc.low %vm547_vm14, %vm547_vm14  ;;  %v486_v47 = vsel %vm466_vm12, 65537, %v8778_v57  ;;  %v515_v49 = vunpack.c.h.b16 %v487_v17  ;;  %vm548_vm14 = vcmp.ne.s32.totalorder %v508_v14, 0  ;;  %v514_v52 = vunpack.c.l.b16 %v487_v17  ;;  %v11986_v17 = vld [vmem:[#allocation10_spill] sm:$0xff] }
 0x159   : > { %6567 = vmatprep.mubr.msk.bf16.mxu1 %vm6566_vm1, %v8781_v16  ;;  %7358 = vmatprep.subr.bf16.mxu0 %v8779_v58  ;;  %vm6564_vm7 = vmpackc.low %vm544_vm4, %vm544_vm4  ;;  %v513_v22 = vunpack.c.h.b16 %v486_v47  ;;  %v512_v45 = vunpack.c.l.b16 %v486_v47 }
 0x15a   : > { %7380 = vmatprep.subr.bf16.mxu1 %v8779_v58  ;;  %vm6568_vm9 = vmpackc.low %vm546_vm5, %vm546_vm5  ;;  %vm555_vm2 = vcmp.ne.s32.totalorder %v515_v49, 0 }
 0x15b   : > { %7359 = vmatpush3.bf16.msra.mxu0 %v8779_v58  ;;  %vm6570_vm10 = vmpackc.low %vm549_vm6, %vm549_vm6  ;;  %vm553_vm0 = vcmp.ne.s32.totalorder %v513_v22, 0  ;;  %vm468_vm6 = vcmp.ge.bf16.partialorder %v11978_v18, %v9296_v27 }
 0x15c   : > { %7381 = vmatpush3.bf16.msra.mxu1 %v8779_v58  ;;  %7360 = vmatprep.subr.bf16.mxu0 %v8779_v58  ;;  %vm6574_vm11 = vmpackc.low %vm551_vm8, %vm551_vm8  ;;  %v488_v51 = vsel %vm468_vm6, 65537, %v8778_v57  ;;  %vm552_vm8 = vcmp.ne.s32.totalorder %v512_v45, 0 }
 0x15d   : > { %7382 = vmatprep.subr.bf16.mxu1 %v8779_v58  ;;  %vm6572_vm1 = vmpackc.low %vm548_vm14, %vm548_vm14  ;;  %v517_v33 = vunpack.c.h.b16 %v488_v51  ;;  %v516_v23 = vunpack.c.l.b16 %v488_v51 }
 0x15e   : > { %vm6576_vm3 = vmpackc.low %vm550_vm15, %vm550_vm15 }
 0x15f   : > { %7361 = vmatpush3.bf16.msra.mxu0 %v8779_v58  ;;  %vm6578_vm4 = vmpackc.low %vm553_vm0, %vm553_vm0  ;;  %vm470_vm0 = vcmp.ge.bf16.partialorder %v11980_v34, %v9296_v27 }
 0x160   : > { %7383 = vmatpush3.bf16.msra.mxu1 %v8779_v58  ;;  %7362 = vmatprep.subr.bf16.mxu0 %v8779_v58  ;;  %vm6582_vm5 = vmpackc.low %vm555_vm2, %vm555_vm2  ;;  %v490_v20 = vsel %vm470_vm0, 65537, %v8778_v57  ;;  %vm556_vm2 = vcmp.ne.s32.totalorder %v516_v23, 0 }
 0x161   : > { %7384 = vmatprep.subr.bf16.mxu1 %v8779_v58  ;;  %v521_v56 = vunpack.c.h.b16 %v490_v20  ;;  %v520_v26 = vunpack.c.l.b16 %v490_v20 }
 0x163   : > { %7363 = vmatpush3.bf16.msra.mxu0 %v8779_v58 }
 0x164   : > { %7385 = vmatpush3.bf16.msra.mxu1 %v8779_v58  ;;  %7364 = vmatprep.subr.bf16.mxu0 %v8779_v58 }
 0x165   : > { %7386 = vmatprep.subr.bf16.mxu1 %v8779_v58 }
 0x167   : > { %7365 = vmatpush3.bf16.msra.mxu0 %v8779_v58 }
 0x168   : > { %7387 = vmatpush3.bf16.msra.mxu1 %v8779_v58  ;;  %7366 = vmatprep.subr.bf16.mxu0 %v8779_v58 }
 0x169   : > { %7388 = vmatprep.subr.bf16.mxu1 %v8779_v58 }
 0x16b   : > { %7367 = vmatpush3.bf16.msra.mxu0 %v8779_v58 }
 0x16c   : > { %7389 = vmatpush3.bf16.msra.mxu1 %v8779_v58  ;;  %7368 = vmatprep.subr.bf16.mxu0 %v8779_v58 }
 0x16d   : > { %7390 = vmatprep.subr.bf16.mxu1 %v8779_v58 }
 0x16f   : > { %7369 = vmatpush3.bf16.msra.mxu0 %v8779_v58 }
 0x170   : > { %7391 = vmatpush3.bf16.msra.mxu1 %v8779_v58  ;;  %7370 = vmatprep.subr.bf16.mxu0 %v8779_v58 }
 0x171   : > { %7392 = vmatprep.subr.bf16.mxu1 %v8779_v58 }
 0x173   : > { %7371 = vmatpush3.bf16.msra.mxu0 %v8779_v58 }
 0x174   : > { %7393 = vmatpush3.bf16.msra.mxu1 %v8779_v58  ;;  %7400 = vmatprep.subr.bf16.mxu0 %v8779_v58 }
 0x175   : > { %7422 = vmatprep.subr.bf16.mxu1 %v8779_v58 }
 0x176   : > { %6565 = vmatmul.mubr.msk.bf16.vlgmr.msra.gmra.mxu0 %vm6564_vm7, %v8781_v16  ;;  %vm469_vm7 = vcmp.ge.bf16.partialorder %v11979_v50, %v9296_v27 }
 0x177   : > { %6569 = vmatmul.mubr.msk.bf16.vlgmr.msra.gmra.mxu1 %vm6568_vm9, %v8781_v16  ;;  %7401 = vmatpush3.bf16.msra.mxu0 %v8779_v58  ;;  %v489_v19 = vsel %vm469_vm7, 65537, %v8778_v57  ;;  %vm554_vm9 = vcmp.ne.s32.totalorder %v514_v52, 0 }
 0x178   : > { %6571 = vmatprep.mubr.msk.bf16.mxu0 %vm6570_vm10, %v8781_v16  ;;  %7423 = vmatpush3.bf16.msra.mxu1 %v8779_v58  ;;  %v519_v53 = vunpack.c.h.b16 %v489_v19  ;;  %vm557_vm10 = vcmp.ne.s32.totalorder %v517_v33, 0  ;;  %vm6584_vm13 = vmpackc.low %vm554_vm9, %vm554_vm9  ;;  %v518_v24 = vunpack.c.l.b16 %v489_v19 }
 0x179   : > { %6575 = vmatprep.mubr.msk.bf16.mxu1 %vm6574_vm11, %v8781_v16  ;;  %7402 = vmatprep.subr.bf16.mxu0 %v8779_v58  ;;  %vm6580_vm11 = vmpackc.low %vm552_vm8, %vm552_vm8 }
 0x17a   : > { %7424 = vmatprep.subr.bf16.mxu1 %v8779_v58  ;;  %vm559_vm12 = vcmp.ne.s32.totalorder %v519_v53, 0  ;;  %vm6586_vm14 = vmpackc.low %vm557_vm10, %vm557_vm10  ;;  %vm472_vm10 = vcmp.ge.bf16.partialorder %v11982_v25, %v9296_v27  ;;  %v11988_v25 = vld [vmem:[#allocation13_spill] sm:$0xff] }
 0x17b   : > { %7403 = vmatpush3.bf16.msra.mxu0 %v8779_v58  ;;  %vm6590_vm15 = vmpackc.low %vm559_vm12, %vm559_vm12  ;;  %v492_v62 = vsel %vm472_vm10, 65537, %v8778_v57  ;;  %vm560_vm12 = vcmp.ne.s32.totalorder %v520_v26, 0 }
 0x17c   : > { %7425 = vmatpush3.bf16.msra.mxu1 %v8779_v58  ;;  %7404 = vmatprep.subr.bf16.mxu0 %v8779_v58  ;;  %v525_v60 = vunpack.c.h.b16 %v492_v62  ;;  %v524_v7 = vunpack.c.l.b16 %v492_v62 }
 0x17d   : > { %7426 = vmatprep.subr.bf16.mxu1 %v8779_v58 }
 0x17f   : > { %7405 = vmatpush3.bf16.msra.mxu0 %v8779_v58 }
 0x180   : > { %7427 = vmatpush3.bf16.msra.mxu1 %v8779_v58  ;;  %7406 = vmatprep.subr.bf16.mxu0 %v8779_v58 }
 0x181   : > { %7428 = vmatprep.subr.bf16.mxu1 %v8779_v58 }
 0x183   : > { %7407 = vmatpush3.bf16.msra.mxu0 %v8779_v58 }
 0x184   : > { %7429 = vmatpush3.bf16.msra.mxu1 %v8779_v58  ;;  %7408 = vmatprep.subr.bf16.mxu0 %v8779_v58 }
 0x185   : > { %7430 = vmatprep.subr.bf16.mxu1 %v8779_v58 }
 0x187   : > { %7409 = vmatpush3.bf16.msra.mxu0 %v8779_v58 }
 0x188   : > { %7431 = vmatpush3.bf16.msra.mxu1 %v8779_v58  ;;  %7410 = vmatprep.subr.bf16.mxu0 %v8779_v58 }
 0x189   : > { %7432 = vmatprep.subr.bf16.mxu1 %v8779_v58 }
 0x18b   : > { %7411 = vmatpush3.bf16.msra.mxu0 %v8779_v58 }
 0x18c   : > { %7433 = vmatpush3.bf16.msra.mxu1 %v8779_v58  ;;  %7412 = vmatprep.subr.bf16.mxu0 %v8779_v58 }
 0x18d   : > { %7434 = vmatprep.subr.bf16.mxu1 %v8779_v58 }
 0x18f   : > { %7413 = vmatpush3.bf16.msra.mxu0 %v8779_v58 }
 0x190   : > { %7435 = vmatpush3.bf16.msra.mxu1 %v8779_v58  ;;  %7414 = vmatprep.subr.bf16.mxu0 %v8779_v58 }
 0x191   : > { %7436 = vmatprep.subr.bf16.mxu1 %v8779_v58 }
 0x193   : > { %7415 = vmatpush3.bf16.msra.mxu0 %v8779_v58 }
 0x194   : > { %7437 = vmatpush3.bf16.msra.mxu1 %v8779_v58  ;;  %7444 = vmatprep.subr.bf16.mxu0 %v8779_v58 }
 0x195   : > { %7466 = vmatprep.subr.bf16.mxu1 %v8779_v58 }
 0x196   : > { %6573 = vmatmul.mubr.msk.bf16.vlgmr.msra.gmra.mxu0 %vm6572_vm1, %v8781_v16  ;;  %vm471_vm1 = vcmp.ge.bf16.partialorder %v11981_v54, %v9296_v27 }
 0x197   : > { %6577 = vmatmul.mubr.msk.bf16.vlgmr.msra.gmra.mxu1 %vm6576_vm3, %v8781_v16  ;;  %7445 = vmatpush3.bf16.msra.mxu0 %v8779_v58  ;;  %v491_v55 = vsel %vm471_vm1, 65537, %v8778_v57  ;;  %vm558_vm3 = vcmp.ne.s32.totalorder %v518_v24, 0 }
 0x198   : > { %6579 = vmatprep.mubr.msk.bf16.mxu0 %vm6578_vm4, %v8781_v16  ;;  %7467 = vmatpush3.bf16.msra.mxu1 %v8779_v58  ;;  %v523_v10 = vunpack.c.h.b16 %v491_v55  ;;  %vm561_vm4 = vcmp.ne.s32.totalorder %v521_v56, 0  ;;  %vm6592_vm7 = vmpackc.low %vm558_vm3, %vm558_vm3  ;;  %v522_v30 = vunpack.c.l.b16 %v491_v55 }
 0x199   : > { %6583 = vmatprep.mubr.msk.bf16.mxu1 %vm6582_vm5, %v8781_v16  ;;  %7446 = vmatprep.subr.bf16.mxu0 %v8779_v58  ;;  %vm6588_vm5 = vmpackc.low %vm556_vm2, %vm556_vm2 }
 0x19a   : > { %7468 = vmatprep.subr.bf16.mxu1 %v8779_v58  ;;  %vm563_vm6 = vcmp.ne.s32.totalorder %v523_v10, 0  ;;  %vm6594_vm8 = vmpackc.low %vm561_vm4, %vm561_vm4  ;;  %vm474_vm4 = vcmp.ge.bf16.partialorder %v11984_v32, %v9296_v27 }
 0x19b   : > { %7447 = vmatpush3.bf16.msra.mxu0 %v8779_v58  ;;  %vm6598_vm9 = vmpackc.low %vm563_vm6, %vm563_vm6  ;;  %v9563_v36 = vsel %vm474_vm4, 65537, %v8778_v57  ;;  %vm564_vm6 = vcmp.ne.s32.totalorder %v524_v7, 0 }
 0x19c   : > { %7469 = vmatpush3.bf16.msra.mxu1 %v8779_v58  ;;  %7448 = vmatprep.subr.bf16.mxu0 %v8779_v58  ;;  %v529_v11 = vunpack.c.h.b16 %v9563_v36  ;;  %v528_v49 = vunpack.c.l.b16 %v9563_v36 }
 0x19d   : > { %7470 = vmatprep.subr.bf16.mxu1 %v8779_v58 }
 0x19f   : > { %7449 = vmatpush3.bf16.msra.mxu0 %v8779_v58 }
 0x1a0   : > { %7471 = vmatpush3.bf16.msra.mxu1 %v8779_v58  ;;  %7450 = vmatprep.subr.bf16.mxu0 %v8779_v58 }
 0x1a1   : > { %7472 = vmatprep.subr.bf16.mxu1 %v8779_v58 }
 0x1a3   : > { %7451 = vmatpush3.bf16.msra.mxu0 %v8779_v58 }
 0x1a4   : > { %7473 = vmatpush3.bf16.msra.mxu1 %v8779_v58  ;;  %7452 = vmatprep.subr.bf16.mxu0 %v8779_v58 }
 0x1a5   : > { %7474 = vmatprep.subr.bf16.mxu1 %v8779_v58 }
 0x1a7   : > { %7453 = vmatpush3.bf16.msra.mxu0 %v8779_v58 }
 0x1a8   : > { %7475 = vmatpush3.bf16.msra.mxu1 %v8779_v58  ;;  %7454 = vmatprep.subr.bf16.mxu0 %v8779_v58 }
 0x1a9   : > { %7476 = vmatprep.subr.bf16.mxu1 %v8779_v58 }
 0x1ab   : > { %7455 = vmatpush3.bf16.msra.mxu0 %v8779_v58 }
 0x1ac   : > { %7477 = vmatpush3.bf16.msra.mxu1 %v8779_v58  ;;  %7456 = vmatprep.subr.bf16.mxu0 %v8779_v58 }
 0x1ad   : > { %7478 = vmatprep.subr.bf16.mxu1 %v8779_v58 }
 0x1af   : > { %7457 = vmatpush3.bf16.msra.mxu0 %v8779_v58 }
 0x1b0   : > { %7479 = vmatpush3.bf16.msra.mxu1 %v8779_v58  ;;  %7458 = vmatprep.subr.bf16.mxu0 %v8779_v58 }
 0x1b1   : > { %7480 = vmatprep.subr.bf16.mxu1 %v8779_v58 }
 0x1b3   : > { %7459 = vmatpush3.bf16.msra.mxu0 %v8779_v58 }
 0x1b4   : > { %7481 = vmatpush3.bf16.msra.mxu1 %v8779_v58  ;;  %7488 = vmatprep.subr.bf16.mxu0 %v8779_v58 }
 0x1b5   : > { %7510 = vmatprep.subr.bf16.mxu1 %v8779_v58 }
 0x1b6   : > { %6581 = vmatmul.mubr.msk.bf16.vlgmr.msra.gmra.mxu0 %vm6580_vm11, %v8781_v16  ;;  %vm473_vm11 = vcmp.ge.bf16.partialorder %v11983_v40, %v9296_v27  ;;  %v11989_v40 = vld [vmem:[#allocation12_spill] sm:$0xff] }
 0x1b7   : > { %6585 = vmatmul.mubr.msk.bf16.vlgmr.msra.gmra.mxu1 %vm6584_vm13, %v8781_v16  ;;  %7489 = vmatpush3.bf16.msra.mxu0 %v8779_v58  ;;  %v493_v29 = vsel %vm473_vm11, 65537, %v8778_v57  ;;  %vm562_vm13 = vcmp.ne.s32.totalorder %v522_v30, 0 }
 0x1b8   : > { %6587 = vmatprep.mubr.msk.bf16.mxu0 %vm6586_vm14, %v8781_v16  ;;  %7511 = vmatpush3.bf16.msra.mxu1 %v8779_v58  ;;  %v527_v28 = vunpack.c.h.b16 %v493_v29  ;;  %vm565_vm14 = vcmp.ne.s32.totalorder %v525_v60, 0  ;;  %vm6600_vm1 = vmpackc.low %vm562_vm13, %vm562_vm13  ;;  %v526_v37 = vunpack.c.l.b16 %v493_v29 }
 0x1b9   : > { %6591 = vmatprep.mubr.msk.bf16.mxu1 %vm6590_vm15, %v8781_v16  ;;  %7490 = vmatprep.subr.bf16.mxu0 %v8779_v58  ;;  %vm6596_vm15 = vmpackc.low %vm560_vm12, %vm560_vm12 }
 0x1ba   : > { %7512 = vmatprep.subr.bf16.mxu1 %v8779_v58  ;;  %vm567_vm0 = vcmp.ne.s32.totalorder %v527_v28, 0  ;;  %vm6602_vm2 = vmpackc.low %vm565_vm14, %vm565_vm14  ;;  %vm476_vm14 = vcmp.ge.bf16.partialorder %v11986_v17, %v9296_v27  ;;  %v8782_v28 = vmov 0.0  }
 0x1bb   : > { %7491 = vmatpush3.bf16.msra.mxu0 %v8779_v58  ;;  %vm6606_vm3 = vmpackc.low %vm567_vm0, %vm567_vm0  ;;  %v9611_v22 = vsel %vm476_vm14, 65537, %v8778_v57  ;;  %vm568_vm0 = vcmp.ne.s32.totalorder %v528_v49, 0 }
 0x1bc   : > { %7513 = vmatpush3.bf16.msra.mxu1 %v8779_v58  ;;  %7492 = vmatprep.subr.bf16.mxu0 %v8779_v58  ;;  %v533_v51 = vunpack.c.h.b16 %v9611_v22  ;;  %v532_v30 = vunpack.c.l.b16 %v9611_v22 }
 0x1bd   : > { %7514 = vmatprep.subr.bf16.mxu1 %v8779_v58 }
 0x1bf   : > { %7493 = vmatpush3.bf16.msra.mxu0 %v8779_v58 }
 0x1c0   : > { %7515 = vmatpush3.bf16.msra.mxu1 %v8779_v58  ;;  %7494 = vmatprep.subr.bf16.mxu0 %v8779_v58 }
 0x1c1   : > { %7516 = vmatprep.subr.bf16.mxu1 %v8779_v58 }
 0x1c3   : > { %7495 = vmatpush3.bf16.msra.mxu0 %v8779_v58 }
 0x1c4   : > { %7517 = vmatpush3.bf16.msra.mxu1 %v8779_v58  ;;  %7496 = vmatprep.subr.bf16.mxu0 %v8779_v58 }
 0x1c5   : > { %7518 = vmatprep.subr.bf16.mxu1 %v8779_v58 }
 0x1c7   : > { %7497 = vmatpush3.bf16.msra.mxu0 %v8779_v58 }
 0x1c8   : > { %7519 = vmatpush3.bf16.msra.mxu1 %v8779_v58  ;;  %7498 = vmatprep.subr.bf16.mxu0 %v8779_v58 }
 0x1c9   : > { %7520 = vmatprep.subr.bf16.mxu1 %v8779_v58 }
 0x1cb   : > { %7499 = vmatpush3.bf16.msra.mxu0 %v8779_v58 }
 0x1cc   : > { %7521 = vmatpush3.bf16.msra.mxu1 %v8779_v58  ;;  %7500 = vmatprep.subr.bf16.mxu0 %v8779_v58 }
 0x1cd   : > { %7522 = vmatprep.subr.bf16.mxu1 %v8779_v58 }
 0x1cf   : > { %7501 = vmatpush3.bf16.msra.mxu0 %v8779_v58 }
 0x1d0   : > { %7523 = vmatpush3.bf16.msra.mxu1 %v8779_v58  ;;  %7502 = vmatprep.subr.bf16.mxu0 %v8779_v58 }
 0x1d1   : > { %7524 = vmatprep.subr.bf16.mxu1 %v8779_v58 }
 0x1d3   : > { %7503 = vmatpush3.bf16.msra.mxu0 %v8779_v58 }
 0x1d4   : > { %7525 = vmatpush3.bf16.msra.mxu1 %v8779_v58  ;;  %7532 = vmatprep.subr.bf16.mxu0 %v8779_v58 }
 0x1d5   : > { %7554 = vmatprep.subr.bf16.mxu1 %v8779_v58 }
 0x1d6   : > { %6589 = vmatmul.mubr.msk.bf16.vlgmr.msra.gmra.mxu0 %vm6588_vm5, %v8781_v16  ;;  %vm475_vm5 = vcmp.ge.bf16.partialorder %v11985_v35, %v9296_v27 }
 0x1d7   : > { %6593 = vmatmul.mubr.msk.bf16.vlgmr.msra.gmra.mxu1 %vm6592_vm7, %v8781_v16  ;;  %7533 = vmatpush3.bf16.msra.mxu0 %v8779_v58  ;;  %v9566_v21 = vsel %vm475_vm5, 65537, %v8778_v57  ;;  %vm566_vm7 = vcmp.ne.s32.totalorder %v526_v37, 0 }
 0x1d8   : > { %6595 = vmatprep.mubr.msk.bf16.mxu0 %vm6594_vm8, %v8781_v16  ;;  %7555 = vmatpush3.bf16.msra.mxu1 %v8779_v58  ;;  %v531_v38 = vunpack.c.h.b16 %v9566_v21  ;;  %vm569_vm8 = vcmp.ne.s32.totalorder %v529_v11, 0  ;;  %vm6608_vm11 = vmpackc.low %vm566_vm7, %vm566_vm7  ;;  %v530_v50 = vunpack.c.l.b16 %v9566_v21 }
 0x1d9   : > { %6599 = vmatprep.mubr.msk.bf16.mxu1 %vm6598_vm9, %v8781_v16  ;;  %7534 = vmatprep.subr.bf16.mxu0 %v8779_v58  ;;  %vm6604_vm9 = vmpackc.low %vm564_vm6, %vm564_vm6 }
 0x1da   : > { %7556 = vmatprep.subr.bf16.mxu1 %v8779_v58  ;;  %vm571_vm10 = vcmp.ne.s32.totalorder %v531_v38, 0  ;;  %vm6610_vm12 = vmpackc.low %vm569_vm8, %vm569_vm8  ;;  %vm479_vm8 = vcmp.ge.bf16.partialorder %v11988_v25, %v9296_v27 }
 0x1db   : > { %7535 = vmatpush3.bf16.msra.mxu0 %v8779_v58  ;;  %vm6614_vm13 = vmpackc.low %vm571_vm10, %vm571_vm10  ;;  %v9657_v62 = vsel %vm479_vm8, 65537, %v8778_v57 }
 0x1dc   : > { %7557 = vmatpush3.bf16.msra.mxu1 %v8779_v58  ;;  %7536 = vmatprep.subr.bf16.mxu0 %v8779_v58  ;;  %v539_v29 = vunpack.c.h.b16 %v9657_v62 }
 0x1dd   : > { %7558 = vmatprep.subr.bf16.mxu1 %v8779_v58 }
 0x1de   : > { %vm579_vm10 = vcmp.ne.s32.totalorder %v539_v29, 0 }
 0x1df   : > { %7537 = vmatpush3.bf16.msra.mxu0 %v8779_v58  ;;  %v6553_v32 = vsel %vm579_vm10, 1.0, %v8782_v28 }
 0x1e0   : > { %7559 = vmatpush3.bf16.msra.mxu1 %v8779_v58  ;;  %7538 = vmatprep.subr.bf16.mxu0 %v8779_v58  ;;  %v699_v7 = vpack.c.bf16 %v6553_v32, %v6553_v32 }
 0x1e1   : > { %7560 = vmatprep.subr.bf16.mxu1 %v8779_v58 }
 0x1e3   : > { %7539 = vmatpush3.bf16.msra.mxu0 %v8779_v58 }
 0x1e4   : > { %7561 = vmatpush3.bf16.msra.mxu1 %v8779_v58  ;;  %7540 = vmatprep.subr.bf16.mxu0 %v8779_v58 }
 0x1e5   : > { %7562 = vmatprep.subr.bf16.mxu1 %v8779_v58 }
 0x1e7   : > { %7541 = vmatpush3.bf16.msra.mxu0 %v8779_v58 }
 0x1e8   : > { %7563 = vmatpush3.bf16.msra.mxu1 %v8779_v58  ;;  %7542 = vmatprep.subr.bf16.mxu0 %v8779_v58 }
 0x1e9   : > { %7564 = vmatprep.subr.bf16.mxu1 %v8779_v58 }
 0x1eb   : > { %7543 = vmatpush3.bf16.msra.mxu0 %v8779_v58 }
 0x1ec   : > { %7565 = vmatpush3.bf16.msra.mxu1 %v8779_v58  ;;  %7544 = vmatprep.subr.bf16.mxu0 %v8779_v58 }
 0x1ed   : > { %7566 = vmatprep.subr.bf16.mxu1 %v8779_v58 }
 0x1ef   : > { %7545 = vmatpush3.bf16.msra.mxu0 %v8779_v58 }
 0x1f0   : > { %7567 = vmatpush3.bf16.msra.mxu1 %v8779_v58  ;;  %7546 = vmatprep.subr.bf16.mxu0 %v8779_v58 }
 0x1f1   : > { %7568 = vmatprep.subr.bf16.mxu1 %v8779_v58 }
 0x1f3   : > { %7547 = vmatpush3.bf16.msra.mxu0 %v8779_v58 }
 0x1f4   : > { %7569 = vmatpush3.bf16.msra.mxu1 %v8779_v58  ;;  %7576 = vmatprep.subr.bf16.mxu0 %v8779_v58 }
 0x1f5   : > { %7598 = vmatprep.subr.bf16.mxu1 %v8779_v58 }
 0x1f6   : > { %6597 = vmatmul.mubr.msk.bf16.vlgmr.msra.gmra.mxu0 %vm6596_vm15, %v8781_v16  ;;  %vm477_vm15 = vcmp.ge.bf16.partialorder %v11987_v48, %v9296_v27 }
 0x1f7   : > { %6601 = vmatmul.mubr.msk.bf16.vlgmr.msra.gmra.mxu1 %vm6600_vm1, %v8781_v16  ;;  %7577 = vmatpush3.bf16.msra.mxu0 %v8779_v58  ;;  %v9615_v18 = vsel %vm477_vm15, 65537, %v8778_v57  ;;  %vm570_vm1 = vcmp.ne.s32.totalorder %v530_v50, 0 }
 0x1f8   : > { %6603 = vmatprep.mubr.msk.bf16.mxu0 %vm6602_vm2, %v8781_v16  ;;  %7599 = vmatpush3.bf16.msra.mxu1 %v8779_v58  ;;  %v535_v45 = vunpack.c.h.b16 %v9615_v18  ;;  %vm573_vm2 = vcmp.ne.s32.totalorder %v533_v51, 0  ;;  %vm6616_vm5 = vmpackc.low %vm570_vm1, %vm570_vm1 }
 0x1f9   : > { %6607 = vmatprep.mubr.msk.bf16.mxu1 %vm6606_vm3, %v8781_v16  ;;  %7578 = vmatprep.subr.bf16.mxu0 %v8779_v58  ;;  %vm6612_vm3 = vmpackc.low %vm568_vm0, %vm568_vm0  ;;  %vm700_vm0 = vcmask 637952  }
 0x1fa   : > { %7600 = vmatprep.subr.bf16.mxu1 %v8779_v58  ;;  %vm575_vm4 = vcmp.ne.s32.totalorder %v535_v45, 0  ;;  %vm6618_vm6 = vmpackc.low %vm573_vm2, %vm573_vm2 }
 0x1fb   : > { %7579 = vmatpush3.bf16.msra.mxu0 %v8779_v58  ;;  %vm6622_vm7 = vmpackc.low %vm575_vm4, %vm575_vm4 }
 0x1fc   : > { %7601 = vmatpush3.bf16.msra.mxu1 %v8779_v58  ;;  %7580 = vmatprep.subr.bf16.mxu0 %v8779_v58 }
 0x1fd   : > { %7602 = vmatprep.subr.bf16.mxu1 %v8779_v58 }
 0x1ff   : > { %7581 = vmatpush3.bf16.msra.mxu0 %v8779_v58 }
 0x200   : > { %7603 = vmatpush3.bf16.msra.mxu1 %v8779_v58  ;;  %7582 = vmatprep.subr.bf16.mxu0 %v8779_v58 }
 0x201   : > { %7604 = vmatprep.subr.bf16.mxu1 %v8779_v58 }
 0x203   : > { %7583 = vmatpush3.bf16.msra.mxu0 %v8779_v58 }
 0x204   : > { %7605 = vmatpush3.bf16.msra.mxu1 %v8779_v58  ;;  %7584 = vmatprep.subr.bf16.mxu0 %v8779_v58 }
 0x205   : > { %7606 = vmatprep.subr.bf16.mxu1 %v8779_v58 }
 0x207   : > { %7585 = vmatpush3.bf16.msra.mxu0 %v8779_v58 }
 0x208   : > { %7607 = vmatpush3.bf16.msra.mxu1 %v8779_v58  ;;  %7586 = vmatprep.subr.bf16.mxu0 %v8779_v58 }
 0x209   : > { %7608 = vmatprep.subr.bf16.mxu1 %v8779_v58 }
 0x20b   : > { %7587 = vmatpush3.bf16.msra.mxu0 %v8779_v58 }
 0x20c   : > { %7609 = vmatpush3.bf16.msra.mxu1 %v8779_v58  ;;  %7588 = vmatprep.subr.bf16.mxu0 %v8779_v58 }
 0x20d   : > { %7610 = vmatprep.subr.bf16.mxu1 %v8779_v58 }
 0x20f   : > { %7589 = vmatpush3.bf16.msra.mxu0 %v8779_v58 }
 0x210   : > { %7611 = vmatpush3.bf16.msra.mxu1 %v8779_v58  ;;  %7590 = vmatprep.subr.bf16.mxu0 %v8779_v58 }
 0x211   : > { %7612 = vmatprep.subr.bf16.mxu1 %v8779_v58 }
 0x213   : > { %7591 = vmatpush3.bf16.msra.mxu0 %v8779_v58 }
 0x214   : > { %7613 = vmatpush3.bf16.msra.mxu1 %v8779_v58  ;;  %7620 = vmatprep.subr.bf16.mxu0 %v8779_v58 }
 0x215   : > { %7642 = vmatprep.subr.bf16.mxu1 %v8779_v58 }
 0x216   : > { %6605 = vmatmul.mubr.msk.bf16.vlgmr.msra.gmra.mxu0 %vm6604_vm9, %v8781_v16  ;;  %v7328_v12 = vpop.f32.mrf.mxu0  ;;  %vm478_vm9 = vcmp.ge.bf16.partialorder %v11989_v40, %v9296_v27  ;;  %v534_v27 = vunpack.c.l.b16 %v9615_v18 }
 0x217   : > { %6609 = vmatmul.mubr.msk.bf16.vlgmr.msra.gmra.mxu1 %vm6608_vm11, %v8781_v16  ;;  %v7350_v41 = vpop.f32.mrf.mxu1  ;;  %7621 = vmatpush3.bf16.msra.mxu0 %v8779_v58  ;;  %v9664_v26 = vsel %vm478_vm9, 65537, %v8778_v57  ;;  %vm572_vm11 = vcmp.ne.s32.totalorder %v532_v30, 0 }
 0x218   : > { %6611 = vmatprep.mubr.msk.bf16.mxu0 %vm6610_vm12, %v8781_v16  ;;  %7643 = vmatpush3.bf16.msra.mxu1 %v8779_v58  ;;  %v7329_v42 = vpop.f32.mrf.mxu0  ;;  %v537_v60 = vunpack.c.h.b16 %v9664_v26  ;;  %vm574_vm12 = vcmp.ne.s32.totalorder %v534_v27, 0  ;;  %vm6620_vm14 = vmpackc.low %vm572_vm11, %vm572_vm11 }
 0x219   : > { %6615 = vmatprep.mubr.msk.bf16.mxu1 %vm6614_vm13, %v8781_v16  ;;  %v7330_v61 = vadd.f32 %v7329_v42, %v7328_v12  ;;  %v7351_v43 = vpop.f32.mrf.mxu1  ;;  %7622 = vmatprep.subr.bf16.mxu0 %v8779_v58  ;;  %vm6624_vm15 = vmpackc.low %vm574_vm12, %vm574_vm12 }
 0x21a   : > { %v7352_v13 = vadd.f32 %v7351_v43, %v7350_v41  ;;  %7644 = vmatprep.subr.bf16.mxu1 %v8779_v58  ;;  %v7331_v44 = vpop.f32.mrf.mxu0  ;;  %vm577_vm13 = vcmp.ne.s32.totalorder %v537_v60, 0 }
 0x21b   : > { %v7353_v63 = vpop.f32.mrf.mxu1  ;;  %7623 = vmatpush3.bf16.msra.mxu0 %v8779_v58  ;;  %vm6626_vm1 = vmpackc.low %vm577_vm13, %vm577_vm13  ;;  %v536_v44 = vunpack.c.l.b16 %v9664_v26 }
 0x21c   : > { %v783_v46 = vadd.f32 %v7352_v13, %v7330_v61  ;;  %7645 = vmatpush3.bf16.msra.mxu1 %v8779_v58  ;;  %v7332_v47 = vpop.f32.mrf.mxu0  ;;  %7624 = vmatprep.subr.bf16.mxu0 %v8779_v58 }
 0x21d   : > { %v7354_v14 = vpop.f32.mrf.mxu1  ;;  %7646 = vmatprep.subr.bf16.mxu1 %v8779_v58  ;;  %vm576_vm2 = vcmp.ne.s32.totalorder %v536_v44, 0 }
 0x21e   : > { %vm6628_vm4 = vmpackc.low %vm576_vm2, %vm576_vm2 }
 0x21f   : > { %7625 = vmatpush3.bf16.msra.mxu0 %v8779_v58 }
 0x220   : > { %7647 = vmatpush3.bf16.msra.mxu1 %v8779_v58  ;;  %7626 = vmatprep.subr.bf16.mxu0 %v8779_v58 }
 0x221   : > { %7648 = vmatprep.subr.bf16.mxu1 %v8779_v58 }
 0x223   : > { %7627 = vmatpush3.bf16.msra.mxu0 %v8779_v58 }
 0x224   : > { %7649 = vmatpush3.bf16.msra.mxu1 %v8779_v58  ;;  %7628 = vmatprep.subr.bf16.mxu0 %v8779_v58 }
 0x225   : > { %7650 = vmatprep.subr.bf16.mxu1 %v8779_v58 }
 0x227   : > { %7629 = vmatpush3.bf16.msra.mxu0 %v8779_v58 }
 0x228   : > { %7651 = vmatpush3.bf16.msra.mxu1 %v8779_v58  ;;  %7630 = vmatprep.subr.bf16.mxu0 %v8779_v58 }
 0x229   : > { %7652 = vmatprep.subr.bf16.mxu1 %v8779_v58 }
 0x22b   : > { %7631 = vmatpush3.bf16.msra.mxu0 %v8779_v58 }
 0x22c   : > { %7653 = vmatpush3.bf16.msra.mxu1 %v8779_v58  ;;  %7632 = vmatprep.subr.bf16.mxu0 %v8779_v58 }
 0x22d   : > { %7654 = vmatprep.subr.bf16.mxu1 %v8779_v58 }
 0x22f   : > { %7633 = vmatpush3.bf16.msra.mxu0 %v8779_v58 }
 0x230   : > { %7655 = vmatpush3.bf16.msra.mxu1 %v8779_v58  ;;  %7634 = vmatprep.subr.bf16.mxu0 %v8779_v58 }
 0x231   : > { %7656 = vmatprep.subr.bf16.mxu1 %v8779_v58 }
 0x233   : > { %7635 = vmatpush3.bf16.msra.mxu0 %v8779_v58 }
 0x234   : > { %7657 = vmatpush3.bf16.msra.mxu1 %v8779_v58  ;;  %7664 = vmatprep.subr.bf16.mxu0 %v8779_v58 }
 0x235   : > { %7686 = vmatprep.subr.bf16.mxu1 %v8779_v58 }
 0x236   : > { %v7372_v19 = vpop.f32.mrf.mxu0  ;;  %6613 = vmatmul.mubr.msk.bf16.vlgmr.msra.gmra.mxu0 %vm6612_vm3, %v8781_v16  ;;  %vm704_vm3 = vcmask 1046528  }
 0x237   : > { %v7394_v52 = vpop.f32.mrf.mxu1  ;;  %6617 = vmatmul.mubr.msk.bf16.vlgmr.msra.gmra.mxu1 %vm6616_vm5, %v8781_v16  ;;  %7665 = vmatpush3.bf16.msra.mxu0 %v8779_v58  ;;  %v706_v63 = vsel %vm704_vm3, 1065369472, %v8778_v57 }
 0x238   : > { %6619 = vmatprep.mubr.msk.bf16.mxu0 %vm6618_vm6, %v8781_v16  ;;  %7687 = vmatpush3.bf16.msra.mxu1 %v8779_v58  ;;  %v7373_v33 = vpop.f32.mrf.mxu0 }
 0x239   : > { %6623 = vmatprep.mubr.msk.bf16.mxu1 %vm6622_vm7, %v8781_v16  ;;  %v7374_v53 = vadd.f32 %v7373_v33, %v7372_v19  ;;  %v7395_v34 = vpop.f32.mrf.mxu1  ;;  %7666 = vmatprep.subr.bf16.mxu0 %v8779_v58 }
 0x23a   : > { %v7396_v54 = vadd.f32 %v7395_v34, %v7394_v52  ;;  %v7375_v20 = vpop.f32.mrf.mxu0  ;;  %7688 = vmatprep.subr.bf16.mxu1 %v8779_v58  ;;  %v538_v52 = vunpack.c.l.b16 %v9657_v62 }
 0x23b   : > { %v823_v23 = vadd.f32 %v7374_v53, %v783_v46  ;;  %v7397_v55 = vpop.f32.mrf.mxu1  ;;  %7667 = vmatpush3.bf16.msra.mxu0 %v8779_v58 }
 0x23c   : > { %7689 = vmatpush3.bf16.msra.mxu1 %v8779_v58  ;;  %v7376_v24 = vpop.f32.mrf.mxu0  ;;  %7668 = vmatprep.subr.bf16.mxu0 %v8779_v58  ;;  %vm578_vm5 = vcmp.ne.s32.totalorder %v538_v52, 0 }
 0x23d   : > { %v863_v56 = vadd.f32 %v7396_v54, %v823_v23  ;;  %v7398_v10 = vpop.f32.mrf.mxu1  ;;  %7690 = vmatprep.subr.bf16.mxu1 %v8779_v58  ;;  %vm6631_vm6 = vmpackc.low %vm578_vm5, %vm578_vm5 }
 0x23f   : > { %7669 = vmatpush3.bf16.msra.mxu0 %v8779_v58 }
 0x240   : > { %7691 = vmatpush3.bf16.msra.mxu1 %v8779_v58  ;;  %7670 = vmatprep.subr.bf16.mxu0 %v8779_v58 }
 0x241   : > { %7692 = vmatprep.subr.bf16.mxu1 %v8779_v58 }
 0x243   : > { %7671 = vmatpush3.bf16.msra.mxu0 %v8779_v58 }
 0x244   : > { %7693 = vmatpush3.bf16.msra.mxu1 %v8779_v58  ;;  %7672 = vmatprep.subr.bf16.mxu0 %v8779_v58 }
 0x245   : > { %7694 = vmatprep.subr.bf16.mxu1 %v8779_v58 }
 0x247   : > { %7673 = vmatpush3.bf16.msra.mxu0 %v8779_v58 }
 0x248   : > { %7695 = vmatpush3.bf16.msra.mxu1 %v8779_v58  ;;  %7674 = vmatprep.subr.bf16.mxu0 %v8779_v58 }
 0x249   : > { %7696 = vmatprep.subr.bf16.mxu1 %v8779_v58 }
 0x24b   : > { %7675 = vmatpush3.bf16.msra.mxu0 %v8779_v58 }
 0x24c   : > { %7697 = vmatpush3.bf16.msra.mxu1 %v8779_v58  ;;  %7676 = vmatprep.subr.bf16.mxu0 %v8779_v58 }
 0x24d   : > { %7698 = vmatprep.subr.bf16.mxu1 %v8779_v58 }
 0x24f   : > { %7677 = vmatpush3.bf16.msra.mxu0 %v8779_v58 }
 0x250   : > { %7699 = vmatpush3.bf16.msra.mxu1 %v8779_v58  ;;  %7678 = vmatprep.subr.bf16.mxu0 %v8779_v58 }
 0x251   : > { %7700 = vmatprep.subr.bf16.mxu1 %v8779_v58 }
 0x253   : > { %7679 = vmatpush3.bf16.msra.mxu0 %v8779_v58 }
 0x254   : > { %7701 = vmatpush3.bf16.msra.mxu1 %v8779_v58  ;;  %7708 = vmatprep.subr.bf16.mxu0 %v8779_v58 }
 0x255   : > { %1468 = vmatprep.subr.bf16.mxu1 %v8778_v57 }
 0x256   : > { %v7416_v35 = vpop.f32.mrf.mxu0  ;;  %6621 = vmatmul.mubr.msk.bf16.vlgmr.msra.gmra.mxu0 %vm6620_vm14, %v8781_v16 }
 0x257   : > { %v7438_v36 = vpop.f32.mrf.mxu1  ;;  %6625 = vmatmul.mubr.msk.bf16.vlgmr.msra.gmra.mxu1 %vm6624_vm15, %v8781_v16  ;;  %7709 = vmatpush3.bf16.msra.mxu0 %v8779_v58 }
 0x258   : > { %6627 = vmatprep.mubr.msk.bf16.mxu0 %vm6626_vm1, %v8781_v16  ;;  %1469 = vmatpush1.bf16.msra.mxu1 %v8779_v58  ;;  %v7417_v21 = vpop.f32.mrf.mxu0 }
 0x259   : > { %6630 = vmatprep.mubr.msk.bf16.mxu1 %vm700_vm0, %v699_v7  ;;  %v7418_v37 = vadd.f32 %v7417_v21, %v7416_v35  ;;  %v7439_v11 = vpop.f32.mrf.mxu1  ;;  %7710 = vmatprep.subr.bf16.mxu0 %v8779_v58 }
 0x25a   : > { %v7440_v38 = vadd.f32 %v7439_v11, %v7438_v36  ;;  %v7419_v12 = vpop.f32.mrf.mxu0  ;;  %1470 = vmatprep.subr.bf16.mxu1 %v8778_v57 }
 0x25b   : > { %v903_v41 = vadd.f32 %v7418_v37, %v863_v56  ;;  %v7441_v42 = vpop.f32.mrf.mxu1  ;;  %7711 = vmatpush3.bf16.msra.mxu0 %v8779_v58 }
 0x25c   : > { %1471 = vmatpush1.bf16.msra.mxu1 %v8779_v58  ;;  %v7420_v61 = vpop.f32.mrf.mxu0  ;;  %7712 = vmatprep.subr.bf16.mxu0 %v8779_v58 }
 0x25d   : > { %v943_v43 = vadd.f32 %v7440_v38, %v903_v41  ;;  %v7442_v13 = vpop.f32.mrf.mxu1  ;;  %1472 = vmatprep.subr.bf16.mxu1 %v8778_v57 }
 0x25f   : > { %7713 = vmatpush3.bf16.msra.mxu0 %v8779_v58 }
 0x260   : > { %1473 = vmatpush1.bf16.msra.mxu1 %v8779_v58  ;;  %7714 = vmatprep.subr.bf16.mxu0 %v8779_v58 }
 0x261   : > { %1474 = vmatprep.subr.bf16.mxu1 %v8778_v57 }
 0x263   : > { %7715 = vmatpush3.bf16.msra.mxu0 %v8779_v58 }
 0x264   : > { %1475 = vmatpush1.bf16.msra.mxu1 %v8779_v58  ;;  %7716 = vmatprep.subr.bf16.mxu0 %v8779_v58 }
 0x265   : > { %1476 = vmatprep.subr.bf16.mxu1 %v8778_v57 }
 0x267   : > { %7717 = vmatpush3.bf16.msra.mxu0 %v8779_v58 }
 0x268   : > { %1477 = vmatpush1.bf16.msra.mxu1 %v8779_v58  ;;  %7718 = vmatprep.subr.bf16.mxu0 %v8779_v58 }
 0x269   : > { %1478 = vmatprep.subr.bf16.mxu1 %v8778_v57 }
 0x26b   : > { %7719 = vmatpush3.bf16.msra.mxu0 %v8779_v58 }
 0x26c   : > { %1479 = vmatpush1.bf16.msra.mxu1 %v8779_v58  ;;  %7720 = vmatprep.subr.bf16.mxu0 %v8779_v58 }
 0x26d   : > { %1480 = vmatprep.subr.bf16.mxu1 %v8778_v57 }
 0x26f   : > { %7721 = vmatpush3.bf16.msra.mxu0 %v8779_v58 }
 0x270   : > { %1481 = vmatpush1.bf16.msra.mxu1 %v8779_v58  ;;  %7722 = vmatprep.subr.bf16.mxu0 %v8779_v58 }
 0x271   : > { %1482 = vmatprep.subr.bf16.mxu1 %v8778_v57 }
 0x273   : > { %7723 = vmatpush3.bf16.msra.mxu0 %v8779_v58 }
 0x274   : > { %1483 = vmatpush1.bf16.msra.mxu1 %v8779_v58 }
 0x275   : > { %1490 = vmatprep.subr.bf16.mxu1 %v8778_v57 }
 0x276   : > { %v7460_v46 = vpop.f32.mrf.mxu0  ;;  %6629 = vmatmul.mubr.msk.bf16.vlgmr.msra.gmra.mxu0 %vm6628_vm4, %v8781_v16 }
 0x277   : > { %v7482_v47 = vpop.f32.mrf.mxu1 }
 0x278   : > { %1491 = vmatpush2.bf16.msra.mxu1 %v706_v63  ;;  %v7461_v14 = vpop.f32.mrf.mxu0 }
 0x279   : > { %v7462_v17 = vadd.f32 %v7461_v14, %v7460_v46  ;;  %v7483_v48 = vpop.f32.mrf.mxu1  ;;  %1492 = vmatprep.subr.bf16.mxu1 %v8778_v57 }
 0x27a   : > { %v7484_v22 = vadd.f32 %v7483_v48, %v7482_v47  ;;  %v7463_v49 = vpop.f32.mrf.mxu0 }
 0x27b   : > { %v983_v18 = vadd.f32 %v7462_v17, %v943_v43  ;;  %v7485_v50 = vpop.f32.mrf.mxu1 }
 0x27c   : > { %1493 = vmatpush2.bf16.msra.mxu1 %v8779_v58  ;;  %v7464_v51 = vpop.f32.mrf.mxu0 }
 0x27d   : > { %v1023_v45 = vadd.f32 %v7484_v22, %v983_v18  ;;  %v7486_v19 = vpop.f32.mrf.mxu1  ;;  %1494 = vmatprep.subr.bf16.mxu1 %v8778_v57 }
 0x280   : > { %1495 = vmatpush2.bf16.msra.mxu1 %v8779_v58 }
 0x281   : > { %1496 = vmatprep.subr.bf16.mxu1 %v8778_v57 }
 0x284   : > { %1497 = vmatpush2.bf16.msra.mxu1 %v8779_v58 }
 0x285   : > { %1498 = vmatprep.subr.bf16.mxu1 %v8778_v57 }
 0x288   : > { %1499 = vmatpush2.bf16.msra.mxu1 %v8779_v58 }
 0x28b   : > { %6632 = vmatmul.mubr.msk.bf16.vlgmr.msra.gmra.mxu1 %vm6631_vm6, %v8781_v16 }
 0x296   : > { %v7504_v33 = vpop.f32.mrf.mxu0 }
 0x297   : > { %v7526_v53 = vpop.f32.mrf.mxu1 }
 0x298   : > { %v7505_v34 = vpop.f32.mrf.mxu0 }
 0x299   : > { %v7506_v54 = vadd.f32 %v7505_v34, %v7504_v33  ;;  %v7527_v20 = vpop.f32.mrf.mxu1 }
 0x29a   : > { %v7528_v23 = vadd.f32 %v7527_v20, %v7526_v53  ;;  %v7507_v55 = vpop.f32.mrf.mxu0 }
 0x29b   : > { %v1063_v24 = vadd.f32 %v7506_v54, %v1023_v45  ;;  %v7529_v56 = vpop.f32.mrf.mxu1 }
 0x29c   : > { %v7508_v10 = vpop.f32.mrf.mxu0 }
 0x29d   : > { %v1103_v25 = vadd.f32 %v7528_v23, %v1063_v24  ;;  %v7530_v40 = vpop.f32.mrf.mxu1 }
 0x2b6   : > { %v7548_v62 = vpop.f32.mrf.mxu0 }
 0x2b7   : > { %v7570_v57 = vpop.f32.mrf.mxu1 }
 0x2b8   : > { %v7549_v26 = vpop.f32.mrf.mxu0 }
 0x2b9   : > { %v7550_v29 = vadd.f32 %v7549_v26, %v7548_v62  ;;  %v7571_v58 = vpop.f32.mrf.mxu1 }
 0x2ba   : > { %v7572_v30 = vadd.f32 %v7571_v58, %v7570_v57  ;;  %v7551_v27 = vpop.f32.mrf.mxu0 }
 0x2bb   : > { %v1143_v16 = vadd.f32 %v7550_v29, %v1103_v25  ;;  %v7573_v60 = vpop.f32.mrf.mxu1  ;;  %v1509_v29 = vunpack.c.l.bf16 %v9259_v59 }
 0x2bc   : > { %v7552_v28 = vpop.f32.mrf.mxu0 }
 0x2bd   : > { %v1183_v32 = vadd.f32 %v7572_v30, %v1143_v16  ;;  %v7574_v35 = vpop.f32.mrf.mxu1 }
 0x2be   :  { %v7805_v35 = vld [vmem:[%s11937_s1 + $0x174] ss:$8 sps:$4 sm:$0xff] (%p438_p0)  }
 0x2bf   :  { %5571 = vmatprep.subr.bf16.mxu1 (%p438_p0), %v7805_v35  ;;  %v7886_v35 = vld [vmem:[%s11937_s1 + $0x1a0] ss:$8 sps:$4 sm:$0xff] (%p438_p0)  }
 0x2d6   : > { %v7592_v36 = vpop.f32.mrf.mxu0 }
 0x2d7   : > { %v7614_v7 = vpop.f32.mrf.mxu1 }
 0x2d8   : > { %v7593_v21 = vpop.f32.mrf.mxu0 }
 0x2d9   : > { %v7594_v37 = vadd.f32 %v7593_v21, %v7592_v36  ;;  %v7615_v11 = vpop.f32.mrf.mxu1  ;;  %v7807_v36 = vld [vmem:[%s11937_s1 + $0x70] ss:$8 sps:$4 sm:$0xff] (%p438_p0)   ;;  %v7811_v21 = vld [vmem:[%s11937_s1 + $0x164] ss:$8 sps:$4 sm:$0xff] (%p438_p0)  }
 0x2da   : > { %v7616_v38 = vadd.f32 %v7615_v11, %v7614_v7  ;;  %v7595_v12 = vpop.f32.mrf.mxu0  ;;  %v7809_v7 = vld [vmem:[%s11937_s1 + $0x64] ss:$8 sps:$4 sm:$0xff] (%p438_p0)   ;;  %v7814_v11 = vld [vmem:[%s11937_s1 + $0x160] ss:$8 sps:$4 sm:$0xff] (%p438_p0)  }
 0x2db   : > { %v1223_v41 = vadd.f32 %v7594_v37, %v1183_v32  ;;  %v7617_v42 = vpop.f32.mrf.mxu1  ;;  %v7803_v32 = vld [vmem:[%s11937_s1 + $0x74] ss:$8 sps:$4 sm:$0xff] (%p438_p0)   ;;  %v7813_v37 = vld [vmem:[%s11937_s1 + $0x60] ss:$8 sps:$4 sm:$0xff] (%p438_p0)  }
 0x2dc   : > { %v7596_v61 = vpop.f32.mrf.mxu0  ;;  %5530 = vmatprep.subr.bf16.mxu0 (%p438_p0), %v7803_v32  ;;  %v7817_v12 = vld [vmem:[%s11937_s1 + $0x154] ss:$8 sps:$4 sm:$0xff] (%p438_p0)   ;;  %v7820_v42 = vld [vmem:[%s11937_s1 + $0x150] ss:$8 sps:$4 sm:$0xff] (%p438_p0)   ;;  %v7883_v32 = vld [vmem:[%s11937_s1 + $0x1a4] ss:$8 sps:$4 sm:$0xff] (%p438_p0)  }
 0x2dd   : > { %v1263_v43 = vadd.f32 %v7616_v38, %v1223_v41  ;;  %v7618_v13 = vpop.f32.mrf.mxu1  ;;  %5531 = vmatpush1.bf16.msra.mxu0 (%p438_p0), %v7807_v36  ;;  %v7815_v38 = vld [vmem:[%s11937_s1 + $0x54] ss:$8 sps:$4 sm:$0xff] (%p438_p0)   ;;  %v7819_v41 = vld [vmem:[%s11937_s1 + $0x50] ss:$8 sps:$4 sm:$0xff] (%p438_p0)   ;;  %v7821_v61 = vld [vmem:[%s11937_s1 + $0x44] ss:$8 sps:$4 sm:$0xff] (%p438_p0)  }
 0x2de   :  { %5532 = vmatprep.subr.bf16.mxu0 (%p438_p0), %v7809_v7  ;;  %v7825_v13 = vld [vmem:[%s11937_s1 + $0x40] ss:$8 sps:$4 sm:$0xff] (%p438_p0)   ;;  %v7887_v36 = vld [vmem:[%s11937_s1 + $0x94] ss:$8 sps:$4 sm:$0xff] (%p438_p0)   ;;  %v7891_v7 = vld [vmem:[%s11937_s1 + $0x90] ss:$8 sps:$4 sm:$0xff] (%p438_p0)  }
 0x2e1   :  { %5533 = vmatpush1.bf16.msra.mxu0 (%p438_p0), %v7813_v37  ;;  %v7893_v37 = vld [vmem:[%s11937_s1 + $0x84] ss:$8 sps:$4 sm:$0xff] (%p438_p0)  }
 0x2e2   :  { %5534 = vmatprep.subr.bf16.mxu0 (%p438_p0), %v7815_v38  ;;  %v7897_v38 = vld [vmem:[%s11937_s1 + $0x80] ss:$8 sps:$4 sm:$0xff] (%p438_p0)  }
 0x2e5   :  { %5535 = vmatpush1.bf16.msra.mxu0 (%p438_p0), %v7819_v41  ;;  %v7901_v41 = vld [vmem:[%s11937_s1 + $0x274] ss:$8 sps:$4 sm:$0xff] (%p438_p0)  }
 0x2e6   :  { %5536 = vmatprep.subr.bf16.mxu0 (%p438_p0), %v7821_v61 }
 0x2e9   :  { %5537 = vmatpush1.bf16.msra.mxu0 (%p438_p0), %v7825_v13  ;;  %v7899_v13 = vld [vmem:[%s11937_s1 + $0x270] ss:$8 sps:$4 sm:$0xff] (%p438_p0)  }
 0x2f6   : > { %v7636_v44 = vpop.f32.mrf.mxu0 }
 0x2f7   : > { %v7658_v63 = vpop.f32.mrf.mxu1 }
 0x2f8   : > { %v7637_v46 = vpop.f32.mrf.mxu0 }
 0x2f9   : > { %v7638_v47 = vadd.f32 %v7637_v46, %v7636_v44  ;;  %v7659_v14 = vpop.f32.mrf.mxu1  ;;  %v7826_v44 = vld [vmem:[%s11937_s1 + $0x140] ss:$8 sps:$4 sm:$0xff] (%p438_p0)   ;;  %v7829_v46 = vld [vmem:[%s11937_s1 + $0x134] ss:$8 sps:$4 sm:$0xff] (%p438_p0)  }
 0x2fa   : > { %v7660_v17 = vadd.f32 %v7659_v14, %v7658_v63  ;;  %v7639_v48 = vpop.f32.mrf.mxu0  ;;  %v7827_v63 = vld [vmem:[%s11937_s1 + $0x34] ss:$8 sps:$4 sm:$0xff] (%p438_p0)   ;;  %v7832_v14 = vld [vmem:[%s11937_s1 + $0x130] ss:$8 sps:$4 sm:$0xff] (%p438_p0)  }
 0x2fb   : > { %v1303_v22 = vadd.f32 %v7638_v47, %v1263_v43  ;;  %v7661_v49 = vpop.f32.mrf.mxu1  ;;  %v7823_v43 = vld [vmem:[%s11937_s1 + $0x144] ss:$8 sps:$4 sm:$0xff] (%p438_p0)   ;;  %v7831_v47 = vld [vmem:[%s11937_s1 + $0x30] ss:$8 sps:$4 sm:$0xff] (%p438_p0)   ;;  %5538 = vmatprep.subr.bf16.mxu0 (%p438_p0), %v7827_v63 }
 0x2fc   : > { %v7640_v18 = vpop.f32.mrf.mxu0  ;;  %v7835_v48 = vld [vmem:[%s11937_s1 + $0x124] ss:$8 sps:$4 sm:$0xff] (%p438_p0)   ;;  %5539 = vmatpush1.bf16.msra.mxu0 (%p438_p0), %v7831_v47  ;;  %v7838_v49 = vld [vmem:[%s11937_s1 + $0x120] ss:$8 sps:$4 sm:$0xff] (%p438_p0)  }
 0x2fd   : > { %v1343_v50 = vadd.f32 %v7660_v17, %v1303_v22  ;;  %v7662_v51 = vpop.f32.mrf.mxu1  ;;  %v7833_v17 = vld [vmem:[%s11937_s1 + $0x24] ss:$8 sps:$4 sm:$0xff] (%p438_p0)   ;;  %v7837_v22 = vld [vmem:[%s11937_s1 + $0x20] ss:$8 sps:$4 sm:$0xff] (%p438_p0)   ;;  %v7839_v18 = vld [vmem:[%s11937_s1 + $0x14] ss:$8 sps:$4 sm:$0xff] (%p438_p0)  }
 0x2fe   :  { %5540 = vmatprep.subr.bf16.mxu0 (%p438_p0), %v7833_v17  ;;  %v7843_v51 = vld [vmem:[%s11937_s1 + $0x10] ss:$8 sps:$4 sm:$0xff] (%p438_p0)  }
 0x300   :  { %5541 = vmatpush1.bf16.msra.mxu0 (%p438_p0), %v7837_v22 }
 0x301   :  { %5542 = vmatprep.subr.bf16.mxu0 (%p438_p0), %v7839_v18  ;;  %v7908_v18 = vld [vmem:[%s11937_s1 + $0x360] ss:$8 sps:$4 sm:$0xff] (%p438_p0)  }
 0x304   :  { %5543 = vmatpush1.bf16.msra.mxu0 (%p438_p0), %v7843_v51  ;;  %v7916_v51 = vld [vmem:[%s11937_s1 + $0x354] ss:$8 sps:$4 sm:$0xff] (%p438_p0)  }
 0x316   : > { %v7680_v45 = vpop.f32.mrf.mxu0 }
 0x317   : > { %v7702_v19 = vpop.f32.mrf.mxu1 }
 0x318   : > { %v7681_v52 = vpop.f32.mrf.mxu0 }
 0x319   : > { %v7703_v33 = vpop.f32.mrf.mxu1  ;;  %v7682_v10 = vadd.f32 %v7681_v52, %v7680_v45  ;;  %v7844_v45 = vld [vmem:[%s11937_s1 + $0x110] ss:$8 sps:$4 sm:$0xff] (%p438_p0)   ;;  %v7847_v52 = vld [vmem:[%s11937_s1 + $0x104] ss:$8 sps:$4 sm:$0xff] (%p438_p0)  }
 0x31a   : > { %v7683_v53 = vpop.f32.mrf.mxu0  ;;  %v7704_v40 = vadd.f32 %v7703_v33, %v7702_v19  ;;  %v7845_v19 = vld [vmem:[%s11937_s1 + $0x4] ss:$8 sps:$4 sm:$0xff] (%p438_p0)   ;;  %v7849_v33 = vld [vmem:[%s11937_s1] ss:$8 sps:$4 sm:$0xff] (%p438_p0)  }
 0x31b   : > { %v7705_v34 = vpop.f32.mrf.mxu1  ;;  %v1383_v25 = vadd.f32 %v7682_v10, %v1343_v50  ;;  %v7841_v50 = vld [vmem:[%s11937_s1 + $0x114] ss:$8 sps:$4 sm:$0xff] (%p438_p0)   ;;  %v7850_v53 = vld [vmem:[%s11937_s1 + $0x100] ss:$8 sps:$4 sm:$0xff] (%p438_p0)   ;;  %5544 = vmatprep.subr.bf16.mxu0 (%p438_p0), %v7845_v19  ;;  %v7914_v19 = vld [vmem:[%s11937_s1 + $0x350] ss:$8 sps:$4 sm:$0xff] (%p438_p0)  }
 0x31c   : > { %v7684_v54 = vpop.f32.mrf.mxu0  ;;  %v7851_v34 = vld [vmem:[%s11937_s1 + $0xf4] ss:$8 sps:$4 sm:$0xff] (%p438_p0)   ;;  %5545 = vmatpush1.bf16.msra.mxu0 (%p438_p0), %v7849_v33  ;;  %v7862_v10 = vld [vmem:[%s11937_s1 + $0x1e0] ss:$8 sps:$4 sm:$0xff] (%p438_p0)   ;;  %v7922_v33 = vld [vmem:[%s11937_s1 + $0x344] ss:$8 sps:$4 sm:$0xff] (%p438_p0)  }
 0x31d   : > { %v7706_v20 = vpop.f32.mrf.mxu1  ;;  %v1423_v57 = vadd.f32 %v7704_v40, %v1383_v25  ;;  %v7853_v54 = vld [vmem:[%s11937_s1 + $0x1f4] ss:$8 sps:$4 sm:$0xff] (%p438_p0)   ;;  %5546 = vmatprep.subr.bf16.mxu0 (%p438_p0), %v7851_v34  ;;  %v7920_v34 = vld [vmem:[%s11937_s1 + $0x340] ss:$8 sps:$4 sm:$0xff] (%p438_p0)  }
 0x31e   :  { %v7855_v20 = vld [vmem:[%s11937_s1 + $0xf0] ss:$8 sps:$4 sm:$0xff] (%p438_p0)   ;;  %v7863_v25 = vld [vmem:[%s11937_s1 + $0xd4] ss:$8 sps:$4 sm:$0xff] (%p438_p0)  }
 0x31f   :  { %v7865_v40 = vld [vmem:[%s11937_s1 + $0x1d4] ss:$8 sps:$4 sm:$0xff] (%p438_p0)  }
 0x320   :  { %5547 = vmatpush2.bf16.msra.mxu0 (%p438_p0), %v7855_v20  ;;  %v7928_v20 = vld [vmem:[%s11937_s1 + $0x334] ss:$8 sps:$4 sm:$0xff] (%p438_p0)  }
 0x336   : > { %v7724_v23 = vpop.f32.mrf.mxu0 }
 0x338   : > { %v7725_v55 = vpop.f32.mrf.mxu0 }
 0x339   : > { %v7726_v62 = vadd.f32 %v7725_v55, %v7724_v23  ;;  %v7856_v23 = vld [vmem:[%s11937_s1 + $0x1f0] ss:$8 sps:$4 sm:$0xff] (%p438_p0)   ;;  %v7857_v55 = vld [vmem:[%s11937_s1 + $0xe4] ss:$8 sps:$4 sm:$0xff] (%p438_p0)  }
 0x33a   : > { %v7727_v24 = vpop.f32.mrf.mxu0  ;;  %5548 = vmatprep.subr.bf16.mxu0 (%p438_p0), %v7857_v55  ;;  %v7926_v55 = vld [vmem:[%s11937_s1 + $0x330] ss:$8 sps:$4 sm:$0xff] (%p438_p0)  }
 0x33b   : > { %v1463_v26 = vadd.f32 %v7726_v62, %v1423_v57  ;;  %v7859_v24 = vld [vmem:[%s11937_s1 + $0x1e4] ss:$8 sps:$4 sm:$0xff] (%p438_p0)   ;;  %v7867_v62 = vld [vmem:[%s11937_s1 + $0xd0] ss:$8 sps:$4 sm:$0xff] (%p438_p0)  }
 0x33c   : > { %v7728_v56 = vpop.f32.mrf.mxu0  ;;  %v7868_v57 = vld [vmem:[%s11937_s1 + $0x1d0] ss:$8 sps:$4 sm:$0xff] (%p438_p0)  }
 0x33d   :  { %v7861_v56 = vld [vmem:[%s11937_s1 + $0xe0] ss:$8 sps:$4 sm:$0xff] (%p438_p0)  }
 0x33e   :  { %5549 = vmatpush2.bf16.msra.mxu0 (%p438_p0), %v7861_v56  ;;  %v7934_v56 = vld [vmem:[%s11937_s1 + $0x324] ss:$8 sps:$4 sm:$0xff] (%p438_p0)  }
 0x33f   :  { %5550 = vmatprep.subr.bf16.mxu0 (%p438_p0), %v7863_v25  ;;  %v7932_v25 = vld [vmem:[%s11937_s1 + $0x320] ss:$8 sps:$4 sm:$0xff] (%p438_p0)  }
 0x342   :  { %5551 = vmatpush2.bf16.msra.mxu0 (%p438_p0), %v7867_v62  ;;  %v7940_v62 = vld [vmem:[%s11937_s1 + $0x314] ss:$8 sps:$4 sm:$0xff] (%p438_p0)  }
 0x34b   : > { %v1502_v58 = vpop.f32.mrf.mxu1 }
 0x34c   : > { %v1503_v30 = vadd.f32 %v1502_v58, %v1463_v26  ;;  %v7869_v26 = vld [vmem:[%s11937_s1 + $0xc4] ss:$8 sps:$4 sm:$0xff] (%p438_p0)   ;;  %v7873_v58 = vld [vmem:[%s11937_s1 + $0xc0] ss:$8 sps:$4 sm:$0xff] (%p438_p0)  }
 0x34d   : > { %v1504_v27 = vpop.f32.mrf.mxu1  ;;  %440 = sbr.rel (!%p438_p0) target bundleno = 202 (0xca), region = 47  ;;  %5552 = vmatprep.subr.bf16.mxu0 (%p438_p0), %v7869_v26  ;;  %v7938_v26 = vld [vmem:[%s11937_s1 + $0x310] ss:$8 sps:$4 sm:$0xff] (%p438_p0)  }
 0x34e   : > { %vm1508_vm7 = vcmp.ge.f32.partialorder %v1503_v30, 400.0  ;;  %v7874_v30 = vld [vmem:[%s11937_s1 + $0x1c0] ss:$8 sps:$4 sm:$0xff] (%p438_p0)   ;;  %v7875_v27 = vld [vmem:[%s11937_s1 + $0xb4] ss:$8 sps:$4 sm:$0xff] (%p438_p0)   ;;  %5553 = vmatpush2.bf16.msra.mxu0 (%p438_p0), %v7873_v58 }
 0x34f   : > { %v1510_v16 = vsel %vm1508_vm7, %v1509_v29, %v8772_v15   ;;  %v1511_v39 = vsel %vm1508_vm7, %v8768_v39, %v1509_v29   ;;  %v1505_v60 = vpop.f32.mrf.mxu1  ;;  %v7871_v29 = vld [vmem:[%s11937_s1 + $0x1c4] ss:$8 sps:$4 sm:$0xff] (%p438_p0)   ;;  %5554 = vmatprep.subr.bf16.mxu0 (%p438_p0), %v7875_v27  ;;  %v7944_v27 = vld [vmem:[%s11937_s1 + $0x300] ss:$8 sps:$4 sm:$0xff] (%p438_p0)  }
 0x350   : > { %v11990_v15 = vmov %v1510_v16  ;;  %v1512_v59 = vpack.c.bf16 (%p438_p0), %v1510_v16, %v1510_v16  ;;  %v7808_v39 = vld [vmem:[%s11937_s1 + $0x170] ss:$8 sps:$4 sm:$0xff] (%p438_p0)   ;;  %v7877_v16 = vld [vmem:[%s11937_s1 + $0x1b4] ss:$8 sps:$4 sm:$0xff] (%p438_p0)   ;;  %v7946_v58 = vld [vmem:[%s11937_s1 + $0x304] ss:$8 sps:$4 sm:$0xff] (%p438_p0)  }
 0x351   : > { %v1506_v28 = vpop.f32.mrf.mxu1  ;;  %v8783_v15 = vmov (%p438_p0), 0   ;;  %5572 = vmatpush1.bf16.msra.mxu1 (%p438_p0), %v7808_v39  ;;  %v7879_v60 = vld [vmem:[%s11937_s1 + $0xb0] ss:$8 sps:$4 sm:$0xff] (%p438_p0)   ;;  %v7889_v39 = vld [vmem:[%s11937_s1 + $0x194] ss:$8 sps:$4 sm:$0xff] (%p438_p0)  }
 0x352   :  { %7802 = vset.pattern.permute.xlu0 %v8783_v15  ;;  %5573 = vmatprep.subr.bf16.mxu1 %v7811_v21  ;;  %v7880_v28 = vld [vmem:[%s11937_s1 + $0x1b0] ss:$8 sps:$4 sm:$0xff]   ;;  %v7885_v15 = vld [vmem:[%s11937_s1 + $0xa0] ss:$8 sps:$4 sm:$0xff]  }
 0x353   :  { %1515 = vperm.xlu0 %7802, %v1512_v59   ;;  %v7881_v59 = vld [vmem:[%s11937_s1 + $0xa4] ss:$8 sps:$4 sm:$0xff]   ;;  %5555 = vmatpush2.bf16.msra.mxu0 %v7879_v60  ;;  %v7892_v21 = vld [vmem:[%s11937_s1 + $0x190] ss:$8 sps:$4 sm:$0xff]   ;;  %v7952_v60 = vld [vmem:[%s11937_s1 + $0x3f4] ss:$8 sps:$4 sm:$0xff]  }
 0x354   :  { %5556 = vmatprep.subr.bf16.mxu0 %v7881_v59  ;;  %v7950_v59 = vld [vmem:[%s11937_s1 + $0x3f0] ss:$8 sps:$4 sm:$0xff]  }
 0x355   :  { %5574 = vmatpush1.bf16.msra.mxu1 %v7814_v11  ;;  %v7895_v11 = vld [vmem:[%s11937_s1 + $0x184] ss:$8 sps:$4 sm:$0xff]  }
 0x356   :  { %5575 = vmatprep.subr.bf16.mxu1 %v7817_v12  ;;  %v7898_v12 = vld [vmem:[%s11937_s1 + $0x180] ss:$8 sps:$4 sm:$0xff]  }
 0x357   :  { %5557 = vmatpush2.bf16.msra.mxu0 %v7885_v15  ;;  %v7958_v15 = vld [vmem:[%s11937_s1 + $0x3e4] ss:$8 sps:$4 sm:$0xff]  }
 0x358   :  { %5558 = vmatprep.subr.bf16.mxu0 %v7887_v36  ;;  %v7956_v36 = vld [vmem:[%s11937_s1 + $0x3e0] ss:$8 sps:$4 sm:$0xff]  }
 0x359   :  { %5576 = vmatpush1.bf16.msra.mxu1 %v7820_v42  ;;  %v7904_v42 = vld [vmem:[%s11937_s1 + $0x374] ss:$8 sps:$4 sm:$0xff]  }
 0x35a   :  { %5577 = vmatprep.subr.bf16.mxu1 %v7823_v43 }
 0x35b   :  { %5559 = vmatpush2.bf16.msra.mxu0 %v7891_v7  ;;  %v7964_v7 = vld [vmem:[%s11937_s1 + $0x3d4] ss:$8 sps:$4 sm:$0xff]  }
 0x35c   :  { %5560 = vmatprep.subr.bf16.mxu0 %v7893_v37  ;;  %v7962_v37 = vld [vmem:[%s11937_s1 + $0x3d0] ss:$8 sps:$4 sm:$0xff]  }
 0x35d   :  { %5578 = vmatpush1.bf16.msra.mxu1 %v7826_v44  ;;  %v7902_v44 = vld [vmem:[%s11937_s1 + $0x370] ss:$8 sps:$4 sm:$0xff]  }
 0x35e   :  { %5579 = vmatprep.subr.bf16.mxu1 %v7829_v46 }
 0x35f   :  { %5561 = vmatpush2.bf16.msra.mxu0 %v7897_v38  ;;  %v7970_v38 = vld [vmem:[%s11937_s1 + $0x3c4] ss:$8 sps:$4 sm:$0xff]  }
 0x360   :  { %5612 = vmatprep.subr.bf16.mxu0 %v7901_v41  ;;  %v7968_v41 = vld [vmem:[%s11937_s1 + $0x3c0] ss:$8 sps:$4 sm:$0xff]  }
 0x361   :  { %5580 = vmatpush1.bf16.msra.mxu1 %v7832_v14 }
 0x362   :  { %5581 = vmatprep.subr.bf16.mxu1 %v7835_v48 }
 0x365   :  { %5582 = vmatpush1.bf16.msra.mxu1 %v7838_v49  ;;  %v7907_v49 = vld [vmem:[%s11937_s1 + $0x264] ss:$8 sps:$4 sm:$0xff]  }
 0x366   :  { %5583 = vmatprep.subr.bf16.mxu1 %v7841_v50  ;;  %v7913_v50 = vld [vmem:[%s11937_s1 + $0x254] ss:$8 sps:$4 sm:$0xff]  }
 0x369   :  { %5584 = vmatpush1.bf16.msra.mxu1 %v7844_v45  ;;  %v7911_v45 = vld [vmem:[%s11937_s1 + $0x250] ss:$8 sps:$4 sm:$0xff]  }
 0x36a   :  { %5585 = vmatprep.subr.bf16.mxu1 %v7847_v52  ;;  %v7919_v52 = vld [vmem:[%s11937_s1 + $0x244] ss:$8 sps:$4 sm:$0xff]  }
 0x36d   :  { %5586 = vmatpush1.bf16.msra.mxu1 %v7850_v53  ;;  %v7917_v53 = vld [vmem:[%s11937_s1 + $0x240] ss:$8 sps:$4 sm:$0xff]  }
 0x36e   :  { %5587 = vmatprep.subr.bf16.mxu1 %v7853_v54  ;;  %v7925_v54 = vld [vmem:[%s11937_s1 + $0x234] ss:$8 sps:$4 sm:$0xff]  }
 0x371   :  { %5588 = vmatpush2.bf16.msra.mxu1 %v7856_v23  ;;  %v7923_v23 = vld [vmem:[%s11937_s1 + $0x230] ss:$8 sps:$4 sm:$0xff]  }
 0x372   :  { %5589 = vmatprep.subr.bf16.mxu1 %v7859_v24  ;;  %v7931_v24 = vld [vmem:[%s11937_s1 + $0x224] ss:$8 sps:$4 sm:$0xff]  }
 0x375   :  { %5590 = vmatpush2.bf16.msra.mxu1 %v7862_v10  ;;  %v7929_v10 = vld [vmem:[%s11937_s1 + $0x220] ss:$8 sps:$4 sm:$0xff]  }
 0x376   :  { %5591 = vmatprep.subr.bf16.mxu1 %v7865_v40  ;;  %v7937_v40 = vld [vmem:[%s11937_s1 + $0x214] ss:$8 sps:$4 sm:$0xff]  }
 0x379   :  { %5592 = vmatpush2.bf16.msra.mxu1 %v7868_v57  ;;  %v7935_v57 = vld [vmem:[%s11937_s1 + $0x210] ss:$8 sps:$4 sm:$0xff]  }
 0x37a   :  { %5593 = vmatprep.subr.bf16.mxu1 %v7871_v29  ;;  %v7943_v29 = vld [vmem:[%s11937_s1 + $0x204] ss:$8 sps:$4 sm:$0xff]  }
 0x37d   :  { %5594 = vmatpush2.bf16.msra.mxu1 %v7874_v30  ;;  %v7941_v30 = vld [vmem:[%s11937_s1 + $0x200] ss:$8 sps:$4 sm:$0xff]  }
 0x37e   :  { %5595 = vmatprep.subr.bf16.mxu1 %v7877_v16  ;;  %v7949_v16 = vld [vmem:[%s11937_s1 + $0x2f4] ss:$8 sps:$4 sm:$0xff]  }
 0x381   :  { %5596 = vmatpush2.bf16.msra.mxu1 %v7880_v28  ;;  %v7947_v28 = vld [vmem:[%s11937_s1 + $0x2f0] ss:$8 sps:$4 sm:$0xff]  }
 0x382   :  { %5597 = vmatprep.subr.bf16.mxu1 %v7883_v32  ;;  %v7955_v32 = vld [vmem:[%s11937_s1 + $0x2e4] ss:$8 sps:$4 sm:$0xff]  }
 0x385   :  { %5598 = vmatpush2.bf16.msra.mxu1 %v7886_v35  ;;  %v7953_v35 = vld [vmem:[%s11937_s1 + $0x2e0] ss:$8 sps:$4 sm:$0xff]  }
 0x386   :  { %5599 = vmatprep.subr.bf16.mxu1 %v7889_v39  ;;  %v7961_v39 = vld [vmem:[%s11937_s1 + $0x2d4] ss:$8 sps:$4 sm:$0xff]  }
 0x389   :  { %5600 = vmatpush2.bf16.msra.mxu1 %v7892_v21  ;;  %v7959_v21 = vld [vmem:[%s11937_s1 + $0x2d0] ss:$8 sps:$4 sm:$0xff]  }
 0x38a   :  { %5601 = vmatprep.subr.bf16.mxu1 %v7895_v11  ;;  %v7967_v11 = vld [vmem:[%s11937_s1 + $0x2c4] ss:$8 sps:$4 sm:$0xff]  }
 0x38d   :  { %5602 = vmatpush2.bf16.msra.mxu1 %v7898_v12  ;;  %v7965_v12 = vld [vmem:[%s11937_s1 + $0x2c0] ss:$8 sps:$4 sm:$0xff]  }
 0x38e   :  { %5653 = vmatprep.subr.bf16.mxu1 %v7904_v42  ;;  %v7973_v42 = vld [vmem:[%s11937_s1 + $0x2b4] ss:$8 sps:$4 sm:$0xff]  }
 0x3ce   :  { %v1516_v61 = vpop.permute.xlu0 %1515 }
 0x3cf   :  { %v9936_v43 = vrot.slane %v1516_v61, %v9293_v6  ;;  %v7976_v61 = vld [vmem:[%s11937_s1 + $0x3b4] ss:$8 sps:$4 sm:$0xff]  }
 0x3d1   :  { %vm1526_vm8 = vcmp.ge.bf16.partialorder %v8818_v0, %v9936_v43  ;;  %vm1527_vm9 = vcmp.ge.bf16.partialorder %v8823_v1, %v9936_v43  ;;  %vm1528_vm10 = vcmp.ge.bf16.partialorder %v8828_v2, %v9936_v43  ;;  %vm1529_vm11 = vcmp.ge.bf16.partialorder %v8833_v3, %v9936_v43 }
 0x3d2   :  { %v1546_v6 = vsel %vm1526_vm8, %v8818_v0, 0  ;;  %v1547_v63 = vsel %vm1527_vm9, %v8823_v1, 0  ;;  %v9955_v46 = vsel %vm1528_vm10, %v8828_v2, 0  ;;  %v9958_v47 = vsel %vm1529_vm11, %v8833_v3, 0  ;;  %v7910_v0 = vld [vmem:[%s11937_s1 + $0x364] ss:$8 sps:$4 sm:$0xff]  }
 0x3d3   :  { %v6633_v14 = vcombine.low %v1546_v6, %v1546_v6  ;;  %v6634_v17 = vcombine.high %v1546_v6, %v1546_v6  ;;  %v6635_v48 = vcombine.low %v1547_v63, %v1547_v63  ;;  %v6636_v22 = vcombine.high %v1547_v63, %v1547_v63  ;;  %v7905_v3 = vld [vmem:[%s11937_s1 + $0x260] ss:$8 sps:$4 sm:$0xff]   ;;  %v7979_v6 = vld [vmem:[%s11937_s1 + $0x2a4] ss:$8 sps:$4 sm:$0xff]  }
 0x3d4   :  { %v6638_v1 = vcombine.high %v9955_v46, %v9955_v46  ;;  %v6640_v2 = vcombine.high %v9958_v47, %v9958_v47  ;;  %v7982_v63 = vld [vmem:[%s11937_s1 + $0x3a4] ss:$8 sps:$4 sm:$0xff]   ;;  %vm1530_vm12 = vcmp.ge.bf16.partialorder %v8838_v4, %v9936_v43  ;;  %vm1531_vm13 = vcmp.ge.bf16.partialorder %v8843_v5, %v9936_v43 }
 0x3d5   :  { %5562 = vmatprep.mubr.bf16.mxu0 %v6634_v17  ;;  %5603 = vmatprep.mubr.bf16.mxu1 %v6636_v22  ;;  %v7980_v17 = vld [vmem:[%s11937_s1 + $0x3a0] ss:$8 sps:$4 sm:$0xff]   ;;  %v7988_v22 = vld [vmem:[%s11937_s1 + $0x394] ss:$8 sps:$4 sm:$0xff]   ;;  %vm1532_vm14 = vcmp.ge.bf16.partialorder %v8856_v8, %v9936_v43  ;;  %vm1533_vm15 = vcmp.ge.bf16.partialorder %v8861_v9, %v9936_v43 }
 0x3d6   :  { %5563 = vmatmul.mubr.bf16.vlgmr.msra.gmra.mxu0 %v6633_v14  ;;  %5604 = vmatmul.mubr.bf16.vlgmr.msra.gmra.mxu1 %v6635_v48  ;;  %v7977_v14 = vld [vmem:[%s11937_s1 + $0x2a0] ss:$8 sps:$4 sm:$0xff]   ;;  %v7985_v48 = vld [vmem:[%s11937_s1 + $0x294] ss:$8 sps:$4 sm:$0xff]  }
 0x3d7   :  { %5613 = vmatpush1.bf16.msra.mxu0 %v7899_v13  ;;  %5654 = vmatpush1.bf16.msra.mxu1 %v7902_v44  ;;  %v7971_v13 = vld [vmem:[%s11937_s1 + $0x2b0] ss:$8 sps:$4 sm:$0xff]  }
 0x3d8   :  { %5644 = vmatprep.mubr.bf16.mxu0 %v6638_v1  ;;  %5685 = vmatprep.mubr.bf16.mxu1 %v6640_v2  ;;  %v7974_v44 = vld [vmem:[%s11937_s1 + $0x3b0] ss:$8 sps:$4 sm:$0xff]   ;;  %v7991_v1 = vld [vmem:[%s11937_s1 + $0x284] ss:$8 sps:$4 sm:$0xff]  }
 0x3d9   :  { %5614 = vmatprep.subr.bf16.mxu0 %v7907_v49  ;;  %5655 = vmatprep.subr.bf16.mxu1 %v7910_v0  ;;  %v7983_v49 = vld [vmem:[%s11937_s1 + $0x290] ss:$8 sps:$4 sm:$0xff]   ;;  %v7994_v2 = vld [vmem:[%s11937_s1 + $0x384] ss:$8 sps:$4 sm:$0xff]  }
 0x3da   :  { %v7986_v0 = vld [vmem:[%s11937_s1 + $0x390] ss:$8 sps:$4 sm:$0xff]  }
 0x3db   :  { %5615 = vmatpush1.bf16.msra.mxu0 %v7905_v3  ;;  %5656 = vmatpush1.bf16.msra.mxu1 %v7908_v18  ;;  %v7989_v3 = vld [vmem:[%s11937_s1 + $0x280] ss:$8 sps:$4 sm:$0xff]  }
 0x3dc   :  { %5616 = vmatprep.subr.bf16.mxu0 %v7913_v50  ;;  %5657 = vmatprep.subr.bf16.mxu1 %v7916_v51  ;;  %v7992_v18 = vld [vmem:[%s11937_s1 + $0x380] ss:$8 sps:$4 sm:$0xff]   ;;  %v7997_v50 = vld [vmem:[%s11937_s1 + $0x474] ss:$8 sps:$4 sm:$0xff]  }
 0x3dd   :  { %v8000_v51 = vld [vmem:[%s11937_s1 + $0x574] ss:$8 sps:$4 sm:$0xff]  }
 0x3df   :  { %5617 = vmatpush1.bf16.msra.mxu0 %v7911_v45  ;;  %5658 = vmatpush1.bf16.msra.mxu1 %v7914_v19  ;;  %v7995_v45 = vld [vmem:[%s11937_s1 + $0x470] ss:$8 sps:$4 sm:$0xff]  }
 0x3e0   :  { %5618 = vmatprep.subr.bf16.mxu0 %v7919_v52  ;;  %5659 = vmatprep.subr.bf16.mxu1 %v7922_v33  ;;  %v7998_v19 = vld [vmem:[%s11937_s1 + $0x570] ss:$8 sps:$4 sm:$0xff]   ;;  %v10161_v52 = vsel %vm1530_vm12, %v8838_v4, 0  ;;  %v10164_v33 = vsel %vm1531_vm13, %v8843_v5, 0  ;;  %v6639_v4 = vcombine.low %v9958_v47, %v9958_v47  ;;  %v8009_v47 = vld [vmem:[%s11937_s1 + $0x454] ss:$8 sps:$4 sm:$0xff]  }
 0x3e1   :  { %v6642_v5 = vcombine.high %v10161_v52, %v10161_v52 }
 0x3e3   :  { %5619 = vmatpush1.bf16.msra.mxu0 %v7917_v53  ;;  %5660 = vmatpush1.bf16.msra.mxu1 %v7920_v34  ;;  %v8003_v53 = vld [vmem:[%s11937_s1 + $0x464] ss:$8 sps:$4 sm:$0xff]  }
 0x3e4   :  { %5620 = vmatprep.subr.bf16.mxu0 %v7925_v54  ;;  %5661 = vmatprep.subr.bf16.mxu1 %v7928_v20  ;;  %v8006_v34 = vld [vmem:[%s11937_s1 + $0x564] ss:$8 sps:$4 sm:$0xff]   ;;  %v6637_v54 = vcombine.low %v9955_v46, %v9955_v46  ;;  %v6644_v20 = vcombine.high %v10164_v33, %v10164_v33  ;;  %v8004_v46 = vld [vmem:[%s11937_s1 + $0x560] ss:$8 sps:$4 sm:$0xff]  }
 0x3e7   :  { %5621 = vmatpush1.bf16.msra.mxu0 %v7923_v23  ;;  %5662 = vmatpush1.bf16.msra.mxu1 %v7926_v55  ;;  %v8001_v23 = vld [vmem:[%s11937_s1 + $0x460] ss:$8 sps:$4 sm:$0xff]   ;;  %v8012_v55 = vld [vmem:[%s11937_s1 + $0x554] ss:$8 sps:$4 sm:$0xff]  }
 0x3e8   :  { %5622 = vmatprep.subr.bf16.mxu0 %v7931_v24  ;;  %5663 = vmatprep.subr.bf16.mxu1 %v7934_v56  ;;  %v8007_v24 = vld [vmem:[%s11937_s1 + $0x450] ss:$8 sps:$4 sm:$0xff]  }
 0x3e9   :  { %v8010_v56 = vld [vmem:[%s11937_s1 + $0x550] ss:$8 sps:$4 sm:$0xff]  }
 0x3eb   :  { %5623 = vmatpush1.bf16.msra.mxu0 %v7929_v10  ;;  %5664 = vmatpush1.bf16.msra.mxu1 %v7932_v25  ;;  %v8015_v10 = vld [vmem:[%s11937_s1 + $0x444] ss:$8 sps:$4 sm:$0xff]   ;;  %v8013_v25 = vld [vmem:[%s11937_s1 + $0x440] ss:$8 sps:$4 sm:$0xff]  }
 0x3ec   :  { %5624 = vmatprep.subr.bf16.mxu0 %v7937_v40  ;;  %5665 = vmatprep.subr.bf16.mxu1 %v7940_v62  ;;  %v8018_v40 = vld [vmem:[%s11937_s1 + $0x544] ss:$8 sps:$4 sm:$0xff]   ;;  %v8016_v62 = vld [vmem:[%s11937_s1 + $0x540] ss:$8 sps:$4 sm:$0xff]  }
 0x3ef   :  { %5625 = vmatpush1.bf16.msra.mxu0 %v7935_v57  ;;  %5666 = vmatpush1.bf16.msra.mxu1 %v7938_v26  ;;  %v8021_v57 = vld [vmem:[%s11937_s1 + $0x434] ss:$8 sps:$4 sm:$0xff]   ;;  %v8019_v26 = vld [vmem:[%s11937_s1 + $0x430] ss:$8 sps:$4 sm:$0xff]  }
 0x3f0   :  { %5626 = vmatprep.subr.bf16.mxu0 %v7943_v29  ;;  %5667 = vmatprep.subr.bf16.mxu1 %v7946_v58  ;;  %v8024_v29 = vld [vmem:[%s11937_s1 + $0x534] ss:$8 sps:$4 sm:$0xff]   ;;  %v8022_v58 = vld [vmem:[%s11937_s1 + $0x530] ss:$8 sps:$4 sm:$0xff]  }
 0x3f3   :  { %5627 = vmatpush1.bf16.msra.mxu0 %v7941_v30  ;;  %5668 = vmatpush1.bf16.msra.mxu1 %v7944_v27  ;;  %v8027_v30 = vld [vmem:[%s11937_s1 + $0x424] ss:$8 sps:$4 sm:$0xff]   ;;  %v8025_v27 = vld [vmem:[%s11937_s1 + $0x420] ss:$8 sps:$4 sm:$0xff]  }
 0x3f4   :  { %5628 = vmatprep.subr.bf16.mxu0 %v7949_v16  ;;  %5669 = vmatprep.subr.bf16.mxu1 %v7952_v60  ;;  %v8030_v16 = vld [vmem:[%s11937_s1 + $0x524] ss:$8 sps:$4 sm:$0xff]   ;;  %v8028_v60 = vld [vmem:[%s11937_s1 + $0x520] ss:$8 sps:$4 sm:$0xff]  }
 0x3f7   :  { %5629 = vmatpush2.bf16.msra.mxu0 %v7947_v28  ;;  %5670 = vmatpush2.bf16.msra.mxu1 %v7950_v59  ;;  %v8033_v28 = vld [vmem:[%s11937_s1 + $0x414] ss:$8 sps:$4 sm:$0xff]   ;;  %v8031_v59 = vld [vmem:[%s11937_s1 + $0x410] ss:$8 sps:$4 sm:$0xff]  }
 0x3f8   :  { %5630 = vmatprep.subr.bf16.mxu0 %v7955_v32  ;;  %5671 = vmatprep.subr.bf16.mxu1 %v7958_v15  ;;  %v8036_v32 = vld [vmem:[%s11937_s1 + $0x514] ss:$8 sps:$4 sm:$0xff]   ;;  %v8034_v15 = vld [vmem:[%s11937_s1 + $0x510] ss:$8 sps:$4 sm:$0xff]  }
 0x3fb   :  { %5631 = vmatpush2.bf16.msra.mxu0 %v7953_v35  ;;  %5672 = vmatpush2.bf16.msra.mxu1 %v7956_v36  ;;  %v8039_v35 = vld [vmem:[%s11937_s1 + $0x404] ss:$8 sps:$4 sm:$0xff]   ;;  %v8037_v36 = vld [vmem:[%s11937_s1 + $0x400] ss:$8 sps:$4 sm:$0xff]  }
 0x3fc   :  { %5632 = vmatprep.subr.bf16.mxu0 %v7961_v39  ;;  %5673 = vmatprep.subr.bf16.mxu1 %v7964_v7  ;;  %v8042_v39 = vld [vmem:[%s11937_s1 + $0x504] ss:$8 sps:$4 sm:$0xff]   ;;  %v8040_v7 = vld [vmem:[%s11937_s1 + $0x500] ss:$8 sps:$4 sm:$0xff]  }
 0x3ff   :  { %5633 = vmatpush2.bf16.msra.mxu0 %v7959_v21  ;;  %5674 = vmatpush2.bf16.msra.mxu1 %v7962_v37  ;;  %v8045_v21 = vld [vmem:[%s11937_s1 + $0x4f4] ss:$8 sps:$4 sm:$0xff]   ;;  %v8043_v37 = vld [vmem:[%s11937_s1 + $0x4f0] ss:$8 sps:$4 sm:$0xff]  }
 0x400   :  { %5634 = vmatprep.subr.bf16.mxu0 %v7967_v11  ;;  %5675 = vmatprep.subr.bf16.mxu1 %v7970_v38  ;;  %v8048_v11 = vld [vmem:[%s11937_s1 + $0x5f4] ss:$8 sps:$4 sm:$0xff]   ;;  %v8046_v38 = vld [vmem:[%s11937_s1 + $0x5f0] ss:$8 sps:$4 sm:$0xff]  }
 0x403   :  { %5635 = vmatpush2.bf16.msra.mxu0 %v7965_v12  ;;  %5676 = vmatpush2.bf16.msra.mxu1 %v7968_v41  ;;  %v8051_v12 = vld [vmem:[%s11937_s1 + $0x4e4] ss:$8 sps:$4 sm:$0xff]   ;;  %v8049_v41 = vld [vmem:[%s11937_s1 + $0x4e0] ss:$8 sps:$4 sm:$0xff]  }
 0x404   :  { %5636 = vmatprep.subr.bf16.mxu0 %v7973_v42  ;;  %5677 = vmatprep.subr.bf16.mxu1 %v7976_v61  ;;  %v8054_v42 = vld [vmem:[%s11937_s1 + $0x5e4] ss:$8 sps:$4 sm:$0xff]   ;;  %v8052_v61 = vld [vmem:[%s11937_s1 + $0x5e0] ss:$8 sps:$4 sm:$0xff]  }
 0x407   :  { %5637 = vmatpush2.bf16.msra.mxu0 %v7971_v13  ;;  %5678 = vmatpush2.bf16.msra.mxu1 %v7974_v44  ;;  %v8057_v13 = vld [vmem:[%s11937_s1 + $0x4d4] ss:$8 sps:$4 sm:$0xff]   ;;  %v8055_v44 = vld [vmem:[%s11937_s1 + $0x4d0] ss:$8 sps:$4 sm:$0xff]  }
 0x408   :  { %5638 = vmatprep.subr.bf16.mxu0 %v7979_v6  ;;  %5679 = vmatprep.subr.bf16.mxu1 %v7982_v63  ;;  %v8060_v6 = vld [vmem:[%s11937_s1 + $0x5d4] ss:$8 sps:$4 sm:$0xff]   ;;  %v8058_v63 = vld [vmem:[%s11937_s1 + $0x5d0] ss:$8 sps:$4 sm:$0xff]  }
 0x40b   :  { %5639 = vmatpush2.bf16.msra.mxu0 %v7977_v14  ;;  %5680 = vmatpush2.bf16.msra.mxu1 %v7980_v17  ;;  %v8063_v14 = vld [vmem:[%s11937_s1 + $0x4c4] ss:$8 sps:$4 sm:$0xff]   ;;  %v8061_v17 = vld [vmem:[%s11937_s1 + $0x4c0] ss:$8 sps:$4 sm:$0xff]  }
 0x40c   :  { %5640 = vmatprep.subr.bf16.mxu0 %v7985_v48  ;;  %5681 = vmatprep.subr.bf16.mxu1 %v7988_v22  ;;  %v8066_v48 = vld [vmem:[%s11937_s1 + $0x5c4] ss:$8 sps:$4 sm:$0xff]   ;;  %v8064_v22 = vld [vmem:[%s11937_s1 + $0x5c0] ss:$8 sps:$4 sm:$0xff]  }
 0x40f   :  { %5641 = vmatpush2.bf16.msra.mxu0 %v7983_v49  ;;  %5682 = vmatpush2.bf16.msra.mxu1 %v7986_v0  ;;  %v8069_v49 = vld [vmem:[%s11937_s1 + $0x4b4] ss:$8 sps:$4 sm:$0xff]   ;;  %v8067_v0 = vld [vmem:[%s11937_s1 + $0x4b0] ss:$8 sps:$4 sm:$0xff]  }
 0x410   :  { %5642 = vmatprep.subr.bf16.mxu0 %v7991_v1  ;;  %5683 = vmatprep.subr.bf16.mxu1 %v7994_v2  ;;  %v8072_v1 = vld [vmem:[%s11937_s1 + $0x5b4] ss:$8 sps:$4 sm:$0xff]   ;;  %v8070_v2 = vld [vmem:[%s11937_s1 + $0x5b0] ss:$8 sps:$4 sm:$0xff]  }
 0x413   :  { %5643 = vmatpush2.bf16.msra.mxu0 %v7989_v3  ;;  %5684 = vmatpush2.bf16.msra.mxu1 %v7992_v18  ;;  %v8075_v3 = vld [vmem:[%s11937_s1 + $0x4a4] ss:$8 sps:$4 sm:$0xff]   ;;  %v8073_v18 = vld [vmem:[%s11937_s1 + $0x4a0] ss:$8 sps:$4 sm:$0xff]  }
 0x414   :  { %5694 = vmatprep.subr.bf16.mxu0 %v7997_v50  ;;  %5735 = vmatprep.subr.bf16.mxu1 %v8000_v51  ;;  %v8078_v50 = vld [vmem:[%s11937_s1 + $0x5a4] ss:$8 sps:$4 sm:$0xff]   ;;  %v8076_v51 = vld [vmem:[%s11937_s1 + $0x5a0] ss:$8 sps:$4 sm:$0xff]  }
 0x416   :  { %5645 = vmatmul.mubr.bf16.vlgmr.msra.gmra.mxu0 %v6637_v54  ;;  %5686 = vmatmul.mubr.bf16.vlgmr.msra.gmra.mxu1 %v6639_v4  ;;  %v8087_v54 = vld [vmem:[%s11937_s1 + $0x484] ss:$8 sps:$4 sm:$0xff]   ;;  %v8085_v4 = vld [vmem:[%s11937_s1 + $0x480] ss:$8 sps:$4 sm:$0xff]  }
 0x417   :  { %5695 = vmatpush1.bf16.msra.mxu0 %v7995_v45  ;;  %5726 = vmatprep.mubr.bf16.mxu0 %v6642_v5  ;;  %v8081_v45 = vld [vmem:[%s11937_s1 + $0x494] ss:$8 sps:$4 sm:$0xff]   ;;  %v8090_v5 = vld [vmem:[%s11937_s1 + $0x584] ss:$8 sps:$4 sm:$0xff]  }
 0x418   :  { %5736 = vmatpush1.bf16.msra.mxu1 %v7998_v19  ;;  %5767 = vmatprep.mubr.bf16.mxu1 %v6644_v20  ;;  %v8079_v19 = vld [vmem:[%s11937_s1 + $0x490] ss:$8 sps:$4 sm:$0xff]   ;;  %v8088_v20 = vld [vmem:[%s11937_s1 + $0x580] ss:$8 sps:$4 sm:$0xff]  }
 0x419   :  { %5696 = vmatprep.subr.bf16.mxu0 %v8003_v53  ;;  %5737 = vmatprep.subr.bf16.mxu1 %v8006_v34  ;;  %v8084_v53 = vld [vmem:[%s11937_s1 + $0x594] ss:$8 sps:$4 sm:$0xff]   ;;  %v8082_v34 = vld [vmem:[%s11937_s1 + $0x590] ss:$8 sps:$4 sm:$0xff]  }
 0x41b   :  { %5697 = vmatpush1.bf16.msra.mxu0 %v8001_v23  ;;  %v8093_v23 = vld [vmem:[%s11937_s1 + $0x674] ss:$8 sps:$4 sm:$0xff]  }
 0x41c   :  { %5738 = vmatpush1.bf16.msra.mxu1 %v8004_v46  ;;  %5698 = vmatprep.subr.bf16.mxu0 %v8009_v47  ;;  %v8091_v46 = vld [vmem:[%s11937_s1 + $0x670] ss:$8 sps:$4 sm:$0xff]   ;;  %v8096_v47 = vld [vmem:[%s11937_s1 + $0x774] ss:$8 sps:$4 sm:$0xff]  }
 0x41d   :  { %5739 = vmatprep.subr.bf16.mxu1 %v8012_v55  ;;  %v8094_v55 = vld [vmem:[%s11937_s1 + $0x770] ss:$8 sps:$4 sm:$0xff]  }
 0x41f   :  { %5699 = vmatpush1.bf16.msra.mxu0 %v8007_v24  ;;  %v10371_v24 = vsel %vm1532_vm14, %v8856_v8, 0  ;;  %v6643_v8 = vcombine.low %v10164_v33, %v10164_v33  ;;  %vm6456_vm14 = vcmask 80896  }
 0x420   :  { %5740 = vmatpush1.bf16.msra.mxu1 %v8010_v56  ;;  %5700 = vmatprep.subr.bf16.mxu0 %v8015_v10  ;;  %v8099_v56 = vld [vmem:[%s11937_s1 + $0x664] ss:$8 sps:$4 sm:$0xff]   ;;  %v6641_v10 = vcombine.low %v10161_v52, %v10161_v52  ;;  %v6646_v52 = vcombine.high %v10371_v24, %v10371_v24 }
 0x421   :  { %5741 = vmatprep.subr.bf16.mxu1 %v8018_v40  ;;  %v8102_v40 = vld [vmem:[%s11937_s1 + $0x764] ss:$8 sps:$4 sm:$0xff]  }
 0x423   :  { %5701 = vmatpush1.bf16.msra.mxu0 %v8013_v25  ;;  %v10379_v25 = vsel %vm1533_vm15, %v8861_v9, 0  ;;  %v8100_v9 = vld [vmem:[%s11937_s1 + $0x760] ss:$8 sps:$4 sm:$0xff]  }
 0x424   :  { %5742 = vmatpush1.bf16.msra.mxu1 %v8016_v62  ;;  %5702 = vmatprep.subr.bf16.mxu0 %v8021_v57  ;;  %v8097_v62 = vld [vmem:[%s11937_s1 + $0x660] ss:$8 sps:$4 sm:$0xff]   ;;  %v8105_v57 = vld [vmem:[%s11937_s1 + $0x654] ss:$8 sps:$4 sm:$0xff]   ;;  %v6648_v33 = vcombine.high %v10379_v25, %v10379_v25 }
 0x425   :  { %5743 = vmatprep.subr.bf16.mxu1 %v8024_v29  ;;  %v8103_v29 = vld [vmem:[%s11937_s1 + $0x650] ss:$8 sps:$4 sm:$0xff]  }
 0x427   :  { %5703 = vmatpush1.bf16.msra.mxu0 %v8019_v26  ;;  %v8108_v26 = vld [vmem:[%s11937_s1 + $0x754] ss:$8 sps:$4 sm:$0xff]  }
 0x428   :  { %5744 = vmatpush1.bf16.msra.mxu1 %v8022_v58  ;;  %5704 = vmatprep.subr.bf16.mxu0 %v8027_v30  ;;  %v8106_v58 = vld [vmem:[%s11937_s1 + $0x750] ss:$8 sps:$4 sm:$0xff]   ;;  %v8111_v30 = vld [vmem:[%s11937_s1 + $0x644] ss:$8 sps:$4 sm:$0xff]  }
 0x429   :  { %5745 = vmatprep.subr.bf16.mxu1 %v8030_v16  ;;  %v8114_v16 = vld [vmem:[%s11937_s1 + $0x744] ss:$8 sps:$4 sm:$0xff]  }
 0x42b   :  { %5705 = vmatpush1.bf16.msra.mxu0 %v8025_v27  ;;  %v8109_v27 = vld [vmem:[%s11937_s1 + $0x640] ss:$8 sps:$4 sm:$0xff]  }
 0x42c   :  { %5746 = vmatpush1.bf16.msra.mxu1 %v8028_v60  ;;  %5706 = vmatprep.subr.bf16.mxu0 %v8033_v28  ;;  %v8112_v60 = vld [vmem:[%s11937_s1 + $0x740] ss:$8 sps:$4 sm:$0xff]   ;;  %v8117_v28 = vld [vmem:[%s11937_s1 + $0x634] ss:$8 sps:$4 sm:$0xff]  }
 0x42d   :  { %5747 = vmatprep.subr.bf16.mxu1 %v8036_v32  ;;  %v8120_v32 = vld [vmem:[%s11937_s1 + $0x734] ss:$8 sps:$4 sm:$0xff]  }
 0x42f   :  { %5707 = vmatpush1.bf16.msra.mxu0 %v8031_v59  ;;  %v8115_v59 = vld [vmem:[%s11937_s1 + $0x630] ss:$8 sps:$4 sm:$0xff]  }
 0x430   :  { %5748 = vmatpush1.bf16.msra.mxu1 %v8034_v15  ;;  %5708 = vmatprep.subr.bf16.mxu0 %v8039_v35  ;;  %v8118_v15 = vld [vmem:[%s11937_s1 + $0x730] ss:$8 sps:$4 sm:$0xff]   ;;  %v8123_v35 = vld [vmem:[%s11937_s1 + $0x624] ss:$8 sps:$4 sm:$0xff]  }
 0x431   :  { %5749 = vmatprep.subr.bf16.mxu1 %v8042_v39  ;;  %v8126_v39 = vld [vmem:[%s11937_s1 + $0x724] ss:$8 sps:$4 sm:$0xff]  }
 0x433   :  { %5709 = vmatpush1.bf16.msra.mxu0 %v8037_v36  ;;  %v8121_v36 = vld [vmem:[%s11937_s1 + $0x620] ss:$8 sps:$4 sm:$0xff]  }
 0x434   :  { %5750 = vmatpush1.bf16.msra.mxu1 %v8040_v7  ;;  %5710 = vmatprep.subr.bf16.mxu0 %v8045_v21  ;;  %v8124_v7 = vld [vmem:[%s11937_s1 + $0x720] ss:$8 sps:$4 sm:$0xff]   ;;  %v8129_v21 = vld [vmem:[%s11937_s1 + $0x614] ss:$8 sps:$4 sm:$0xff]  }
 0x435   :  { %5751 = vmatprep.subr.bf16.mxu1 %v8048_v11  ;;  %v8132_v11 = vld [vmem:[%s11937_s1 + $0x714] ss:$8 sps:$4 sm:$0xff]  }
 0x437   :  { %5711 = vmatpush2.bf16.msra.mxu0 %v8043_v37  ;;  %v8127_v37 = vld [vmem:[%s11937_s1 + $0x610] ss:$8 sps:$4 sm:$0xff]  }
 0x438   :  { %5752 = vmatpush2.bf16.msra.mxu1 %v8046_v38  ;;  %5712 = vmatprep.subr.bf16.mxu0 %v8051_v12  ;;  %v8130_v38 = vld [vmem:[%s11937_s1 + $0x710] ss:$8 sps:$4 sm:$0xff]   ;;  %v8135_v12 = vld [vmem:[%s11937_s1 + $0x604] ss:$8 sps:$4 sm:$0xff]  }
 0x439   :  { %5753 = vmatprep.subr.bf16.mxu1 %v8054_v42  ;;  %v8138_v42 = vld [vmem:[%s11937_s1 + $0x704] ss:$8 sps:$4 sm:$0xff]  }
 0x43b   :  { %5713 = vmatpush2.bf16.msra.mxu0 %v8049_v41  ;;  %v8133_v41 = vld [vmem:[%s11937_s1 + $0x600] ss:$8 sps:$4 sm:$0xff]  }
 0x43c   :  { %5754 = vmatpush2.bf16.msra.mxu1 %v8052_v61  ;;  %5714 = vmatprep.subr.bf16.mxu0 %v8057_v13  ;;  %v8136_v61 = vld [vmem:[%s11937_s1 + $0x700] ss:$8 sps:$4 sm:$0xff]   ;;  %v8141_v13 = vld [vmem:[%s11937_s1 + $0x6f4] ss:$8 sps:$4 sm:$0xff]  }
 0x43d   :  { %5755 = vmatprep.subr.bf16.mxu1 %v8060_v6  ;;  %v8144_v6 = vld [vmem:[%s11937_s1 + $0x7f4] ss:$8 sps:$4 sm:$0xff]  }
 0x43f   :  { %5715 = vmatpush2.bf16.msra.mxu0 %v8055_v44  ;;  %v8139_v44 = vld [vmem:[%s11937_s1 + $0x6f0] ss:$8 sps:$4 sm:$0xff]  }
 0x440   :  { %5756 = vmatpush2.bf16.msra.mxu1 %v8058_v63  ;;  %5716 = vmatprep.subr.bf16.mxu0 %v8063_v14  ;;  %v8142_v63 = vld [vmem:[%s11937_s1 + $0x7f0] ss:$8 sps:$4 sm:$0xff]   ;;  %v8147_v14 = vld [vmem:[%s11937_s1 + $0x6e4] ss:$8 sps:$4 sm:$0xff]  }
 0x441   :  { %5757 = vmatprep.subr.bf16.mxu1 %v8066_v48  ;;  %v8150_v48 = vld [vmem:[%s11937_s1 + $0x7e4] ss:$8 sps:$4 sm:$0xff]  }
 0x443   :  { %5717 = vmatpush2.bf16.msra.mxu0 %v8061_v17  ;;  %v8145_v17 = vld [vmem:[%s11937_s1 + $0x6e0] ss:$8 sps:$4 sm:$0xff]  }
 0x444   :  { %5758 = vmatpush2.bf16.msra.mxu1 %v8064_v22  ;;  %5718 = vmatprep.subr.bf16.mxu0 %v8069_v49  ;;  %v8148_v22 = vld [vmem:[%s11937_s1 + $0x7e0] ss:$8 sps:$4 sm:$0xff]   ;;  %v8153_v49 = vld [vmem:[%s11937_s1 + $0x6d4] ss:$8 sps:$4 sm:$0xff]  }
 0x445   :  { %5759 = vmatprep.subr.bf16.mxu1 %v8072_v1  ;;  %v8156_v1 = vld [vmem:[%s11937_s1 + $0x7d4] ss:$8 sps:$4 sm:$0xff]  }
 0x447   :  { %5719 = vmatpush2.bf16.msra.mxu0 %v8067_v0  ;;  %v8151_v0 = vld [vmem:[%s11937_s1 + $0x6d0] ss:$8 sps:$4 sm:$0xff]  }
 0x448   :  { %5760 = vmatpush2.bf16.msra.mxu1 %v8070_v2  ;;  %5720 = vmatprep.subr.bf16.mxu0 %v8075_v3  ;;  %v8154_v2 = vld [vmem:[%s11937_s1 + $0x7d0] ss:$8 sps:$4 sm:$0xff]   ;;  %v8159_v3 = vld [vmem:[%s11937_s1 + $0x6c4] ss:$8 sps:$4 sm:$0xff]  }
 0x449   :  { %5761 = vmatprep.subr.bf16.mxu1 %v8078_v50  ;;  %v8162_v50 = vld [vmem:[%s11937_s1 + $0x7c4] ss:$8 sps:$4 sm:$0xff]  }
 0x44b   :  { %5721 = vmatpush2.bf16.msra.mxu0 %v8073_v18  ;;  %v8157_v18 = vld [vmem:[%s11937_s1 + $0x6c0] ss:$8 sps:$4 sm:$0xff]  }
 0x44c   :  { %5762 = vmatpush2.bf16.msra.mxu1 %v8076_v51  ;;  %5722 = vmatprep.subr.bf16.mxu0 %v8081_v45  ;;  %v8160_v51 = vld [vmem:[%s11937_s1 + $0x7c0] ss:$8 sps:$4 sm:$0xff]   ;;  %v8165_v45 = vld [vmem:[%s11937_s1 + $0x6b4] ss:$8 sps:$4 sm:$0xff]  }
 0x44d   :  { %5763 = vmatprep.subr.bf16.mxu1 %v8084_v53  ;;  %v8168_v53 = vld [vmem:[%s11937_s1 + $0x7b4] ss:$8 sps:$4 sm:$0xff]  }
 0x44f   :  { %5723 = vmatpush2.bf16.msra.mxu0 %v8079_v19  ;;  %v8163_v19 = vld [vmem:[%s11937_s1 + $0x6b0] ss:$8 sps:$4 sm:$0xff]  }
 0x450   :  { %5764 = vmatpush2.bf16.msra.mxu1 %v8082_v34  ;;  %5724 = vmatprep.subr.bf16.mxu0 %v8087_v54  ;;  %v8166_v34 = vld [vmem:[%s11937_s1 + $0x7b0] ss:$8 sps:$4 sm:$0xff]   ;;  %v8171_v54 = vld [vmem:[%s11937_s1 + $0x6a4] ss:$8 sps:$4 sm:$0xff]  }
 0x451   :  { %5765 = vmatprep.subr.bf16.mxu1 %v8090_v5  ;;  %v8174_v5 = vld [vmem:[%s11937_s1 + $0x7a4] ss:$8 sps:$4 sm:$0xff]  }
 0x453   :  { %5725 = vmatpush2.bf16.msra.mxu0 %v8085_v4  ;;  %v8169_v4 = vld [vmem:[%s11937_s1 + $0x6a0] ss:$8 sps:$4 sm:$0xff]  }
 0x454   :  { %5766 = vmatpush2.bf16.msra.mxu1 %v8088_v20  ;;  %5776 = vmatprep.subr.bf16.mxu0 %v8093_v23  ;;  %v8172_v20 = vld [vmem:[%s11937_s1 + $0x7a0] ss:$8 sps:$4 sm:$0xff]   ;;  %v8177_v23 = vld [vmem:[%s11937_s1 + $0x694] ss:$8 sps:$4 sm:$0xff]  }
 0x455   :  { %5817 = vmatprep.subr.bf16.mxu1 %v8096_v47  ;;  %v8180_v47 = vld [vmem:[%s11937_s1 + $0x794] ss:$8 sps:$4 sm:$0xff]  }
 0x456   :  { %5727 = vmatmul.mubr.bf16.vlgmr.msra.gmra.mxu0 %v6641_v10  ;;  %v8181_v10 = vld [vmem:[%s11937_s1 + $0x680] ss:$8 sps:$4 sm:$0xff]  }
 0x457   :  { %5768 = vmatmul.mubr.bf16.vlgmr.msra.gmra.mxu1 %v6643_v8  ;;  %5777 = vmatpush1.bf16.msra.mxu0 %v8091_v46  ;;  %v8175_v46 = vld [vmem:[%s11937_s1 + $0x690] ss:$8 sps:$4 sm:$0xff]   ;;  %v2204_v8 = vsub.s32 0, %v9290_v31 }
 0x458   :  { %5808 = vmatprep.mubr.bf16.mxu0 %v6646_v52  ;;  %5818 = vmatpush1.bf16.msra.mxu1 %v8094_v55  ;;  %v8178_v55 = vld [vmem:[%s11937_s1 + $0x790] ss:$8 sps:$4 sm:$0xff]   ;;  %v8189_v52 = vld [vmem:[%s11937_s1 + $0x874] ss:$8 sps:$4 sm:$0xff]  }
 0x459   :  { %5849 = vmatprep.mubr.bf16.mxu1 %v6648_v33  ;;  %5778 = vmatprep.subr.bf16.mxu0 %v8099_v56  ;;  %v8183_v56 = vld [vmem:[%s11937_s1 + $0x684] ss:$8 sps:$4 sm:$0xff]   ;;  %v8187_v33 = vld [vmem:[%s11937_s1 + $0x870] ss:$8 sps:$4 sm:$0xff]  }
 0x45a   :  { %5819 = vmatprep.subr.bf16.mxu1 %v8102_v40  ;;  %v8186_v40 = vld [vmem:[%s11937_s1 + $0x784] ss:$8 sps:$4 sm:$0xff]  }
 0x45b   :  { %5779 = vmatpush1.bf16.msra.mxu0 %v8097_v62  ;;  %v8184_v62 = vld [vmem:[%s11937_s1 + $0x780] ss:$8 sps:$4 sm:$0xff]  }
 0x45c   :  { %5820 = vmatpush1.bf16.msra.mxu1 %v8100_v9  ;;  %5780 = vmatprep.subr.bf16.mxu0 %v8105_v57  ;;  %v2200_v9 = vld [vmem:[%s11938_s2] sm:$0x3] }
 0x45d   :  { %5821 = vmatprep.subr.bf16.mxu1 %v8108_v26  ;;  %v11991_v57 = vld [vmem:[#allocation2_spill] sm:$0xff]  ;;  %v8192_v26 = vld [vmem:[%s11937_s1 + $0x974] ss:$8 sps:$4 sm:$0xff]  }
 0x45e   :  { %vm1534_vm1 = vcmp.ge.bf16.partialorder %v11991_v57, %v9936_v43 }
 0x45f   :  { %5781 = vmatpush1.bf16.msra.mxu0 %v8103_v29  ;;  %v11992_v29 = vld [vmem:[#allocation3_spill] sm:$0xff] }
 0x460   :  { %5822 = vmatpush1.bf16.msra.mxu1 %v8106_v58  ;;  %5782 = vmatprep.subr.bf16.mxu0 %v8111_v30  ;;  %vm1535_vm2 = vcmp.ge.bf16.partialorder %v11992_v29, %v9936_v43  ;;  %v2208_v58 = vsub.s32 1, %v9290_v31  ;;  %v8190_v30 = vld [vmem:[%s11937_s1 + $0x970] ss:$8 sps:$4 sm:$0xff]  }
 0x461   :  { %5823 = vmatprep.subr.bf16.mxu1 %v8114_v16  ;;  %v10586_v16 = vsel %vm1534_vm1, %v11991_v57, 0  ;;  %v10594_v31 = vsel %vm1535_vm2, %v11992_v29, 0  ;;  %v8252_v57 = vld [vmem:[%s11937_s1 + $0x9d4] ss:$8 sps:$4 sm:$0xff]   ;;  %v8255_v29 = vld [vmem:[%s11937_s1 + $0x8c4] ss:$8 sps:$4 sm:$0xff]  }
 0x463   :  { %5783 = vmatpush1.bf16.msra.mxu0 %v8109_v27  ;;  %v2205_v27 = vrot.slane %v2200_v9, %v2204_v8  ;;  %v8246_v8 = vld [vmem:[%s11937_s1 + $0x9e4] ss:$8 sps:$4 sm:$0xff]  }
 0x464   :  { %5824 = vmatpush1.bf16.msra.mxu1 %v8112_v60  ;;  %5784 = vmatprep.subr.bf16.mxu0 %v8117_v28  ;;  %v8195_v60 = vld [vmem:[%s11937_s1 + $0x864] ss:$8 sps:$4 sm:$0xff]   ;;  %v6645_v28 = vcombine.low %v10371_v24, %v10371_v24 }
 0x465   :  { %5825 = vmatprep.subr.bf16.mxu1 %v8120_v32  ;;  %v6647_v32 = vcombine.low %v10379_v25, %v10379_v25  ;;  %v8201_v25 = vld [vmem:[%s11937_s1 + $0x854] ss:$8 sps:$4 sm:$0xff]  }
 0x467   :  { %5785 = vmatpush1.bf16.msra.mxu0 %v8115_v59  ;;  %v8198_v59 = vld [vmem:[%s11937_s1 + $0x964] ss:$8 sps:$4 sm:$0xff]  }
 0x468   :  { %5826 = vmatpush1.bf16.msra.mxu1 %v8118_v15  ;;  %5786 = vmatprep.subr.bf16.mxu0 %v8123_v35  ;;  %v2209_v15 = vrot.slane %v2200_v9, %v2208_v58  ;;  %v8193_v35 = vld [vmem:[%s11937_s1 + $0x860] ss:$8 sps:$4 sm:$0xff]   ;;  %v8249_v9 = vld [vmem:[%s11937_s1 + $0x8d4] ss:$8 sps:$4 sm:$0xff]   ;;  %v8258_v58 = vld [vmem:[%s11937_s1 + $0x9c4] ss:$8 sps:$4 sm:$0xff]  }
 0x469   :  { %5827 = vmatprep.subr.bf16.mxu1 %v8126_v39  ;;  %v6650_v39 = vcombine.high %v10586_v16, %v10586_v16 }
 0x46b   :  { %5787 = vmatpush1.bf16.msra.mxu0 %v8121_v36 }
 0x46c   :  { %5828 = vmatpush1.bf16.msra.mxu1 %v8124_v7  ;;  %5788 = vmatprep.subr.bf16.mxu0 %v8129_v21  ;;  %v8196_v7 = vld [vmem:[%s11937_s1 + $0x960] ss:$8 sps:$4 sm:$0xff]  }
 0x46d   :  { %5829 = vmatprep.subr.bf16.mxu1 %v8132_v11 }
 0x46f   :  { %5789 = vmatpush1.bf16.msra.mxu0 %v8127_v37  ;;  %v6652_v37 = vcombine.high %v10594_v31, %v10594_v31 }
 0x470   :  { %5830 = vmatpush1.bf16.msra.mxu1 %v8130_v38  ;;  %5790 = vmatprep.subr.bf16.mxu0 %v8135_v12 }
 0x471   :  { %5831 = vmatprep.subr.bf16.mxu1 %v8138_v42  ;;  %v8204_v42 = vld [vmem:[%s11937_s1 + $0x954] ss:$8 sps:$4 sm:$0xff]  }
 0x473   :  { %5791 = vmatpush1.bf16.msra.mxu0 %v8133_v41 }
 0x474   :  { %5832 = vmatpush1.bf16.msra.mxu1 %v8136_v61  ;;  %5792 = vmatprep.subr.bf16.mxu0 %v8141_v13 }
 0x475   :  { %5833 = vmatprep.subr.bf16.mxu1 %v8144_v6  ;;  %v8199_v6 = vld [vmem:[%s11937_s1 + $0x850] ss:$8 sps:$4 sm:$0xff]  }
 0x477   :  { %5793 = vmatpush2.bf16.msra.mxu0 %v8139_v44 }
 0x478   :  { %5834 = vmatpush2.bf16.msra.mxu1 %v8142_v63  ;;  %5794 = vmatprep.subr.bf16.mxu0 %v8147_v14  ;;  %v8202_v63 = vld [vmem:[%s11937_s1 + $0x950] ss:$8 sps:$4 sm:$0xff]  }
 0x479   :  { %5835 = vmatprep.subr.bf16.mxu1 %v8150_v48  ;;  %v8207_v48 = vld [vmem:[%s11937_s1 + $0x844] ss:$8 sps:$4 sm:$0xff]  }
 0x47b   :  { %5795 = vmatpush2.bf16.msra.mxu0 %v8145_v17 }
 0x47c   :  { %5836 = vmatpush2.bf16.msra.mxu1 %v8148_v22  ;;  %5796 = vmatprep.subr.bf16.mxu0 %v8153_v49  ;;  %v8210_v22 = vld [vmem:[%s11937_s1 + $0x944] ss:$8 sps:$4 sm:$0xff]   ;;  %v8205_v49 = vld [vmem:[%s11937_s1 + $0x840] ss:$8 sps:$4 sm:$0xff]  }
 0x47d   :  { %5837 = vmatprep.subr.bf16.mxu1 %v8156_v1  ;;  %v8213_v1 = vld [vmem:[%s11937_s1 + $0x834] ss:$8 sps:$4 sm:$0xff]  }
 0x47f   :  { %5797 = vmatpush2.bf16.msra.mxu0 %v8151_v0  ;;  %v8208_v0 = vld [vmem:[%s11937_s1 + $0x940] ss:$8 sps:$4 sm:$0xff]  }
 0x480   :  { %5838 = vmatpush2.bf16.msra.mxu1 %v8154_v2  ;;  %5798 = vmatprep.subr.bf16.mxu0 %v8159_v3  ;;  %v8211_v2 = vld [vmem:[%s11937_s1 + $0x830] ss:$8 sps:$4 sm:$0xff]   ;;  %v8216_v3 = vld [vmem:[%s11937_s1 + $0x934] ss:$8 sps:$4 sm:$0xff]  }
 0x481   :  { %5839 = vmatprep.subr.bf16.mxu1 %v8162_v50  ;;  %v8219_v50 = vld [vmem:[%s11937_s1 + $0x824] ss:$8 sps:$4 sm:$0xff]  }
 0x483   :  { %5799 = vmatpush2.bf16.msra.mxu0 %v8157_v18  ;;  %v8214_v18 = vld [vmem:[%s11937_s1 + $0x930] ss:$8 sps:$4 sm:$0xff]  }
 0x484   :  { %5840 = vmatpush2.bf16.msra.mxu1 %v8160_v51  ;;  %5800 = vmatprep.subr.bf16.mxu0 %v8165_v45  ;;  %v8217_v51 = vld [vmem:[%s11937_s1 + $0x820] ss:$8 sps:$4 sm:$0xff]   ;;  %v8222_v45 = vld [vmem:[%s11937_s1 + $0x924] ss:$8 sps:$4 sm:$0xff]  }
 0x485   :  { %5841 = vmatprep.subr.bf16.mxu1 %v8168_v53  ;;  %v8225_v53 = vld [vmem:[%s11937_s1 + $0x814] ss:$8 sps:$4 sm:$0xff]  }
 0x487   :  { %5801 = vmatpush2.bf16.msra.mxu0 %v8163_v19  ;;  %v8220_v19 = vld [vmem:[%s11937_s1 + $0x920] ss:$8 sps:$4 sm:$0xff]  }
 0x488   :  { %5842 = vmatpush2.bf16.msra.mxu1 %v8166_v34  ;;  %5802 = vmatprep.subr.bf16.mxu0 %v8171_v54  ;;  %v8223_v34 = vld [vmem:[%s11937_s1 + $0x810] ss:$8 sps:$4 sm:$0xff]   ;;  %v8228_v54 = vld [vmem:[%s11937_s1 + $0x914] ss:$8 sps:$4 sm:$0xff]  }
 0x489   :  { %5843 = vmatprep.subr.bf16.mxu1 %v8174_v5  ;;  %v8231_v5 = vld [vmem:[%s11937_s1 + $0x804] ss:$8 sps:$4 sm:$0xff]  }
 0x48b   :  { %5803 = vmatpush2.bf16.msra.mxu0 %v8169_v4  ;;  %v8226_v4 = vld [vmem:[%s11937_s1 + $0x910] ss:$8 sps:$4 sm:$0xff]  }
 0x48c   :  { %5844 = vmatpush2.bf16.msra.mxu1 %v8172_v20  ;;  %5804 = vmatprep.subr.bf16.mxu0 %v8177_v23  ;;  %v8234_v20 = vld [vmem:[%s11937_s1 + $0x904] ss:$8 sps:$4 sm:$0xff]   ;;  %v8229_v23 = vld [vmem:[%s11937_s1 + $0x800] ss:$8 sps:$4 sm:$0xff]  }
 0x48d   :  { %5845 = vmatprep.subr.bf16.mxu1 %v8180_v47  ;;  %v8237_v47 = vld [vmem:[%s11937_s1 + $0x8f4] ss:$8 sps:$4 sm:$0xff]  }
 0x48f   :  { %5805 = vmatpush2.bf16.msra.mxu0 %v8175_v46  ;;  %v8232_v46 = vld [vmem:[%s11937_s1 + $0x900] ss:$8 sps:$4 sm:$0xff]  }
 0x490   :  { %5846 = vmatpush2.bf16.msra.mxu1 %v8178_v55  ;;  %5806 = vmatprep.subr.bf16.mxu0 %v8183_v56  ;;  %v8240_v55 = vld [vmem:[%s11937_s1 + $0x9f4] ss:$8 sps:$4 sm:$0xff]   ;;  %v8235_v56 = vld [vmem:[%s11937_s1 + $0x8f0] ss:$8 sps:$4 sm:$0xff]  }
 0x491   :  { %5847 = vmatprep.subr.bf16.mxu1 %v8186_v40  ;;  %v8243_v40 = vld [vmem:[%s11937_s1 + $0x8e4] ss:$8 sps:$4 sm:$0xff]  }
 0x493   :  { %5807 = vmatpush2.bf16.msra.mxu0 %v8181_v10  ;;  %v8238_v10 = vld [vmem:[%s11937_s1 + $0x9f0] ss:$8 sps:$4 sm:$0xff]  }
 0x494   :  { %5848 = vmatpush2.bf16.msra.mxu1 %v8184_v62  ;;  %5858 = vmatprep.subr.bf16.mxu0 %v8189_v52  ;;  %v8241_v62 = vld [vmem:[%s11937_s1 + $0x8e0] ss:$8 sps:$4 sm:$0xff]  }
 0x495   :  { %5899 = vmatprep.subr.bf16.mxu1 %v8192_v26  ;;  %v8244_v52 = vld [vmem:[%s11937_s1 + $0x9e0] ss:$8 sps:$4 sm:$0xff]   ;;  %v8250_v26 = vld [vmem:[%s11937_s1 + $0x9d0] ss:$8 sps:$4 sm:$0xff]  }
 0x496   :  { %5809 = vmatmul.mubr.bf16.vlgmr.msra.gmra.mxu0 %v6645_v28  ;;  %v5564_v24 = vpop.f32.mrf.mxu0  ;;  %v5605_v36 = vpop.f32.mrf.mxu1  ;;  %v8264_v28 = vld [vmem:[%s11937_s1 + $0x9b4] ss:$8 sps:$4 sm:$0xff]  }
 0x497   :  { %5850 = vmatmul.mubr.bf16.vlgmr.msra.gmra.mxu1 %v6647_v32  ;;  %v5565_v21 = vadd.f32 %v5564_v24, %v2205_v27  ;;  %5859 = vmatpush1.bf16.msra.mxu0 %v8187_v33  ;;  %v8247_v33 = vld [vmem:[%s11937_s1 + $0x8d0] ss:$8 sps:$4 sm:$0xff]   ;;  %v8256_v27 = vld [vmem:[%s11937_s1 + $0x9c0] ss:$8 sps:$4 sm:$0xff]  }
 0x498   :  { %5890 = vmatprep.mubr.bf16.mxu0 %v6650_v39  ;;  %5900 = vmatpush1.bf16.msra.mxu1 %v8190_v30  ;;  %v5566_v11 = vpop.f32.mrf.mxu0  ;;  %v5607_v38 = vpop.f32.mrf.mxu1  ;;  %v8253_v30 = vld [vmem:[%s11937_s1 + $0x8c0] ss:$8 sps:$4 sm:$0xff]   ;;  %v8262_v32 = vld [vmem:[%s11937_s1 + $0x9b0] ss:$8 sps:$4 sm:$0xff]   ;;  %v8273_v39 = vld [vmem:[%s11937_s1 + $0x894] ss:$8 sps:$4 sm:$0xff]  }
 0x499   :  { %v10614_v12 = vadd.f32 %v5605_v36, %v5565_v21  ;;  %5931 = vmatprep.mubr.bf16.mxu1 %v6652_v37  ;;  %v5567_v41 = vadd.f32 %v5566_v11, %v2209_v15  ;;  %5860 = vmatprep.subr.bf16.mxu0 %v8195_v60  ;;  %v8261_v60 = vld [vmem:[%s11937_s1 + $0x8b4] ss:$8 sps:$4 sm:$0xff]   ;;  %v8267_v15 = vld [vmem:[%s11937_s1 + $0x8a4] ss:$8 sps:$4 sm:$0xff]   ;;  %v8265_v24 = vld [vmem:[%s11937_s1 + $0x8a0] ss:$8 sps:$4 sm:$0xff]  }
 0x49a   :  { %5901 = vmatprep.subr.bf16.mxu1 %v8198_v59  ;;  %v5568_v61 = vpop.f32.mrf.mxu0  ;;  %v5609_v13 = vpop.f32.mrf.mxu1  ;;  %v8259_v59 = vld [vmem:[%s11937_s1 + $0x8b0] ss:$8 sps:$4 sm:$0xff]   ;;  %v8268_v36 = vld [vmem:[%s11937_s1 + $0x9a0] ss:$8 sps:$4 sm:$0xff]   ;;  %v8279_v37 = vld [vmem:[%s11937_s1 + $0x884] ss:$8 sps:$4 sm:$0xff]  }
 0x49b   :  { %v10619_v44 = vadd.f32 %v5607_v38, %v5567_v41  ;;  %5861 = vmatpush1.bf16.msra.mxu0 %v8193_v35  ;;  %v8270_v35 = vld [vmem:[%s11937_s1 + $0x9a4] ss:$8 sps:$4 sm:$0xff]   ;;  %v8274_v21 = vld [vmem:[%s11937_s1 + $0x990] ss:$8 sps:$4 sm:$0xff]   ;;  %v8277_v38 = vld [vmem:[%s11937_s1 + $0x880] ss:$8 sps:$4 sm:$0xff]  }
 0x49c   :  { %5902 = vmatpush1.bf16.msra.mxu1 %v8196_v7  ;;  %v5569_v14 = vpop.f32.mrf.mxu0  ;;  %v5610_v17 = vpop.f32.mrf.mxu1  ;;  %5862 = vmatprep.subr.bf16.mxu0 %v8201_v25  ;;  %v8276_v7 = vld [vmem:[%s11937_s1 + $0x994] ss:$8 sps:$4 sm:$0xff]   ;;  %v8271_v25 = vld [vmem:[%s11937_s1 + $0x890] ss:$8 sps:$4 sm:$0xff]   ;;  %v8282_v11 = vld [vmem:[%s11937_s1 + $0x984] ss:$8 sps:$4 sm:$0xff]  }
 0x49d   :  { %5903 = vmatprep.subr.bf16.mxu1 %v8204_v42  ;;  %v8280_v41 = vld [vmem:[%s11937_s1 + $0x980] ss:$8 sps:$4 sm:$0xff]   ;;  %v8285_v42 = vld [vmem:[%s11937_s1 + $0xa74] ss:$8 sps:$4 sm:$0xff]   ;;  %v6649_v17 = vcombine.low %v10586_v16, %v10586_v16 }
 0x49e   :  { %v11993_v61 = vld [vmem:[#allocation4_spill] sm:$0xff] }
 0x49f   :  { %5863 = vmatpush1.bf16.msra.mxu0 %v8199_v6  ;;  %vm1536_vm4 = vcmp.ge.bf16.partialorder %v11993_v61, %v9936_v43  ;;  %v8288_v13 = vld [vmem:[%s11937_s1 + $0xb74] ss:$8 sps:$4 sm:$0xff]  }
 0x4a0   :  { %5904 = vmatpush1.bf16.msra.mxu1 %v8202_v63  ;;  %5864 = vmatprep.subr.bf16.mxu0 %v8207_v48  ;;  %v11994_v6 = vld [vmem:[#allocation5_spill] sm:$0xff]  ;;  %v10797_v14 = vsel %vm1536_vm4, %v11993_v61, 0  ;;  %v8351_v61 = vld [vmem:[%s11937_s1 + $0xac4] ss:$8 sps:$4 sm:$0xff]  }
 0x4a1   :  { %5905 = vmatprep.subr.bf16.mxu1 %v8210_v22  ;;  %vm1537_vm5 = vcmp.ge.bf16.partialorder %v11994_v6, %v9936_v43  ;;  %v8283_v63 = vld [vmem:[%s11937_s1 + $0xa70] ss:$8 sps:$4 sm:$0xff]   ;;  %v6654_v16 = vcombine.high %v10797_v14, %v10797_v14 }
 0x4a2   :  { %v8286_v48 = vld [vmem:[%s11937_s1 + $0xb70] ss:$8 sps:$4 sm:$0xff]   ;;  %v10805_v22 = vsel %vm1537_vm5, %v11994_v6, 0  ;;  %v8349_v6 = vld [vmem:[%s11937_s1 + $0xac0] ss:$8 sps:$4 sm:$0xff]  }
 0x4a3   :  { %5865 = vmatpush1.bf16.msra.mxu0 %v8205_v49  ;;  %v6651_v49 = vcombine.low %v10594_v31, %v10594_v31  ;;  %v6656_v31 = vcombine.high %v10805_v22, %v10805_v22 }
 0x4a4   :  { %5906 = vmatpush1.bf16.msra.mxu1 %v8208_v0  ;;  %5866 = vmatprep.subr.bf16.mxu0 %v8213_v1  ;;  %v8291_v0 = vld [vmem:[%s11937_s1 + $0xa64] ss:$8 sps:$4 sm:$0xff]  }
 0x4a5   :  { %5907 = vmatprep.subr.bf16.mxu1 %v8216_v3  ;;  %v8294_v3 = vld [vmem:[%s11937_s1 + $0xb64] ss:$8 sps:$4 sm:$0xff]  }
 0x4a7   :  { %5867 = vmatpush1.bf16.msra.mxu0 %v8211_v2 }
 0x4a8   :  { %5908 = vmatpush1.bf16.msra.mxu1 %v8214_v18  ;;  %5868 = vmatprep.subr.bf16.mxu0 %v8219_v50  ;;  %v8289_v50 = vld [vmem:[%s11937_s1 + $0xa60] ss:$8 sps:$4 sm:$0xff]  }
 0x4a9   :  { %5909 = vmatprep.subr.bf16.mxu1 %v8222_v45 }
 0x4ab   :  { %5869 = vmatpush1.bf16.msra.mxu0 %v8217_v51 }
 0x4ac   :  { %5910 = vmatpush1.bf16.msra.mxu1 %v8220_v19  ;;  %5870 = vmatprep.subr.bf16.mxu0 %v8225_v53  ;;  %v8292_v19 = vld [vmem:[%s11937_s1 + $0xb60] ss:$8 sps:$4 sm:$0xff]  }
 0x4ad   :  { %5911 = vmatprep.subr.bf16.mxu1 %v8228_v54  ;;  %v8300_v54 = vld [vmem:[%s11937_s1 + $0xb54] ss:$8 sps:$4 sm:$0xff]  }
 0x4af   :  { %5871 = vmatpush1.bf16.msra.mxu0 %v8223_v34 }
 0x4b0   :  { %5912 = vmatpush1.bf16.msra.mxu1 %v8226_v4  ;;  %5872 = vmatprep.subr.bf16.mxu0 %v8231_v5 }
 0x4b1   :  { %5913 = vmatprep.subr.bf16.mxu1 %v8234_v20 }
 0x4b3   :  { %5873 = vmatpush1.bf16.msra.mxu0 %v8229_v23  ;;  %v8295_v23 = vld [vmem:[%s11937_s1 + $0xa50] ss:$8 sps:$4 sm:$0xff]  }
 0x4b4   :  { %5914 = vmatpush1.bf16.msra.mxu1 %v8232_v46  ;;  %5874 = vmatprep.subr.bf16.mxu0 %v8237_v47 }
 0x4b5   :  { %5915 = vmatprep.subr.bf16.mxu1 %v8240_v55  ;;  %v8303_v55 = vld [vmem:[%s11937_s1 + $0xa44] ss:$8 sps:$4 sm:$0xff]  }
 0x4b7   :  { %5875 = vmatpush2.bf16.msra.mxu0 %v8235_v56  ;;  %v8306_v56 = vld [vmem:[%s11937_s1 + $0xb44] ss:$8 sps:$4 sm:$0xff]  }
 0x4b8   :  { %5916 = vmatpush2.bf16.msra.mxu1 %v8238_v10  ;;  %5876 = vmatprep.subr.bf16.mxu0 %v8243_v40  ;;  %v8301_v10 = vld [vmem:[%s11937_s1 + $0xa40] ss:$8 sps:$4 sm:$0xff]  }
 0x4b9   :  { %5917 = vmatprep.subr.bf16.mxu1 %v8246_v8  ;;  %v8304_v40 = vld [vmem:[%s11937_s1 + $0xb40] ss:$8 sps:$4 sm:$0xff]   ;;  %v8309_v8 = vld [vmem:[%s11937_s1 + $0xa34] ss:$8 sps:$4 sm:$0xff]  }
 0x4bb   :  { %5877 = vmatpush2.bf16.msra.mxu0 %v8241_v62  ;;  %v8312_v62 = vld [vmem:[%s11937_s1 + $0xb34] ss:$8 sps:$4 sm:$0xff]  }
 0x4bc   :  { %5918 = vmatpush2.bf16.msra.mxu1 %v8244_v52  ;;  %5878 = vmatprep.subr.bf16.mxu0 %v8249_v9  ;;  %v8307_v52 = vld [vmem:[%s11937_s1 + $0xa30] ss:$8 sps:$4 sm:$0xff]  }
 0x4bd   :  { %5919 = vmatprep.subr.bf16.mxu1 %v8252_v57  ;;  %v8310_v9 = vld [vmem:[%s11937_s1 + $0xb30] ss:$8 sps:$4 sm:$0xff]   ;;  %v8315_v57 = vld [vmem:[%s11937_s1 + $0xa24] ss:$8 sps:$4 sm:$0xff]  }
 0x4bf   :  { %5879 = vmatpush2.bf16.msra.mxu0 %v8247_v33  ;;  %v8318_v33 = vld [vmem:[%s11937_s1 + $0xb24] ss:$8 sps:$4 sm:$0xff]  }
 0x4c0   :  { %5920 = vmatpush2.bf16.msra.mxu1 %v8250_v26  ;;  %5880 = vmatprep.subr.bf16.mxu0 %v8255_v29  ;;  %v8313_v26 = vld [vmem:[%s11937_s1 + $0xa20] ss:$8 sps:$4 sm:$0xff]  }
 0x4c1   :  { %5921 = vmatprep.subr.bf16.mxu1 %v8258_v58  ;;  %v8316_v29 = vld [vmem:[%s11937_s1 + $0xb20] ss:$8 sps:$4 sm:$0xff]   ;;  %v8321_v58 = vld [vmem:[%s11937_s1 + $0xa14] ss:$8 sps:$4 sm:$0xff]  }
 0x4c3   :  { %5881 = vmatpush2.bf16.msra.mxu0 %v8253_v30  ;;  %v8324_v30 = vld [vmem:[%s11937_s1 + $0xb14] ss:$8 sps:$4 sm:$0xff]  }
 0x4c4   :  { %5922 = vmatpush2.bf16.msra.mxu1 %v8256_v27  ;;  %5882 = vmatprep.subr.bf16.mxu0 %v8261_v60  ;;  %v8319_v27 = vld [vmem:[%s11937_s1 + $0xa10] ss:$8 sps:$4 sm:$0xff]  }
 0x4c5   :  { %5923 = vmatprep.subr.bf16.mxu1 %v8264_v28  ;;  %v8322_v60 = vld [vmem:[%s11937_s1 + $0xb10] ss:$8 sps:$4 sm:$0xff]   ;;  %v8327_v28 = vld [vmem:[%s11937_s1 + $0xa04] ss:$8 sps:$4 sm:$0xff]  }
 0x4c7   :  { %5883 = vmatpush2.bf16.msra.mxu0 %v8259_v59  ;;  %v8330_v59 = vld [vmem:[%s11937_s1 + $0xb04] ss:$8 sps:$4 sm:$0xff]  }
 0x4c8   :  { %5924 = vmatpush2.bf16.msra.mxu1 %v8262_v32  ;;  %5884 = vmatprep.subr.bf16.mxu0 %v8267_v15  ;;  %v8325_v32 = vld [vmem:[%s11937_s1 + $0xa00] ss:$8 sps:$4 sm:$0xff]  }
 0x4c9   :  { %5925 = vmatprep.subr.bf16.mxu1 %v8270_v35  ;;  %v8328_v15 = vld [vmem:[%s11937_s1 + $0xb00] ss:$8 sps:$4 sm:$0xff]   ;;  %v8333_v35 = vld [vmem:[%s11937_s1 + $0xaf4] ss:$8 sps:$4 sm:$0xff]  }
 0x4cb   :  { %5885 = vmatpush2.bf16.msra.mxu0 %v8265_v24  ;;  %v8336_v24 = vld [vmem:[%s11937_s1 + $0xbf4] ss:$8 sps:$4 sm:$0xff]  }
 0x4cc   :  { %5926 = vmatpush2.bf16.msra.mxu1 %v8268_v36  ;;  %5886 = vmatprep.subr.bf16.mxu0 %v8273_v39  ;;  %v8331_v36 = vld [vmem:[%s11937_s1 + $0xaf0] ss:$8 sps:$4 sm:$0xff]  }
 0x4cd   :  { %5927 = vmatprep.subr.bf16.mxu1 %v8276_v7  ;;  %v8334_v39 = vld [vmem:[%s11937_s1 + $0xbf0] ss:$8 sps:$4 sm:$0xff]   ;;  %v8339_v7 = vld [vmem:[%s11937_s1 + $0xae4] ss:$8 sps:$4 sm:$0xff]  }
 0x4cf   :  { %5887 = vmatpush2.bf16.msra.mxu0 %v8271_v25  ;;  %v8342_v25 = vld [vmem:[%s11937_s1 + $0xbe4] ss:$8 sps:$4 sm:$0xff]  }
 0x4d0   :  { %5928 = vmatpush2.bf16.msra.mxu1 %v8274_v21  ;;  %5888 = vmatprep.subr.bf16.mxu0 %v8279_v37  ;;  %v8337_v21 = vld [vmem:[%s11937_s1 + $0xae0] ss:$8 sps:$4 sm:$0xff]  }
 0x4d1   :  { %5929 = vmatprep.subr.bf16.mxu1 %v8282_v11  ;;  %v8340_v37 = vld [vmem:[%s11937_s1 + $0xbe0] ss:$8 sps:$4 sm:$0xff]   ;;  %v8345_v11 = vld [vmem:[%s11937_s1 + $0xad4] ss:$8 sps:$4 sm:$0xff]  }
 0x4d3   :  { %5889 = vmatpush2.bf16.msra.mxu0 %v8277_v38  ;;  %v8348_v38 = vld [vmem:[%s11937_s1 + $0xbd4] ss:$8 sps:$4 sm:$0xff]  }
 0x4d4   :  { %5930 = vmatpush2.bf16.msra.mxu1 %v8280_v41  ;;  %5940 = vmatprep.subr.bf16.mxu0 %v8285_v42  ;;  %v8343_v41 = vld [vmem:[%s11937_s1 + $0xad0] ss:$8 sps:$4 sm:$0xff]  }
 0x4d5   :  { %5981 = vmatprep.subr.bf16.mxu1 %v8288_v13  ;;  %v8346_v42 = vld [vmem:[%s11937_s1 + $0xbd0] ss:$8 sps:$4 sm:$0xff]   ;;  %v8354_v13 = vld [vmem:[%s11937_s1 + $0xbc4] ss:$8 sps:$4 sm:$0xff]  }
 0x4d6   :  { %v5646_v1 = vpop.f32.mrf.mxu0  ;;  %v5687_v2 = vpop.f32.mrf.mxu1  ;;  %5891 = vmatmul.mubr.bf16.vlgmr.msra.gmra.mxu0 %v6649_v17  ;;  %v8357_v17 = vld [vmem:[%s11937_s1 + $0xab4] ss:$8 sps:$4 sm:$0xff]  }
 0x4d7   :  { %v5647_v18 = vadd.f32 %v5646_v1, %v10614_v12  ;;  %5932 = vmatmul.mubr.bf16.vlgmr.msra.gmra.mxu1 %v6651_v49  ;;  %5941 = vmatpush1.bf16.msra.mxu0 %v8283_v63  ;;  %v8297_v12 = vld [vmem:[%s11937_s1 + $0xa54] ss:$8 sps:$4 sm:$0xff]   ;;  %v8352_v63 = vld [vmem:[%s11937_s1 + $0xbc0] ss:$8 sps:$4 sm:$0xff]   ;;  %v8355_v49 = vld [vmem:[%s11937_s1 + $0xab0] ss:$8 sps:$4 sm:$0xff]  }
 0x4d8   :  { %5972 = vmatprep.mubr.bf16.mxu0 %v6654_v16  ;;  %5982 = vmatpush1.bf16.msra.mxu1 %v8286_v48  ;;  %v5648_v51 = vpop.f32.mrf.mxu0  ;;  %v5689_v45 = vpop.f32.mrf.mxu1  ;;  %v8360_v48 = vld [vmem:[%s11937_s1 + $0xbb4] ss:$8 sps:$4 sm:$0xff]   ;;  %v8363_v1 = vld [vmem:[%s11937_s1 + $0xaa4] ss:$8 sps:$4 sm:$0xff]   ;;  %v8361_v16 = vld [vmem:[%s11937_s1 + $0xaa0] ss:$8 sps:$4 sm:$0xff]  }
 0x4d9   :  { %v10829_v53 = vadd.f32 %v5687_v2, %v5647_v18  ;;  %6013 = vmatprep.mubr.bf16.mxu1 %v6656_v31  ;;  %v5649_v34 = vadd.f32 %v5648_v51, %v10619_v44  ;;  %5942 = vmatprep.subr.bf16.mxu0 %v8291_v0  ;;  %v8298_v44 = vld [vmem:[%s11937_s1 + $0xb50] ss:$8 sps:$4 sm:$0xff]   ;;  %v8366_v2 = vld [vmem:[%s11937_s1 + $0xba4] ss:$8 sps:$4 sm:$0xff]   ;;  %v8369_v18 = vld [vmem:[%s11937_s1 + $0xa94] ss:$8 sps:$4 sm:$0xff]  }
 0x4da   :  { %v5650_v4 = vpop.f32.mrf.mxu0  ;;  %v5691_v5 = vpop.f32.mrf.mxu1  ;;  %5983 = vmatprep.subr.bf16.mxu1 %v8294_v3  ;;  %v8358_v0 = vld [vmem:[%s11937_s1 + $0xbb0] ss:$8 sps:$4 sm:$0xff]   ;;  %v8364_v3 = vld [vmem:[%s11937_s1 + $0xba0] ss:$8 sps:$4 sm:$0xff]   ;;  %v8372_v31 = vld [vmem:[%s11937_s1 + $0xb94] ss:$8 sps:$4 sm:$0xff]  }
 0x4db   :  { %v10835_v20 = vadd.f32 %v5689_v45, %v5649_v34  ;;  %5943 = vmatpush1.bf16.msra.mxu0 %v8289_v50  ;;  %v8367_v50 = vld [vmem:[%s11937_s1 + $0xa90] ss:$8 sps:$4 sm:$0xff]   ;;  %v8375_v45 = vld [vmem:[%s11937_s1 + $0xa84] ss:$8 sps:$4 sm:$0xff]   ;;  %v8376_v34 = vld [vmem:[%s11937_s1 + $0xb80] ss:$8 sps:$4 sm:$0xff]  }
 0x4dc   :  { %5984 = vmatpush1.bf16.msra.mxu1 %v8292_v19  ;;  %v5651_v46 = vpop.f32.mrf.mxu0  ;;  %v5692_v47 = vpop.f32.mrf.mxu1  ;;  %5944 = vmatprep.subr.bf16.mxu0 %v8297_v12  ;;  %v8370_v51 = vld [vmem:[%s11937_s1 + $0xb90] ss:$8 sps:$4 sm:$0xff]   ;;  %v8378_v19 = vld [vmem:[%s11937_s1 + $0xb84] ss:$8 sps:$4 sm:$0xff]   ;;  %v8373_v12 = vld [vmem:[%s11937_s1 + $0xa80] ss:$8 sps:$4 sm:$0xff]  }
 0x4dd   :  { %5985 = vmatprep.subr.bf16.mxu1 %v8300_v54  ;;  %v8381_v54 = vld [vmem:[%s11937_s1 + $0xc74] ss:$8 sps:$4 sm:$0xff]   ;;  %v11995_v4 = vld [vmem:[#allocation6_spill] sm:$0xff]  ;;  %v8379_v46 = vld [vmem:[%s11937_s1 + $0xc70] ss:$8 sps:$4 sm:$0xff]  }
 0x4de   :  { %vm1538_vm6 = vcmp.ge.bf16.partialorder %v11995_v4, %v9936_v43  ;;  %v8384_v5 = vld [vmem:[%s11937_s1 + $0xd74] ss:$8 sps:$4 sm:$0xff]  }
 0x4df   :  { %5945 = vmatpush1.bf16.msra.mxu0 %v8295_v23  ;;  %v11996_v23 = vld [vmem:[#allocation7_spill] sm:$0xff]  ;;  %v11013_v47 = vsel %vm1538_vm6, %v11995_v4, 0 }
 0x4e0   :  { %5986 = vmatpush1.bf16.msra.mxu1 %v8298_v44  ;;  %5946 = vmatprep.subr.bf16.mxu0 %v8303_v55  ;;  %vm1539_vm7 = vcmp.ge.bf16.partialorder %v11996_v23, %v9936_v43  ;;  %v6653_v44 = vcombine.low %v10797_v14, %v10797_v14  ;;  %v8382_v55 = vld [vmem:[%s11937_s1 + $0xd70] ss:$8 sps:$4 sm:$0xff]   ;;  %v6658_v14 = vcombine.high %v11013_v47, %v11013_v47  ;;  %v8447_v4 = vld [vmem:[%s11937_s1 + $0xcc4] ss:$8 sps:$4 sm:$0xff]  }
 0x4e1   :  { %5987 = vmatprep.subr.bf16.mxu1 %v8306_v56  ;;  %v11021_v56 = vsel %vm1539_vm7, %v11996_v23, 0  ;;  %v8445_v23 = vld [vmem:[%s11937_s1 + $0xcc0] ss:$8 sps:$4 sm:$0xff]  }
 0x4e3   :  { %5947 = vmatpush1.bf16.msra.mxu0 %v8301_v10  ;;  %v6655_v10 = vcombine.low %v10805_v22, %v10805_v22  ;;  %v6660_v22 = vcombine.high %v11021_v56, %v11021_v56 }
 0x4e4   :  { %5988 = vmatpush1.bf16.msra.mxu1 %v8304_v40  ;;  %5948 = vmatprep.subr.bf16.mxu0 %v8309_v8  ;;  %v8387_v40 = vld [vmem:[%s11937_s1 + $0xc64] ss:$8 sps:$4 sm:$0xff]  }
 0x4e5   :  { %5989 = vmatprep.subr.bf16.mxu1 %v8312_v62  ;;  %v8390_v62 = vld [vmem:[%s11937_s1 + $0xd64] ss:$8 sps:$4 sm:$0xff]  }
 0x4e7   :  { %5949 = vmatpush1.bf16.msra.mxu0 %v8307_v52 }
 0x4e8   :  { %5990 = vmatpush1.bf16.msra.mxu1 %v8310_v9  ;;  %5950 = vmatprep.subr.bf16.mxu0 %v8315_v57  ;;  %v8385_v57 = vld [vmem:[%s11937_s1 + $0xc60] ss:$8 sps:$4 sm:$0xff]  }
 0x4e9   :  { %5991 = vmatprep.subr.bf16.mxu1 %v8318_v33 }
 0x4eb   :  { %5951 = vmatpush1.bf16.msra.mxu0 %v8313_v26  ;;  %v8388_v26 = vld [vmem:[%s11937_s1 + $0xd60] ss:$8 sps:$4 sm:$0xff]  }
 0x4ec   :  { %5992 = vmatpush1.bf16.msra.mxu1 %v8316_v29  ;;  %5952 = vmatprep.subr.bf16.mxu0 %v8321_v58 }
 0x4ed   :  { %5993 = vmatprep.subr.bf16.mxu1 %v8324_v30 }
 0x4ef   :  { %5953 = vmatpush1.bf16.msra.mxu0 %v8319_v27  ;;  %v8396_v27 = vld [vmem:[%s11937_s1 + $0xd54] ss:$8 sps:$4 sm:$0xff]  }
 0x4f0   :  { %5994 = vmatpush1.bf16.msra.mxu1 %v8322_v60  ;;  %5954 = vmatprep.subr.bf16.mxu0 %v8327_v28 }
 0x4f1   :  { %5995 = vmatprep.subr.bf16.mxu1 %v8330_v59 }
 0x4f3   :  { %5955 = vmatpush1.bf16.msra.mxu0 %v8325_v32  ;;  %v8391_v32 = vld [vmem:[%s11937_s1 + $0xc50] ss:$8 sps:$4 sm:$0xff]  }
 0x4f4   :  { %5996 = vmatpush1.bf16.msra.mxu1 %v8328_v15  ;;  %5956 = vmatprep.subr.bf16.mxu0 %v8333_v35  ;;  %v8399_v35 = vld [vmem:[%s11937_s1 + $0xc44] ss:$8 sps:$4 sm:$0xff]  }
 0x4f5   :  { %5997 = vmatprep.subr.bf16.mxu1 %v8336_v24 }
 0x4f7   :  { %5957 = vmatpush2.bf16.msra.mxu0 %v8331_v36  ;;  %v8402_v36 = vld [vmem:[%s11937_s1 + $0xd44] ss:$8 sps:$4 sm:$0xff]  }
 0x4f8   :  { %5998 = vmatpush2.bf16.msra.mxu1 %v8334_v39  ;;  %5958 = vmatprep.subr.bf16.mxu0 %v8339_v7  ;;  %v8397_v39 = vld [vmem:[%s11937_s1 + $0xc40] ss:$8 sps:$4 sm:$0xff]  }
 0x4f9   :  { %5999 = vmatprep.subr.bf16.mxu1 %v8342_v25  ;;  %v8400_v7 = vld [vmem:[%s11937_s1 + $0xd40] ss:$8 sps:$4 sm:$0xff]   ;;  %v8405_v25 = vld [vmem:[%s11937_s1 + $0xc34] ss:$8 sps:$4 sm:$0xff]  }
 0x4fb   :  { %5959 = vmatpush2.bf16.msra.mxu0 %v8337_v21  ;;  %v8408_v21 = vld [vmem:[%s11937_s1 + $0xd34] ss:$8 sps:$4 sm:$0xff]  }
 0x4fc   :  { %6000 = vmatpush2.bf16.msra.mxu1 %v8340_v37  ;;  %5960 = vmatprep.subr.bf16.mxu0 %v8345_v11  ;;  %v8403_v37 = vld [vmem:[%s11937_s1 + $0xc30] ss:$8 sps:$4 sm:$0xff]  }
 0x4fd   :  { %6001 = vmatprep.subr.bf16.mxu1 %v8348_v38  ;;  %v8406_v11 = vld [vmem:[%s11937_s1 + $0xd30] ss:$8 sps:$4 sm:$0xff]   ;;  %v8411_v38 = vld [vmem:[%s11937_s1 + $0xc24] ss:$8 sps:$4 sm:$0xff]  }
 0x4ff   :  { %5961 = vmatpush2.bf16.msra.mxu0 %v8343_v41  ;;  %v8414_v41 = vld [vmem:[%s11937_s1 + $0xd24] ss:$8 sps:$4 sm:$0xff]  }
 0x500   :  { %6002 = vmatpush2.bf16.msra.mxu1 %v8346_v42  ;;  %5962 = vmatprep.subr.bf16.mxu0 %v8351_v61  ;;  %v8409_v42 = vld [vmem:[%s11937_s1 + $0xc20] ss:$8 sps:$4 sm:$0xff]  }
 0x501   :  { %6003 = vmatprep.subr.bf16.mxu1 %v8354_v13  ;;  %v8412_v61 = vld [vmem:[%s11937_s1 + $0xd20] ss:$8 sps:$4 sm:$0xff]   ;;  %v8417_v13 = vld [vmem:[%s11937_s1 + $0xc14] ss:$8 sps:$4 sm:$0xff]  }
 0x503   :  { %5963 = vmatpush2.bf16.msra.mxu0 %v8349_v6  ;;  %v8420_v6 = vld [vmem:[%s11937_s1 + $0xd14] ss:$8 sps:$4 sm:$0xff]  }
 0x504   :  { %6004 = vmatpush2.bf16.msra.mxu1 %v8352_v63  ;;  %5964 = vmatprep.subr.bf16.mxu0 %v8357_v17  ;;  %v8415_v63 = vld [vmem:[%s11937_s1 + $0xc10] ss:$8 sps:$4 sm:$0xff]  }
 0x505   :  { %6005 = vmatprep.subr.bf16.mxu1 %v8360_v48  ;;  %v8418_v17 = vld [vmem:[%s11937_s1 + $0xd10] ss:$8 sps:$4 sm:$0xff]   ;;  %v8423_v48 = vld [vmem:[%s11937_s1 + $0xc04] ss:$8 sps:$4 sm:$0xff]  }
 0x507   :  { %5965 = vmatpush2.bf16.msra.mxu0 %v8355_v49  ;;  %v8426_v49 = vld [vmem:[%s11937_s1 + $0xd04] ss:$8 sps:$4 sm:$0xff]  }
 0x508   :  { %6006 = vmatpush2.bf16.msra.mxu1 %v8358_v0  ;;  %5966 = vmatprep.subr.bf16.mxu0 %v8363_v1  ;;  %v8421_v0 = vld [vmem:[%s11937_s1 + $0xc00] ss:$8 sps:$4 sm:$0xff]  }
 0x509   :  { %6007 = vmatprep.subr.bf16.mxu1 %v8366_v2  ;;  %v8424_v1 = vld [vmem:[%s11937_s1 + $0xd00] ss:$8 sps:$4 sm:$0xff]   ;;  %v8429_v2 = vld [vmem:[%s11937_s1 + $0xcf4] ss:$8 sps:$4 sm:$0xff]  }
 0x50b   :  { %5967 = vmatpush2.bf16.msra.mxu0 %v8361_v16  ;;  %v8432_v16 = vld [vmem:[%s11937_s1 + $0xdf4] ss:$8 sps:$4 sm:$0xff]  }
 0x50c   :  { %6008 = vmatpush2.bf16.msra.mxu1 %v8364_v3  ;;  %5968 = vmatprep.subr.bf16.mxu0 %v8369_v18  ;;  %v8427_v3 = vld [vmem:[%s11937_s1 + $0xcf0] ss:$8 sps:$4 sm:$0xff]  }
 0x50d   :  { %6009 = vmatprep.subr.bf16.mxu1 %v8372_v31  ;;  %v8430_v18 = vld [vmem:[%s11937_s1 + $0xdf0] ss:$8 sps:$4 sm:$0xff]   ;;  %v8435_v31 = vld [vmem:[%s11937_s1 + $0xce4] ss:$8 sps:$4 sm:$0xff]  }
 0x50f   :  { %5969 = vmatpush2.bf16.msra.mxu0 %v8367_v50  ;;  %v8438_v50 = vld [vmem:[%s11937_s1 + $0xde4] ss:$8 sps:$4 sm:$0xff]  }
 0x510   :  { %6010 = vmatpush2.bf16.msra.mxu1 %v8370_v51  ;;  %5970 = vmatprep.subr.bf16.mxu0 %v8375_v45  ;;  %v8433_v51 = vld [vmem:[%s11937_s1 + $0xce0] ss:$8 sps:$4 sm:$0xff]  }
 0x511   :  { %6011 = vmatprep.subr.bf16.mxu1 %v8378_v19  ;;  %v8436_v45 = vld [vmem:[%s11937_s1 + $0xde0] ss:$8 sps:$4 sm:$0xff]   ;;  %v8441_v19 = vld [vmem:[%s11937_s1 + $0xcd4] ss:$8 sps:$4 sm:$0xff]  }
 0x513   :  { %5971 = vmatpush2.bf16.msra.mxu0 %v8373_v12  ;;  %v8444_v12 = vld [vmem:[%s11937_s1 + $0xdd4] ss:$8 sps:$4 sm:$0xff]  }
 0x514   :  { %6012 = vmatpush2.bf16.msra.mxu1 %v8376_v34  ;;  %6022 = vmatprep.subr.bf16.mxu0 %v8381_v54  ;;  %v8439_v34 = vld [vmem:[%s11937_s1 + $0xcd0] ss:$8 sps:$4 sm:$0xff]  }
 0x515   :  { %6063 = vmatprep.subr.bf16.mxu1 %v8384_v5  ;;  %v8442_v54 = vld [vmem:[%s11937_s1 + $0xdd0] ss:$8 sps:$4 sm:$0xff]   ;;  %v8450_v5 = vld [vmem:[%s11937_s1 + $0xdc4] ss:$8 sps:$4 sm:$0xff]  }
 0x516   :  { %v5728_v8 = vpop.f32.mrf.mxu0  ;;  %5973 = vmatmul.mubr.bf16.vlgmr.msra.gmra.mxu0 %v6653_v44  ;;  %v8453_v44 = vld [vmem:[%s11937_s1 + $0xcb4] ss:$8 sps:$4 sm:$0xff]  }
 0x517   :  { %v5729_v52 = vadd.f32 %v5728_v8, %v10829_v53  ;;  %v5769_v9 = vpop.f32.mrf.mxu1  ;;  %6014 = vmatmul.mubr.bf16.vlgmr.msra.gmra.mxu1 %v6655_v10  ;;  %6023 = vmatpush1.bf16.msra.mxu0 %v8379_v46  ;;  %v8393_v53 = vld [vmem:[%s11937_s1 + $0xc54] ss:$8 sps:$4 sm:$0xff]   ;;  %v8448_v46 = vld [vmem:[%s11937_s1 + $0xdc0] ss:$8 sps:$4 sm:$0xff]   ;;  %v8451_v10 = vld [vmem:[%s11937_s1 + $0xcb0] ss:$8 sps:$4 sm:$0xff]  }
 0x518   :  { %6054 = vmatprep.mubr.bf16.mxu0 %v6658_v14  ;;  %6064 = vmatpush1.bf16.msra.mxu1 %v8382_v55  ;;  %v5730_v33 = vpop.f32.mrf.mxu0  ;;  %v8456_v55 = vld [vmem:[%s11937_s1 + $0xdb4] ss:$8 sps:$4 sm:$0xff]   ;;  %v8459_v8 = vld [vmem:[%s11937_s1 + $0xca4] ss:$8 sps:$4 sm:$0xff]  }
 0x519   :  { %v11045_v29 = vadd.f32 %v5769_v9, %v5729_v52  ;;  %6095 = vmatprep.mubr.bf16.mxu1 %v6660_v22  ;;  %v5731_v58 = vadd.f32 %v5730_v33, %v10835_v20  ;;  %v5771_v30 = vpop.f32.mrf.mxu1  ;;  %6024 = vmatprep.subr.bf16.mxu0 %v8387_v40  ;;  %v8394_v20 = vld [vmem:[%s11937_s1 + $0xd50] ss:$8 sps:$4 sm:$0xff]   ;;  %v8462_v14 = vld [vmem:[%s11937_s1 + $0xda4] ss:$8 sps:$4 sm:$0xff]   ;;  %v8460_v52 = vld [vmem:[%s11937_s1 + $0xda0] ss:$8 sps:$4 sm:$0xff]  }
 0x51a   :  { %v5732_v60 = vpop.f32.mrf.mxu0  ;;  %6065 = vmatprep.subr.bf16.mxu1 %v8390_v62  ;;  %v8454_v40 = vld [vmem:[%s11937_s1 + $0xdb0] ss:$8 sps:$4 sm:$0xff]   ;;  %v8457_v62 = vld [vmem:[%s11937_s1 + $0xca0] ss:$8 sps:$4 sm:$0xff]   ;;  %v8465_v9 = vld [vmem:[%s11937_s1 + $0xc94] ss:$8 sps:$4 sm:$0xff]  }
 0x51b   :  { %v11051_v28 = vadd.f32 %v5771_v30, %v5731_v58  ;;  %v5773_v59 = vpop.f32.mrf.mxu1  ;;  %6025 = vmatpush1.bf16.msra.mxu0 %v8385_v57  ;;  %v8468_v22 = vld [vmem:[%s11937_s1 + $0xd94] ss:$8 sps:$4 sm:$0xff]   ;;  %v8463_v57 = vld [vmem:[%s11937_s1 + $0xc90] ss:$8 sps:$4 sm:$0xff]   ;;  %v8469_v58 = vld [vmem:[%s11937_s1 + $0xc80] ss:$8 sps:$4 sm:$0xff]  }
 0x51c   :  { %6066 = vmatpush1.bf16.msra.mxu1 %v8388_v26  ;;  %v5733_v15 = vpop.f32.mrf.mxu0  ;;  %6026 = vmatprep.subr.bf16.mxu0 %v8393_v53  ;;  %v8466_v33 = vld [vmem:[%s11937_s1 + $0xd90] ss:$8 sps:$4 sm:$0xff]   ;;  %v8471_v26 = vld [vmem:[%s11937_s1 + $0xc84] ss:$8 sps:$4 sm:$0xff]   ;;  %v8472_v30 = vld [vmem:[%s11937_s1 + $0xd80] ss:$8 sps:$4 sm:$0xff]  }
 0x51d   :  { %v5774_v24 = vpop.f32.mrf.mxu1  ;;  %6067 = vmatprep.subr.bf16.mxu1 %v8396_v27  ;;  %v8474_v53 = vld [vmem:[%s11937_s1 + $0xd84] ss:$8 sps:$4 sm:$0xff]   ;;  %v8477_v27 = vld [vmem:[%s11937_s1 + $0xe74] ss:$8 sps:$4 sm:$0xff]   ;;  %v8475_v15 = vld [vmem:[%s11937_s1 + $0xe70] ss:$8 sps:$4 sm:$0xff]  }
 0x51e   :  { %v11997_v60 = vld [vmem:[#allocation8_spill] sm:$0xff] }
 0x51f   :  { %6027 = vmatpush1.bf16.msra.mxu0 %v8391_v32  ;;  %vm1540_vm8 = vcmp.ge.bf16.partialorder %v11997_v60, %v9936_v43  ;;  %v8480_v59 = vld [vmem:[%s11937_s1 + $0xf74] ss:$8 sps:$4 sm:$0xff]   ;;  %v8478_v24 = vld [vmem:[%s11937_s1 + $0xf70] ss:$8 sps:$4 sm:$0xff]  }
 0x520   :  { %6068 = vmatpush1.bf16.msra.mxu1 %v8394_v20  ;;  %6028 = vmatprep.subr.bf16.mxu0 %v8399_v35  ;;  %v11998_v32 = vld [vmem:[#allocation9_spill] sm:$0xff]  ;;  %v11229_v20 = vsel %vm1540_vm8, %v11997_v60, 0  ;;  %v6657_v35 = vcombine.low %v11013_v47, %v11013_v47  ;;  %v8543_v60 = vld [vmem:[%s11937_s1 + $0xec4] ss:$8 sps:$4 sm:$0xff]  }
 0x521   :  { %6069 = vmatprep.subr.bf16.mxu1 %v8402_v36  ;;  %vm1541_vm9 = vcmp.ge.bf16.partialorder %v11998_v32, %v9936_v43  ;;  %v6662_v47 = vcombine.high %v11229_v20, %v11229_v20 }
 0x522   :  { %v11237_v36 = vsel %vm1541_vm9, %v11998_v32, 0  ;;  %v8541_v32 = vld [vmem:[%s11937_s1 + $0xec0] ss:$8 sps:$4 sm:$0xff]  }
 0x523   :  { %6029 = vmatpush1.bf16.msra.mxu0 %v8397_v39  ;;  %v6659_v39 = vcombine.low %v11021_v56, %v11021_v56  ;;  %v6664_v56 = vcombine.high %v11237_v36, %v11237_v36 }
 0x524   :  { %6070 = vmatpush1.bf16.msra.mxu1 %v8400_v7  ;;  %6030 = vmatprep.subr.bf16.mxu0 %v8405_v25  ;;  %v8483_v7 = vld [vmem:[%s11937_s1 + $0xe64] ss:$8 sps:$4 sm:$0xff]  }
 0x525   :  { %6071 = vmatprep.subr.bf16.mxu1 %v8408_v21  ;;  %v8486_v21 = vld [vmem:[%s11937_s1 + $0xf64] ss:$8 sps:$4 sm:$0xff]  }
 0x527   :  { %6031 = vmatpush1.bf16.msra.mxu0 %v8403_v37 }
 0x528   :  { %6072 = vmatpush1.bf16.msra.mxu1 %v8406_v11  ;;  %6032 = vmatprep.subr.bf16.mxu0 %v8411_v38  ;;  %v8481_v38 = vld [vmem:[%s11937_s1 + $0xe60] ss:$8 sps:$4 sm:$0xff]  }
 0x529   :  { %6073 = vmatprep.subr.bf16.mxu1 %v8414_v41 }
 0x52b   :  { %6033 = vmatpush1.bf16.msra.mxu0 %v8409_v42  ;;  %v8484_v42 = vld [vmem:[%s11937_s1 + $0xf60] ss:$8 sps:$4 sm:$0xff]  }
 0x52c   :  { %6074 = vmatpush1.bf16.msra.mxu1 %v8412_v61  ;;  %6034 = vmatprep.subr.bf16.mxu0 %v8417_v13 }
 0x52d   :  { %6075 = vmatprep.subr.bf16.mxu1 %v8420_v6 }
 0x52f   :  { %6035 = vmatpush1.bf16.msra.mxu0 %v8415_v63  ;;  %v8492_v63 = vld [vmem:[%s11937_s1 + $0xf54] ss:$8 sps:$4 sm:$0xff]  }
 0x530   :  { %6076 = vmatpush1.bf16.msra.mxu1 %v8418_v17  ;;  %6036 = vmatprep.subr.bf16.mxu0 %v8423_v48 }
 0x531   :  { %6077 = vmatprep.subr.bf16.mxu1 %v8426_v49 }
 0x533   :  { %6037 = vmatpush1.bf16.msra.mxu0 %v8421_v0  ;;  %v8487_v0 = vld [vmem:[%s11937_s1 + $0xe50] ss:$8 sps:$4 sm:$0xff]  }
 0x534   :  { %6078 = vmatpush1.bf16.msra.mxu1 %v8424_v1  ;;  %6038 = vmatprep.subr.bf16.mxu0 %v8429_v2  ;;  %v8495_v2 = vld [vmem:[%s11937_s1 + $0xe44] ss:$8 sps:$4 sm:$0xff]  }
 0x535   :  { %6079 = vmatprep.subr.bf16.mxu1 %v8432_v16 }
 0x537   :  { %6039 = vmatpush2.bf16.msra.mxu0 %v8427_v3  ;;  %v8498_v3 = vld [vmem:[%s11937_s1 + $0xf44] ss:$8 sps:$4 sm:$0xff]  }
 0x538   :  { %6080 = vmatpush2.bf16.msra.mxu1 %v8430_v18  ;;  %6040 = vmatprep.subr.bf16.mxu0 %v8435_v31  ;;  %v8493_v18 = vld [vmem:[%s11937_s1 + $0xe40] ss:$8 sps:$4 sm:$0xff]  }
 0x539   :  { %6081 = vmatprep.subr.bf16.mxu1 %v8438_v50  ;;  %v8496_v31 = vld [vmem:[%s11937_s1 + $0xf40] ss:$8 sps:$4 sm:$0xff]   ;;  %v8501_v50 = vld [vmem:[%s11937_s1 + $0xe34] ss:$8 sps:$4 sm:$0xff]  }
 0x53b   :  { %6041 = vmatpush2.bf16.msra.mxu0 %v8433_v51  ;;  %v8504_v51 = vld [vmem:[%s11937_s1 + $0xf34] ss:$8 sps:$4 sm:$0xff]  }
 0x53c   :  { %6082 = vmatpush2.bf16.msra.mxu1 %v8436_v45  ;;  %6042 = vmatprep.subr.bf16.mxu0 %v8441_v19  ;;  %v8499_v45 = vld [vmem:[%s11937_s1 + $0xe30] ss:$8 sps:$4 sm:$0xff]  }
 0x53d   :  { %6083 = vmatprep.subr.bf16.mxu1 %v8444_v12  ;;  %v8502_v19 = vld [vmem:[%s11937_s1 + $0xf30] ss:$8 sps:$4 sm:$0xff]   ;;  %v8507_v12 = vld [vmem:[%s11937_s1 + $0xe24] ss:$8 sps:$4 sm:$0xff]  }
 0x53f   :  { %6043 = vmatpush2.bf16.msra.mxu0 %v8439_v34  ;;  %v8510_v34 = vld [vmem:[%s11937_s1 + $0xf24] ss:$8 sps:$4 sm:$0xff]  }
 0x540   :  { %6084 = vmatpush2.bf16.msra.mxu1 %v8442_v54  ;;  %6044 = vmatprep.subr.bf16.mxu0 %v8447_v4  ;;  %v8505_v54 = vld [vmem:[%s11937_s1 + $0xe20] ss:$8 sps:$4 sm:$0xff]  }
 0x541   :  { %6085 = vmatprep.subr.bf16.mxu1 %v8450_v5  ;;  %v8508_v4 = vld [vmem:[%s11937_s1 + $0xf20] ss:$8 sps:$4 sm:$0xff]   ;;  %v8513_v5 = vld [vmem:[%s11937_s1 + $0xe14] ss:$8 sps:$4 sm:$0xff]  }
 0x543   :  { %6045 = vmatpush2.bf16.msra.mxu0 %v8445_v23  ;;  %v8516_v23 = vld [vmem:[%s11937_s1 + $0xf14] ss:$8 sps:$4 sm:$0xff]  }
 0x544   :  { %6086 = vmatpush2.bf16.msra.mxu1 %v8448_v46  ;;  %6046 = vmatprep.subr.bf16.mxu0 %v8453_v44  ;;  %v8511_v46 = vld [vmem:[%s11937_s1 + $0xe10] ss:$8 sps:$4 sm:$0xff]  }
 0x545   :  { %6087 = vmatprep.subr.bf16.mxu1 %v8456_v55  ;;  %v8514_v44 = vld [vmem:[%s11937_s1 + $0xf10] ss:$8 sps:$4 sm:$0xff]   ;;  %v8519_v55 = vld [vmem:[%s11937_s1 + $0xe04] ss:$8 sps:$4 sm:$0xff]  }
 0x547   :  { %6047 = vmatpush2.bf16.msra.mxu0 %v8451_v10  ;;  %v8522_v10 = vld [vmem:[%s11937_s1 + $0xf04] ss:$8 sps:$4 sm:$0xff]  }
 0x548   :  { %6088 = vmatpush2.bf16.msra.mxu1 %v8454_v40  ;;  %6048 = vmatprep.subr.bf16.mxu0 %v8459_v8  ;;  %v8517_v40 = vld [vmem:[%s11937_s1 + $0xe00] ss:$8 sps:$4 sm:$0xff]  }
 0x549   :  { %6089 = vmatprep.subr.bf16.mxu1 %v8462_v14  ;;  %v8520_v8 = vld [vmem:[%s11937_s1 + $0xf00] ss:$8 sps:$4 sm:$0xff]   ;;  %v8525_v14 = vld [vmem:[%s11937_s1 + $0xef4] ss:$8 sps:$4 sm:$0xff]  }
 0x54b   :  { %6049 = vmatpush2.bf16.msra.mxu0 %v8457_v62  ;;  %v8528_v62 = vld [vmem:[%s11937_s1 + $0xff4] ss:$8 sps:$4 sm:$0xff]  }
 0x54c   :  { %6090 = vmatpush2.bf16.msra.mxu1 %v8460_v52  ;;  %6050 = vmatprep.subr.bf16.mxu0 %v8465_v9  ;;  %v8523_v52 = vld [vmem:[%s11937_s1 + $0xef0] ss:$8 sps:$4 sm:$0xff]  }
 0x54d   :  { %6091 = vmatprep.subr.bf16.mxu1 %v8468_v22  ;;  %v8526_v9 = vld [vmem:[%s11937_s1 + $0xff0] ss:$8 sps:$4 sm:$0xff]   ;;  %v8531_v22 = vld [vmem:[%s11937_s1 + $0xee4] ss:$8 sps:$4 sm:$0xff]  }
 0x54f   :  { %6051 = vmatpush2.bf16.msra.mxu0 %v8463_v57  ;;  %v8534_v57 = vld [vmem:[%s11937_s1 + $0xfe4] ss:$8 sps:$4 sm:$0xff]  }
 0x550   :  { %6092 = vmatpush2.bf16.msra.mxu1 %v8466_v33  ;;  %6052 = vmatprep.subr.bf16.mxu0 %v8471_v26  ;;  %v8529_v33 = vld [vmem:[%s11937_s1 + $0xee0] ss:$8 sps:$4 sm:$0xff]  }
 0x551   :  { %6093 = vmatprep.subr.bf16.mxu1 %v8474_v53  ;;  %v8532_v26 = vld [vmem:[%s11937_s1 + $0xfe0] ss:$8 sps:$4 sm:$0xff]   ;;  %v8537_v53 = vld [vmem:[%s11937_s1 + $0xed4] ss:$8 sps:$4 sm:$0xff]  }
 0x553   :  { %6053 = vmatpush2.bf16.msra.mxu0 %v8469_v58  ;;  %v8540_v58 = vld [vmem:[%s11937_s1 + $0xfd4] ss:$8 sps:$4 sm:$0xff]  }
 0x554   :  { %6094 = vmatpush2.bf16.msra.mxu1 %v8472_v30  ;;  %6104 = vmatprep.subr.bf16.mxu0 %v8477_v27  ;;  %v8535_v30 = vld [vmem:[%s11937_s1 + $0xed0] ss:$8 sps:$4 sm:$0xff]  }
 0x555   :  { %6145 = vmatprep.subr.bf16.mxu1 %v8480_v59  ;;  %v8538_v27 = vld [vmem:[%s11937_s1 + $0xfd0] ss:$8 sps:$4 sm:$0xff]   ;;  %v8546_v59 = vld [vmem:[%s11937_s1 + $0xfc4] ss:$8 sps:$4 sm:$0xff]  }
 0x556   :  { %v5810_v25 = vpop.f32.mrf.mxu0  ;;  %6055 = vmatmul.mubr.bf16.vlgmr.msra.gmra.mxu0 %v6657_v35  ;;  %v8549_v35 = vld [vmem:[%s11937_s1 + $0xeb4] ss:$8 sps:$4 sm:$0xff]  }
 0x557   :  { %v5811_v37 = vadd.f32 %v5810_v25, %v11045_v29  ;;  %v5851_v11 = vpop.f32.mrf.mxu1  ;;  %6096 = vmatmul.mubr.bf16.vlgmr.msra.gmra.mxu1 %v6659_v39  ;;  %6105 = vmatpush1.bf16.msra.mxu0 %v8475_v15  ;;  %v8489_v29 = vld [vmem:[%s11937_s1 + $0xe54] ss:$8 sps:$4 sm:$0xff]   ;;  %v8544_v15 = vld [vmem:[%s11937_s1 + $0xfc0] ss:$8 sps:$4 sm:$0xff]   ;;  %v8547_v39 = vld [vmem:[%s11937_s1 + $0xeb0] ss:$8 sps:$4 sm:$0xff]  }
 0x558   :  { %6136 = vmatprep.mubr.bf16.mxu0 %v6662_v47  ;;  %6146 = vmatpush1.bf16.msra.mxu1 %v8478_v24  ;;  %v5812_v41 = vpop.f32.mrf.mxu0  ;;  %v8552_v24 = vld [vmem:[%s11937_s1 + $0xfb4] ss:$8 sps:$4 sm:$0xff]   ;;  %v8555_v25 = vld [vmem:[%s11937_s1 + $0xea4] ss:$8 sps:$4 sm:$0xff]  }
 0x559   :  { %v11261_v61 = vadd.f32 %v5851_v11, %v5811_v37  ;;  %6177 = vmatprep.mubr.bf16.mxu1 %v6664_v56  ;;  %v5813_v13 = vadd.f32 %v5812_v41, %v11051_v28  ;;  %v5853_v6 = vpop.f32.mrf.mxu1  ;;  %6106 = vmatprep.subr.bf16.mxu0 %v8483_v7  ;;  %v8490_v28 = vld [vmem:[%s11937_s1 + $0xf50] ss:$8 sps:$4 sm:$0xff]   ;;  %v8558_v47 = vld [vmem:[%s11937_s1 + $0xfa4] ss:$8 sps:$4 sm:$0xff]   ;;  %v8556_v37 = vld [vmem:[%s11937_s1 + $0xfa0] ss:$8 sps:$4 sm:$0xff]  }
 0x55a   :  { %v5814_v17 = vpop.f32.mrf.mxu0  ;;  %6147 = vmatprep.subr.bf16.mxu1 %v8486_v21  ;;  %v8550_v7 = vld [vmem:[%s11937_s1 + $0xfb0] ss:$8 sps:$4 sm:$0xff]   ;;  %v8553_v21 = vld [vmem:[%s11937_s1 + $0xea0] ss:$8 sps:$4 sm:$0xff]   ;;  %v8561_v11 = vld [vmem:[%s11937_s1 + $0xe94] ss:$8 sps:$4 sm:$0xff]  }
 0x55b   :  { %v11267_v48 = vadd.f32 %v5853_v6, %v5813_v13  ;;  %v5855_v49 = vpop.f32.mrf.mxu1  ;;  %6107 = vmatpush1.bf16.msra.mxu0 %v8481_v38  ;;  %v8564_v56 = vld [vmem:[%s11937_s1 + $0xf94] ss:$8 sps:$4 sm:$0xff]   ;;  %v8559_v38 = vld [vmem:[%s11937_s1 + $0xe90] ss:$8 sps:$4 sm:$0xff]   ;;  %v8565_v13 = vld [vmem:[%s11937_s1 + $0xe80] ss:$8 sps:$4 sm:$0xff]  }
 0x55c   :  { %6148 = vmatpush1.bf16.msra.mxu1 %v8484_v42  ;;  %v5815_v1 = vpop.f32.mrf.mxu0  ;;  %6108 = vmatprep.subr.bf16.mxu0 %v8489_v29  ;;  %v8562_v41 = vld [vmem:[%s11937_s1 + $0xf90] ss:$8 sps:$4 sm:$0xff]   ;;  %v8567_v42 = vld [vmem:[%s11937_s1 + $0xe84] ss:$8 sps:$4 sm:$0xff]   ;;  %v8568_v6 = vld [vmem:[%s11937_s1 + $0xf80] ss:$8 sps:$4 sm:$0xff]  }
 0x55d   :  { %v5856_v16 = vpop.f32.mrf.mxu1  ;;  %6149 = vmatprep.subr.bf16.mxu1 %v8492_v63  ;;  %v8570_v29 = vld [vmem:[%s11937_s1 + $0xf84] ss:$8 sps:$4 sm:$0xff]   ;;  %v8573_v63 = vld [vmem:[%s11937_s1 + $0x1074] ss:$8 sps:$4 sm:$0xff]   ;;  %v8571_v1 = vld [vmem:[%s11937_s1 + $0x1070] ss:$8 sps:$4 sm:$0xff]  }
 0x55e   :  { %v11999_v17 = vld [vmem:[#allocation10_spill] sm:$0xff]  ;;  %v8576_v49 = vld [vmem:[%s11937_s1 + $0x1174] ss:$8 sps:$4 sm:$0xff]   ;;  %v8574_v16 = vld [vmem:[%s11937_s1 + $0x1170] ss:$8 sps:$4 sm:$0xff]  }
 0x55f   :  { %6109 = vmatpush1.bf16.msra.mxu0 %v8487_v0  ;;  %vm1542_vm10 = vcmp.ge.bf16.partialorder %v11999_v17, %v9936_v43  ;;  %v12000_v0 = vld [vmem:[#allocation11_spill] sm:$0xff] }
 0x560   :  { %6150 = vmatpush1.bf16.msra.mxu1 %v8490_v28  ;;  %6110 = vmatprep.subr.bf16.mxu0 %v8495_v2  ;;  %vm1543_vm11 = vcmp.ge.bf16.partialorder %v12000_v0, %v9936_v43  ;;  %v11445_v28 = vsel %vm1542_vm10, %v11999_v17, 0  ;;  %v6661_v2 = vcombine.low %v11229_v20, %v11229_v20  ;;  %v8639_v17 = vld [vmem:[%s11937_s1 + $0x10c4] ss:$8 sps:$4 sm:$0xff]  }
 0x561   :  { %6151 = vmatprep.subr.bf16.mxu1 %v8498_v3  ;;  %v11453_v3 = vsel %vm1543_vm11, %v12000_v0, 0  ;;  %v6666_v20 = vcombine.high %v11445_v28, %v11445_v28  ;;  %v8637_v0 = vld [vmem:[%s11937_s1 + $0x10c0] ss:$8 sps:$4 sm:$0xff]  }
 0x563   :  { %6111 = vmatpush1.bf16.msra.mxu0 %v8493_v18  ;;  %v6663_v18 = vcombine.low %v11237_v36, %v11237_v36  ;;  %v6668_v36 = vcombine.high %v11453_v3, %v11453_v3 }
 0x564   :  { %6152 = vmatpush1.bf16.msra.mxu1 %v8496_v31  ;;  %6112 = vmatprep.subr.bf16.mxu0 %v8501_v50  ;;  %v8579_v31 = vld [vmem:[%s11937_s1 + $0x1064] ss:$8 sps:$4 sm:$0xff]  }
 0x565   :  { %6153 = vmatprep.subr.bf16.mxu1 %v8504_v51  ;;  %v8582_v51 = vld [vmem:[%s11937_s1 + $0x1164] ss:$8 sps:$4 sm:$0xff]  }
 0x567   :  { %6113 = vmatpush1.bf16.msra.mxu0 %v8499_v45 }
 0x568   :  { %6154 = vmatpush1.bf16.msra.mxu1 %v8502_v19  ;;  %6114 = vmatprep.subr.bf16.mxu0 %v8507_v12  ;;  %v8577_v12 = vld [vmem:[%s11937_s1 + $0x1060] ss:$8 sps:$4 sm:$0xff]  }
 0x569   :  { %6155 = vmatprep.subr.bf16.mxu1 %v8510_v34 }
 0x56b   :  { %6115 = vmatpush1.bf16.msra.mxu0 %v8505_v54  ;;  %v8580_v54 = vld [vmem:[%s11937_s1 + $0x1160] ss:$8 sps:$4 sm:$0xff]  }
 0x56c   :  { %6156 = vmatpush1.bf16.msra.mxu1 %v8508_v4  ;;  %6116 = vmatprep.subr.bf16.mxu0 %v8513_v5 }
 0x56d   :  { %6157 = vmatprep.subr.bf16.mxu1 %v8516_v23 }
 0x56f   :  { %6117 = vmatpush1.bf16.msra.mxu0 %v8511_v46  ;;  %v8588_v46 = vld [vmem:[%s11937_s1 + $0x1154] ss:$8 sps:$4 sm:$0xff]  }
 0x570   :  { %6158 = vmatpush1.bf16.msra.mxu1 %v8514_v44  ;;  %6118 = vmatprep.subr.bf16.mxu0 %v8519_v55 }
 0x571   :  { %6159 = vmatprep.subr.bf16.mxu1 %v8522_v10 }
 0x573   :  { %6119 = vmatpush1.bf16.msra.mxu0 %v8517_v40  ;;  %v8583_v40 = vld [vmem:[%s11937_s1 + $0x1050] ss:$8 sps:$4 sm:$0xff]  }
 0x574   :  { %6160 = vmatpush1.bf16.msra.mxu1 %v8520_v8  ;;  %6120 = vmatprep.subr.bf16.mxu0 %v8525_v14  ;;  %v8591_v14 = vld [vmem:[%s11937_s1 + $0x1044] ss:$8 sps:$4 sm:$0xff]  }
 0x575   :  { %6161 = vmatprep.subr.bf16.mxu1 %v8528_v62 }
 0x577   :  { %6121 = vmatpush2.bf16.msra.mxu0 %v8523_v52  ;;  %v8594_v52 = vld [vmem:[%s11937_s1 + $0x1144] ss:$8 sps:$4 sm:$0xff]  }
 0x578   :  { %6162 = vmatpush2.bf16.msra.mxu1 %v8526_v9  ;;  %6122 = vmatprep.subr.bf16.mxu0 %v8531_v22  ;;  %v8589_v9 = vld [vmem:[%s11937_s1 + $0x1040] ss:$8 sps:$4 sm:$0xff]  }
 0x579   :  { %6163 = vmatprep.subr.bf16.mxu1 %v8534_v57  ;;  %v8592_v22 = vld [vmem:[%s11937_s1 + $0x1140] ss:$8 sps:$4 sm:$0xff]   ;;  %v8597_v57 = vld [vmem:[%s11937_s1 + $0x1034] ss:$8 sps:$4 sm:$0xff]  }
 0x57b   :  { %6123 = vmatpush2.bf16.msra.mxu0 %v8529_v33  ;;  %v8600_v33 = vld [vmem:[%s11937_s1 + $0x1134] ss:$8 sps:$4 sm:$0xff]  }
 0x57c   :  { %6164 = vmatpush2.bf16.msra.mxu1 %v8532_v26  ;;  %6124 = vmatprep.subr.bf16.mxu0 %v8537_v53  ;;  %v8595_v26 = vld [vmem:[%s11937_s1 + $0x1030] ss:$8 sps:$4 sm:$0xff]  }
 0x57d   :  { %6165 = vmatprep.subr.bf16.mxu1 %v8540_v58  ;;  %v8598_v53 = vld [vmem:[%s11937_s1 + $0x1130] ss:$8 sps:$4 sm:$0xff]   ;;  %v8603_v58 = vld [vmem:[%s11937_s1 + $0x1024] ss:$8 sps:$4 sm:$0xff]  }
 0x57f   :  { %6125 = vmatpush2.bf16.msra.mxu0 %v8535_v30  ;;  %v8606_v30 = vld [vmem:[%s11937_s1 + $0x1124] ss:$8 sps:$4 sm:$0xff]  }
 0x580   :  { %6166 = vmatpush2.bf16.msra.mxu1 %v8538_v27  ;;  %6126 = vmatprep.subr.bf16.mxu0 %v8543_v60  ;;  %v8601_v27 = vld [vmem:[%s11937_s1 + $0x1020] ss:$8 sps:$4 sm:$0xff]  }
 0x581   :  { %6167 = vmatprep.subr.bf16.mxu1 %v8546_v59  ;;  %v8604_v60 = vld [vmem:[%s11937_s1 + $0x1120] ss:$8 sps:$4 sm:$0xff]   ;;  %v8609_v59 = vld [vmem:[%s11937_s1 + $0x1014] ss:$8 sps:$4 sm:$0xff]  }
 0x583   :  { %6127 = vmatpush2.bf16.msra.mxu0 %v8541_v32  ;;  %v8612_v32 = vld [vmem:[%s11937_s1 + $0x1114] ss:$8 sps:$4 sm:$0xff]  }
 0x584   :  { %6168 = vmatpush2.bf16.msra.mxu1 %v8544_v15  ;;  %6128 = vmatprep.subr.bf16.mxu0 %v8549_v35  ;;  %v8607_v15 = vld [vmem:[%s11937_s1 + $0x1010] ss:$8 sps:$4 sm:$0xff]  }
 0x585   :  { %6169 = vmatprep.subr.bf16.mxu1 %v8552_v24  ;;  %v8610_v35 = vld [vmem:[%s11937_s1 + $0x1110] ss:$8 sps:$4 sm:$0xff]   ;;  %v8615_v24 = vld [vmem:[%s11937_s1 + $0x1004] ss:$8 sps:$4 sm:$0xff]  }
 0x587   :  { %6129 = vmatpush2.bf16.msra.mxu0 %v8547_v39  ;;  %v8618_v39 = vld [vmem:[%s11937_s1 + $0x1104] ss:$8 sps:$4 sm:$0xff]  }
 0x588   :  { %6170 = vmatpush2.bf16.msra.mxu1 %v8550_v7  ;;  %6130 = vmatprep.subr.bf16.mxu0 %v8555_v25  ;;  %v8613_v7 = vld [vmem:[%s11937_s1 + $0x1000] ss:$8 sps:$4 sm:$0xff]  }
 0x589   :  { %6171 = vmatprep.subr.bf16.mxu1 %v8558_v47  ;;  %v8616_v25 = vld [vmem:[%s11937_s1 + $0x1100] ss:$8 sps:$4 sm:$0xff]   ;;  %v8621_v47 = vld [vmem:[%s11937_s1 + $0x10f4] ss:$8 sps:$4 sm:$0xff]  }
 0x58b   :  { %6131 = vmatpush2.bf16.msra.mxu0 %v8553_v21  ;;  %v8624_v21 = vld [vmem:[%s11937_s1 + $0x11f4] ss:$8 sps:$4 sm:$0xff]  }
 0x58c   :  { %6172 = vmatpush2.bf16.msra.mxu1 %v8556_v37  ;;  %6132 = vmatprep.subr.bf16.mxu0 %v8561_v11  ;;  %v8619_v37 = vld [vmem:[%s11937_s1 + $0x10f0] ss:$8 sps:$4 sm:$0xff]  }
 0x58d   :  { %6173 = vmatprep.subr.bf16.mxu1 %v8564_v56  ;;  %v8622_v11 = vld [vmem:[%s11937_s1 + $0x11f0] ss:$8 sps:$4 sm:$0xff]   ;;  %v8627_v56 = vld [vmem:[%s11937_s1 + $0x10e4] ss:$8 sps:$4 sm:$0xff]  }
 0x58f   :  { %6133 = vmatpush2.bf16.msra.mxu0 %v8559_v38  ;;  %v8630_v38 = vld [vmem:[%s11937_s1 + $0x11e4] ss:$8 sps:$4 sm:$0xff]  }
 0x590   :  { %6174 = vmatpush2.bf16.msra.mxu1 %v8562_v41  ;;  %6134 = vmatprep.subr.bf16.mxu0 %v8567_v42  ;;  %v8625_v41 = vld [vmem:[%s11937_s1 + $0x10e0] ss:$8 sps:$4 sm:$0xff]  }
 0x591   :  { %6175 = vmatprep.subr.bf16.mxu1 %v8570_v29  ;;  %v8628_v42 = vld [vmem:[%s11937_s1 + $0x11e0] ss:$8 sps:$4 sm:$0xff]   ;;  %v8633_v29 = vld [vmem:[%s11937_s1 + $0x10d4] ss:$8 sps:$4 sm:$0xff]  }
 0x593   :  { %6135 = vmatpush2.bf16.msra.mxu0 %v8565_v13  ;;  %v8636_v13 = vld [vmem:[%s11937_s1 + $0x11d4] ss:$8 sps:$4 sm:$0xff]  }
 0x594   :  { %6176 = vmatpush2.bf16.msra.mxu1 %v8568_v6  ;;  %6186 = vmatprep.subr.bf16.mxu0 %v8573_v63  ;;  %v8631_v6 = vld [vmem:[%s11937_s1 + $0x10d0] ss:$8 sps:$4 sm:$0xff]  }
 0x595   :  { %6227 = vmatprep.subr.bf16.mxu1 %v8576_v49  ;;  %v8634_v63 = vld [vmem:[%s11937_s1 + $0x11d0] ss:$8 sps:$4 sm:$0xff]   ;;  %v8642_v49 = vld [vmem:[%s11937_s1 + $0x11c4] ss:$8 sps:$4 sm:$0xff]  }
 0x596   :  { %v5892_v50 = vpop.f32.mrf.mxu0  ;;  %6137 = vmatmul.mubr.bf16.vlgmr.msra.gmra.mxu0 %v6661_v2  ;;  %v8645_v2 = vld [vmem:[%s11937_s1 + $0x10b4] ss:$8 sps:$4 sm:$0xff]  }
 0x597   :  { %v5893_v45 = vadd.f32 %v5892_v50, %v11261_v61  ;;  %v5933_v19 = vpop.f32.mrf.mxu1  ;;  %6178 = vmatmul.mubr.bf16.vlgmr.msra.gmra.mxu1 %v6663_v18  ;;  %6187 = vmatpush1.bf16.msra.mxu0 %v8571_v1  ;;  %v8585_v61 = vld [vmem:[%s11937_s1 + $0x1054] ss:$8 sps:$4 sm:$0xff]   ;;  %v8640_v1 = vld [vmem:[%s11937_s1 + $0x11c0] ss:$8 sps:$4 sm:$0xff]   ;;  %v8643_v18 = vld [vmem:[%s11937_s1 + $0x10b0] ss:$8 sps:$4 sm:$0xff]  }
 0x598   :  { %6218 = vmatprep.mubr.bf16.mxu0 %v6666_v20  ;;  %6228 = vmatpush1.bf16.msra.mxu1 %v8574_v16  ;;  %v5894_v34 = vpop.f32.mrf.mxu0  ;;  %v8648_v16 = vld [vmem:[%s11937_s1 + $0x11b4] ss:$8 sps:$4 sm:$0xff]   ;;  %v8651_v50 = vld [vmem:[%s11937_s1 + $0x10a4] ss:$8 sps:$4 sm:$0xff]  }
 0x599   :  { %v11477_v4 = vadd.f32 %v5933_v19, %v5893_v45  ;;  %6259 = vmatprep.mubr.bf16.mxu1 %v6668_v36  ;;  %v5895_v5 = vadd.f32 %v5894_v34, %v11267_v48  ;;  %v5935_v23 = vpop.f32.mrf.mxu1  ;;  %6188 = vmatprep.subr.bf16.mxu0 %v8579_v31  ;;  %v8586_v48 = vld [vmem:[%s11937_s1 + $0x1150] ss:$8 sps:$4 sm:$0xff]   ;;  %v8654_v20 = vld [vmem:[%s11937_s1 + $0x11a4] ss:$8 sps:$4 sm:$0xff]   ;;  %v8652_v45 = vld [vmem:[%s11937_s1 + $0x11a0] ss:$8 sps:$4 sm:$0xff]  }
 0x59a   :  { %v5896_v44 = vpop.f32.mrf.mxu0  ;;  %6229 = vmatprep.subr.bf16.mxu1 %v8582_v51  ;;  %v8646_v31 = vld [vmem:[%s11937_s1 + $0x11b0] ss:$8 sps:$4 sm:$0xff]   ;;  %v8649_v51 = vld [vmem:[%s11937_s1 + $0x10a0] ss:$8 sps:$4 sm:$0xff]   ;;  %v8657_v19 = vld [vmem:[%s11937_s1 + $0x1094] ss:$8 sps:$4 sm:$0xff]  }
 0x59b   :  { %v11483_v55 = vadd.f32 %v5935_v23, %v5895_v5  ;;  %v5937_v10 = vpop.f32.mrf.mxu1  ;;  %6189 = vmatpush1.bf16.msra.mxu0 %v8577_v12  ;;  %v8660_v36 = vld [vmem:[%s11937_s1 + $0x1194] ss:$8 sps:$4 sm:$0xff]   ;;  %v8655_v12 = vld [vmem:[%s11937_s1 + $0x1090] ss:$8 sps:$4 sm:$0xff]   ;;  %v8661_v5 = vld [vmem:[%s11937_s1 + $0x1080] ss:$8 sps:$4 sm:$0xff]  }
 0x59c   :  { %6230 = vmatpush1.bf16.msra.mxu1 %v8580_v54  ;;  %v5897_v8 = vpop.f32.mrf.mxu0  ;;  %6190 = vmatprep.subr.bf16.mxu0 %v8585_v61  ;;  %v8658_v34 = vld [vmem:[%s11937_s1 + $0x1190] ss:$8 sps:$4 sm:$0xff]   ;;  %v8663_v54 = vld [vmem:[%s11937_s1 + $0x1084] ss:$8 sps:$4 sm:$0xff]   ;;  %v8664_v23 = vld [vmem:[%s11937_s1 + $0x1180] ss:$8 sps:$4 sm:$0xff]  }
 0x59d   :  { %v5938_v62 = vpop.f32.mrf.mxu1  ;;  %6231 = vmatprep.subr.bf16.mxu1 %v8588_v46  ;;  %v8666_v61 = vld [vmem:[%s11937_s1 + $0x1184] ss:$8 sps:$4 sm:$0xff]   ;;  %v8669_v46 = vld [vmem:[%s11937_s1 + $0x1274] ss:$8 sps:$4 sm:$0xff]   ;;  %v8667_v8 = vld [vmem:[%s11937_s1 + $0x1270] ss:$8 sps:$4 sm:$0xff]  }
 0x59e   :  { %v12001_v44 = vld [vmem:[#allocation12_spill] sm:$0xff] }
 0x59f   :  { %6191 = vmatpush1.bf16.msra.mxu0 %v8583_v40  ;;  %vm1544_vm12 = vcmp.ge.bf16.partialorder %v12001_v44, %v9936_v43  ;;  %v8672_v10 = vld [vmem:[%s11937_s1 + $0x1374] ss:$8 sps:$4 sm:$0xff]   ;;  %v8670_v62 = vld [vmem:[%s11937_s1 + $0x1370] ss:$8 sps:$4 sm:$0xff]  }
 0x5a0   :  { %6232 = vmatpush1.bf16.msra.mxu1 %v8586_v48  ;;  %6192 = vmatprep.subr.bf16.mxu0 %v8591_v14  ;;  %v12002_v40 = vld [vmem:[#allocation13_spill] sm:$0xff]  ;;  %v11661_v48 = vsel %vm1544_vm12, %v12001_v44, 0  ;;  %v6665_v14 = vcombine.low %v11445_v28, %v11445_v28  ;;  %v8735_v44 = vld [vmem:[%s11937_s1 + $0x12c4] ss:$8 sps:$4 sm:$0xff]  }
 0x5a1   :  { %6233 = vmatprep.subr.bf16.mxu1 %v8594_v52  ;;  %vm1545_vm13 = vcmp.ge.bf16.partialorder %v12002_v40, %v9936_v43  ;;  %v6667_v43 = vcombine.low %v11453_v3, %v11453_v3  ;;  %v6670_v28 = vcombine.high %v11661_v48, %v11661_v48 }
 0x5a2   :  { %v11669_v52 = vsel %vm1545_vm13, %v12002_v40, 0  ;;  %v8733_v40 = vld [vmem:[%s11937_s1 + $0x12c0] ss:$8 sps:$4 sm:$0xff]  }
 0x5a3   :  { %6193 = vmatpush1.bf16.msra.mxu0 %v8589_v9  ;;  %v8675_v9 = vld [vmem:[%s11937_s1 + $0x1264] ss:$8 sps:$4 sm:$0xff]   ;;  %v6672_v3 = vcombine.high %v11669_v52, %v11669_v52 }
 0x5a4   :  { %6234 = vmatpush1.bf16.msra.mxu1 %v8592_v22  ;;  %6194 = vmatprep.subr.bf16.mxu0 %v8597_v57  ;;  %v8678_v57 = vld [vmem:[%s11937_s1 + $0x1364] ss:$8 sps:$4 sm:$0xff]  }
 0x5a5   :  { %6235 = vmatprep.subr.bf16.mxu1 %v8600_v33 }
 0x5a7   :  { %6195 = vmatpush1.bf16.msra.mxu0 %v8595_v26 }
 0x5a8   :  { %6236 = vmatpush1.bf16.msra.mxu1 %v8598_v53  ;;  %6196 = vmatprep.subr.bf16.mxu0 %v8603_v58  ;;  %v8673_v53 = vld [vmem:[%s11937_s1 + $0x1260] ss:$8 sps:$4 sm:$0xff]  }
 0x5a9   :  { %6237 = vmatprep.subr.bf16.mxu1 %v8606_v30  ;;  %v8676_v30 = vld [vmem:[%s11937_s1 + $0x1360] ss:$8 sps:$4 sm:$0xff]  }
 0x5ab   :  { %6197 = vmatpush1.bf16.msra.mxu0 %v8601_v27 }
 0x5ac   :  { %6238 = vmatpush1.bf16.msra.mxu1 %v8604_v60  ;;  %6198 = vmatprep.subr.bf16.mxu0 %v8609_v59 }
 0x5ad   :  { %6239 = vmatprep.subr.bf16.mxu1 %v8612_v32  ;;  %v8684_v32 = vld [vmem:[%s11937_s1 + $0x1354] ss:$8 sps:$4 sm:$0xff]  }
 0x5af   :  { %6199 = vmatpush1.bf16.msra.mxu0 %v8607_v15 }
 0x5b0   :  { %6240 = vmatpush1.bf16.msra.mxu1 %v8610_v35  ;;  %6200 = vmatprep.subr.bf16.mxu0 %v8615_v24 }
 0x5b1   :  { %6241 = vmatprep.subr.bf16.mxu1 %v8618_v39  ;;  %v8679_v39 = vld [vmem:[%s11937_s1 + $0x1250] ss:$8 sps:$4 sm:$0xff]  }
 0x5b3   :  { %6201 = vmatpush1.bf16.msra.mxu0 %v8613_v7 }
 0x5b4   :  { %6242 = vmatpush1.bf16.msra.mxu1 %v8616_v25  ;;  %6202 = vmatprep.subr.bf16.mxu0 %v8621_v47  ;;  %v8687_v25 = vld [vmem:[%s11937_s1 + $0x1244] ss:$8 sps:$4 sm:$0xff]  }
 0x5b5   :  { %6243 = vmatprep.subr.bf16.mxu1 %v8624_v21  ;;  %v8690_v21 = vld [vmem:[%s11937_s1 + $0x1344] ss:$8 sps:$4 sm:$0xff]  }
 0x5b7   :  { %6203 = vmatpush2.bf16.msra.mxu0 %v8619_v37  ;;  %v8685_v37 = vld [vmem:[%s11937_s1 + $0x1240] ss:$8 sps:$4 sm:$0xff]  }
 0x5b8   :  { %6244 = vmatpush2.bf16.msra.mxu1 %v8622_v11  ;;  %6204 = vmatprep.subr.bf16.mxu0 %v8627_v56  ;;  %v8688_v11 = vld [vmem:[%s11937_s1 + $0x1340] ss:$8 sps:$4 sm:$0xff]   ;;  %v8693_v56 = vld [vmem:[%s11937_s1 + $0x1234] ss:$8 sps:$4 sm:$0xff]  }
 0x5b9   :  { %6245 = vmatprep.subr.bf16.mxu1 %v8630_v38  ;;  %v8696_v38 = vld [vmem:[%s11937_s1 + $0x1334] ss:$8 sps:$4 sm:$0xff]  }
 0x5bb   :  { %6205 = vmatpush2.bf16.msra.mxu0 %v8625_v41  ;;  %v8691_v41 = vld [vmem:[%s11937_s1 + $0x1230] ss:$8 sps:$4 sm:$0xff]  }
 0x5bc   :  { %6246 = vmatpush2.bf16.msra.mxu1 %v8628_v42  ;;  %6206 = vmatprep.subr.bf16.mxu0 %v8633_v29  ;;  %v8694_v42 = vld [vmem:[%s11937_s1 + $0x1330] ss:$8 sps:$4 sm:$0xff]   ;;  %v8699_v29 = vld [vmem:[%s11937_s1 + $0x1224] ss:$8 sps:$4 sm:$0xff]  }
 0x5bd   :  { %6247 = vmatprep.subr.bf16.mxu1 %v8636_v13  ;;  %v8702_v13 = vld [vmem:[%s11937_s1 + $0x1324] ss:$8 sps:$4 sm:$0xff]  }
 0x5bf   :  { %6207 = vmatpush2.bf16.msra.mxu0 %v8631_v6  ;;  %v8697_v6 = vld [vmem:[%s11937_s1 + $0x1220] ss:$8 sps:$4 sm:$0xff]  }
 0x5c0   :  { %6248 = vmatpush2.bf16.msra.mxu1 %v8634_v63  ;;  %6208 = vmatprep.subr.bf16.mxu0 %v8639_v17  ;;  %v8700_v63 = vld [vmem:[%s11937_s1 + $0x1320] ss:$8 sps:$4 sm:$0xff]   ;;  %v8705_v17 = vld [vmem:[%s11937_s1 + $0x1214] ss:$8 sps:$4 sm:$0xff]  }
 0x5c1   :  { %6249 = vmatprep.subr.bf16.mxu1 %v8642_v49  ;;  %v8708_v49 = vld [vmem:[%s11937_s1 + $0x1314] ss:$8 sps:$4 sm:$0xff]  }
 0x5c3   :  { %6209 = vmatpush2.bf16.msra.mxu0 %v8637_v0  ;;  %v8703_v0 = vld [vmem:[%s11937_s1 + $0x1210] ss:$8 sps:$4 sm:$0xff]  }
 0x5c4   :  { %6250 = vmatpush2.bf16.msra.mxu1 %v8640_v1  ;;  %6210 = vmatprep.subr.bf16.mxu0 %v8645_v2  ;;  %v8706_v1 = vld [vmem:[%s11937_s1 + $0x1310] ss:$8 sps:$4 sm:$0xff]   ;;  %v8711_v2 = vld [vmem:[%s11937_s1 + $0x1204] ss:$8 sps:$4 sm:$0xff]  }
 0x5c5   :  { %6251 = vmatprep.subr.bf16.mxu1 %v8648_v16  ;;  %v8714_v16 = vld [vmem:[%s11937_s1 + $0x1304] ss:$8 sps:$4 sm:$0xff]  }
 0x5c7   :  { %6211 = vmatpush2.bf16.msra.mxu0 %v8643_v18  ;;  %v8709_v18 = vld [vmem:[%s11937_s1 + $0x1200] ss:$8 sps:$4 sm:$0xff]  }
 0x5c8   :  { %6252 = vmatpush2.bf16.msra.mxu1 %v8646_v31  ;;  %6212 = vmatprep.subr.bf16.mxu0 %v8651_v50  ;;  %v8712_v31 = vld [vmem:[%s11937_s1 + $0x1300] ss:$8 sps:$4 sm:$0xff]   ;;  %v8717_v50 = vld [vmem:[%s11937_s1 + $0x12f4] ss:$8 sps:$4 sm:$0xff]  }
 0x5c9   :  { %6253 = vmatprep.subr.bf16.mxu1 %v8654_v20  ;;  %v8718_v20 = vld [vmem:[%s11937_s1 + $0x13c4] ss:$8 sps:$4 sm:$0x7f]  }
 0x5cb   :  { %6213 = vmatpush2.bf16.msra.mxu0 %v8649_v51  ;;  %v8720_v51 = vld [vmem:[%s11937_s1 + $0x13c0] ss:$8 sps:$4 sm:$0x7f]  }
 0x5cc   :  { %6254 = vmatpush2.bf16.msra.mxu1 %v8652_v45  ;;  %6214 = vmatprep.subr.bf16.mxu0 %v8657_v19  ;;  %v8715_v45 = vld [vmem:[%s11937_s1 + $0x12f0] ss:$8 sps:$4 sm:$0xff]   ;;  %v8723_v19 = vld [vmem:[%s11937_s1 + $0x12e4] ss:$8 sps:$4 sm:$0xff]  }
 0x5cd   :  { %6255 = vmatprep.subr.bf16.mxu1 %v8660_v36  ;;  %v5525_v36 = vsel %vm704_vm3, %v8720_v51, 0  ;;  %v6353_v51 = vld [vmem:[%s11939_s3 + $0x8] sm:$0xff] }
 0x5cf   :  { %6215 = vmatpush2.bf16.msra.mxu0 %v8655_v12  ;;  %v8726_v12 = vld [vmem:[%s11937_s1 + $0x13b4] ss:$8 sps:$4 sm:$0xff]  }
 0x5d0   :  { %6256 = vmatpush2.bf16.msra.mxu1 %v8658_v34  ;;  %6216 = vmatprep.subr.bf16.mxu0 %v8663_v54  ;;  %v8721_v34 = vld [vmem:[%s11937_s1 + $0x12e0] ss:$8 sps:$4 sm:$0xff]   ;;  %v8724_v54 = vld [vmem:[%s11937_s1 + $0x13b0] ss:$8 sps:$4 sm:$0xff]  }
 0x5d1   :  { %6257 = vmatprep.subr.bf16.mxu1 %v8666_v61  ;;  %v8729_v61 = vld [vmem:[%s11937_s1 + $0x12d4] ss:$8 sps:$4 sm:$0xff]  }
 0x5d3   :  { %6217 = vmatpush2.bf16.msra.mxu0 %v8661_v5  ;;  %v8732_v5 = vld [vmem:[%s11937_s1 + $0x13a4] ss:$8 sps:$4 sm:$0xff]  }
 0x5d4   :  { %6258 = vmatpush2.bf16.msra.mxu1 %v8664_v23  ;;  %6268 = vmatprep.subr.bf16.mxu0 %v8669_v46  ;;  %v8727_v23 = vld [vmem:[%s11937_s1 + $0x12d0] ss:$8 sps:$4 sm:$0xff]   ;;  %v8730_v46 = vld [vmem:[%s11937_s1 + $0x13a0] ss:$8 sps:$4 sm:$0xff]  }
 0x5d5   :  { %6309 = vmatprep.subr.bf16.mxu1 %v8672_v10  ;;  %v8738_v10 = vld [vmem:[%s11937_s1 + $0x1394] ss:$8 sps:$4 sm:$0xff]  }
 0x5d6   :  { %v5974_v22 = vpop.f32.mrf.mxu0  ;;  %6219 = vmatmul.mubr.bf16.vlgmr.msra.gmra.mxu0 %v6665_v14  ;;  %v8741_v14 = vld [vmem:[%s11937_s1 + $0x12b4] ss:$8 sps:$4 sm:$0xff]  }
 0x5d7   :  { %v5975_v33 = vadd.f32 %v5974_v22, %v11477_v4  ;;  %v6015_v26 = vpop.f32.mrf.mxu1  ;;  %6260 = vmatmul.mubr.bf16.vlgmr.msra.gmra.mxu1 %v6667_v43  ;;  %6269 = vmatpush1.bf16.msra.mxu0 %v8667_v8  ;;  %v8681_v4 = vld [vmem:[%s11937_s1 + $0x1254] ss:$8 sps:$4 sm:$0xff]   ;;  %v8736_v8 = vld [vmem:[%s11937_s1 + $0x1390] ss:$8 sps:$4 sm:$0xff]   ;;  %v8747_v22 = vld [vmem:[%s11937_s1 + $0x12a4] ss:$8 sps:$4 sm:$0xff]  }
 0x5d8   :  { %6300 = vmatprep.mubr.bf16.mxu0 %v6670_v28  ;;  %6310 = vmatpush1.bf16.msra.mxu1 %v8670_v62  ;;  %v5976_v58 = vpop.f32.mrf.mxu0  ;;  %v8744_v62 = vld [vmem:[%s11937_s1 + $0x1384] ss:$8 sps:$4 sm:$0xff]   ;;  %v8739_v43 = vld [vmem:[%s11937_s1 + $0x12b0] ss:$8 sps:$4 sm:$0xff]   ;;  %v8745_v28 = vld [vmem:[%s11937_s1 + $0x12a0] ss:$8 sps:$4 sm:$0xff]  }
 0x5d9   :  { %v11693_v27 = vadd.f32 %v6015_v26, %v5975_v33  ;;  %7308 = vmatprep.mubr.msk.bf16.mxu1 %vm700_vm0, %v6672_v3  ;;  %v5977_v60 = vadd.f32 %v5976_v58, %v11483_v55  ;;  %v6017_v59 = vpop.f32.mrf.mxu1  ;;  %6270 = vmatprep.subr.bf16.mxu0 %v8675_v9  ;;  %v8682_v55 = vld [vmem:[%s11937_s1 + $0x1350] ss:$8 sps:$4 sm:$0xff]   ;;  %v8742_v9 = vld [vmem:[%s11937_s1 + $0x1380] ss:$8 sps:$4 sm:$0xff]   ;;  %v6671_v33 = vcombine.low %v11669_v52, %v11669_v52  ;;  %v8753_v3 = vld [vmem:[%s11937_s1 + $0x1284] ss:$8 sps:$4 sm:$0xff]  }
 0x5da   :  { %v5978_v15 = vpop.f32.mrf.mxu0  ;;  %6311 = vmatprep.subr.bf16.mxu1 %v8678_v57  ;;  %v8750_v57 = vld [vmem:[%s11937_s1 + $0x1294] ss:$8 sps:$4 sm:$0xff]   ;;  %v8748_v26 = vld [vmem:[%s11937_s1 + $0x1290] ss:$8 sps:$4 sm:$0xff]   ;;  %v6669_v52 = vcombine.low %v11661_v48, %v11661_v48  ;;  %v8784_v48 = vmov 0.0   ;;  %vm6382_vm0 = vcmask 1045504  }
 0x5db   :  { %v11700_v35 = vadd.f32 %v6017_v59, %v5977_v60  ;;  %v6019_v24 = vpop.f32.mrf.mxu1  ;;  %6271 = vmatpush1.bf16.msra.mxu0 %v8673_v53  ;;  %v8751_v53 = vld [vmem:[%s11937_s1 + $0x1280] ss:$8 sps:$4 sm:$0xff]  }
 0x5dc   :  { %6312 = vmatpush1.bf16.msra.mxu1 %v8676_v30  ;;  %v5979_v7 = vpop.f32.mrf.mxu0  ;;  %6272 = vmatprep.subr.bf16.mxu0 %v8681_v4 }
 0x5dd   :  { %v6020_v47 = vpop.f32.mrf.mxu1  ;;  %6313 = vmatprep.subr.bf16.mxu1 %v8684_v32 }
 0x5de   :  { %v6367_v47 = vld [vmem:[%s11939_s3 + $0x78] sm:$0xff] }
 0x5df   :  { %6273 = vmatpush1.bf16.msra.mxu0 %v8679_v39 }
 0x5e0   :  { %6314 = vmatpush1.bf16.msra.mxu1 %v8682_v55  ;;  %6274 = vmatprep.subr.bf16.mxu0 %v8687_v25 }
 0x5e1   :  { %6315 = vmatprep.subr.bf16.mxu1 %v8690_v21  ;;  %v6364_v21 = vld [vmem:[%s11939_s3 + $0x60] sm:$0xff] }
 0x5e3   :  { %6275 = vmatpush1.bf16.msra.mxu0 %v8685_v37  ;;  %v6363_v37 = vld [vmem:[%s11939_s3 + $0x58] sm:$0xff] }
 0x5e4   :  { %6316 = vmatpush1.bf16.msra.mxu1 %v8688_v11  ;;  %6276 = vmatprep.subr.bf16.mxu0 %v8693_v56  ;;  %v6362_v11 = vld [vmem:[%s11939_s3 + $0x50] sm:$0xff]  ;;  %v6361_v56 = vld [vmem:[%s11939_s3 + $0x48] sm:$0xff] }
 0x5e5   :  { %6317 = vmatprep.subr.bf16.mxu1 %v8696_v38  ;;  %v6360_v38 = vld [vmem:[%s11939_s3 + $0x40] sm:$0xff] }
 0x5e7   :  { %6277 = vmatpush1.bf16.msra.mxu0 %v8691_v41  ;;  %v6359_v41 = vld [vmem:[%s11939_s3 + $0x38] sm:$0xff] }
 0x5e8   :  { %6318 = vmatpush1.bf16.msra.mxu1 %v8694_v42  ;;  %6278 = vmatprep.subr.bf16.mxu0 %v8699_v29  ;;  %v6358_v42 = vld [vmem:[%s11939_s3 + $0x30] sm:$0xff]  ;;  %v6357_v29 = vld [vmem:[%s11939_s3 + $0x28] sm:$0xff] }
 0x5e9   :  { %6319 = vmatprep.subr.bf16.mxu1 %v8702_v13  ;;  %v6356_v13 = vld [vmem:[%s11939_s3 + $0x20] sm:$0xff] }
 0x5eb   :  { %6279 = vmatpush1.bf16.msra.mxu0 %v8697_v6  ;;  %v6355_v6 = vld [vmem:[%s11939_s3 + $0x18] sm:$0xff] }
 0x5ec   :  { %6320 = vmatpush1.bf16.msra.mxu1 %v8700_v63  ;;  %6280 = vmatprep.subr.bf16.mxu0 %v8705_v17  ;;  %v6354_v63 = vld [vmem:[%s11939_s3 + $0x10] sm:$0xff] }
 0x5ed   :  { %6321 = vmatprep.subr.bf16.mxu1 %v8708_v49 }
 0x5ef   :  { %6281 = vmatpush1.bf16.msra.mxu0 %v8703_v0 }
 0x5f0   :  { %6322 = vmatpush1.bf16.msra.mxu1 %v8706_v1  ;;  %6282 = vmatprep.subr.bf16.mxu0 %v8711_v2 }
 0x5f1   :  { %6323 = vmatprep.subr.bf16.mxu1 %v8714_v16 }
 0x5f3   :  { %6283 = vmatpush1.bf16.msra.mxu0 %v8709_v18 }
 0x5f4   :  { %6324 = vmatpush1.bf16.msra.mxu1 %v8712_v31  ;;  %6284 = vmatprep.subr.bf16.mxu0 %v8717_v50 }
 0x5f5   :  { %7307 = vmatprep.subr.msk.bf16.mxu1 %vm704_vm3, %v8718_v20  ;;  %vm6378_vm3 = vcmask 179200  }
 0x5f7   :  { %6285 = vmatpush2.bf16.msra.mxu0 %v8715_v45 }
 0x5f8   :  { %6332 = vmatpush2.bf16.msra.mxu1 %v5525_v36  ;;  %6286 = vmatprep.subr.bf16.mxu0 %v8723_v19  ;;  %v6352_v36 = vld [vmem:[%s11939_s3] sm:$0xff] }
 0x5f9   :  { %6333 = vmatprep.subr.bf16.mxu1 %v8726_v12  ;;  %v6370_v12 = vld [vmem:[%s11939_s3 + $0x90] sm:$0x3f] }
 0x5fb   :  { %6287 = vmatpush2.bf16.msra.mxu0 %v8721_v34  ;;  %v6369_v34 = vld [vmem:[%s11939_s3 + $0x88] sm:$0xff] }
 0x5fc   :  { %6334 = vmatpush2.bf16.msra.mxu1 %v8724_v54  ;;  %6288 = vmatprep.subr.bf16.mxu0 %v8729_v61  ;;  %v6368_v54 = vld [vmem:[%s11939_s3 + $0x80] sm:$0xff] }
 0x5fd   :  { %6335 = vmatprep.subr.bf16.mxu1 %v8732_v5 }
 0x5ff   :  { %6289 = vmatpush2.bf16.msra.mxu0 %v8727_v23 }
 0x600   :  { %6336 = vmatpush2.bf16.msra.mxu1 %v8730_v46  ;;  %6290 = vmatprep.subr.bf16.mxu0 %v8735_v44 }
 0x601   :  { %6337 = vmatprep.subr.bf16.mxu1 %v8738_v10 }
 0x603   :  { %6291 = vmatpush2.bf16.msra.mxu0 %v8733_v40 }
 0x604   :  { %6338 = vmatpush2.bf16.msra.mxu1 %v8736_v8  ;;  %6292 = vmatprep.subr.bf16.mxu0 %v8741_v14 }
 0x605   :  { %6339 = vmatprep.subr.bf16.mxu1 %v8744_v62 }
 0x607   :  { %6293 = vmatpush2.bf16.msra.mxu0 %v8739_v43 }
 0x608   :  { %6340 = vmatpush2.bf16.msra.mxu1 %v8742_v9  ;;  %6294 = vmatprep.subr.bf16.mxu0 %v8747_v22 }
 0x609   :  { %6386 = vmatprep.subr.mxu1 %v8784_v48 }
 0x60b   :  { %6342 = vmatmul.mubr.bf16.vlgmr.msra.gmra.mxu1 %v6671_v33  ;;  %6295 = vmatpush2.bf16.msra.mxu0 %v8745_v28 }
 0x60c   :  { %6296 = vmatprep.subr.bf16.mxu0 %v8750_v57  ;;  %6387 = vmatpush1.msra.mxu1 %v6367_v47 }
 0x60d   :  { %6388 = vmatprep.subr.mxu1 %v8784_v48 }
 0x60f   :  { %6297 = vmatpush2.bf16.msra.mxu0 %v8748_v26 }
 0x610   :  { %6298 = vmatprep.subr.bf16.mxu0 %v8753_v3 }
 0x613   :  { %6299 = vmatpush2.bf16.msra.mxu0 %v8751_v53 }
 0x616   :  { %v6056_v58 = vpop.f32.mrf.mxu0  ;;  %6301 = vmatmul.mubr.bf16.vlgmr.msra.gmra.mxu0 %v6669_v52 }
 0x617   :  { %v6057_v30 = vadd.f32 %v6056_v58, %v11693_v27  ;;  %v6097_v4 = vpop.f32.mrf.mxu1  ;;  %v6366_v27 = vld [vmem:[%s11939_s3 + $0x70] sm:$0xff] }
 0x618   :  { %v6058_v60 = vpop.f32.mrf.mxu0  ;;  %6389 = vmatpush1.msra.mxu1 %v6366_v27 }
 0x619   :  { %v6098_v59 = vadd.f32 %v6097_v4, %v6057_v30  ;;  %v6059_v32 = vadd.f32 %v6058_v60, %v11700_v35  ;;  %v6099_v15 = vpop.f32.mrf.mxu1  ;;  %v6365_v35 = vld [vmem:[%s11939_s3 + $0x68] sm:$0xff]  ;;  %6390 = vmatprep.subr.mxu1 %v8784_v48 }
 0x61a   :  { %v6060_v24 = vpop.f32.mrf.mxu0  ;;  %6391 = vmatpush1.msra.mxu1 %v6365_v35 }
 0x61b   :  { %v6100_v39 = vadd.f32 %v6099_v15, %v6059_v32  ;;  %v6101_v7 = vpop.f32.mrf.mxu1  ;;  %6392 = vmatprep.subr.mxu1 %v8784_v48  ;;  %v7309_v15 = vld [vmem:[%s11940_s4] ss:$0 sm:$0xff] }
 0x61c   :  { %v6061_v55 = vpop.f32.mrf.mxu0  ;;  %6393 = vmatpush1.msra.mxu1 %v6364_v21 }
 0x61d   :  { %v6102_v25 = vpop.f32.mrf.mxu1  ;;  %6394 = vmatprep.subr.mxu1 %v8784_v48 }
 0x61e   :  { %6395 = vmatpush1.msra.mxu1 %v6363_v37 }
 0x61f   :  { %6396 = vmatprep.subr.mxu1 %v8784_v48 }
 0x620   :  { %6397 = vmatpush1.msra.mxu1 %v6362_v11 }
 0x621   :  { %6398 = vmatprep.subr.mxu1 %v8784_v48 }
 0x622   :  { %6399 = vmatpush1.msra.mxu1 %v6361_v56 }
 0x623   :  { %6400 = vmatprep.subr.mxu1 %v8784_v48 }
 0x624   :  { %6401 = vmatpush1.msra.mxu1 %v6360_v38 }
 0x625   :  { %6402 = vmatprep.subr.mxu1 %v8784_v48 }
 0x626   :  { %6403 = vmatpush1.msra.mxu1 %v6359_v41 }
 0x627   :  { %6404 = vmatprep.subr.mxu1 %v8784_v48 }
 0x628   :  { %6405 = vmatpush1.msra.mxu1 %v6358_v42 }
 0x629   :  { %6406 = vmatprep.subr.mxu1 %v8784_v48 }
 0x62a   :  { %6407 = vmatpush1.msra.mxu1 %v6357_v29 }
 0x62b   :  { %6408 = vmatprep.subr.mxu1 %v8784_v48 }
 0x62c   :  { %6409 = vmatpush1.msra.mxu1 %v6356_v13 }
 0x62d   :  { %6410 = vmatprep.subr.mxu1 %v8784_v48 }
 0x62e   :  { %6411 = vmatpush1.msra.mxu1 %v6355_v6 }
 0x62f   :  { %6412 = vmatprep.subr.mxu1 %v8784_v48 }
 0x630   :  { %6413 = vmatpush1.msra.mxu1 %v6354_v63 }
 0x631   :  { %6414 = vmatprep.subr.mxu1 %v8784_v48 }
 0x632   :  { %6415 = vmatpush1.msra.mxu1 %v6353_v51 }
 0x633   :  { %6416 = vmatprep.subr.mxu1 %v8784_v48 }
 0x634   :  { %6417 = vmatpush1.msra.mxu1 %v6352_v36 }
 0x635   :  { %6444 = vmatprep.subr.mxu1 %v8784_v48 }
 0x636   :  { %7310 = vmatpush2.msk.msra.mxu1 %vm6382_vm0, %v6370_v12 }
 0x637   :  { %6446 = vmatprep.subr.mxu1 %v8784_v48 }
 0x638   :  { %6447 = vmatpush2.msra.mxu1 %v6369_v34 }
 0x639   :  { %6448 = vmatprep.subr.mxu1 %v8784_v48 }
 0x63a   :  { %6449 = vmatpush2.msra.mxu1 %v6368_v54 }
 0x656   :  { %v6138_v17 = vpop.f32.mrf.mxu0 }
 0x657   :  { %v6139_v49 = vadd.f32 %v6138_v17, %v6098_v59  ;;  %v6179_v0 = vpop.f32.mrf.mxu1 }
 0x658   :  { %v6140_v1 = vpop.f32.mrf.mxu0 }
 0x659   :  { %v6180_v2 = vadd.f32 %v6179_v0, %v6139_v49  ;;  %v6141_v16 = vadd.f32 %v6140_v1, %v6100_v39  ;;  %v6181_v18 = vpop.f32.mrf.mxu1 }
 0x65a   :  { %v6142_v31 = vpop.f32.mrf.mxu0 }
 0x65b   :  { %v6182_v50 = vadd.f32 %v6181_v18, %v6141_v16  ;;  %v6183_v20 = vpop.f32.mrf.mxu1 }
 0x65c   :  { %v6143_v45 = vpop.f32.mrf.mxu0 }
 0x65d   :  { %v6184_v19 = vpop.f32.mrf.mxu1 }
 0x696   :  { %v6220_v61 = vpop.f32.mrf.mxu0 }
 0x697   :  { %v6221_v5 = vadd.f32 %v6220_v61, %v6180_v2  ;;  %v6261_v23 = vpop.f32.mrf.mxu1 }
 0x698   :  { %v6222_v46 = vpop.f32.mrf.mxu0 }
 0x699   :  { %v6262_v44 = vadd.f32 %v6261_v23, %v6221_v5  ;;  %v6263_v10 = vpop.f32.mrf.mxu1  ;;  %v6223_v57 = vadd.f32 %v6222_v46, %v6182_v50 }
 0x69a   :  { %v6224_v40 = vpop.f32.mrf.mxu0 }
 0x69b   :  { %v6265_v8 = vpop.f32.mrf.mxu1  ;;  %v6264_v26 = vadd.f32 %v6263_v10, %v6223_v57 }
 0x69c   :  { %v6225_v14 = vpop.f32.mrf.mxu0 }
 0x69d   :  { %v6266_v62 = vpop.f32.mrf.mxu1 }
 0x6cb   :  { %v6343_v43 = vpop.f32.mrf.mxu1 }
 0x6cd   :  { %v6345_v9 = vpop.f32.mrf.mxu1 }
 0x6cf   :  { %v6347_v22 = vpop.f32.mrf.mxu1 }
 0x6d1   :  { %v6348_v28 = vpop.f32.mrf.mxu1 }
 0x6d6   :  { %v6302_v33 = vpop.f32.mrf.mxu0 }
 0x6d7   :  { %v6303_v3 = vadd.f32 %v6302_v33, %v6262_v44 }
 0x6d8   :  { %v6304_v53 = vpop.f32.mrf.mxu0 }
 0x6d9   :  { %v6305_v52 = vadd.f32 %v6304_v53, %v6264_v26  ;;  %v6344_v58 = vadd.f32 %v6343_v43, %v6303_v3 }
 0x6da   :  { %v6306_v30 = vpop.f32.mrf.mxu0 }
 0x6db   :  { %v6346_v4 = vadd.f32 %v6345_v9, %v6305_v52  ;;  %v6350_v32 = vmax.f32 %v6344_v58, 0.0 }
 0x6dc   :  { %v6307_v60 = vpop.f32.mrf.mxu0 }
 0x6dd   :  { %v6351_v59 = vmax.f32 %v6346_v4, 0.0 }
 0x6df   :  { %7311 = vmatprep.mubr.msk.f32.mxu1 %vm6378_vm3, %v6351_v59 }
 0x6e0   :  { %6451 = vmatmul.mubr.f32.vlgmr.msra.gmra.mxu1 %v6350_v32 }
 0x7a0   :  { %v6452_v24 = vpop.f32.mrf.mxu1 }
 0x7a1   :  { %v6453_v39 = vadd.f32 %v7309_v15, %v6452_v24 }
 0x7a2   :  { %v6454_v7 = vpop.f32.mrf.mxu1 }
 0x7a3   :  { %6457 = vst.msk [vmem:[%s11941_s5] sm:$0xff] %vm6456_vm14, %v6453_v39 }

</bundles_post_ra>
